<compile_context>
chip_gen: v7x
topology: tpu7x:2x2x1
jax: 0.10.0
libtpu: 0.0.40
codegen_flags: <defaults>
</compile_context>

<pallas_src>
import jax
import jax.numpy as jnp
from jax.experimental import pallas as pl
from jax.experimental.pallas import tpu as pltpu


# --------------------------------------------------------------------------
# Kernel 1: fused 3x3 'same' conv + bias + ReLU + 2x2/2 max-pool.
# The 2x2 pool is expressed as an elementwise max over the four output-parity
# GEMMs; bias + ReLU are applied once after the max (both commute with it).
# --------------------------------------------------------------------------
def _conv_pool_kernel(p00_ref, p01_ref, p10_ref, p11_ref, w_ref, b_ref, o_ref):
    """One image per grid step.

    pXY_ref : (1, K, M) im2col patches for pool-output parity (row=X, col=Y)
              K = 9*Cin in (kh, kw, ci) order, M = HP*WP (lane-dense)
    w_ref   : (Cout, K)
    b_ref   : (Cout, 1)
    o_ref   : (1, Cout, M) pooled activation, NCHW-flattened (lane-dense)
    """
    w = w_ref[...]
    a = jnp.dot(w, p00_ref[0], preferred_element_type=jnp.float32)
    a = jnp.maximum(a, jnp.dot(w, p01_ref[0], preferred_element_type=jnp.float32))
    a = jnp.maximum(a, jnp.dot(w, p10_ref[0], preferred_element_type=jnp.float32))
    a = jnp.maximum(a, jnp.dot(w, p11_ref[0], preferred_element_type=jnp.float32))
    o_ref[0] = jnp.maximum(a + b_ref[...], 0.0)


def _pool_parity_patches(x_nchw):
    """XLA-side im2col: one (B, 9*Cin, HP*WP) patch tensor per 2x2-pool parity."""
    B, Cin, H, W = x_nchw.shape
    HP, WP = H // 2, W // 2
    xp = jnp.pad(x_nchw, ((0, 0), (0, 0), (1, 1), (1, 1)))
    patches = []
    for pr in (0, 1):
        for pc in (0, 1):
            taps = [xp[:, :, pr + kh:pr + kh + H:2, pc + kw:pc + kw + W:2]
                    for kh in range(3) for kw in range(3)]   # 9 x (B,Cin,HP,WP)
            p = jnp.stack(taps, axis=1)                       # (B, 9, Cin, HP, WP)
            patches.append(p.reshape(B, 9 * Cin, HP * WP))
    return patches


def conv3x3_relu_pool(x_nchw, w_mat, b_col):
    """3x3 'same' conv + bias + ReLU + 2x2 max-pool; returns (B, Cout, HP*WP)."""
    B, Cin, H, W = x_nchw.shape
    Cout = w_mat.shape[0]
    K = 9 * Cin
    assert w_mat.shape == (Cout, K)
    assert H % 2 == 0 and W % 2 == 0
    M = (H // 2) * (W // 2)
    assert M % 128 == 0, "pooled spatial size must be lane-aligned"

    patches = _pool_parity_patches(x_nchw)
    pat_spec = pl.BlockSpec((1, K, M), lambda b: (b, 0, 0))
    return pl.pallas_call(
        _conv_pool_kernel,
        out_shape=jax.ShapeDtypeStruct((B, Cout, M), jnp.float32),
        grid_spec=pltpu.PrefetchScalarGridSpec(
            num_scalar_prefetch=0,
            grid=(B,),
            in_specs=[pat_spec, pat_spec, pat_spec, pat_spec,
                      pl.BlockSpec((Cout, K), lambda b: (0, 0)),
                      pl.BlockSpec((Cout, 1), lambda b: (0, 0))],
            out_specs=pl.BlockSpec((1, Cout, M), lambda b: (b, 0, 0)),
        ),
        compiler_params=pltpu.CompilerParams(
            dimension_semantics=("parallel",)),
    )(*patches, w_mat, b_col)


# --------------------------------------------------------------------------
# Kernel 2: fused FC head:  Linear(32768,128)+ReLU -> Linear(128,1)+Sigmoid
# K-dim grid with a VMEM accumulator; fc1 weights streamed as bf16 (HBM-bound),
# accumulated in f32.  Dropout is identity at inference.
# --------------------------------------------------------------------------
def _fc_head_kernel(x_ref, w1_ref, b1_ref, w2_ref, b2_ref, o_ref, acc_ref):
    k = pl.program_id(0)

    @pl.when(k == 0)
    def _():
        acc_ref[...] = jnp.zeros_like(acc_ref)

    acc_ref[...] += jnp.dot(x_ref[...].astype(jnp.bfloat16), w1_ref[...],
                            preferred_element_type=jnp.float32)

    @pl.when(k == pl.num_programs(0) - 1)
    def _():
        h = jnp.maximum(acc_ref[...] + b1_ref[...], 0.0)
        logit = jnp.dot(h, w2_ref[...],
                        preferred_element_type=jnp.float32) + b2_ref[...]
        # numerically stable sigmoid
        o_ref[...] = 0.5 * (jnp.tanh(0.5 * logit) + 1.0)


def fc_head(x_flat, w1t_bf16, b1, w2t, b2, *, tk=16384):
    B, F = x_flat.shape
    Hdim = w1t_bf16.shape[1]
    tk = min(tk, F)
    while F % tk:                      # fall back to a divisor of F
        tk //= 2
    return pl.pallas_call(
        _fc_head_kernel,
        out_shape=jax.ShapeDtypeStruct((B, 1), jnp.float32),
        grid_spec=pltpu.PrefetchScalarGridSpec(
            num_scalar_prefetch=0,
            grid=(F // tk,),
            in_specs=[
                pl.BlockSpec((B, tk), lambda k: (0, k)),
                pl.BlockSpec((tk, Hdim), lambda k: (k, 0)),
                pl.BlockSpec((1, Hdim), lambda k: (0, 0)),
                pl.BlockSpec((Hdim, 1), lambda k: (0, 0)),
                pl.BlockSpec((1, 1), lambda k: (0, 0)),
            ],
            out_specs=pl.BlockSpec((B, 1), lambda k: (0, 0)),
            scratch_shapes=[pltpu.VMEM((B, Hdim), jnp.float32)],
        ),
        compiler_params=pltpu.CompilerParams(
            dimension_semantics=("arbitrary",)),
    )(x_flat, w1t_bf16, b1, w2t, b2)


# --------------------------------------------------------------------------
# Parameters (PyTorch-convention shapes), one-time kernel-layout prep, forward
# --------------------------------------------------------------------------
def init_params(key):
    ks = jax.random.split(key, 8)

    def u(k, shape, fan_in):
        bound = 1.0 / jnp.sqrt(float(fan_in))
        return jax.random.uniform(k, shape, jnp.float32, -bound, bound)

    return {
        "conv1_w": u(ks[0], (16, 3, 3, 3), 3 * 9),
        "conv1_b": u(ks[1], (16,), 3 * 9),
        "conv2_w": u(ks[2], (32, 16, 3, 3), 16 * 9),
        "conv2_b": u(ks[3], (32,), 16 * 9),
        "fc1_w": u(ks[4], (128, 32 * 32 * 32), 32 * 32 * 32),
        "fc1_b": u(ks[5], (128,), 32 * 32 * 32),
        "fc2_w": u(ks[6], (1, 128), 128),
        "fc2_b": u(ks[7], (1,), 128),
    }


def prepare_params(p):
    """One-time (outside jit) conversion of torch-layout params to kernel layout."""
    def conv_w(w):  # (Cout, Cin, 3, 3) -> (Cout, 9*Cin) with (kh, kw, ci) columns
        return jnp.transpose(w, (0, 2, 3, 1)).reshape(w.shape[0], -1)

    return {
        "conv1_wmat": conv_w(p["conv1_w"]),
        "conv1_b": p["conv1_b"].reshape(-1, 1),
        "conv2_wmat": conv_w(p["conv2_w"]),
        "conv2_b": p["conv2_b"].reshape(-1, 1),
        # Conv kernels emit the torch (C, H, W) flatten order natively, so fc1
        # only needs a transpose.  Stored bf16: the 16 MB HBM weight stream
        # dominates the fc head wall time; accumulation stays f32 in-kernel.
        "fc1_wmat": p["fc1_w"].T.astype(jnp.bfloat16),
        "fc1_b": p["fc1_b"].reshape(1, -1),
        "fc2_wmat": p["fc2_w"].T,
        "fc2_b": p["fc2_b"].reshape(1, 1),
    }


@jax.jit
def flip_detection_forward(kp, x_nchw):
    x = x_nchw.astype(jnp.float32)
    B = x.shape[0]
    x = conv3x3_relu_pool(x, kp["conv1_wmat"], kp["conv1_b"])   # (B, 16, 64*64)
    x = x.reshape(B, 16, 64, 64)
    x = conv3x3_relu_pool(x, kp["conv2_wmat"], kp["conv2_b"])   # (B, 32, 32*32)
    x = x.reshape(B, -1)                     # == torch's (C, H, W) flatten order
    return fc_head(x, kp["fc1_wmat"], kp["fc1_b"],
                   kp["fc2_wmat"], kp["fc2_b"])                 # (B, 1)


# --------------------------------------------------------------------------
# Pure-JAX f32 reference (torch layout / torch flatten order) for self-check
# --------------------------------------------------------------------------
def _reference_forward(p, x_nchw):
    x = x_nchw.astype(jnp.float32)

    def conv_relu_pool(x, w, b):
        y = jax.lax.conv_general_dilated(
            x, w, window_strides=(1, 1), padding=((1, 1), (1, 1)),
            dimension_numbers=("NCHW", "OIHW", "NCHW"))
        y = jnp.maximum(y + b.reshape(1, -1, 1, 1), 0.0)
        B, C, H, W = y.shape
        return y.reshape(B, C, H // 2, 2, W // 2, 2).max(axis=(3, 5))

    x = conv_relu_pool(x, p["conv1_w"], p["conv1_b"])
    x = conv_relu_pool(x, p["conv2_w"], p["conv2_b"])
    x = x.reshape(x.shape[0], -1)
    h = jnp.maximum(x @ p["fc1_w"].T + p["fc1_b"], 0.0)
    logit = h @ p["fc2_w"].T + p["fc2_b"]
    return jax.nn.sigmoid(logit)


if __name__ == "__main__":
    key = jax.random.PRNGKey(0)
    pkey, xkey = jax.random.split(key)
    torch_params = init_params(pkey)
    kernel_params = prepare_params(torch_params)
    # 128x128 input is implied by the Linear(32*32*32, 128) layer.
    x = jax.random.normal(xkey, (2, 3, 128, 128), jnp.float32)

    out = flip_detection_forward(kernel_params, x)
    jax.block_until_ready(out)

    assert out.shape == (2, 1)
    assert bool(jnp.all((out >= 0.0) & (out <= 1.0)))

    ref = _reference_forward(torch_params, x)
    max_err = float(jnp.max(jnp.abs(out - ref)))
    # All-f32 pipeline except the bf16 fc1 weight stream: expected max output
    # error ~5e-4 through the sigmoid; 2e-3 leaves margin without hiding bugs.
    assert max_err < 2e-3, f"mismatch vs reference: max abs err {max_err}"
    print("KERNEL_OK")
</pallas_src>

<mosaic_0001>
module attributes {stable_mosaic.version = 11 : i64} {
  func.func @_conv_pool_kernel(%arg0: i32, %arg1: memref<1x27x4096xf32, #tpu.memory_space<vmem>>, %arg2: memref<1x27x4096xf32, #tpu.memory_space<vmem>>, %arg3: memref<1x27x4096xf32, #tpu.memory_space<vmem>>, %arg4: memref<1x27x4096xf32, #tpu.memory_space<vmem>>, %arg5: memref<16x27xf32, #tpu.memory_space<vmem>>, %arg6: memref<16x1xf32, #tpu.memory_space<vmem>>, %arg7: memref<1x16x4096xf32, #tpu.memory_space<vmem>>) attributes {dimension_semantics = [#tpu.dimension_semantics<parallel>], iteration_bounds = array<i64: 2>, scalar_prefetch = 0 : i64, scratch_operands = 0 : i64, tpu.core_type = #tpu.core_type<tc>, window_params = [{transform_indices = @transform_0, window_bounds = array<i64: 1, 27, 4096>}, {transform_indices = @transform_1, window_bounds = array<i64: 1, 27, 4096>}, {transform_indices = @transform_2, window_bounds = array<i64: 1, 27, 4096>}, {transform_indices = @transform_3, window_bounds = array<i64: 1, 27, 4096>}, {pipeline_mode = #tpu.pipeline_mode<synchronous>, transform_indices = @transform_4, window_bounds = array<i64: 16, 27>}, {pipeline_mode = #tpu.pipeline_mode<synchronous>, transform_indices = @transform_5, window_bounds = array<i64: 16, 1>}, {transform_indices = @transform_6, window_bounds = array<i64: 1, 16, 4096>}]} {
    %c0 = arith.constant 0 : index
    %c0_0 = arith.constant 0 : index
    %0 = vector.load %arg5[%c0, %c0_0] : memref<16x27xf32, #tpu.memory_space<vmem>>, vector<16x27xf32>
    %c0_1 = arith.constant 0 : index
    %c0_2 = arith.constant 0 : index
    %c0_3 = arith.constant 0 : index
    %1 = vector.load %arg1[%c0_1, %c0_2, %c0_3] : memref<1x27x4096xf32, #tpu.memory_space<vmem>>, vector<1x27x4096xf32>
    %2 = vector.shape_cast %1 : vector<1x27x4096xf32> to vector<27x4096xf32>
    %cst = arith.constant dense<0.000000e+00> : vector<16x4096xf32>
    %3 = tpu.matmul %0, %2, %cst {dimension_numbers = #tpu.dot_dimension_numbers<[1], [0], [0], [1], [0, 0, 1, 1], [], []>} : vector<16x27xf32>, vector<27x4096xf32>, vector<16x4096xf32> -> vector<16x4096xf32>
    %c0_4 = arith.constant 0 : index
    %c0_5 = arith.constant 0 : index
    %c0_6 = arith.constant 0 : index
    %4 = vector.load %arg2[%c0_4, %c0_5, %c0_6] : memref<1x27x4096xf32, #tpu.memory_space<vmem>>, vector<1x27x4096xf32>
    %5 = vector.shape_cast %4 : vector<1x27x4096xf32> to vector<27x4096xf32>
    %cst_7 = arith.constant dense<0.000000e+00> : vector<16x4096xf32>
    %6 = tpu.matmul %0, %5, %cst_7 {dimension_numbers = #tpu.dot_dimension_numbers<[1], [0], [0], [1], [0, 0, 1, 1], [], []>} : vector<16x27xf32>, vector<27x4096xf32>, vector<16x4096xf32> -> vector<16x4096xf32>
    %7 = arith.maximumf %3, %6 : vector<16x4096xf32>
    %c0_8 = arith.constant 0 : index
    %c0_9 = arith.constant 0 : index
    %c0_10 = arith.constant 0 : index
    %8 = vector.load %arg3[%c0_8, %c0_9, %c0_10] : memref<1x27x4096xf32, #tpu.memory_space<vmem>>, vector<1x27x4096xf32>
    %9 = vector.shape_cast %8 : vector<1x27x4096xf32> to vector<27x4096xf32>
    %cst_11 = arith.constant dense<0.000000e+00> : vector<16x4096xf32>
    %10 = tpu.matmul %0, %9, %cst_11 {dimension_numbers = #tpu.dot_dimension_numbers<[1], [0], [0], [1], [0, 0, 1, 1], [], []>} : vector<16x27xf32>, vector<27x4096xf32>, vector<16x4096xf32> -> vector<16x4096xf32>
    %11 = arith.maximumf %7, %10 : vector<16x4096xf32>
    %c0_12 = arith.constant 0 : index
    %c0_13 = arith.constant 0 : index
    %c0_14 = arith.constant 0 : index
    %12 = vector.load %arg4[%c0_12, %c0_13, %c0_14] : memref<1x27x4096xf32, #tpu.memory_space<vmem>>, vector<1x27x4096xf32>
    %13 = vector.shape_cast %12 : vector<1x27x4096xf32> to vector<27x4096xf32>
    %cst_15 = arith.constant dense<0.000000e+00> : vector<16x4096xf32>
    %14 = tpu.matmul %0, %13, %cst_15 {dimension_numbers = #tpu.dot_dimension_numbers<[1], [0], [0], [1], [0, 0, 1, 1], [], []>} : vector<16x27xf32>, vector<27x4096xf32>, vector<16x4096xf32> -> vector<16x4096xf32>
    %15 = arith.maximumf %11, %14 : vector<16x4096xf32>
    %c0_16 = arith.constant 0 : index
    %c0_17 = arith.constant 0 : index
    %16 = vector.load %arg6[%c0_16, %c0_17] : memref<16x1xf32, #tpu.memory_space<vmem>>, vector<16x1xf32>
    %17 = vector.broadcast %16 : vector<16x1xf32> to vector<16x4096xf32>
    %18 = arith.addf %15, %17 : vector<16x4096xf32>
    %cst_18 = arith.constant 0.000000e+00 : f32
    %19 = vector.broadcast %cst_18 : f32 to vector<16x4096xf32>
    %20 = arith.maximumf %18, %19 : vector<16x4096xf32>
    %c0_19 = arith.constant 0 : index
    %c0_20 = arith.constant 0 : index
    %c0_21 = arith.constant 0 : index
    %21 = vector.load %arg7[%c0_19, %c0_20, %c0_21] : memref<1x16x4096xf32, #tpu.memory_space<vmem>>, vector<1x16x4096xf32>
    %22 = vector.shape_cast %21 : vector<1x16x4096xf32> to vector<16x4096xf32>
    %23 = vector.shape_cast %20 : vector<16x4096xf32> to vector<1x16x4096xf32>
    tpu.vector_store %arg7[%c0_19, %c0_20, %c0_21], %23 {strides = array<i32>} : memref<1x16x4096xf32, #tpu.memory_space<vmem>>, vector<1x16x4096xf32>,
    return
  }
  func.func @transform_0(%arg0: i32) -> (i32, i32, i32) {
    %c0_i32 = arith.constant 0 : i32
    %c0_i32_0 = arith.constant 0 : i32
    %c0_i32_1 = arith.constant 0 : i32
    return %arg0, %c0_i32, %c0_i32_0 : i32, i32, i32
  }
  func.func @transform_1(%arg0: i32) -> (i32, i32, i32) {
    %c0_i32 = arith.constant 0 : i32
    %c0_i32_0 = arith.constant 0 : i32
    %c0_i32_1 = arith.constant 0 : i32
    return %arg0, %c0_i32, %c0_i32_0 : i32, i32, i32
  }
  func.func @transform_2(%arg0: i32) -> (i32, i32, i32) {
    %c0_i32 = arith.constant 0 : i32
    %c0_i32_0 = arith.constant 0 : i32
    %c0_i32_1 = arith.constant 0 : i32
    return %arg0, %c0_i32, %c0_i32_0 : i32, i32, i32
  }
  func.func @transform_3(%arg0: i32) -> (i32, i32, i32) {
    %c0_i32 = arith.constant 0 : i32
    %c0_i32_0 = arith.constant 0 : i32
    %c0_i32_1 = arith.constant 0 : i32
    return %arg0, %c0_i32, %c0_i32_0 : i32, i32, i32
  }
  func.func @transform_4(%arg0: i32) -> (i32, i32) {
    %c0_i32 = arith.constant 0 : i32
    %c0_i32_0 = arith.constant 0 : i32
    %c0_i32_1 = arith.constant 0 : i32
    return %c0_i32, %c0_i32_0 : i32, i32
  }
  func.func @transform_5(%arg0: i32) -> (i32, i32) {
    %c0_i32 = arith.constant 0 : i32
    %c0_i32_0 = arith.constant 0 : i32
    %c0_i32_1 = arith.constant 0 : i32
    return %c0_i32, %c0_i32_0 : i32, i32
  }
  func.func @transform_6(%arg0: i32) -> (i32, i32, i32) {
    %c0_i32 = arith.constant 0 : i32
    %c0_i32_0 = arith.constant 0 : i32
    %c0_i32_1 = arith.constant 0 : i32
    return %arg0, %c0_i32, %c0_i32_0 : i32, i32, i32
  }
}

module attributes {stable_mosaic.version = 11 : i64} {
  func.func @_conv_pool_kernel(%arg0: i32, %arg1: memref<1x144x1024xf32, #tpu.memory_space<vmem>>, %arg2: memref<1x144x1024xf32, #tpu.memory_space<vmem>>, %arg3: memref<1x144x1024xf32, #tpu.memory_space<vmem>>, %arg4: memref<1x144x1024xf32, #tpu.memory_space<vmem>>, %arg5: memref<32x144xf32, #tpu.memory_space<vmem>>, %arg6: memref<32x1xf32, #tpu.memory_space<vmem>>, %arg7: memref<1x32x1024xf32, #tpu.memory_space<vmem>>) attributes {dimension_semantics = [#tpu.dimension_semantics<parallel>], iteration_bounds = array<i64: 2>, scalar_prefetch = 0 : i64, scratch_operands = 0 : i64, tpu.core_type = #tpu.core_type<tc>, window_params = [{transform_indices = @transform_0, window_bounds = array<i64: 1, 144, 1024>}, {transform_indices = @transform_1, window_bounds = array<i64: 1, 144, 1024>}, {transform_indices = @transform_2, window_bounds = array<i64: 1, 144, 1024>}, {transform_indices = @transform_3, window_bounds = array<i64: 1, 144, 1024>}, {pipeline_mode = #tpu.pipeline_mode<synchronous>, transform_indices = @transform_4, window_bounds = array<i64: 32, 144>}, {pipeline_mode = #tpu.pipeline_mode<synchronous>, transform_indices = @transform_5, window_bounds = array<i64: 32, 1>}, {transform_indices = @transform_6, window_bounds = array<i64: 1, 32, 1024>}]} {
    %c0 = arith.constant 0 : index
    %c0_0 = arith.constant 0 : index
    %0 = vector.load %arg5[%c0, %c0_0] : memref<32x144xf32, #tpu.memory_space<vmem>>, vector<32x144xf32>
    %c0_1 = arith.constant 0 : index
    %c0_2 = arith.constant 0 : index
    %c0_3 = arith.constant 0 : index
    %1 = vector.load %arg1[%c0_1, %c0_2, %c0_3] : memref<1x144x1024xf32, #tpu.memory_space<vmem>>, vector<1x144x1024xf32>
    %2 = vector.shape_cast %1 : vector<1x144x1024xf32> to vector<144x1024xf32>
    %cst = arith.constant dense<0.000000e+00> : vector<32x1024xf32>
    %3 = tpu.matmul %0, %2, %cst {dimension_numbers = #tpu.dot_dimension_numbers<[1], [0], [0], [1], [0, 0, 1, 1], [], []>} : vector<32x144xf32>, vector<144x1024xf32>, vector<32x1024xf32> -> vector<32x1024xf32>
    %c0_4 = arith.constant 0 : index
    %c0_5 = arith.constant 0 : index
    %c0_6 = arith.constant 0 : index
    %4 = vector.load %arg2[%c0_4, %c0_5, %c0_6] : memref<1x144x1024xf32, #tpu.memory_space<vmem>>, vector<1x144x1024xf32>
    %5 = vector.shape_cast %4 : vector<1x144x1024xf32> to vector<144x1024xf32>
    %cst_7 = arith.constant dense<0.000000e+00> : vector<32x1024xf32>
    %6 = tpu.matmul %0, %5, %cst_7 {dimension_numbers = #tpu.dot_dimension_numbers<[1], [0], [0], [1], [0, 0, 1, 1], [], []>} : vector<32x144xf32>, vector<144x1024xf32>, vector<32x1024xf32> -> vector<32x1024xf32>
    %7 = arith.maximumf %3, %6 : vector<32x1024xf32>
    %c0_8 = arith.constant 0 : index
    %c0_9 = arith.constant 0 : index
    %c0_10 = arith.constant 0 : index
    %8 = vector.load %arg3[%c0_8, %c0_9, %c0_10] : memref<1x144x1024xf32, #tpu.memory_space<vmem>>, vector<1x144x1024xf32>
    %9 = vector.shape_cast %8 : vector<1x144x1024xf32> to vector<144x1024xf32>
    %cst_11 = arith.constant dense<0.000000e+00> : vector<32x1024xf32>
    %10 = tpu.matmul %0, %9, %cst_11 {dimension_numbers = #tpu.dot_dimension_numbers<[1], [0], [0], [1], [0, 0, 1, 1], [], []>} : vector<32x144xf32>, vector<144x1024xf32>, vector<32x1024xf32> -> vector<32x1024xf32>
    %11 = arith.maximumf %7, %10 : vector<32x1024xf32>
    %c0_12 = arith.constant 0 : index
    %c0_13 = arith.constant 0 : index
    %c0_14 = arith.constant 0 : index
    %12 = vector.load %arg4[%c0_12, %c0_13, %c0_14] : memref<1x144x1024xf32, #tpu.memory_space<vmem>>, vector<1x144x1024xf32>
    %13 = vector.shape_cast %12 : vector<1x144x1024xf32> to vector<144x1024xf32>
    %cst_15 = arith.constant dense<0.000000e+00> : vector<32x1024xf32>
    %14 = tpu.matmul %0, %13, %cst_15 {dimension_numbers = #tpu.dot_dimension_numbers<[1], [0], [0], [1], [0, 0, 1, 1], [], []>} : vector<32x144xf32>, vector<144x1024xf32>, vector<32x1024xf32> -> vector<32x1024xf32>
    %15 = arith.maximumf %11, %14 : vector<32x1024xf32>
    %c0_16 = arith.constant 0 : index
    %c0_17 = arith.constant 0 : index
    %16 = vector.load %arg6[%c0_16, %c0_17] : memref<32x1xf32, #tpu.memory_space<vmem>>, vector<32x1xf32>
    %17 = vector.broadcast %16 : vector<32x1xf32> to vector<32x1024xf32>
    %18 = arith.addf %15, %17 : vector<32x1024xf32>
    %cst_18 = arith.constant 0.000000e+00 : f32
    %19 = vector.broadcast %cst_18 : f32 to vector<32x1024xf32>
    %20 = arith.maximumf %18, %19 : vector<32x1024xf32>
    %c0_19 = arith.constant 0 : index
    %c0_20 = arith.constant 0 : index
    %c0_21 = arith.constant 0 : index
    %21 = vector.load %arg7[%c0_19, %c0_20, %c0_21] : memref<1x32x1024xf32, #tpu.memory_space<vmem>>, vector<1x32x1024xf32>
    %22 = vector.shape_cast %21 : vector<1x32x1024xf32> to vector<32x1024xf32>
    %23 = vector.shape_cast %20 : vector<32x1024xf32> to vector<1x32x1024xf32>
    tpu.vector_store %arg7[%c0_19, %c0_20, %c0_21], %23 {strides = array<i32>} : memref<1x32x1024xf32, #tpu.memory_space<vmem>>, vector<1x32x1024xf32>,
    return
  }
  func.func @transform_0(%arg0: i32) -> (i32, i32, i32) {
    %c0_i32 = arith.constant 0 : i32
    %c0_i32_0 = arith.constant 0 : i32
    %c0_i32_1 = arith.constant 0 : i32
    return %arg0, %c0_i32, %c0_i32_0 : i32, i32, i32
  }
  func.func @transform_1(%arg0: i32) -> (i32, i32, i32) {
    %c0_i32 = arith.constant 0 : i32
    %c0_i32_0 = arith.constant 0 : i32
    %c0_i32_1 = arith.constant 0 : i32
    return %arg0, %c0_i32, %c0_i32_0 : i32, i32, i32
  }
  func.func @transform_2(%arg0: i32) -> (i32, i32, i32) {
    %c0_i32 = arith.constant 0 : i32
    %c0_i32_0 = arith.constant 0 : i32
    %c0_i32_1 = arith.constant 0 : i32
    return %arg0, %c0_i32, %c0_i32_0 : i32, i32, i32
  }
  func.func @transform_3(%arg0: i32) -> (i32, i32, i32) {
    %c0_i32 = arith.constant 0 : i32
    %c0_i32_0 = arith.constant 0 : i32
    %c0_i32_1 = arith.constant 0 : i32
    return %arg0, %c0_i32, %c0_i32_0 : i32, i32, i32
  }
  func.func @transform_4(%arg0: i32) -> (i32, i32) {
    %c0_i32 = arith.constant 0 : i32
    %c0_i32_0 = arith.constant 0 : i32
    %c0_i32_1 = arith.constant 0 : i32
    return %c0_i32, %c0_i32_0 : i32, i32
  }
  func.func @transform_5(%arg0: i32) -> (i32, i32) {
    %c0_i32 = arith.constant 0 : i32
    %c0_i32_0 = arith.constant 0 : i32
    %c0_i32_1 = arith.constant 0 : i32
    return %c0_i32, %c0_i32_0 : i32, i32
  }
  func.func @transform_6(%arg0: i32) -> (i32, i32, i32) {
    %c0_i32 = arith.constant 0 : i32
    %c0_i32_0 = arith.constant 0 : i32
    %c0_i32_1 = arith.constant 0 : i32
    return %arg0, %c0_i32, %c0_i32_0 : i32, i32, i32
  }
}

module attributes {stable_mosaic.version = 11 : i64} {
  func.func @_fc_head_kernel(%arg0: i32, %arg1: memref<2x16384xf32, #tpu.memory_space<vmem>>, %arg2: memref<16384x128xbf16, #tpu.memory_space<vmem>>, %arg3: memref<1x128xf32, #tpu.memory_space<vmem>>, %arg4: memref<128x1xf32, #tpu.memory_space<vmem>>, %arg5: memref<1x1xf32, #tpu.memory_space<vmem>>, %arg6: memref<2x1xf32, #tpu.memory_space<vmem>>, %arg7: memref<2x128xf32, #tpu.memory_space<vmem>>) attributes {dimension_semantics = [#tpu.dimension_semantics<arbitrary>], iteration_bounds = array<i64: 2>, scalar_prefetch = 0 : i64, scratch_operands = 1 : i64, tpu.core_type = #tpu.core_type<tc>, window_params = [{transform_indices = @transform_0, window_bounds = array<i64: 2, 16384>}, {transform_indices = @transform_1, window_bounds = array<i64: 16384, 128>}, {pipeline_mode = #tpu.pipeline_mode<synchronous>, transform_indices = @transform_2, window_bounds = array<i64: 1, 128>}, {pipeline_mode = #tpu.pipeline_mode<synchronous>, transform_indices = @transform_3, window_bounds = array<i64: 128, 1>}, {pipeline_mode = #tpu.pipeline_mode<synchronous>, transform_indices = @transform_4, window_bounds = array<i64: 1, 1>}, {pipeline_mode = #tpu.pipeline_mode<synchronous>, transform_indices = @transform_5, window_bounds = array<i64: 2, 1>}]} {
    %c0_i32 = arith.constant 0 : i32
    %0 = arith.cmpi eq, %arg0, %c0_i32 : i32
    %1 = arith.extui %0 : i1 to i32
    %c0_i32_0 = arith.constant 0 : i32
    %2 = arith.cmpi ne, %1, %c0_i32_0 : i32
    scf.if %2 {
      %cst_9 = arith.constant 0.000000e+00 : f32
      %13 = vector.broadcast %cst_9 : f32 to vector<2x128xf32>
      %c0_10 = arith.constant 0 : index
      %c0_11 = arith.constant 0 : index
      %14 = vector.load %arg7[%c0_10, %c0_11] : memref<2x128xf32, #tpu.memory_space<vmem>>, vector<2x128xf32>
      tpu.vector_store %arg7[%c0_10, %c0_11], %13 {strides = array<i32>} : memref<2x128xf32, #tpu.memory_space<vmem>>, vector<2x128xf32>,
    } else {
    }
    %c0 = arith.constant 0 : index
    %c0_1 = arith.constant 0 : index
    %3 = vector.load %arg7[%c0, %c0_1] : memref<2x128xf32, #tpu.memory_space<vmem>>, vector<2x128xf32>
    %c0_2 = arith.constant 0 : index
    %c0_3 = arith.constant 0 : index
    %4 = vector.load %arg1[%c0_2, %c0_3] : memref<2x16384xf32, #tpu.memory_space<vmem>>, vector<2x16384xf32>
    %5 = arith.truncf %4 : vector<2x16384xf32> to vector<2x16384xbf16>
    %c0_4 = arith.constant 0 : index
    %c0_5 = arith.constant 0 : index
    %6 = vector.load %arg2[%c0_4, %c0_5] : memref<16384x128xbf16, #tpu.memory_space<vmem>>, vector<16384x128xbf16>
    %cst = arith.constant dense<0.000000e+00> : vector<2x128xf32>
    %7 = tpu.matmul %5, %6, %cst {dimension_numbers = #tpu.dot_dimension_numbers<[1], [0], [0], [1], [0, 0, 1, 1], [], []>} : vector<2x16384xbf16>, vector<16384x128xbf16>, vector<2x128xf32> -> vector<2x128xf32>
    %8 = arith.addf %3, %7 : vector<2x128xf32>
    %c0_6 = arith.constant 0 : index
    %c0_7 = arith.constant 0 : index
    %9 = vector.load %arg7[%c0_6, %c0_7] : memref<2x128xf32, #tpu.memory_space<vmem>>, vector<2x128xf32>
    tpu.vector_store %arg7[%c0_6, %c0_7], %8 {strides = array<i32>} : memref<2x128xf32, #tpu.memory_space<vmem>>, vector<2x128xf32>,
    %c1_i32 = arith.constant 1 : i32
    %10 = arith.cmpi eq, %arg0, %c1_i32 : i32
    %11 = arith.extui %10 : i1 to i32
    %c0_i32_8 = arith.constant 0 : i32
    %12 = arith.cmpi ne, %11, %c0_i32_8 : i32
    scf.if %12 {
      %c0_9 = arith.constant 0 : index
      %c0_10 = arith.constant 0 : index
      %13 = vector.load %arg7[%c0_9, %c0_10] : memref<2x128xf32, #tpu.memory_space<vmem>>, vector<2x128xf32>
      %c0_11 = arith.constant 0 : index
      %c0_12 = arith.constant 0 : index
      %14 = vector.load %arg3[%c0_11, %c0_12] : memref<1x128xf32, #tpu.memory_space<vmem>>, vector<1x128xf32>
      %15 = vector.broadcast %14 : vector<1x128xf32> to vector<2x128xf32>
      %16 = arith.addf %13, %15 : vector<2x128xf32>
      %cst_13 = arith.constant 0.000000e+00 : f32
      %17 = vector.broadcast %cst_13 : f32 to vector<2x128xf32>
      %18 = arith.maximumf %16, %17 : vector<2x128xf32>
      %c0_14 = arith.constant 0 : index
      %c0_15 = arith.constant 0 : index
      %19 = vector.load %arg4[%c0_14, %c0_15] : memref<128x1xf32, #tpu.memory_space<vmem>>, vector<128x1xf32>
      %cst_16 = arith.constant dense<0.000000e+00> : vector<2x1xf32>
      %20 = tpu.matmul %18, %19, %cst_16 {dimension_numbers = #tpu.dot_dimension_numbers<[1], [0], [0], [1], [0, 0, 1, 1], [], []>} : vector<2x128xf32>, vector<128x1xf32>, vector<2x1xf32> -> vector<2x1xf32>
      %c0_17 = arith.constant 0 : index
      %c0_18 = arith.constant 0 : index
      %21 = vector.load %arg5[%c0_17, %c0_18] : memref<1x1xf32, #tpu.memory_space<vmem>>, vector<1x1xf32>
      %22 = vector.broadcast %21 : vector<1x1xf32> to vector<2x1xf32>
      %23 = arith.addf %20, %22 : vector<2x1xf32>
      %cst_19 = arith.constant 5.000000e-01 : f32
      %24 = vector.broadcast %cst_19 : f32 to vector<2x1xf32>
      %25 = arith.mulf %24, %23 : vector<2x1xf32>
      %26 = math.tanh %25 : vector<2x1xf32>
      %cst_20 = arith.constant 1.000000e+00 : f32
      %27 = vector.broadcast %cst_20 : f32 to vector<2x1xf32>
      %28 = arith.addf %26, %27 : vector<2x1xf32>
      %cst_21 = arith.constant 5.000000e-01 : f32
      %29 = vector.broadcast %cst_21 : f32 to vector<2x1xf32>
      %30 = arith.mulf %29, %28 : vector<2x1xf32>
      %c0_22 = arith.constant 0 : index
      %c0_23 = arith.constant 0 : index
      %31 = vector.load %arg6[%c0_22, %c0_23] : memref<2x1xf32, #tpu.memory_space<vmem>>, vector<2x1xf32>
      tpu.vector_store %arg6[%c0_22, %c0_23], %30 {strides = array<i32>} : memref<2x1xf32, #tpu.memory_space<vmem>>, vector<2x1xf32>,
    } else {
    }
    return
  }
  func.func @transform_0(%arg0: i32) -> (i32, i32) {
    %c0_i32 = arith.constant 0 : i32
    %c0_i32_0 = arith.constant 0 : i32
    return %c0_i32, %arg0 : i32, i32
  }
  func.func @transform_1(%arg0: i32) -> (i32, i32) {
    %c0_i32 = arith.constant 0 : i32
    %c0_i32_0 = arith.constant 0 : i32
    return %arg0, %c0_i32 : i32, i32
  }
  func.func @transform_2(%arg0: i32) -> (i32, i32) {
    %c0_i32 = arith.constant 0 : i32
    %c0_i32_0 = arith.constant 0 : i32
    %c0_i32_1 = arith.constant 0 : i32
    return %c0_i32, %c0_i32_0 : i32, i32
  }
  func.func @transform_3(%arg0: i32) -> (i32, i32) {
    %c0_i32 = arith.constant 0 : i32
    %c0_i32_0 = arith.constant 0 : i32
    %c0_i32_1 = arith.constant 0 : i32
    return %c0_i32, %c0_i32_0 : i32, i32
  }
  func.func @transform_4(%arg0: i32) -> (i32, i32) {
    %c0_i32 = arith.constant 0 : i32
    %c0_i32_0 = arith.constant 0 : i32
    %c0_i32_1 = arith.constant 0 : i32
    return %c0_i32, %c0_i32_0 : i32, i32
  }
  func.func @transform_5(%arg0: i32) -> (i32, i32) {
    %c0_i32 = arith.constant 0 : i32
    %c0_i32_0 = arith.constant 0 : i32
    %c0_i32_1 = arith.constant 0 : i32
    return %c0_i32, %c0_i32_0 : i32, i32
  }
}

</mosaic_0001>

<bundles_post_ra>
// kernel: flip_detection_forward.3
= control target key start
LH: loop header
LB: loop body
LE: loop exit
PB: predicated region body
PF: predicated region fallthrough
CT: control target
= control target key end

     0   :  { %s7613_s21 = smov 0   ;;  %s9751_s0 = inlined_call_operand.vmem [shape: f32[2,27,4096], index: 0, kind: input, shape index: {}]   ;;  %s9752_s1 = inlined_call_operand.vmem [shape: f32[2,27,4096], index: 1, kind: input, shape index: {}]   ;;  %s9753_s2 = inlined_call_operand.vmem [shape: f32[2,27,4096], index: 2, kind: input, shape index: {}]   ;;  %s9754_s3 = inlined_call_operand.vmem [shape: f32[2,27,4096], index: 3, kind: input, shape index: {}]   ;;  %s9755_s4 = inlined_call_operand.vmem [shape: f32[16,27], index: 4, kind: input, shape index: {}]   ;;  %s9756_s5 = inlined_call_operand.vmem [shape: f32[16,1], index: 5, kind: input, shape index: {}]   ;;  %s9757_s6 = inlined_call_operand.vmem [shape: f32[2,16,4096], index: 6, kind: output, shape index: {}]  }
   0x1 LB: > { %s6633_s22 = sadd.s32 4294967295, %s7573_s21   ;;  %p6637_p0 = scmp.ge.s32.totalorder %s7573_s21, 1  ;;  %s7573_s21 = sphi %s7613_s21, %s16_s21  }
   0x2   : > { %p242_p1 = scmp.lt.s32.totalorder %s7573_s21, 3 }
   0x4   : > { %p243_p2 = pnand %p6637_p0, %p242_p1 }
   0x6   : > { %246 = sbr.rel (%p243_p2) target bundleno = 503 (0x1f7), region = 44 }
   0xd   : > { %p287_p3 = scmp.lt.s32.totalorder %s6633_s22, 1  ;;  %v7575_v0 = vmov 0.0   ;;  %vm449_vm0 = vcmask 1042432   ;;  %vm7576_vm1 = vmmov 1   ;;  %v7663_v28 = vld [vmem:[%s9755_s4] sm:$0xff]  ;;  %vm442_vm3 = vcmask 220160  }
   0xe   : > { %610 = vmatprep.mubr.f32.mxu0 %v7575_v0  ;;  %687 = vmatprep.mubr.f32.mxu1 %v7575_v0  ;;  %vm7634_vm2 = vmpackc.low %vm449_vm0, %vm7576_vm1  ;;  %v7692_v51 = vld [vmem:[%s9755_s4 + $0x8] sm:$0xff] }
   0xf   : > { %s10110_s22 = smov (!%p287_p3, %s6633_s22), 1  ;;  %v6339_v1 = vld [vmem:[%s9756_s5 + $0x8] sm:$0xff] }
  0x10   : > { %s7626_s23 = sshll.u32 %s10110_s22, 10  ;;  %s6910_s30 = sshll.u32 %s10110_s22, 9 }
  0x11   : > { %s7632_s26 = scalar_lea.vmem %s9751_s0, %s7626_s23  ;;  %s7900_s9 = scalar_lea.vmem %s9752_s1, %s7626_s23 }
  0x12   : > { %v315_v2 = vld [vmem:[%s7632_s26 + $0x8] sm:$0xff]  ;;  %v317_v4 = vld [vmem:[%s7632_s26 + $0x18] sm:$0xff]  ;;  %v314_v7 = vld [vmem:[%s7632_s26] sm:$0xff]  ;;  %s8204_s16 = scalar_lea.vmem %s9753_s2, %s7626_s23  ;;  %s8498_s19 = scalar_lea.vmem %s9754_s3, %s7626_s23 }
  0x13   : > { %v347_v3 = vld [vmem:[%s7632_s26 + $0x108] sm:$0xff]  ;;  %v349_v6 = vld [vmem:[%s7632_s26 + $0x118] sm:$0xff]  ;;  %v346_v8 = vld [vmem:[%s7632_s26 + $0x100] sm:$0xff] }
  0x14   : > { %v6911_v5 = vpack.c.bf16 %v347_v3, %v315_v2  ;;  %v6921_v9 = vpack.c.bf16 %v349_v6, %v317_v4  ;;  %v6913_v10 = vpack.c.bf16 %v346_v8, %v314_v7  ;;  %v316_v11 = vld [vmem:[%s7632_s26 + $0x10] sm:$0xff]  ;;  %v379_v13 = vld [vmem:[%s7632_s26 + $0x208] sm:$0xff]  ;;  %v381_v16 = vld [vmem:[%s7632_s26 + $0x218] sm:$0xff] }
  0x15   : > { %v348_v12 = vld [vmem:[%s7632_s26 + $0x110] sm:$0xff]  ;;  %v411_v15 = vld [vmem:[%s7632_s26 + $0x308] sm:$0x7]  ;;  %v413_v17 = vld [vmem:[%s7632_s26 + $0x318] sm:$0x7] }
  0x16   : > { %6912 = vmatprep.subr.bf16.mxu0 %v6911_v5  ;;  %v6923_v14 = vpack.c.bf16 %v348_v12, %v316_v11  ;;  %6922 = vmatprep.subr.bf16.mxu1 %v6921_v9  ;;  %v6915_v18 = vpack.c.bf16 %v411_v15, %v379_v13  ;;  %v6925_v19 = vpack.c.bf16 %v413_v17, %v381_v16  ;;  %v378_v20 = vld [vmem:[%s7632_s26 + $0x200] sm:$0xff]  ;;  %v380_v22 = vld [vmem:[%s7632_s26 + $0x210] sm:$0xff]  ;;  %v319_v25 = vld [vmem:[%s7632_s26 + $0x28] sm:$0xff] }
  0x17   : > { %6914 = vmatpush1.bf16.msra.mxu0 %v6913_v10  ;;  %v410_v21 = vld [vmem:[%s7632_s26 + $0x300] sm:$0x7]  ;;  %v412_v24 = vld [vmem:[%s7632_s26 + $0x310] sm:$0x7]  ;;  %v351_v26 = vld [vmem:[%s7632_s26 + $0x128] sm:$0xff] }
  0x18   : > { %6924 = vmatpush1.bf16.msra.mxu1 %v6923_v14  ;;  %v6918_v23 = vpack.c.bf16 %v410_v21, %v378_v20  ;;  %6917 = vmatprep.subr.msk.bf16.mxu0 %vm7634_vm2, %v6915_v18  ;;  %v6928_v27 = vpack.c.bf16 %v412_v24, %v380_v22  ;;  %v6931_v29 = vpack.c.bf16 %v351_v26, %v319_v25  ;;  %v321_v30 = vld [vmem:[%s7632_s26 + $0x38] sm:$0xff]  ;;  %v318_v32 = vld [vmem:[%s7632_s26 + $0x20] sm:$0xff]  ;;  %v320_v35 = vld [vmem:[%s7632_s26 + $0x30] sm:$0xff] }
  0x19   : > { %6927 = vmatprep.subr.msk.bf16.mxu1 %vm7634_vm2, %v6925_v19  ;;  %v353_v31 = vld [vmem:[%s7632_s26 + $0x138] sm:$0xff]  ;;  %v350_v34 = vld [vmem:[%s7632_s26 + $0x120] sm:$0xff]  ;;  %v352_v36 = vld [vmem:[%s7632_s26 + $0x130] sm:$0xff] }
  0x1a   : > { %v6941_v33 = vpack.c.bf16 %v353_v31, %v321_v30  ;;  %v6933_v37 = vpack.c.bf16 %v350_v34, %v318_v32  ;;  %v383_v38 = vld [vmem:[%s7632_s26 + $0x228] sm:$0xff]  ;;  %v385_v40 = vld [vmem:[%s7632_s26 + $0x238] sm:$0xff]  ;;  %v6943_v41 = vpack.c.bf16 %v352_v36, %v320_v35  ;;  %v382_v43 = vld [vmem:[%s7632_s26 + $0x220] sm:$0xff] }
  0x1b   : > { %6920 = vmatpush1.bf16.msk.msra.mxu0 %vm7634_vm2, %v6918_v23  ;;  %v415_v39 = vld [vmem:[%s7632_s26 + $0x328] sm:$0x7]  ;;  %v417_v42 = vld [vmem:[%s7632_s26 + $0x338] sm:$0x7]  ;;  %v414_v44 = vld [vmem:[%s7632_s26 + $0x320] sm:$0x7] }
  0x1c   : > { %6930 = vmatpush1.bf16.msk.msra.mxu1 %vm7634_vm2, %v6928_v27  ;;  %6932 = vmatprep.subr.bf16.mxu0 %v6931_v29  ;;  %v6935_v45 = vpack.c.bf16 %v415_v39, %v383_v38  ;;  %v384_v46 = vld [vmem:[%s7632_s26 + $0x230] sm:$0xff]  ;;  %v6945_v48 = vpack.c.bf16 %v417_v42, %v385_v40  ;;  %v323_v49 = vld [vmem:[%s7632_s26 + $0x48] sm:$0xff]  ;;  %v6938_v52 = vpack.c.bf16 %v414_v44, %v382_v43  ;;  %v325_v53 = vld [vmem:[%s7632_s26 + $0x58] sm:$0xff] }
  0x1d   : > { %6942 = vmatprep.subr.bf16.mxu1 %v6941_v33  ;;  %v416_v47 = vld [vmem:[%s7632_s26 + $0x330] sm:$0x7]  ;;  %v355_v50 = vld [vmem:[%s7632_s26 + $0x148] sm:$0xff]  ;;  %v357_v54 = vld [vmem:[%s7632_s26 + $0x158] sm:$0xff] }
  0x1e   : > { %6650 = vmatmul.mubr.msk.f32.vlgmr.msra.gmra.mrb[0].mxu0 %vm442_vm3, %v7663_v28  ;;  %v6948_v55 = vpack.c.bf16 %v416_v47, %v384_v46  ;;  %v322_v56 = vld [vmem:[%s7632_s26 + $0x40] sm:$0xff]  ;;  %v6951_v58 = vpack.c.bf16 %v355_v50, %v323_v49  ;;  %v324_v59 = vld [vmem:[%s7632_s26 + $0x50] sm:$0xff]  ;;  %v6961_v61 = vpack.c.bf16 %v357_v54, %v325_v53  ;;  %v387_v62 = vld [vmem:[%s7632_s26 + $0x248] sm:$0xff] }
  0x1f   : > { %6654 = vmatmul.mubr.msk.f32.vlgmr.msra.gmra.mrb[0].mxu1 %vm442_vm3, %v7663_v28  ;;  %6934 = vmatpush1.bf16.msra.mxu0 %v6933_v37  ;;  %v354_v57 = vld [vmem:[%s7632_s26 + $0x140] sm:$0xff]  ;;  %v356_v60 = vld [vmem:[%s7632_s26 + $0x150] sm:$0xff]  ;;  %v419_v63 = vld [vmem:[%s7632_s26 + $0x348] sm:$0x7] }
  0x20   : > { %6944 = vmatpush1.bf16.msra.mxu1 %v6943_v41  ;;  %616 = vmatprep.mubr.f32.mxu0 %v7575_v0  ;;  %v6953_v2 = vpack.c.bf16 %v354_v57, %v322_v56  ;;  %v389_v3 = vld [vmem:[%s7632_s26 + $0x258] sm:$0xff]  ;;  %v6963_v5 = vpack.c.bf16 %v356_v60, %v324_v59  ;;  %v386_v6 = vld [vmem:[%s7632_s26 + $0x240] sm:$0xff]  ;;  %v6955_v8 = vpack.c.bf16 %v419_v63, %v387_v62  ;;  %v388_v9 = vld [vmem:[%s7632_s26 + $0x250] sm:$0xff] }
  0x21   : > { %693 = vmatprep.mubr.f32.mxu1 %v7575_v0  ;;  %6937 = vmatprep.subr.msk.bf16.mxu0 %vm7634_vm2, %v6935_v45  ;;  %v421_v4 = vld [vmem:[%s7632_s26 + $0x358] sm:$0x7]  ;;  %v418_v7 = vld [vmem:[%s7632_s26 + $0x340] sm:$0x7]  ;;  %v420_v10 = vld [vmem:[%s7632_s26 + $0x350] sm:$0x7] }
  0x22   : > { %6651 = vmatmul.mubr.msk.f32.gmra.mrb[2].mxu0 %vm442_vm3, %v7692_v51  ;;  %6947 = vmatprep.subr.msk.bf16.mxu1 %vm7634_vm2, %v6945_v48  ;;  %v6965_v11 = vpack.c.bf16 %v421_v4, %v389_v3  ;;  %v327_v12 = vld [vmem:[%s7632_s26 + $0x68] sm:$0xff]  ;;  %v6958_v14 = vpack.c.bf16 %v418_v7, %v386_v6  ;;  %v329_v15 = vld [vmem:[%s7632_s26 + $0x78] sm:$0xff]  ;;  %v6968_v17 = vpack.c.bf16 %v420_v10, %v388_v9  ;;  %v326_v18 = vld [vmem:[%s7632_s26 + $0x60] sm:$0xff] }
  0x23   : > { %6655 = vmatmul.mubr.msk.f32.gmra.mrb[2].mxu1 %vm442_vm3, %v7692_v51  ;;  %6940 = vmatpush1.bf16.msk.msra.mxu0 %vm7634_vm2, %v6938_v52  ;;  %v359_v13 = vld [vmem:[%s7632_s26 + $0x168] sm:$0xff]  ;;  %v361_v16 = vld [vmem:[%s7632_s26 + $0x178] sm:$0xff]  ;;  %v358_v19 = vld [vmem:[%s7632_s26 + $0x160] sm:$0xff] }
  0x24   : > { %6950 = vmatpush1.bf16.msk.msra.mxu1 %vm7634_vm2, %v6948_v55  ;;  %764 = vmatprep.mubr.f32.mxu0 %v7575_v0  ;;  %v6971_v20 = vpack.c.bf16 %v359_v13, %v327_v12  ;;  %v328_v21 = vld [vmem:[%s7632_s26 + $0x70] sm:$0xff]  ;;  %v6981_v23 = vpack.c.bf16 %v361_v16, %v329_v15  ;;  %v391_v24 = vld [vmem:[%s7632_s26 + $0x268] sm:$0xff]  ;;  %v6973_v26 = vpack.c.bf16 %v358_v19, %v326_v18  ;;  %v393_v27 = vld [vmem:[%s7632_s26 + $0x278] sm:$0xff] }
  0x25   : > { %841 = vmatprep.mubr.f32.mxu1 %v7575_v0  ;;  %6952 = vmatprep.subr.bf16.mxu0 %v6951_v58  ;;  %v360_v22 = vld [vmem:[%s7632_s26 + $0x170] sm:$0xff]  ;;  %v423_v25 = vld [vmem:[%s7632_s26 + $0x368] sm:$0x7]  ;;  %v425_v29 = vld [vmem:[%s7632_s26 + $0x378] sm:$0x7] }
  0x26   : > { %6658 = vmatmul.mubr.msk.f32.vlgmr.msra.gmra.mrb[4].mxu0 %vm442_vm3, %v7663_v28  ;;  %6962 = vmatprep.subr.bf16.mxu1 %v6961_v61  ;;  %v6983_v30 = vpack.c.bf16 %v360_v22, %v328_v21  ;;  %v390_v31 = vld [vmem:[%s7632_s26 + $0x260] sm:$0xff]  ;;  %v6975_v33 = vpack.c.bf16 %v423_v25, %v391_v24  ;;  %v392_v34 = vld [vmem:[%s7632_s26 + $0x270] sm:$0xff]  ;;  %v6985_v36 = vpack.c.bf16 %v425_v29, %v393_v27  ;;  %v331_v37 = vld [vmem:[%s7632_s26 + $0x88] sm:$0xff] }
  0x27   : > { %6662 = vmatmul.mubr.msk.f32.vlgmr.msra.gmra.mrb[4].mxu1 %vm442_vm3, %v7663_v28  ;;  %6954 = vmatpush1.bf16.msra.mxu0 %v6953_v2  ;;  %v422_v32 = vld [vmem:[%s7632_s26 + $0x360] sm:$0x7]  ;;  %v424_v35 = vld [vmem:[%s7632_s26 + $0x370] sm:$0x7]  ;;  %v363_v38 = vld [vmem:[%s7632_s26 + $0x188] sm:$0xff] }
  0x28   : > { %6964 = vmatpush1.bf16.msra.mxu1 %v6963_v5  ;;  %770 = vmatprep.mubr.f32.mxu0 %v7575_v0  ;;  %v6978_v39 = vpack.c.bf16 %v422_v32, %v390_v31  ;;  %v333_v40 = vld [vmem:[%s7632_s26 + $0x98] sm:$0xff]  ;;  %v6988_v42 = vpack.c.bf16 %v424_v35, %v392_v34  ;;  %v330_v43 = vld [vmem:[%s7632_s26 + $0x80] sm:$0xff]  ;;  %v6991_v45 = vpack.c.bf16 %v363_v38, %v331_v37  ;;  %v332_v46 = vld [vmem:[%s7632_s26 + $0x90] sm:$0xff] }
  0x29   : > { %847 = vmatprep.mubr.f32.mxu1 %v7575_v0  ;;  %6957 = vmatprep.subr.msk.bf16.mxu0 %vm7634_vm2, %v6955_v8  ;;  %v365_v41 = vld [vmem:[%s7632_s26 + $0x198] sm:$0xff]  ;;  %v362_v44 = vld [vmem:[%s7632_s26 + $0x180] sm:$0xff]  ;;  %v364_v47 = vld [vmem:[%s7632_s26 + $0x190] sm:$0xff] }
  0x2a   : > { %6659 = vmatmul.mubr.msk.f32.gmra.mrb[6].mxu0 %vm442_vm3, %v7692_v51  ;;  %6967 = vmatprep.subr.msk.bf16.mxu1 %vm7634_vm2, %v6965_v11  ;;  %v7001_v48 = vpack.c.bf16 %v365_v41, %v333_v40  ;;  %v395_v49 = vld [vmem:[%s7632_s26 + $0x288] sm:$0xff]  ;;  %v6993_v52 = vpack.c.bf16 %v362_v44, %v330_v43  ;;  %v397_v53 = vld [vmem:[%s7632_s26 + $0x298] sm:$0xff]  ;;  %v7003_v55 = vpack.c.bf16 %v364_v47, %v332_v46  ;;  %v394_v56 = vld [vmem:[%s7632_s26 + $0x280] sm:$0xff] }
  0x2b   : > { %6663 = vmatmul.mubr.msk.f32.gmra.mrb[6].mxu1 %vm442_vm3, %v7692_v51  ;;  %6960 = vmatpush1.bf16.msk.msra.mxu0 %vm7634_vm2, %v6958_v14  ;;  %v427_v50 = vld [vmem:[%s7632_s26 + $0x388] sm:$0x7]  ;;  %v429_v54 = vld [vmem:[%s7632_s26 + $0x398] sm:$0x7]  ;;  %v426_v57 = vld [vmem:[%s7632_s26 + $0x380] sm:$0x7] }
  0x2c   : > { %6970 = vmatpush1.bf16.msk.msra.mxu1 %vm7634_vm2, %v6968_v17  ;;  %918 = vmatprep.mubr.f32.mxu0 %v7575_v0  ;;  %v6995_v58 = vpack.c.bf16 %v427_v50, %v395_v49  ;;  %v396_v59 = vld [vmem:[%s7632_s26 + $0x290] sm:$0xff]  ;;  %v7005_v61 = vpack.c.bf16 %v429_v54, %v397_v53  ;;  %v335_v62 = vld [vmem:[%s7632_s26 + $0xa8] sm:$0xff]  ;;  %v6998_v2 = vpack.c.bf16 %v426_v57, %v394_v56  ;;  %v337_v3 = vld [vmem:[%s7632_s26 + $0xb8] sm:$0xff] }
  0x2d   : > { %995 = vmatprep.mubr.f32.mxu1 %v7575_v0  ;;  %6972 = vmatprep.subr.bf16.mxu0 %v6971_v20  ;;  %v428_v60 = vld [vmem:[%s7632_s26 + $0x390] sm:$0x7]  ;;  %v367_v63 = vld [vmem:[%s7632_s26 + $0x1a8] sm:$0xff]  ;;  %v369_v4 = vld [vmem:[%s7632_s26 + $0x1b8] sm:$0xff] }
  0x2e   : > { %6666 = vmatmul.mubr.msk.f32.vlgmr.msra.gmra.mrb[8].mxu0 %vm442_vm3, %v7663_v28  ;;  %6982 = vmatprep.subr.bf16.mxu1 %v6981_v23  ;;  %v7008_v5 = vpack.c.bf16 %v428_v60, %v396_v59  ;;  %v334_v6 = vld [vmem:[%s7632_s26 + $0xa0] sm:$0xff]  ;;  %v7011_v8 = vpack.c.bf16 %v367_v63, %v335_v62  ;;  %v336_v9 = vld [vmem:[%s7632_s26 + $0xb0] sm:$0xff]  ;;  %v7021_v11 = vpack.c.bf16 %v369_v4, %v337_v3  ;;  %v399_v12 = vld [vmem:[%s7632_s26 + $0x2a8] sm:$0xff] }
  0x2f   : > { %6670 = vmatmul.mubr.msk.f32.vlgmr.msra.gmra.mrb[8].mxu1 %vm442_vm3, %v7663_v28  ;;  %6974 = vmatpush1.bf16.msra.mxu0 %v6973_v26  ;;  %v366_v7 = vld [vmem:[%s7632_s26 + $0x1a0] sm:$0xff]  ;;  %v368_v10 = vld [vmem:[%s7632_s26 + $0x1b0] sm:$0xff]  ;;  %v431_v13 = vld [vmem:[%s7632_s26 + $0x3a8] sm:$0x7] }
  0x30   : > { %6984 = vmatpush1.bf16.msra.mxu1 %v6983_v30  ;;  %924 = vmatprep.mubr.f32.mxu0 %v7575_v0  ;;  %v7013_v14 = vpack.c.bf16 %v366_v7, %v334_v6  ;;  %v401_v15 = vld [vmem:[%s7632_s26 + $0x2b8] sm:$0xff]  ;;  %v7023_v17 = vpack.c.bf16 %v368_v10, %v336_v9  ;;  %v398_v18 = vld [vmem:[%s7632_s26 + $0x2a0] sm:$0xff]  ;;  %v7015_v20 = vpack.c.bf16 %v431_v13, %v399_v12  ;;  %v400_v21 = vld [vmem:[%s7632_s26 + $0x2b0] sm:$0xff] }
  0x31   : > { %1001 = vmatprep.mubr.f32.mxu1 %v7575_v0  ;;  %6977 = vmatprep.subr.msk.bf16.mxu0 %vm7634_vm2, %v6975_v33  ;;  %v433_v16 = vld [vmem:[%s7632_s26 + $0x3b8] sm:$0x7]  ;;  %v430_v19 = vld [vmem:[%s7632_s26 + $0x3a0] sm:$0x7]  ;;  %v432_v22 = vld [vmem:[%s7632_s26 + $0x3b0] sm:$0x7] }
  0x32   : > { %6667 = vmatmul.mubr.msk.f32.gmra.mrb[10].mxu0 %vm442_vm3, %v7692_v51  ;;  %6987 = vmatprep.subr.msk.bf16.mxu1 %vm7634_vm2, %v6985_v36  ;;  %v7025_v23 = vpack.c.bf16 %v433_v16, %v401_v15  ;;  %v339_v24 = vld [vmem:[%s7632_s26 + $0xc8] sm:$0xff]  ;;  %v7018_v26 = vpack.c.bf16 %v430_v19, %v398_v18  ;;  %v341_v27 = vld [vmem:[%s7632_s26 + $0xd8] sm:$0xff]  ;;  %v7028_v30 = vpack.c.bf16 %v432_v22, %v400_v21  ;;  %v338_v31 = vld [vmem:[%s7632_s26 + $0xc0] sm:$0xff] }
  0x33   : > { %6671 = vmatmul.mubr.msk.f32.gmra.mrb[10].mxu1 %vm442_vm3, %v7692_v51  ;;  %6980 = vmatpush1.bf16.msk.msra.mxu0 %vm7634_vm2, %v6978_v39  ;;  %v371_v25 = vld [vmem:[%s7632_s26 + $0x1c8] sm:$0xff]  ;;  %v373_v29 = vld [vmem:[%s7632_s26 + $0x1d8] sm:$0xff]  ;;  %v370_v32 = vld [vmem:[%s7632_s26 + $0x1c0] sm:$0xff] }
  0x34   : > { %6990 = vmatpush1.bf16.msk.msra.mxu1 %vm7634_vm2, %v6988_v42  ;;  %1072 = vmatprep.mubr.f32.mxu0 %v7575_v0  ;;  %v7031_v33 = vpack.c.bf16 %v371_v25, %v339_v24  ;;  %v340_v34 = vld [vmem:[%s7632_s26 + $0xd0] sm:$0xff]  ;;  %v7041_v36 = vpack.c.bf16 %v373_v29, %v341_v27  ;;  %v403_v37 = vld [vmem:[%s7632_s26 + $0x2c8] sm:$0xff]  ;;  %v7033_v39 = vpack.c.bf16 %v370_v32, %v338_v31  ;;  %v405_v40 = vld [vmem:[%s7632_s26 + $0x2d8] sm:$0xff] }
  0x35   : > { %1149 = vmatprep.mubr.f32.mxu1 %v7575_v0  ;;  %6992 = vmatprep.subr.bf16.mxu0 %v6991_v45  ;;  %v372_v35 = vld [vmem:[%s7632_s26 + $0x1d0] sm:$0xff]  ;;  %v435_v38 = vld [vmem:[%s7632_s26 + $0x3c8] sm:$0x7]  ;;  %v437_v41 = vld [vmem:[%s7632_s26 + $0x3d8] sm:$0x7] }
  0x36   : > { %6674 = vmatmul.mubr.msk.f32.vlgmr.msra.gmra.mrb[12].mxu0 %vm442_vm3, %v7663_v28  ;;  %7002 = vmatprep.subr.bf16.mxu1 %v7001_v48  ;;  %v7043_v42 = vpack.c.bf16 %v372_v35, %v340_v34  ;;  %v402_v43 = vld [vmem:[%s7632_s26 + $0x2c0] sm:$0xff]  ;;  %v7035_v45 = vpack.c.bf16 %v435_v38, %v403_v37  ;;  %v404_v46 = vld [vmem:[%s7632_s26 + $0x2d0] sm:$0xff]  ;;  %v7045_v48 = vpack.c.bf16 %v437_v41, %v405_v40  ;;  %v343_v49 = vld [vmem:[%s7632_s26 + $0xe8] sm:$0xff] }
  0x37   : > { %6678 = vmatmul.mubr.msk.f32.vlgmr.msra.gmra.mrb[12].mxu1 %vm442_vm3, %v7663_v28  ;;  %6994 = vmatpush1.bf16.msra.mxu0 %v6993_v52  ;;  %v434_v44 = vld [vmem:[%s7632_s26 + $0x3c0] sm:$0x7]  ;;  %v436_v47 = vld [vmem:[%s7632_s26 + $0x3d0] sm:$0x7]  ;;  %v375_v50 = vld [vmem:[%s7632_s26 + $0x1e8] sm:$0xff] }
  0x38   : > { %7004 = vmatpush1.bf16.msra.mxu1 %v7003_v55  ;;  %1078 = vmatprep.mubr.f32.mxu0 %v7575_v0  ;;  %v7038_v52 = vpack.c.bf16 %v434_v44, %v402_v43  ;;  %v345_v53 = vld [vmem:[%s7632_s26 + $0xf8] sm:$0xff]  ;;  %v7048_v55 = vpack.c.bf16 %v436_v47, %v404_v46  ;;  %v342_v56 = vld [vmem:[%s7632_s26 + $0xe0] sm:$0xff]  ;;  %v344_v59 = vld [vmem:[%s7632_s26 + $0xf0] sm:$0xff] }
  0x39   : > { %1155 = vmatprep.mubr.f32.mxu1 %v7575_v0  ;;  %6997 = vmatprep.subr.msk.bf16.mxu0 %vm7634_vm2, %v6995_v58  ;;  %v377_v54 = vld [vmem:[%s7632_s26 + $0x1f8] sm:$0xff]  ;;  %v374_v57 = vld [vmem:[%s7632_s26 + $0x1e0] sm:$0xff]  ;;  %v7051_v58 = vpack.c.bf16 %v375_v50, %v343_v49  ;;  %v376_v60 = vld [vmem:[%s7632_s26 + $0x1f0] sm:$0xff] }
  0x3a   : > { %6675 = vmatmul.mubr.msk.f32.gmra.mrb[14].mxu0 %vm442_vm3, %v7692_v51  ;;  %7007 = vmatprep.subr.msk.bf16.mxu1 %vm7634_vm2, %v7005_v61  ;;  %v7061_v61 = vpack.c.bf16 %v377_v54, %v345_v53  ;;  %v407_v62 = vld [vmem:[%s7632_s26 + $0x2e8] sm:$0xff]  ;;  %v409_v3 = vld [vmem:[%s7632_s26 + $0x2f8] sm:$0xff]  ;;  %v406_v6 = vld [vmem:[%s7632_s26 + $0x2e0] sm:$0xff] }
  0x3b   : > { %6679 = vmatmul.mubr.msk.f32.gmra.mrb[14].mxu1 %vm442_vm3, %v7692_v51  ;;  %7000 = vmatpush1.bf16.msk.msra.mxu0 %vm7634_vm2, %v6998_v2  ;;  %v439_v63 = vld [vmem:[%s7632_s26 + $0x3e8] sm:$0x7]  ;;  %v7053_v2 = vpack.c.bf16 %v374_v57, %v342_v56  ;;  %v441_v4 = vld [vmem:[%s7632_s26 + $0x3f8] sm:$0x7]  ;;  %v438_v7 = vld [vmem:[%s7632_s26 + $0x3e0] sm:$0x7] }
  0x3c   : > { %7010 = vmatpush1.bf16.msk.msra.mxu1 %vm7634_vm2, %v7008_v5  ;;  %1226 = vmatprep.mubr.f32.mxu0 %v7575_v0  ;;  %v7063_v5 = vpack.c.bf16 %v376_v60, %v344_v59  ;;  %v408_v9 = vld [vmem:[%s7632_s26 + $0x2f0] sm:$0xff]  ;;  %v1779_v12 = vld [vmem:[%s7900_s9 + $0x8] sm:$0xff]  ;;  %v1781_v15 = vld [vmem:[%s7900_s9 + $0x18] sm:$0xff] }
  0x3d   : > { %1303 = vmatprep.mubr.f32.mxu1 %v7575_v0  ;;  %7012 = vmatprep.subr.bf16.mxu0 %v7011_v8  ;;  %v7055_v8 = vpack.c.bf16 %v439_v63, %v407_v62  ;;  %v440_v10 = vld [vmem:[%s7632_s26 + $0x3f0] sm:$0x7]  ;;  %v1811_v13 = vld [vmem:[%s7900_s9 + $0x108] sm:$0xff]  ;;  %v1813_v16 = vld [vmem:[%s7900_s9 + $0x118] sm:$0xff] }
  0x3e   : > { %6682 = vmatmul.mubr.msk.f32.vlgmr.msra.gmra.mrb[16].mxu0 %vm442_vm3, %v7663_v28  ;;  %7022 = vmatprep.subr.bf16.mxu1 %v7021_v11  ;;  %v7065_v11 = vpack.c.bf16 %v441_v4, %v409_v3  ;;  %v1778_v18 = vld [vmem:[%s7900_s9] sm:$0xff]  ;;  %v1780_v21 = vld [vmem:[%s7900_s9 + $0x10] sm:$0xff]  ;;  %v1843_v24 = vld [vmem:[%s7900_s9 + $0x208] sm:$0xff] }
  0x3f   : > { %6686 = vmatmul.mubr.msk.f32.vlgmr.msra.gmra.mrb[16].mxu1 %vm442_vm3, %v7663_v28  ;;  %7014 = vmatpush1.bf16.msra.mxu0 %v7013_v14  ;;  %v7058_v14 = vpack.c.bf16 %v438_v7, %v406_v6  ;;  %v1810_v19 = vld [vmem:[%s7900_s9 + $0x100] sm:$0xff]  ;;  %v1812_v22 = vld [vmem:[%s7900_s9 + $0x110] sm:$0xff]  ;;  %v1875_v25 = vld [vmem:[%s7900_s9 + $0x308] sm:$0x7] }
  0x40   : > { %7024 = vmatpush1.bf16.msra.mxu1 %v7023_v17  ;;  %1232 = vmatprep.mubr.f32.mxu0 %v7575_v0  ;;  %v7068_v17 = vpack.c.bf16 %v440_v10, %v408_v9  ;;  %v1845_v27 = vld [vmem:[%s7900_s9 + $0x218] sm:$0xff]  ;;  %v1842_v31 = vld [vmem:[%s7900_s9 + $0x200] sm:$0xff]  ;;  %v1844_v34 = vld [vmem:[%s7900_s9 + $0x210] sm:$0xff] }
  0x41   : > { %1309 = vmatprep.mubr.f32.mxu1 %v7575_v0  ;;  %7017 = vmatprep.subr.msk.bf16.mxu0 %vm7634_vm2, %v7015_v20  ;;  %v7071_v20 = vpack.c.bf16 %v1811_v13, %v1779_v12  ;;  %v1877_v29 = vld [vmem:[%s7900_s9 + $0x318] sm:$0x7]  ;;  %v1874_v32 = vld [vmem:[%s7900_s9 + $0x300] sm:$0x7]  ;;  %v1876_v35 = vld [vmem:[%s7900_s9 + $0x310] sm:$0x7] }
  0x42   : > { %6683 = vmatmul.mubr.msk.f32.gmra.mrb[18].mxu0 %vm442_vm3, %v7692_v51  ;;  %7027 = vmatprep.subr.msk.bf16.mxu1 %vm7634_vm2, %v7025_v23  ;;  %v7081_v23 = vpack.c.bf16 %v1813_v16, %v1781_v15  ;;  %v1783_v37 = vld [vmem:[%s7900_s9 + $0x28] sm:$0xff]  ;;  %v1785_v40 = vld [vmem:[%s7900_s9 + $0x38] sm:$0xff]  ;;  %v1782_v43 = vld [vmem:[%s7900_s9 + $0x20] sm:$0xff] }
  0x43   : > { %6687 = vmatmul.mubr.msk.f32.gmra.mrb[18].mxu1 %vm442_vm3, %v7692_v51  ;;  %7020 = vmatpush1.bf16.msk.msra.mxu0 %vm7634_vm2, %v7018_v26  ;;  %v7073_v26 = vpack.c.bf16 %v1810_v19, %v1778_v18  ;;  %v1815_v38 = vld [vmem:[%s7900_s9 + $0x128] sm:$0xff]  ;;  %v1817_v41 = vld [vmem:[%s7900_s9 + $0x138] sm:$0xff]  ;;  %v1814_v44 = vld [vmem:[%s7900_s9 + $0x120] sm:$0xff] }
  0x44   : > { %7030 = vmatpush1.bf16.msk.msra.mxu1 %vm7634_vm2, %v7028_v30  ;;  %1380 = vmatprep.mubr.f32.mxu0 %v7575_v0  ;;  %v7083_v30 = vpack.c.bf16 %v1812_v22, %v1780_v21  ;;  %v1784_v46 = vld [vmem:[%s7900_s9 + $0x30] sm:$0xff]  ;;  %v1847_v49 = vld [vmem:[%s7900_s9 + $0x228] sm:$0xff]  ;;  %v1849_v53 = vld [vmem:[%s7900_s9 + $0x238] sm:$0xff] }
  0x45   : > { %1457 = vmatprep.mubr.f32.mxu1 %v7575_v0  ;;  %7032 = vmatprep.subr.bf16.mxu0 %v7031_v33  ;;  %v7075_v33 = vpack.c.bf16 %v1875_v25, %v1843_v24  ;;  %v1816_v47 = vld [vmem:[%s7900_s9 + $0x130] sm:$0xff]  ;;  %v1879_v50 = vld [vmem:[%s7900_s9 + $0x328] sm:$0x7]  ;;  %v1881_v54 = vld [vmem:[%s7900_s9 + $0x338] sm:$0x7] }
  0x46   : > { %6690 = vmatmul.mubr.msk.f32.vlgmr.msra.gmra.mrb[20].mxu0 %vm442_vm3, %v7663_v28  ;;  %7042 = vmatprep.subr.bf16.mxu1 %v7041_v36  ;;  %v7085_v36 = vpack.c.bf16 %v1877_v29, %v1845_v27  ;;  %v1846_v56 = vld [vmem:[%s7900_s9 + $0x220] sm:$0xff]  ;;  %v1848_v59 = vld [vmem:[%s7900_s9 + $0x230] sm:$0xff]  ;;  %v1787_v62 = vld [vmem:[%s7900_s9 + $0x48] sm:$0xff] }
  0x47   : > { %6694 = vmatmul.mubr.msk.f32.vlgmr.msra.gmra.mrb[20].mxu1 %vm442_vm3, %v7663_v28  ;;  %7034 = vmatpush1.bf16.msra.mxu0 %v7033_v39  ;;  %v7078_v39 = vpack.c.bf16 %v1874_v32, %v1842_v31  ;;  %v1878_v57 = vld [vmem:[%s7900_s9 + $0x320] sm:$0x7]  ;;  %v1880_v60 = vld [vmem:[%s7900_s9 + $0x330] sm:$0x7]  ;;  %v1819_v63 = vld [vmem:[%s7900_s9 + $0x148] sm:$0xff] }
  0x48   : > { %7044 = vmatpush1.bf16.msra.mxu1 %v7043_v42  ;;  %1386 = vmatprep.mubr.f32.mxu0 %v7575_v0  ;;  %v7088_v42 = vpack.c.bf16 %v1876_v35, %v1844_v34  ;;  %v1789_v3 = vld [vmem:[%s7900_s9 + $0x58] sm:$0xff]  ;;  %v1786_v6 = vld [vmem:[%s7900_s9 + $0x40] sm:$0xff]  ;;  %v1788_v9 = vld [vmem:[%s7900_s9 + $0x50] sm:$0xff] }
  0x49   : > { %1463 = vmatprep.mubr.f32.mxu1 %v7575_v0  ;;  %7037 = vmatprep.subr.msk.bf16.mxu0 %vm7634_vm2, %v7035_v45  ;;  %v7091_v45 = vpack.c.bf16 %v1815_v38, %v1783_v37  ;;  %v1821_v4 = vld [vmem:[%s7900_s9 + $0x158] sm:$0xff]  ;;  %v1818_v7 = vld [vmem:[%s7900_s9 + $0x140] sm:$0xff]  ;;  %v1820_v10 = vld [vmem:[%s7900_s9 + $0x150] sm:$0xff] }
  0x4a   : > { %6691 = vmatmul.mubr.msk.f32.gmra.mrb[22].mxu0 %vm442_vm3, %v7692_v51  ;;  %7047 = vmatprep.subr.msk.bf16.mxu1 %vm7634_vm2, %v7045_v48  ;;  %v7101_v48 = vpack.c.bf16 %v1817_v41, %v1785_v40  ;;  %v1851_v12 = vld [vmem:[%s7900_s9 + $0x248] sm:$0xff]  ;;  %v1853_v15 = vld [vmem:[%s7900_s9 + $0x258] sm:$0xff]  ;;  %v1850_v18 = vld [vmem:[%s7900_s9 + $0x240] sm:$0xff] }
  0x4b   : > { %6695 = vmatmul.mubr.msk.f32.gmra.mrb[22].mxu1 %vm442_vm3, %v7692_v51  ;;  %7040 = vmatpush1.bf16.msk.msra.mxu0 %vm7634_vm2, %v7038_v52  ;;  %v7093_v52 = vpack.c.bf16 %v1814_v44, %v1782_v43  ;;  %v1883_v13 = vld [vmem:[%s7900_s9 + $0x348] sm:$0x7]  ;;  %v1885_v16 = vld [vmem:[%s7900_s9 + $0x358] sm:$0x7]  ;;  %v1882_v19 = vld [vmem:[%s7900_s9 + $0x340] sm:$0x7] }
  0x4c   : > { %7050 = vmatpush1.bf16.msk.msra.mxu1 %vm7634_vm2, %v7048_v55  ;;  %1534 = vmatprep.mubr.f32.mxu0 %v7575_v0  ;;  %v7103_v55 = vpack.c.bf16 %v1816_v47, %v1784_v46  ;;  %v1852_v21 = vld [vmem:[%s7900_s9 + $0x250] sm:$0xff]  ;;  %v1791_v24 = vld [vmem:[%s7900_s9 + $0x68] sm:$0xff]  ;;  %v1793_v27 = vld [vmem:[%s7900_s9 + $0x78] sm:$0xff] }
  0x4d   : > { %1611 = vmatprep.mubr.f32.mxu1 %v7575_v0  ;;  %7052 = vmatprep.subr.bf16.mxu0 %v7051_v58  ;;  %v7095_v58 = vpack.c.bf16 %v1879_v50, %v1847_v49  ;;  %v1884_v22 = vld [vmem:[%s7900_s9 + $0x350] sm:$0x7]  ;;  %v1823_v25 = vld [vmem:[%s7900_s9 + $0x168] sm:$0xff]  ;;  %v1825_v29 = vld [vmem:[%s7900_s9 + $0x178] sm:$0xff] }
  0x4e   : > { %6698 = vmatmul.mubr.msk.f32.vlgmr.msra.gmra.mrb[24].mxu0 %vm442_vm3, %v7663_v28  ;;  %7062 = vmatprep.subr.bf16.mxu1 %v7061_v61  ;;  %v7105_v61 = vpack.c.bf16 %v1881_v54, %v1849_v53  ;;  %v1790_v31 = vld [vmem:[%s7900_s9 + $0x60] sm:$0xff]  ;;  %v1792_v34 = vld [vmem:[%s7900_s9 + $0x70] sm:$0xff]  ;;  %v1855_v37 = vld [vmem:[%s7900_s9 + $0x268] sm:$0xff] }
  0x4f   : > { %6702 = vmatmul.mubr.msk.f32.vlgmr.msra.gmra.mrb[24].mxu1 %vm442_vm3, %v7663_v28  ;;  %7054 = vmatpush1.bf16.msra.mxu0 %v7053_v2  ;;  %v7098_v2 = vpack.c.bf16 %v1878_v57, %v1846_v56  ;;  %v1822_v32 = vld [vmem:[%s7900_s9 + $0x160] sm:$0xff]  ;;  %v1824_v35 = vld [vmem:[%s7900_s9 + $0x170] sm:$0xff]  ;;  %v1887_v38 = vld [vmem:[%s7900_s9 + $0x368] sm:$0x7] }
  0x50   : > { %7064 = vmatpush1.bf16.msra.mxu1 %v7063_v5  ;;  %1540 = vmatprep.mubr.f32.mxu0 %v7575_v0  ;;  %v7108_v5 = vpack.c.bf16 %v1880_v60, %v1848_v59  ;;  %v1857_v40 = vld [vmem:[%s7900_s9 + $0x278] sm:$0xff]  ;;  %v1854_v43 = vld [vmem:[%s7900_s9 + $0x260] sm:$0xff]  ;;  %v1856_v46 = vld [vmem:[%s7900_s9 + $0x270] sm:$0xff] }
  0x51   : > { %1617 = vmatprep.mubr.f32.mxu1 %v7575_v0  ;;  %7057 = vmatprep.subr.msk.bf16.mxu0 %vm7634_vm2, %v7055_v8  ;;  %v7111_v8 = vpack.c.bf16 %v1819_v63, %v1787_v62  ;;  %v1889_v41 = vld [vmem:[%s7900_s9 + $0x378] sm:$0x7]  ;;  %v1886_v44 = vld [vmem:[%s7900_s9 + $0x360] sm:$0x7]  ;;  %v1888_v47 = vld [vmem:[%s7900_s9 + $0x370] sm:$0x7] }
  0x52   : > { %6699 = vmatmul.mubr.msk.f32.gmra.mrb[26].mxu0 %vm442_vm3, %v7692_v51  ;;  %7067 = vmatprep.subr.msk.bf16.mxu1 %vm7634_vm2, %v7065_v11  ;;  %v7121_v11 = vpack.c.bf16 %v1821_v4, %v1789_v3  ;;  %v1795_v49 = vld [vmem:[%s7900_s9 + $0x88] sm:$0xff]  ;;  %v1797_v53 = vld [vmem:[%s7900_s9 + $0x98] sm:$0xff]  ;;  %v1794_v56 = vld [vmem:[%s7900_s9 + $0x80] sm:$0xff] }
  0x53   : > { %6703 = vmatmul.mubr.msk.f32.gmra.mrb[26].mxu1 %vm442_vm3, %v7692_v51  ;;  %7060 = vmatpush1.bf16.msk.msra.mxu0 %vm7634_vm2, %v7058_v14  ;;  %v7113_v14 = vpack.c.bf16 %v1818_v7, %v1786_v6  ;;  %v1827_v50 = vld [vmem:[%s7900_s9 + $0x188] sm:$0xff]  ;;  %v1829_v54 = vld [vmem:[%s7900_s9 + $0x198] sm:$0xff]  ;;  %v1826_v57 = vld [vmem:[%s7900_s9 + $0x180] sm:$0xff] }
  0x54   : > { %7070 = vmatpush1.bf16.msk.msra.mxu1 %vm7634_vm2, %v7068_v17  ;;  %1688 = vmatprep.mubr.f32.mxu0 %v7575_v0  ;;  %v7123_v17 = vpack.c.bf16 %v1820_v10, %v1788_v9  ;;  %v1796_v59 = vld [vmem:[%s7900_s9 + $0x90] sm:$0xff]  ;;  %v1859_v62 = vld [vmem:[%s7900_s9 + $0x288] sm:$0xff]  ;;  %v1861_v3 = vld [vmem:[%s7900_s9 + $0x298] sm:$0xff] }
  0x55   : > { %1765 = vmatprep.mubr.f32.mxu1 %v7575_v0  ;;  %7072 = vmatprep.subr.bf16.mxu0 %v7071_v20  ;;  %v7115_v20 = vpack.c.bf16 %v1883_v13, %v1851_v12  ;;  %v1828_v60 = vld [vmem:[%s7900_s9 + $0x190] sm:$0xff]  ;;  %v1891_v63 = vld [vmem:[%s7900_s9 + $0x388] sm:$0x7]  ;;  %v1893_v4 = vld [vmem:[%s7900_s9 + $0x398] sm:$0x7] }
  0x56   : > { %6706 = vmatmul.mubr.msk.f32.vlgmr.msra.gmra.mrb[28].mxu0 %vm442_vm3, %v7663_v28  ;;  %7082 = vmatprep.subr.bf16.mxu1 %v7081_v23  ;;  %v7125_v23 = vpack.c.bf16 %v1885_v16, %v1853_v15  ;;  %v1858_v6 = vld [vmem:[%s7900_s9 + $0x280] sm:$0xff]  ;;  %v1860_v9 = vld [vmem:[%s7900_s9 + $0x290] sm:$0xff]  ;;  %v1799_v12 = vld [vmem:[%s7900_s9 + $0xa8] sm:$0xff] }
  0x57   : > { %6710 = vmatmul.mubr.msk.f32.vlgmr.msra.gmra.mrb[28].mxu1 %vm442_vm3, %v7663_v28  ;;  %7074 = vmatpush1.bf16.msra.mxu0 %v7073_v26  ;;  %v7118_v26 = vpack.c.bf16 %v1882_v19, %v1850_v18  ;;  %v1890_v7 = vld [vmem:[%s7900_s9 + $0x380] sm:$0x7]  ;;  %v1892_v10 = vld [vmem:[%s7900_s9 + $0x390] sm:$0x7]  ;;  %v1831_v13 = vld [vmem:[%s7900_s9 + $0x1a8] sm:$0xff] }
  0x58   : > { %7084 = vmatpush1.bf16.msra.mxu1 %v7083_v30  ;;  %1694 = vmatprep.mubr.f32.mxu0 %v7575_v0  ;;  %v7128_v30 = vpack.c.bf16 %v1884_v22, %v1852_v21  ;;  %v1801_v15 = vld [vmem:[%s7900_s9 + $0xb8] sm:$0xff]  ;;  %v1798_v18 = vld [vmem:[%s7900_s9 + $0xa0] sm:$0xff]  ;;  %v1800_v21 = vld [vmem:[%s7900_s9 + $0xb0] sm:$0xff] }
  0x59   : > { %1771 = vmatprep.mubr.f32.mxu1 %v7575_v0  ;;  %7077 = vmatprep.subr.msk.bf16.mxu0 %vm7634_vm2, %v7075_v33  ;;  %v7131_v33 = vpack.c.bf16 %v1823_v25, %v1791_v24  ;;  %v1833_v16 = vld [vmem:[%s7900_s9 + $0x1b8] sm:$0xff]  ;;  %v1830_v19 = vld [vmem:[%s7900_s9 + $0x1a0] sm:$0xff]  ;;  %v1832_v22 = vld [vmem:[%s7900_s9 + $0x1b0] sm:$0xff] }
  0x5a   : > { %6707 = vmatmul.mubr.msk.f32.gmra.mrb[30].mxu0 %vm442_vm3, %v7692_v51  ;;  %7087 = vmatprep.subr.msk.bf16.mxu1 %vm7634_vm2, %v7085_v36  ;;  %v7141_v36 = vpack.c.bf16 %v1825_v29, %v1793_v27  ;;  %v1863_v24 = vld [vmem:[%s7900_s9 + $0x2a8] sm:$0xff]  ;;  %v1865_v27 = vld [vmem:[%s7900_s9 + $0x2b8] sm:$0xff] }
  0x5b   : > { %6711 = vmatmul.mubr.msk.f32.gmra.mrb[30].mxu1 %vm442_vm3, %v7692_v51  ;;  %7080 = vmatpush1.bf16.msk.msra.mxu0 %vm7634_vm2, %v7078_v39  ;;  %v7133_v39 = vpack.c.bf16 %v1822_v32, %v1790_v31  ;;  %v1895_v25 = vld [vmem:[%s7900_s9 + $0x3a8] sm:$0x7]  ;;  %v1897_v29 = vld [vmem:[%s7900_s9 + $0x3b8] sm:$0x7]  ;;  %v1862_v31 = vld [vmem:[%s7900_s9 + $0x2a0] sm:$0xff] }
  0x5c   : > { %7090 = vmatpush1.bf16.msk.msra.mxu1 %vm7634_vm2, %v7088_v42  ;;  %2066 = vmatprep.mubr.f32.mxu0 %v7575_v0  ;;  %v7143_v42 = vpack.c.bf16 %v1824_v35, %v1792_v34  ;;  %v1894_v32 = vld [vmem:[%s7900_s9 + $0x3a0] sm:$0x7]  ;;  %v1864_v34 = vld [vmem:[%s7900_s9 + $0x2b0] sm:$0xff] }
  0x5d   : > { %2143 = vmatprep.mubr.f32.mxu1 %v7575_v0  ;;  %7092 = vmatprep.subr.bf16.mxu0 %v7091_v45  ;;  %v7135_v45 = vpack.c.bf16 %v1887_v38, %v1855_v37  ;;  %v1896_v35 = vld [vmem:[%s7900_s9 + $0x3b0] sm:$0x7]  ;;  %v1803_v37 = vld [vmem:[%s7900_s9 + $0xc8] sm:$0xff] }
  0x5e   : > { %6714 = vmatmul.mubr.msk.f32.vlgmr.msra.gmra.mrb[32].mxu0 %vm442_vm3, %v7663_v28  ;;  %7102 = vmatprep.subr.bf16.mxu1 %v7101_v48  ;;  %v7145_v48 = vpack.c.bf16 %v1889_v41, %v1857_v40  ;;  %v1835_v38 = vld [vmem:[%s7900_s9 + $0x1c8] sm:$0xff]  ;;  %v1805_v40 = vld [vmem:[%s7900_s9 + $0xd8] sm:$0xff] }
  0x5f   : > { %6718 = vmatmul.mubr.msk.f32.vlgmr.msra.gmra.mrb[32].mxu1 %vm442_vm3, %v7663_v28  ;;  %7094 = vmatpush1.bf16.msra.mxu0 %v7093_v52  ;;  %v7138_v52 = vpack.c.bf16 %v1886_v44, %v1854_v43  ;;  %v1837_v41 = vld [vmem:[%s7900_s9 + $0x1d8] sm:$0xff]  ;;  %v1802_v43 = vld [vmem:[%s7900_s9 + $0xc0] sm:$0xff] }
  0x60   : > { %7104 = vmatpush1.bf16.msra.mxu1 %v7103_v55  ;;  %2072 = vmatprep.mubr.f32.mxu0 %v7575_v0  ;;  %v7148_v55 = vpack.c.bf16 %v1888_v47, %v1856_v46  ;;  %v1834_v44 = vld [vmem:[%s7900_s9 + $0x1c0] sm:$0xff]  ;;  %v1836_v46 = vld [vmem:[%s7900_s9 + $0x1d0] sm:$0xff]  ;;  %v7201_v47 = vpack.c.bf16 %v1837_v41, %v1805_v40  ;;  %v3365_v40 = vld [vmem:[%s8204_s16 + $0x218] sm:$0xff] }
  0x61   : > { %2149 = vmatprep.mubr.f32.mxu1 %v7575_v0  ;;  %7097 = vmatprep.subr.msk.bf16.mxu0 %vm7634_vm2, %v7095_v58  ;;  %v7151_v58 = vpack.c.bf16 %v1827_v50, %v1795_v49  ;;  %v1899_v49 = vld [vmem:[%s7900_s9 + $0x3c8] sm:$0x7]  ;;  %v7193_v50 = vpack.c.bf16 %v1834_v44, %v1802_v43  ;;  %v3397_v41 = vld [vmem:[%s8204_s16 + $0x318] sm:$0x7]  ;;  %v3362_v43 = vld [vmem:[%s8204_s16 + $0x200] sm:$0xff] }
  0x62   : > { %6715 = vmatmul.mubr.msk.f32.gmra.mrb[34].mxu0 %vm442_vm3, %v7692_v51  ;;  %7107 = vmatprep.subr.msk.bf16.mxu1 %vm7634_vm2, %v7105_v61  ;;  %v7161_v61 = vpack.c.bf16 %v1829_v54, %v1797_v53  ;;  %v1901_v53 = vld [vmem:[%s7900_s9 + $0x3d8] sm:$0x7]  ;;  %v3394_v44 = vld [vmem:[%s8204_s16 + $0x300] sm:$0x7] }
  0x63   : > { %6719 = vmatmul.mubr.msk.f32.gmra.mrb[34].mxu1 %vm442_vm3, %v7692_v51  ;;  %7100 = vmatpush1.bf16.msk.msra.mxu0 %vm7634_vm2, %v7098_v2  ;;  %v7153_v2 = vpack.c.bf16 %v1826_v57, %v1794_v56  ;;  %v1898_v56 = vld [vmem:[%s7900_s9 + $0x3c0] sm:$0x7]  ;;  %v1868_v57 = vld [vmem:[%s7900_s9 + $0x2d0] sm:$0xff] }
  0x64   : > { %7110 = vmatpush1.bf16.msk.msra.mxu1 %vm7634_vm2, %v7108_v5  ;;  %2220 = vmatprep.mubr.f32.mxu0 %v7575_v0  ;;  %v7163_v5 = vpack.c.bf16 %v1828_v60, %v1796_v59  ;;  %v8165_v59 = vld [vmem:[%s9755_s4] sm:$0xff] }
  0x65   : > { %2297 = vmatprep.mubr.f32.mxu1 %v7575_v0  ;;  %7112 = vmatprep.subr.bf16.mxu0 %v7111_v8  ;;  %v7155_v8 = vpack.c.bf16 %v1891_v63, %v1859_v62  ;;  %v1839_v62 = vld [vmem:[%s7900_s9 + $0x1e8] sm:$0xff] }
  0x66   : > { %6722 = vmatmul.mubr.msk.f32.vlgmr.msra.gmra.mrb[36].mxu0 %vm442_vm3, %v7663_v28  ;;  %7122 = vmatprep.subr.bf16.mxu1 %v7121_v11  ;;  %v7165_v11 = vpack.c.bf16 %v1893_v4, %v1861_v3  ;;  %v1841_v3 = vld [vmem:[%s7900_s9 + $0x1f8] sm:$0xff] }
  0x67   : > { %6726 = vmatmul.mubr.msk.f32.vlgmr.msra.gmra.mrb[36].mxu1 %vm442_vm3, %v7663_v28  ;;  %7114 = vmatpush1.bf16.msra.mxu0 %v7113_v14  ;;  %v7158_v14 = vpack.c.bf16 %v1890_v7, %v1858_v6  ;;  %v1838_v6 = vld [vmem:[%s7900_s9 + $0x1e0] sm:$0xff] }
  0x68   : > { %7124 = vmatpush1.bf16.msra.mxu1 %v7123_v17  ;;  %2226 = vmatprep.mubr.f32.mxu0 %v7575_v0  ;;  %v7168_v17 = vpack.c.bf16 %v1892_v10, %v1860_v9  ;;  %v1840_v9 = vld [vmem:[%s7900_s9 + $0x1f0] sm:$0xff]  ;;  %v8186_v10 = vld [vmem:[%s9755_s4 + $0x8] sm:$0xff] }
  0x69   : > { %2303 = vmatprep.mubr.f32.mxu1 %v7575_v0  ;;  %7117 = vmatprep.subr.msk.bf16.mxu0 %vm7634_vm2, %v7115_v20  ;;  %v7171_v20 = vpack.c.bf16 %v1831_v13, %v1799_v12  ;;  %v1871_v12 = vld [vmem:[%s7900_s9 + $0x2e8] sm:$0xff] }
  0x6a   : > { %6723 = vmatmul.mubr.msk.f32.gmra.mrb[38].mxu0 %vm442_vm3, %v7692_v51  ;;  %7127 = vmatprep.subr.msk.bf16.mxu1 %vm7634_vm2, %v7125_v23  ;;  %v7181_v23 = vpack.c.bf16 %v1833_v16, %v1801_v15  ;;  %v1903_v13 = vld [vmem:[%s7900_s9 + $0x3e8] sm:$0x7]  ;;  %v1873_v15 = vld [vmem:[%s7900_s9 + $0x2f8] sm:$0xff] }
  0x6b   : > { %6727 = vmatmul.mubr.msk.f32.gmra.mrb[38].mxu1 %vm442_vm3, %v7692_v51  ;;  %7120 = vmatpush1.bf16.msk.msra.mxu0 %vm7634_vm2, %v7118_v26  ;;  %v7173_v26 = vpack.c.bf16 %v1830_v19, %v1798_v18  ;;  %v1905_v16 = vld [vmem:[%s7900_s9 + $0x3f8] sm:$0x7]  ;;  %v1870_v18 = vld [vmem:[%s7900_s9 + $0x2e0] sm:$0xff] }
  0x6c   : > { %7130 = vmatpush1.bf16.msk.msra.mxu1 %vm7634_vm2, %v7128_v30  ;;  %2374 = vmatprep.mubr.f32.mxu0 %v7575_v0  ;;  %v7183_v30 = vpack.c.bf16 %v1832_v22, %v1800_v21  ;;  %v1902_v19 = vld [vmem:[%s7900_s9 + $0x3e0] sm:$0x7]  ;;  %v1872_v21 = vld [vmem:[%s7900_s9 + $0x2f0] sm:$0xff] }
  0x6d   : > { %2451 = vmatprep.mubr.f32.mxu1 %v7575_v0  ;;  %7132 = vmatprep.subr.bf16.mxu0 %v7131_v33  ;;  %v7175_v33 = vpack.c.bf16 %v1895_v25, %v1863_v24  ;;  %v1904_v22 = vld [vmem:[%s7900_s9 + $0x3f0] sm:$0x7]  ;;  %v3299_v24 = vld [vmem:[%s8204_s16 + $0x8] sm:$0xff] }
  0x6e   : > { %6730 = vmatmul.mubr.msk.f32.vlgmr.msra.gmra.mrb[40].mxu0 %vm442_vm3, %v7663_v28  ;;  %7142 = vmatprep.subr.bf16.mxu1 %v7141_v36  ;;  %v7185_v36 = vpack.c.bf16 %v1897_v29, %v1865_v27  ;;  %v3331_v25 = vld [vmem:[%s8204_s16 + $0x108] sm:$0xff]  ;;  %v3301_v27 = vld [vmem:[%s8204_s16 + $0x18] sm:$0xff] }
  0x6f   : > { %6734 = vmatmul.mubr.msk.f32.vlgmr.msra.gmra.mrb[40].mxu1 %vm442_vm3, %v7663_v28  ;;  %7134 = vmatpush1.bf16.msra.mxu0 %v7133_v39  ;;  %v7178_v39 = vpack.c.bf16 %v1894_v32, %v1862_v31  ;;  %v3333_v29 = vld [vmem:[%s8204_s16 + $0x118] sm:$0xff]  ;;  %v3298_v31 = vld [vmem:[%s8204_s16] sm:$0xff] }
  0x70   : > { %7144 = vmatpush1.bf16.msra.mxu1 %v7143_v42  ;;  %2380 = vmatprep.mubr.f32.mxu0 %v7575_v0  ;;  %v7188_v42 = vpack.c.bf16 %v1896_v35, %v1864_v34  ;;  %v3330_v32 = vld [vmem:[%s8204_s16 + $0x100] sm:$0xff]  ;;  %v3300_v34 = vld [vmem:[%s8204_s16 + $0x10] sm:$0xff] }
  0x71   : > { %2457 = vmatprep.mubr.f32.mxu1 %v7575_v0  ;;  %7137 = vmatprep.subr.msk.bf16.mxu0 %vm7634_vm2, %v7135_v45  ;;  %v1804_v45 = vld [vmem:[%s7900_s9 + $0xd0] sm:$0xff] }
  0x72   : > { %6731 = vmatmul.mubr.msk.f32.gmra.mrb[42].mxu0 %vm442_vm3, %v7692_v51  ;;  %7147 = vmatprep.subr.msk.bf16.mxu1 %vm7634_vm2, %v7145_v48  ;;  %v1867_v48 = vld [vmem:[%s7900_s9 + $0x2c8] sm:$0xff]  ;;  %v7203_v54 = vpack.c.bf16 %v1836_v46, %v1804_v45  ;;  %v3332_v35 = vld [vmem:[%s8204_s16 + $0x110] sm:$0xff] }
  0x73   : > { %6735 = vmatmul.mubr.msk.f32.gmra.mrb[42].mxu1 %vm442_vm3, %v7692_v51  ;;  %7140 = vmatpush1.bf16.msk.msra.mxu0 %vm7634_vm2, %v7138_v52  ;;  %v1869_v52 = vld [vmem:[%s7900_s9 + $0x2d8] sm:$0xff]  ;;  %v3364_v45 = vld [vmem:[%s8204_s16 + $0x210] sm:$0xff] }
  0x74   : > { %7150 = vmatpush1.bf16.msk.msra.mxu1 %vm7634_vm2, %v7148_v55  ;;  %2528 = vmatprep.mubr.f32.mxu0 %v7575_v0  ;;  %v1866_v55 = vld [vmem:[%s7900_s9 + $0x2c0] sm:$0xff]  ;;  %v7205_v60 = vpack.c.bf16 %v1901_v53, %v1869_v52  ;;  %v3396_v46 = vld [vmem:[%s8204_s16 + $0x310] sm:$0x7]  ;;  %v3305_v52 = vld [vmem:[%s8204_s16 + $0x38] sm:$0xff] }
  0x75   : > { %2605 = vmatprep.mubr.f32.mxu1 %v7575_v0  ;;  %7152 = vmatprep.subr.bf16.mxu0 %v7151_v58  ;;  %v1900_v58 = vld [vmem:[%s7900_s9 + $0x3d0] sm:$0x7]  ;;  %v7198_v63 = vpack.c.bf16 %v1898_v56, %v1866_v55  ;;  %v3337_v53 = vld [vmem:[%s8204_s16 + $0x138] sm:$0xff]  ;;  %v3302_v55 = vld [vmem:[%s8204_s16 + $0x20] sm:$0xff] }
  0x76   : > { %6738 = vmatmul.mubr.msk.f32.vlgmr.msra.gmra.mrb[44].mxu0 %vm442_vm3, %v7663_v28  ;;  %7162 = vmatprep.subr.bf16.mxu1 %v7161_v61  ;;  %v1807_v61 = vld [vmem:[%s7900_s9 + $0xe8] sm:$0xff]  ;;  %v7208_v4 = vpack.c.bf16 %v1900_v58, %v1868_v57  ;;  %v3334_v56 = vld [vmem:[%s8204_s16 + $0x120] sm:$0xff]  ;;  %v3304_v57 = vld [vmem:[%s8204_s16 + $0x30] sm:$0xff] }
  0x77   : > { %6742 = vmatmul.mubr.msk.f32.vlgmr.msra.gmra.mrb[44].mxu1 %vm442_vm3, %v7663_v28  ;;  %7154 = vmatpush1.bf16.msra.mxu0 %v7153_v2  ;;  %v1809_v2 = vld [vmem:[%s7900_s9 + $0xf8] sm:$0xff]  ;;  %v7211_v7 = vpack.c.bf16 %v1839_v62, %v1807_v61  ;;  %v3336_v58 = vld [vmem:[%s8204_s16 + $0x130] sm:$0xff]  ;;  %v3367_v61 = vld [vmem:[%s8204_s16 + $0x228] sm:$0xff] }
  0x78   : > { %7164 = vmatpush1.bf16.msra.mxu1 %v7163_v5  ;;  %2534 = vmatprep.mubr.f32.mxu0 %v7575_v0  ;;  %v1806_v5 = vld [vmem:[%s7900_s9 + $0xe0] sm:$0xff]  ;;  %v3399_v62 = vld [vmem:[%s8204_s16 + $0x328] sm:$0x7] }
  0x79   : > { %2611 = vmatprep.mubr.f32.mxu1 %v7575_v0  ;;  %7157 = vmatprep.subr.msk.bf16.mxu0 %vm7634_vm2, %v7155_v8  ;;  %v1808_v8 = vld [vmem:[%s7900_s9 + $0xf0] sm:$0xff]  ;;  %s9557_s9 = scalar_lea.vmem %s9757_s6, %s6910_s30 }
  0x7a   : > { %6739 = vmatmul.mubr.msk.f32.gmra.mrb[46].mxu0 %vm442_vm3, %v7692_v51  ;;  %7167 = vmatprep.subr.msk.bf16.mxu1 %vm7634_vm2, %v7165_v11  ;;  %v7221_v11 = vpack.c.bf16 %v1841_v3, %v1809_v2  ;;  %v3369_v2 = vld [vmem:[%s8204_s16 + $0x238] sm:$0xff] }
  0x7b   : > { %6743 = vmatmul.mubr.msk.f32.gmra.mrb[46].mxu1 %vm442_vm3, %v7692_v51  ;;  %7160 = vmatpush1.bf16.msk.msra.mxu0 %vm7634_vm2, %v7158_v14  ;;  %v7213_v14 = vpack.c.bf16 %v1838_v6, %v1806_v5  ;;  %v3401_v3 = vld [vmem:[%s8204_s16 + $0x338] sm:$0x7]  ;;  %v3366_v5 = vld [vmem:[%s8204_s16 + $0x220] sm:$0xff] }
  0x7c   : > { %7170 = vmatpush1.bf16.msk.msra.mxu1 %vm7634_vm2, %v7168_v17  ;;  %2682 = vmatprep.mubr.f32.mxu0 %v7575_v0  ;;  %v7223_v17 = vpack.c.bf16 %v1840_v9, %v1808_v8  ;;  %v3398_v6 = vld [vmem:[%s8204_s16 + $0x320] sm:$0x7]  ;;  %v3368_v8 = vld [vmem:[%s8204_s16 + $0x230] sm:$0xff] }
  0x7d   : > { %2759 = vmatprep.mubr.f32.mxu1 %v7575_v0  ;;  %7172 = vmatprep.subr.bf16.mxu0 %v7171_v20  ;;  %v7215_v20 = vpack.c.bf16 %v1903_v13, %v1871_v12  ;;  %v3400_v9 = vld [vmem:[%s8204_s16 + $0x330] sm:$0x7]  ;;  %v3307_v12 = vld [vmem:[%s8204_s16 + $0x48] sm:$0xff] }
  0x7e   : > { %6746 = vmatmul.mubr.msk.f32.vlgmr.msra.gmra.mrb[48].mxu0 %vm442_vm3, %v7663_v28  ;;  %7182 = vmatprep.subr.bf16.mxu1 %v7181_v23  ;;  %v7225_v23 = vpack.c.bf16 %v1905_v16, %v1873_v15  ;;  %v3339_v13 = vld [vmem:[%s8204_s16 + $0x148] sm:$0xff]  ;;  %v3309_v15 = vld [vmem:[%s8204_s16 + $0x58] sm:$0xff] }
  0x7f   : > { %6750 = vmatmul.mubr.msk.f32.vlgmr.msra.gmra.mrb[48].mxu1 %vm442_vm3, %v7663_v28  ;;  %7174 = vmatpush1.bf16.msra.mxu0 %v7173_v26  ;;  %v7191_v28 = vpack.c.bf16 %v1835_v38, %v1803_v37  ;;  %v7218_v26 = vpack.c.bf16 %v1902_v19, %v1870_v18  ;;  %v3363_v37 = vld [vmem:[%s8204_s16 + $0x208] sm:$0xff]  ;;  %v3341_v16 = vld [vmem:[%s8204_s16 + $0x158] sm:$0xff]  ;;  %v3306_v18 = vld [vmem:[%s8204_s16 + $0x40] sm:$0xff] }
  0x80   : > { %7184 = vmatpush1.bf16.msra.mxu1 %v7183_v30  ;;  %2688 = vmatprep.mubr.f32.mxu0 %v7575_v0  ;;  %v7228_v30 = vpack.c.bf16 %v1904_v22, %v1872_v21  ;;  %v3395_v38 = vld [vmem:[%s8204_s16 + $0x308] sm:$0x7]  ;;  %v3338_v19 = vld [vmem:[%s8204_s16 + $0x140] sm:$0xff]  ;;  %v3308_v21 = vld [vmem:[%s8204_s16 + $0x50] sm:$0xff] }
  0x81   : > { %2765 = vmatprep.mubr.f32.mxu1 %v7575_v0  ;;  %7177 = vmatprep.subr.msk.bf16.mxu0 %vm7634_vm2, %v7175_v33  ;;  %v7231_v33 = vpack.c.bf16 %v3331_v25, %v3299_v24  ;;  %v3340_v22 = vld [vmem:[%s8204_s16 + $0x150] sm:$0xff]  ;;  %v3371_v24 = vld [vmem:[%s8204_s16 + $0x248] sm:$0xff] }
  0x82   : > { %6747 = vmatmul.mubr.msk.f32.gmra.mrb[50].mxu0 %vm442_vm3, %v7692_v51  ;;  %7187 = vmatprep.subr.msk.bf16.mxu1 %vm7634_vm2, %v7185_v36  ;;  %v7241_v36 = vpack.c.bf16 %v3333_v29, %v3301_v27  ;;  %v3403_v25 = vld [vmem:[%s8204_s16 + $0x348] sm:$0x7]  ;;  %v3373_v27 = vld [vmem:[%s8204_s16 + $0x258] sm:$0xff] }
  0x83   : > { %6751 = vmatmul.mubr.msk.f32.gmra.mrb[50].mxu1 %vm442_vm3, %v7692_v51  ;;  %7180 = vmatpush1.bf16.msk.msra.mxu0 %vm7634_vm2, %v7178_v39  ;;  %v7195_v51 = vpack.c.bf16 %v1899_v49, %v1867_v48  ;;  %v7233_v39 = vpack.c.bf16 %v3330_v32, %v3298_v31  ;;  %v3303_v48 = vld [vmem:[%s8204_s16 + $0x28] sm:$0xff]  ;;  %v3405_v29 = vld [vmem:[%s8204_s16 + $0x358] sm:$0x7]  ;;  %v3370_v31 = vld [vmem:[%s8204_s16 + $0x240] sm:$0xff] }
  0x84   : > { %7190 = vmatpush1.bf16.msk.msra.mxu1 %vm7634_vm2, %v7188_v42  ;;  %2836 = vmatprep.mubr.f32.mxu0 %v7575_v0  ;;  %v7243_v42 = vpack.c.bf16 %v3332_v35, %v3300_v34  ;;  %v3335_v49 = vld [vmem:[%s8204_s16 + $0x128] sm:$0xff]  ;;  %v3402_v32 = vld [vmem:[%s8204_s16 + $0x340] sm:$0x7]  ;;  %v3372_v34 = vld [vmem:[%s8204_s16 + $0x250] sm:$0xff] }
  0x85   : > { %2913 = vmatprep.mubr.f32.mxu1 %v7575_v0  ;;  %7192 = vmatprep.subr.bf16.mxu0 %v7191_v28  ;;  %v7235_v28 = vpack.c.bf16 %v3395_v38, %v3363_v37  ;;  %v3404_v35 = vld [vmem:[%s8204_s16 + $0x350] sm:$0x7]  ;;  %v3311_v37 = vld [vmem:[%s8204_s16 + $0x68] sm:$0xff] }
  0x86   : > { %6754 = vmatmul.mubr.msk.f32.vlgmr.msra.gmra.mrb[52].mxu0 %vm442_vm3, %v8165_v59  ;;  %7202 = vmatprep.subr.bf16.mxu1 %v7201_v47  ;;  %v7245_v47 = vpack.c.bf16 %v3397_v41, %v3365_v40  ;;  %v3343_v38 = vld [vmem:[%s8204_s16 + $0x168] sm:$0xff]  ;;  %v3313_v40 = vld [vmem:[%s8204_s16 + $0x78] sm:$0xff] }
  0x87   : > { %6758 = vmatmul.mubr.msk.f32.vlgmr.msra.gmra.mrb[52].mxu1 %vm442_vm3, %v8165_v59  ;;  %7194 = vmatpush1.bf16.msra.mxu0 %v7193_v50  ;;  %v7238_v50 = vpack.c.bf16 %v3394_v44, %v3362_v43  ;;  %v3345_v41 = vld [vmem:[%s8204_s16 + $0x178] sm:$0xff]  ;;  %v3310_v43 = vld [vmem:[%s8204_s16 + $0x60] sm:$0xff] }
  0x88   : > { %7204 = vmatpush1.bf16.msra.mxu1 %v7203_v54  ;;  %2842 = vmatprep.mubr.f32.mxu0 %v7575_v0  ;;  %v7248_v54 = vpack.c.bf16 %v3396_v46, %v3364_v45  ;;  %v3342_v44 = vld [vmem:[%s8204_s16 + $0x160] sm:$0xff]  ;;  %v3312_v45 = vld [vmem:[%s8204_s16 + $0x70] sm:$0xff] }
  0x89   : > { %2919 = vmatprep.mubr.f32.mxu1 %v7575_v0  ;;  %7197 = vmatprep.subr.msk.bf16.mxu0 %vm7634_vm2, %v7195_v51  ;;  %v7251_v51 = vpack.c.bf16 %v3335_v49, %v3303_v48  ;;  %v3344_v46 = vld [vmem:[%s8204_s16 + $0x170] sm:$0xff]  ;;  %v3375_v48 = vld [vmem:[%s8204_s16 + $0x268] sm:$0xff] }
  0x8a   : > { %6755 = vmatmul.mubr.msk.f32.gmra.mrb[54].mxu0 %vm442_vm3, %v8186_v10  ;;  %7207 = vmatprep.subr.msk.bf16.mxu1 %vm7634_vm2, %v7205_v60  ;;  %v7261_v60 = vpack.c.bf16 %v3337_v53, %v3305_v52  ;;  %v3407_v49 = vld [vmem:[%s8204_s16 + $0x368] sm:$0x7]  ;;  %v3377_v52 = vld [vmem:[%s8204_s16 + $0x278] sm:$0xff] }
  0x8b   : > { %6759 = vmatmul.mubr.msk.f32.gmra.mrb[54].mxu1 %vm442_vm3, %v8186_v10  ;;  %7200 = vmatpush1.bf16.msk.msra.mxu0 %vm7634_vm2, %v7198_v63  ;;  %v7253_v63 = vpack.c.bf16 %v3334_v56, %v3302_v55  ;;  %v3409_v53 = vld [vmem:[%s8204_s16 + $0x378] sm:$0x7]  ;;  %v3374_v55 = vld [vmem:[%s8204_s16 + $0x260] sm:$0xff] }
  0x8c   : > { %7210 = vmatpush1.bf16.msk.msra.mxu1 %vm7634_vm2, %v7208_v4  ;;  %2990 = vmatprep.mubr.f32.mxu0 %v7575_v0  ;;  %v7263_v4 = vpack.c.bf16 %v3336_v58, %v3304_v57  ;;  %v3406_v56 = vld [vmem:[%s8204_s16 + $0x360] sm:$0x7]  ;;  %v3376_v57 = vld [vmem:[%s8204_s16 + $0x270] sm:$0xff] }
  0x8d   : > { %3067 = vmatprep.mubr.f32.mxu1 %v7575_v0  ;;  %7212 = vmatprep.subr.bf16.mxu0 %v7211_v7  ;;  %v7255_v7 = vpack.c.bf16 %v3399_v62, %v3367_v61  ;;  %v3408_v58 = vld [vmem:[%s8204_s16 + $0x370] sm:$0x7]  ;;  %v3315_v61 = vld [vmem:[%s8204_s16 + $0x88] sm:$0xff] }
  0x8e   : > { %6762 = vmatmul.mubr.msk.f32.vlgmr.msra.gmra.mrb[56].mxu0 %vm442_vm3, %v8165_v59  ;;  %7222 = vmatprep.subr.bf16.mxu1 %v7221_v11  ;;  %v7265_v11 = vpack.c.bf16 %v3401_v3, %v3369_v2  ;;  %v3347_v62 = vld [vmem:[%s8204_s16 + $0x188] sm:$0xff]  ;;  %v3317_v2 = vld [vmem:[%s8204_s16 + $0x98] sm:$0xff] }
  0x8f   : > { %6766 = vmatmul.mubr.msk.f32.vlgmr.msra.gmra.mrb[56].mxu1 %vm442_vm3, %v8165_v59  ;;  %7214 = vmatpush1.bf16.msra.mxu0 %v7213_v14  ;;  %v7258_v14 = vpack.c.bf16 %v3398_v6, %v3366_v5  ;;  %v3349_v3 = vld [vmem:[%s8204_s16 + $0x198] sm:$0xff]  ;;  %v3314_v5 = vld [vmem:[%s8204_s16 + $0x80] sm:$0xff] }
  0x90   : > { %7224 = vmatpush1.bf16.msra.mxu1 %v7223_v17  ;;  %2996 = vmatprep.mubr.f32.mxu0 %v7575_v0  ;;  %v7268_v17 = vpack.c.bf16 %v3400_v9, %v3368_v8  ;;  %v3346_v6 = vld [vmem:[%s8204_s16 + $0x180] sm:$0xff]  ;;  %v3316_v8 = vld [vmem:[%s8204_s16 + $0x90] sm:$0xff] }
  0x91   : > { %3073 = vmatprep.mubr.f32.mxu1 %v7575_v0  ;;  %7217 = vmatprep.subr.msk.bf16.mxu0 %vm7634_vm2, %v7215_v20  ;;  %v7271_v20 = vpack.c.bf16 %v3339_v13, %v3307_v12  ;;  %v3348_v9 = vld [vmem:[%s8204_s16 + $0x190] sm:$0xff]  ;;  %v3379_v12 = vld [vmem:[%s8204_s16 + $0x288] sm:$0xff] }
  0x92   : > { %6763 = vmatmul.mubr.msk.f32.gmra.mrb[58].mxu0 %vm442_vm3, %v8186_v10  ;;  %7227 = vmatprep.subr.msk.bf16.mxu1 %vm7634_vm2, %v7225_v23  ;;  %v7281_v23 = vpack.c.bf16 %v3341_v16, %v3309_v15  ;;  %v3411_v13 = vld [vmem:[%s8204_s16 + $0x388] sm:$0x7]  ;;  %v3381_v15 = vld [vmem:[%s8204_s16 + $0x298] sm:$0xff] }
  0x93   : > { %6767 = vmatmul.mubr.msk.f32.gmra.mrb[58].mxu1 %vm442_vm3, %v8186_v10  ;;  %7220 = vmatpush1.bf16.msk.msra.mxu0 %vm7634_vm2, %v7218_v26  ;;  %v7273_v26 = vpack.c.bf16 %v3338_v19, %v3306_v18  ;;  %v3413_v16 = vld [vmem:[%s8204_s16 + $0x398] sm:$0x7]  ;;  %v3378_v18 = vld [vmem:[%s8204_s16 + $0x280] sm:$0xff] }
  0x94   : > { %7230 = vmatpush1.bf16.msk.msra.mxu1 %vm7634_vm2, %v7228_v30  ;;  %3144 = vmatprep.mubr.f32.mxu0 %v7575_v0  ;;  %v7283_v30 = vpack.c.bf16 %v3340_v22, %v3308_v21  ;;  %v3410_v19 = vld [vmem:[%s8204_s16 + $0x380] sm:$0x7]  ;;  %v3380_v21 = vld [vmem:[%s8204_s16 + $0x290] sm:$0xff] }
  0x95   : > { %3221 = vmatprep.mubr.f32.mxu1 %v7575_v0  ;;  %7232 = vmatprep.subr.bf16.mxu0 %v7231_v33  ;;  %v7275_v33 = vpack.c.bf16 %v3403_v25, %v3371_v24  ;;  %v3412_v22 = vld [vmem:[%s8204_s16 + $0x390] sm:$0x7]  ;;  %v3319_v24 = vld [vmem:[%s8204_s16 + $0xa8] sm:$0xff] }
  0x96   : > { %6770 = vmatmul.mubr.msk.f32.vlgmr.msra.gmra.mrb[60].mxu0 %vm442_vm3, %v8165_v59  ;;  %7242 = vmatprep.subr.bf16.mxu1 %v7241_v36  ;;  %v7285_v36 = vpack.c.bf16 %v3405_v29, %v3373_v27  ;;  %v3351_v25 = vld [vmem:[%s8204_s16 + $0x1a8] sm:$0xff]  ;;  %v3321_v27 = vld [vmem:[%s8204_s16 + $0xb8] sm:$0xff] }
  0x97   : > { %6774 = vmatmul.mubr.msk.f32.vlgmr.msra.gmra.mrb[60].mxu1 %vm442_vm3, %v8165_v59  ;;  %7234 = vmatpush1.bf16.msra.mxu0 %v7233_v39  ;;  %v7278_v39 = vpack.c.bf16 %v3402_v32, %v3370_v31  ;;  %v3353_v29 = vld [vmem:[%s8204_s16 + $0x1b8] sm:$0xff]  ;;  %v3318_v31 = vld [vmem:[%s8204_s16 + $0xa0] sm:$0xff] }
  0x98   : > { %7244 = vmatpush1.bf16.msra.mxu1 %v7243_v42  ;;  %3150 = vmatprep.mubr.f32.mxu0 %v7575_v0  ;;  %v7288_v42 = vpack.c.bf16 %v3404_v35, %v3372_v34  ;;  %v3350_v32 = vld [vmem:[%s8204_s16 + $0x1a0] sm:$0xff]  ;;  %v3320_v34 = vld [vmem:[%s8204_s16 + $0xb0] sm:$0xff] }
  0x99   : > { %3227 = vmatprep.mubr.f32.mxu1 %v7575_v0  ;;  %7237 = vmatprep.subr.msk.bf16.mxu0 %vm7634_vm2, %v7235_v28  ;;  %v7291_v28 = vpack.c.bf16 %v3343_v38, %v3311_v37  ;;  %v3352_v35 = vld [vmem:[%s8204_s16 + $0x1b0] sm:$0xff]  ;;  %v3383_v37 = vld [vmem:[%s8204_s16 + $0x2a8] sm:$0xff] }
  0x9a   : > { %6771 = vmatmul.mubr.msk.f32.gmra.mrb[62].mxu0 %vm442_vm3, %v8186_v10  ;;  %7247 = vmatprep.subr.msk.bf16.mxu1 %vm7634_vm2, %v7245_v47  ;;  %v7301_v47 = vpack.c.bf16 %v3345_v41, %v3313_v40  ;;  %v3415_v38 = vld [vmem:[%s8204_s16 + $0x3a8] sm:$0x7]  ;;  %v3385_v40 = vld [vmem:[%s8204_s16 + $0x2b8] sm:$0xff] }
  0x9b   : > { %6775 = vmatmul.mubr.msk.f32.gmra.mrb[62].mxu1 %vm442_vm3, %v8186_v10  ;;  %7240 = vmatpush1.bf16.msk.msra.mxu0 %vm7634_vm2, %v7238_v50  ;;  %v7293_v50 = vpack.c.bf16 %v3342_v44, %v3310_v43  ;;  %v3417_v41 = vld [vmem:[%s8204_s16 + $0x3b8] sm:$0x7]  ;;  %v3382_v43 = vld [vmem:[%s8204_s16 + $0x2a0] sm:$0xff] }
  0x9c   : > { %7250 = vmatpush1.bf16.msk.msra.mxu1 %vm7634_vm2, %v7248_v54  ;;  %3586 = vmatprep.mubr.f32.mxu0 %v7575_v0  ;;  %v7303_v54 = vpack.c.bf16 %v3344_v46, %v3312_v45  ;;  %v3414_v44 = vld [vmem:[%s8204_s16 + $0x3a0] sm:$0x7]  ;;  %v3384_v45 = vld [vmem:[%s8204_s16 + $0x2b0] sm:$0xff] }
  0x9d   : > { %3663 = vmatprep.mubr.f32.mxu1 %v7575_v0  ;;  %7252 = vmatprep.subr.bf16.mxu0 %v7251_v51  ;;  %v7295_v51 = vpack.c.bf16 %v3407_v49, %v3375_v48  ;;  %v3416_v46 = vld [vmem:[%s8204_s16 + $0x3b0] sm:$0x7]  ;;  %v3323_v48 = vld [vmem:[%s8204_s16 + $0xc8] sm:$0xff] }
  0x9e   : > { %6778 = vmatmul.mubr.msk.f32.vlgmr.msra.gmra.mrb[64].mxu0 %vm442_vm3, %v8165_v59  ;;  %7262 = vmatprep.subr.bf16.mxu1 %v7261_v60  ;;  %v7305_v60 = vpack.c.bf16 %v3409_v53, %v3377_v52  ;;  %v3355_v49 = vld [vmem:[%s8204_s16 + $0x1c8] sm:$0xff]  ;;  %v3325_v52 = vld [vmem:[%s8204_s16 + $0xd8] sm:$0xff] }
  0x9f   : > { %6782 = vmatmul.mubr.msk.f32.vlgmr.msra.gmra.mrb[64].mxu1 %vm442_vm3, %v8165_v59  ;;  %7254 = vmatpush1.bf16.msra.mxu0 %v7253_v63  ;;  %v7298_v63 = vpack.c.bf16 %v3406_v56, %v3374_v55  ;;  %v3357_v53 = vld [vmem:[%s8204_s16 + $0x1d8] sm:$0xff]  ;;  %v3322_v55 = vld [vmem:[%s8204_s16 + $0xc0] sm:$0xff] }
  0xa0   : > { %7264 = vmatpush1.bf16.msra.mxu1 %v7263_v4  ;;  %3592 = vmatprep.mubr.f32.mxu0 %v7575_v0  ;;  %v7308_v4 = vpack.c.bf16 %v3408_v58, %v3376_v57  ;;  %v3354_v56 = vld [vmem:[%s8204_s16 + $0x1c0] sm:$0xff]  ;;  %v3324_v57 = vld [vmem:[%s8204_s16 + $0xd0] sm:$0xff] }
  0xa1   : > { %3669 = vmatprep.mubr.f32.mxu1 %v7575_v0  ;;  %7257 = vmatprep.subr.msk.bf16.mxu0 %vm7634_vm2, %v7255_v7  ;;  %v7311_v7 = vpack.c.bf16 %v3347_v62, %v3315_v61  ;;  %v3356_v58 = vld [vmem:[%s8204_s16 + $0x1d0] sm:$0xff]  ;;  %v3387_v61 = vld [vmem:[%s8204_s16 + $0x2c8] sm:$0xff] }
  0xa2   : > { %6779 = vmatmul.mubr.msk.f32.gmra.mrb[66].mxu0 %vm442_vm3, %v8186_v10  ;;  %7267 = vmatprep.subr.msk.bf16.mxu1 %vm7634_vm2, %v7265_v11  ;;  %v7321_v11 = vpack.c.bf16 %v3349_v3, %v3317_v2  ;;  %v3419_v62 = vld [vmem:[%s8204_s16 + $0x3c8] sm:$0x7]  ;;  %v3389_v2 = vld [vmem:[%s8204_s16 + $0x2d8] sm:$0xff] }
  0xa3   : > { %6783 = vmatmul.mubr.msk.f32.gmra.mrb[66].mxu1 %vm442_vm3, %v8186_v10  ;;  %7260 = vmatpush1.bf16.msk.msra.mxu0 %vm7634_vm2, %v7258_v14  ;;  %v7313_v14 = vpack.c.bf16 %v3346_v6, %v3314_v5  ;;  %v3421_v3 = vld [vmem:[%s8204_s16 + $0x3d8] sm:$0x7]  ;;  %v3386_v5 = vld [vmem:[%s8204_s16 + $0x2c0] sm:$0xff] }
  0xa4   : > { %7270 = vmatpush1.bf16.msk.msra.mxu1 %vm7634_vm2, %v7268_v17  ;;  %3740 = vmatprep.mubr.f32.mxu0 %v7575_v0  ;;  %v7323_v17 = vpack.c.bf16 %v3348_v9, %v3316_v8  ;;  %v3418_v6 = vld [vmem:[%s8204_s16 + $0x3c0] sm:$0x7]  ;;  %v3388_v8 = vld [vmem:[%s8204_s16 + $0x2d0] sm:$0xff] }
  0xa5   : > { %3817 = vmatprep.mubr.f32.mxu1 %v7575_v0  ;;  %7272 = vmatprep.subr.bf16.mxu0 %v7271_v20  ;;  %v7315_v20 = vpack.c.bf16 %v3411_v13, %v3379_v12  ;;  %v3420_v9 = vld [vmem:[%s8204_s16 + $0x3d0] sm:$0x7]  ;;  %v3327_v12 = vld [vmem:[%s8204_s16 + $0xe8] sm:$0xff] }
  0xa6   : > { %6786 = vmatmul.mubr.msk.f32.vlgmr.msra.gmra.mrb[68].mxu0 %vm442_vm3, %v8165_v59  ;;  %7282 = vmatprep.subr.bf16.mxu1 %v7281_v23  ;;  %v7325_v23 = vpack.c.bf16 %v3413_v16, %v3381_v15  ;;  %v3359_v13 = vld [vmem:[%s8204_s16 + $0x1e8] sm:$0xff]  ;;  %v3329_v15 = vld [vmem:[%s8204_s16 + $0xf8] sm:$0xff] }
  0xa7   : > { %6790 = vmatmul.mubr.msk.f32.vlgmr.msra.gmra.mrb[68].mxu1 %vm442_vm3, %v8165_v59  ;;  %7274 = vmatpush1.bf16.msra.mxu0 %v7273_v26  ;;  %v7318_v26 = vpack.c.bf16 %v3410_v19, %v3378_v18  ;;  %v3361_v16 = vld [vmem:[%s8204_s16 + $0x1f8] sm:$0xff]  ;;  %v3326_v18 = vld [vmem:[%s8204_s16 + $0xe0] sm:$0xff] }
  0xa8   : > { %7284 = vmatpush1.bf16.msra.mxu1 %v7283_v30  ;;  %3746 = vmatprep.mubr.f32.mxu0 %v7575_v0  ;;  %v7328_v30 = vpack.c.bf16 %v3412_v22, %v3380_v21  ;;  %v3358_v19 = vld [vmem:[%s8204_s16 + $0x1e0] sm:$0xff]  ;;  %v3328_v21 = vld [vmem:[%s8204_s16 + $0xf0] sm:$0xff] }
  0xa9   : > { %3823 = vmatprep.mubr.f32.mxu1 %v7575_v0  ;;  %7277 = vmatprep.subr.msk.bf16.mxu0 %vm7634_vm2, %v7275_v33  ;;  %v7331_v33 = vpack.c.bf16 %v3351_v25, %v3319_v24  ;;  %v3360_v22 = vld [vmem:[%s8204_s16 + $0x1f0] sm:$0xff]  ;;  %v3391_v24 = vld [vmem:[%s8204_s16 + $0x2e8] sm:$0xff] }
  0xaa   : > { %6787 = vmatmul.mubr.msk.f32.gmra.mrb[70].mxu0 %vm442_vm3, %v8186_v10  ;;  %7287 = vmatprep.subr.msk.bf16.mxu1 %vm7634_vm2, %v7285_v36  ;;  %v7341_v36 = vpack.c.bf16 %v3353_v29, %v3321_v27  ;;  %v3423_v25 = vld [vmem:[%s8204_s16 + $0x3e8] sm:$0x7]  ;;  %v3393_v27 = vld [vmem:[%s8204_s16 + $0x2f8] sm:$0xff] }
  0xab   : > { %6791 = vmatmul.mubr.msk.f32.gmra.mrb[70].mxu1 %vm442_vm3, %v8186_v10  ;;  %7280 = vmatpush1.bf16.msk.msra.mxu0 %vm7634_vm2, %v7278_v39  ;;  %v7333_v39 = vpack.c.bf16 %v3350_v32, %v3318_v31  ;;  %v3425_v29 = vld [vmem:[%s8204_s16 + $0x3f8] sm:$0x7]  ;;  %v3390_v31 = vld [vmem:[%s8204_s16 + $0x2e0] sm:$0xff] }
  0xac   : > { %7290 = vmatpush1.bf16.msk.msra.mxu1 %vm7634_vm2, %v7288_v42  ;;  %3894 = vmatprep.mubr.f32.mxu0 %v7575_v0  ;;  %v7343_v42 = vpack.c.bf16 %v3352_v35, %v3320_v34  ;;  %v3422_v32 = vld [vmem:[%s8204_s16 + $0x3e0] sm:$0x7]  ;;  %v3392_v34 = vld [vmem:[%s8204_s16 + $0x2f0] sm:$0xff] }
  0xad   : > { %3971 = vmatprep.mubr.f32.mxu1 %v7575_v0  ;;  %7292 = vmatprep.subr.bf16.mxu0 %v7291_v28  ;;  %v7335_v28 = vpack.c.bf16 %v3415_v38, %v3383_v37  ;;  %v3424_v35 = vld [vmem:[%s8204_s16 + $0x3f0] sm:$0x7]  ;;  %v4819_v37 = vld [vmem:[%s8498_s19 + $0x8] sm:$0xff] }
  0xae   : > { %6794 = vmatmul.mubr.msk.f32.vlgmr.msra.gmra.mrb[72].mxu0 %vm442_vm3, %v8165_v59  ;;  %7302 = vmatprep.subr.bf16.mxu1 %v7301_v47  ;;  %v7345_v47 = vpack.c.bf16 %v3417_v41, %v3385_v40  ;;  %v4851_v38 = vld [vmem:[%s8498_s19 + $0x108] sm:$0xff]  ;;  %v4821_v40 = vld [vmem:[%s8498_s19 + $0x18] sm:$0xff] }
  0xaf   : > { %6798 = vmatmul.mubr.msk.f32.vlgmr.msra.gmra.mrb[72].mxu1 %vm442_vm3, %v8165_v59  ;;  %7294 = vmatpush1.bf16.msra.mxu0 %v7293_v50  ;;  %v7338_v50 = vpack.c.bf16 %v3414_v44, %v3382_v43  ;;  %v4853_v41 = vld [vmem:[%s8498_s19 + $0x118] sm:$0xff]  ;;  %v4818_v43 = vld [vmem:[%s8498_s19] sm:$0xff] }
  0xb0   : > { %7304 = vmatpush1.bf16.msra.mxu1 %v7303_v54  ;;  %3900 = vmatprep.mubr.f32.mxu0 %v7575_v0  ;;  %v7348_v54 = vpack.c.bf16 %v3416_v46, %v3384_v45  ;;  %v4850_v44 = vld [vmem:[%s8498_s19 + $0x100] sm:$0xff]  ;;  %v4820_v45 = vld [vmem:[%s8498_s19 + $0x10] sm:$0xff] }
  0xb1   : > { %3977 = vmatprep.mubr.f32.mxu1 %v7575_v0  ;;  %7297 = vmatprep.subr.msk.bf16.mxu0 %vm7634_vm2, %v7295_v51  ;;  %v7351_v51 = vpack.c.bf16 %v3355_v49, %v3323_v48  ;;  %v4852_v46 = vld [vmem:[%s8498_s19 + $0x110] sm:$0xff]  ;;  %v4883_v48 = vld [vmem:[%s8498_s19 + $0x208] sm:$0xff] }
  0xb2   : > { %6795 = vmatmul.mubr.msk.f32.gmra.mrb[74].mxu0 %vm442_vm3, %v8186_v10  ;;  %7307 = vmatprep.subr.msk.bf16.mxu1 %vm7634_vm2, %v7305_v60  ;;  %v7361_v60 = vpack.c.bf16 %v3357_v53, %v3325_v52  ;;  %v4915_v49 = vld [vmem:[%s8498_s19 + $0x308] sm:$0x7]  ;;  %v4885_v52 = vld [vmem:[%s8498_s19 + $0x218] sm:$0xff] }
  0xb3   : > { %6799 = vmatmul.mubr.msk.f32.gmra.mrb[74].mxu1 %vm442_vm3, %v8186_v10  ;;  %7300 = vmatpush1.bf16.msk.msra.mxu0 %vm7634_vm2, %v7298_v63  ;;  %v7353_v63 = vpack.c.bf16 %v3354_v56, %v3322_v55  ;;  %v4917_v53 = vld [vmem:[%s8498_s19 + $0x318] sm:$0x7]  ;;  %v4882_v55 = vld [vmem:[%s8498_s19 + $0x200] sm:$0xff] }
  0xb4   : > { %7310 = vmatpush1.bf16.msk.msra.mxu1 %vm7634_vm2, %v7308_v4  ;;  %4048 = vmatprep.mubr.f32.mxu0 %v7575_v0  ;;  %v7363_v4 = vpack.c.bf16 %v3356_v58, %v3324_v57  ;;  %v4914_v56 = vld [vmem:[%s8498_s19 + $0x300] sm:$0x7]  ;;  %v4884_v57 = vld [vmem:[%s8498_s19 + $0x210] sm:$0xff] }
  0xb5   : > { %4125 = vmatprep.mubr.f32.mxu1 %v7575_v0  ;;  %7312 = vmatprep.subr.bf16.mxu0 %v7311_v7  ;;  %v7355_v7 = vpack.c.bf16 %v3419_v62, %v3387_v61  ;;  %v4916_v58 = vld [vmem:[%s8498_s19 + $0x310] sm:$0x7]  ;;  %v4823_v61 = vld [vmem:[%s8498_s19 + $0x28] sm:$0xff] }
  0xb6   : > { %6802 = vmatmul.mubr.msk.f32.vlgmr.msra.gmra.mrb[76].mxu0 %vm442_vm3, %v8165_v59  ;;  %7322 = vmatprep.subr.bf16.mxu1 %v7321_v11  ;;  %v7365_v11 = vpack.c.bf16 %v3421_v3, %v3389_v2  ;;  %v4855_v62 = vld [vmem:[%s8498_s19 + $0x128] sm:$0xff]  ;;  %v4825_v2 = vld [vmem:[%s8498_s19 + $0x38] sm:$0xff] }
  0xb7   : > { %6806 = vmatmul.mubr.msk.f32.vlgmr.msra.gmra.mrb[76].mxu1 %vm442_vm3, %v8165_v59  ;;  %7314 = vmatpush1.bf16.msra.mxu0 %v7313_v14  ;;  %v7358_v14 = vpack.c.bf16 %v3418_v6, %v3386_v5  ;;  %v4857_v3 = vld [vmem:[%s8498_s19 + $0x138] sm:$0xff]  ;;  %v4822_v5 = vld [vmem:[%s8498_s19 + $0x20] sm:$0xff] }
  0xb8   : > { %7324 = vmatpush1.bf16.msra.mxu1 %v7323_v17  ;;  %4054 = vmatprep.mubr.f32.mxu0 %v7575_v0  ;;  %v7368_v17 = vpack.c.bf16 %v3420_v9, %v3388_v8  ;;  %v4854_v6 = vld [vmem:[%s8498_s19 + $0x120] sm:$0xff]  ;;  %v4824_v8 = vld [vmem:[%s8498_s19 + $0x30] sm:$0xff] }
  0xb9   : > { %4131 = vmatprep.mubr.f32.mxu1 %v7575_v0  ;;  %7317 = vmatprep.subr.msk.bf16.mxu0 %vm7634_vm2, %v7315_v20  ;;  %v7371_v20 = vpack.c.bf16 %v3359_v13, %v3327_v12  ;;  %v4856_v9 = vld [vmem:[%s8498_s19 + $0x130] sm:$0xff]  ;;  %v4887_v12 = vld [vmem:[%s8498_s19 + $0x228] sm:$0xff] }
  0xba   : > { %6803 = vmatmul.mubr.msk.f32.gmra.mrb[78].mxu0 %vm442_vm3, %v8186_v10  ;;  %7327 = vmatprep.subr.msk.bf16.mxu1 %vm7634_vm2, %v7325_v23  ;;  %v7381_v23 = vpack.c.bf16 %v3361_v16, %v3329_v15  ;;  %v4919_v13 = vld [vmem:[%s8498_s19 + $0x328] sm:$0x7]  ;;  %v4889_v15 = vld [vmem:[%s8498_s19 + $0x238] sm:$0xff] }
  0xbb   : > { %6807 = vmatmul.mubr.msk.f32.gmra.mrb[78].mxu1 %vm442_vm3, %v8186_v10  ;;  %7320 = vmatpush1.bf16.msk.msra.mxu0 %vm7634_vm2, %v7318_v26  ;;  %v7373_v26 = vpack.c.bf16 %v3358_v19, %v3326_v18  ;;  %v4921_v16 = vld [vmem:[%s8498_s19 + $0x338] sm:$0x7]  ;;  %v4886_v18 = vld [vmem:[%s8498_s19 + $0x220] sm:$0xff] }
  0xbc   : > { %7330 = vmatpush1.bf16.msk.msra.mxu1 %vm7634_vm2, %v7328_v30  ;;  %4202 = vmatprep.mubr.f32.mxu0 %v7575_v0  ;;  %v7383_v30 = vpack.c.bf16 %v3360_v22, %v3328_v21  ;;  %v4918_v19 = vld [vmem:[%s8498_s19 + $0x320] sm:$0x7]  ;;  %v4888_v21 = vld [vmem:[%s8498_s19 + $0x230] sm:$0xff] }
  0xbd   : > { %4279 = vmatprep.mubr.f32.mxu1 %v7575_v0  ;;  %7332 = vmatprep.subr.bf16.mxu0 %v7331_v33  ;;  %v7375_v33 = vpack.c.bf16 %v3423_v25, %v3391_v24  ;;  %v4920_v22 = vld [vmem:[%s8498_s19 + $0x330] sm:$0x7]  ;;  %v4827_v24 = vld [vmem:[%s8498_s19 + $0x48] sm:$0xff] }
  0xbe   : > { %6810 = vmatmul.mubr.msk.f32.vlgmr.msra.gmra.mrb[80].mxu0 %vm442_vm3, %v8165_v59  ;;  %7342 = vmatprep.subr.bf16.mxu1 %v7341_v36  ;;  %v7385_v36 = vpack.c.bf16 %v3425_v29, %v3393_v27  ;;  %v4859_v25 = vld [vmem:[%s8498_s19 + $0x148] sm:$0xff]  ;;  %v4829_v27 = vld [vmem:[%s8498_s19 + $0x58] sm:$0xff] }
  0xbf   : > { %6814 = vmatmul.mubr.msk.f32.vlgmr.msra.gmra.mrb[80].mxu1 %vm442_vm3, %v8165_v59  ;;  %7334 = vmatpush1.bf16.msra.mxu0 %v7333_v39  ;;  %v7378_v39 = vpack.c.bf16 %v3422_v32, %v3390_v31  ;;  %v4861_v29 = vld [vmem:[%s8498_s19 + $0x158] sm:$0xff]  ;;  %v4826_v31 = vld [vmem:[%s8498_s19 + $0x40] sm:$0xff] }
  0xc0   : > { %7344 = vmatpush1.bf16.msra.mxu1 %v7343_v42  ;;  %4208 = vmatprep.mubr.f32.mxu0 %v7575_v0  ;;  %v7388_v42 = vpack.c.bf16 %v3424_v35, %v3392_v34  ;;  %v4858_v32 = vld [vmem:[%s8498_s19 + $0x140] sm:$0xff]  ;;  %v4828_v34 = vld [vmem:[%s8498_s19 + $0x50] sm:$0xff] }
  0xc1   : > { %4285 = vmatprep.mubr.f32.mxu1 %v7575_v0  ;;  %7337 = vmatprep.subr.msk.bf16.mxu0 %vm7634_vm2, %v7335_v28  ;;  %v7391_v28 = vpack.c.bf16 %v4851_v38, %v4819_v37  ;;  %v4860_v35 = vld [vmem:[%s8498_s19 + $0x150] sm:$0xff]  ;;  %v4891_v37 = vld [vmem:[%s8498_s19 + $0x248] sm:$0xff] }
  0xc2   : > { %6811 = vmatmul.mubr.msk.f32.gmra.mrb[82].mxu0 %vm442_vm3, %v8186_v10  ;;  %7347 = vmatprep.subr.msk.bf16.mxu1 %vm7634_vm2, %v7345_v47  ;;  %v7401_v47 = vpack.c.bf16 %v4853_v41, %v4821_v40  ;;  %v4923_v38 = vld [vmem:[%s8498_s19 + $0x348] sm:$0x7]  ;;  %v4893_v40 = vld [vmem:[%s8498_s19 + $0x258] sm:$0xff] }
  0xc3   : > { %6815 = vmatmul.mubr.msk.f32.gmra.mrb[82].mxu1 %vm442_vm3, %v8186_v10  ;;  %7340 = vmatpush1.bf16.msk.msra.mxu0 %vm7634_vm2, %v7338_v50  ;;  %v7393_v50 = vpack.c.bf16 %v4850_v44, %v4818_v43  ;;  %v4925_v41 = vld [vmem:[%s8498_s19 + $0x358] sm:$0x7]  ;;  %v4890_v43 = vld [vmem:[%s8498_s19 + $0x240] sm:$0xff] }
  0xc4   : > { %7350 = vmatpush1.bf16.msk.msra.mxu1 %vm7634_vm2, %v7348_v54  ;;  %4356 = vmatprep.mubr.f32.mxu0 %v7575_v0  ;;  %v7403_v54 = vpack.c.bf16 %v4852_v46, %v4820_v45  ;;  %v4922_v44 = vld [vmem:[%s8498_s19 + $0x340] sm:$0x7]  ;;  %v4892_v45 = vld [vmem:[%s8498_s19 + $0x250] sm:$0xff] }
  0xc5   : > { %4433 = vmatprep.mubr.f32.mxu1 %v7575_v0  ;;  %7352 = vmatprep.subr.bf16.mxu0 %v7351_v51  ;;  %v7395_v51 = vpack.c.bf16 %v4915_v49, %v4883_v48  ;;  %v4924_v46 = vld [vmem:[%s8498_s19 + $0x350] sm:$0x7]  ;;  %v4831_v48 = vld [vmem:[%s8498_s19 + $0x68] sm:$0xff] }
  0xc6   : > { %6818 = vmatmul.mubr.msk.f32.vlgmr.msra.gmra.mrb[84].mxu0 %vm442_vm3, %v8165_v59  ;;  %7362 = vmatprep.subr.bf16.mxu1 %v7361_v60  ;;  %v7405_v60 = vpack.c.bf16 %v4917_v53, %v4885_v52  ;;  %v4863_v49 = vld [vmem:[%s8498_s19 + $0x168] sm:$0xff]  ;;  %v4833_v52 = vld [vmem:[%s8498_s19 + $0x78] sm:$0xff] }
  0xc7   : > { %6822 = vmatmul.mubr.msk.f32.vlgmr.msra.gmra.mrb[84].mxu1 %vm442_vm3, %v8165_v59  ;;  %7354 = vmatpush1.bf16.msra.mxu0 %v7353_v63  ;;  %v7398_v63 = vpack.c.bf16 %v4914_v56, %v4882_v55  ;;  %v4865_v53 = vld [vmem:[%s8498_s19 + $0x178] sm:$0xff]  ;;  %v4830_v55 = vld [vmem:[%s8498_s19 + $0x60] sm:$0xff] }
  0xc8   : > { %7364 = vmatpush1.bf16.msra.mxu1 %v7363_v4  ;;  %4362 = vmatprep.mubr.f32.mxu0 %v7575_v0  ;;  %v7408_v4 = vpack.c.bf16 %v4916_v58, %v4884_v57  ;;  %v4862_v56 = vld [vmem:[%s8498_s19 + $0x160] sm:$0xff]  ;;  %v4864_v57 = vld [vmem:[%s8498_s19 + $0x170] sm:$0xff]  ;;  %v7461_v58 = vpack.c.bf16 %v4865_v53, %v4833_v52 }
  0xc9   : > { %4439 = vmatprep.mubr.f32.mxu1 %v7575_v0  ;;  %7357 = vmatprep.subr.msk.bf16.mxu0 %vm7634_vm2, %v7355_v7  ;;  %v7411_v7 = vpack.c.bf16 %v4855_v62, %v4823_v61  ;;  %v4927_v61 = vld [vmem:[%s8498_s19 + $0x368] sm:$0x7]  ;;  %v7453_v62 = vpack.c.bf16 %v4862_v56, %v4830_v55  ;;  %v4870_v52 = vld [vmem:[%s8498_s19 + $0x1a0] sm:$0xff]  ;;  %v4840_v55 = vld [vmem:[%s8498_s19 + $0xb0] sm:$0xff] }
  0xca   : > { %6819 = vmatmul.mubr.msk.f32.gmra.mrb[86].mxu0 %vm442_vm3, %v8186_v10  ;;  %7367 = vmatprep.subr.msk.bf16.mxu1 %vm7634_vm2, %v7365_v11  ;;  %v7421_v11 = vpack.c.bf16 %v4857_v3, %v4825_v2  ;;  %v4929_v2 = vld [vmem:[%s8498_s19 + $0x378] sm:$0x7]  ;;  %v4872_v56 = vld [vmem:[%s8498_s19 + $0x1b0] sm:$0xff] }
  0xcb   : > { %6823 = vmatmul.mubr.msk.f32.gmra.mrb[86].mxu1 %vm442_vm3, %v8186_v10  ;;  %7360 = vmatpush1.bf16.msk.msra.mxu0 %vm7634_vm2, %v7358_v14  ;;  %v7413_v14 = vpack.c.bf16 %v4854_v6, %v4822_v5  ;;  %v4926_v5 = vld [vmem:[%s8498_s19 + $0x360] sm:$0x7]  ;;  %v4896_v6 = vld [vmem:[%s8498_s19 + $0x270] sm:$0xff] }
  0xcc   : > { %7370 = vmatpush1.bf16.msk.msra.mxu1 %vm7634_vm2, %v7368_v17  ;;  %4510 = vmatprep.mubr.f32.mxu0 %v7575_v0  ;;  %v7423_v17 = vpack.c.bf16 %v4856_v9, %v4824_v8  ;;  %v8655_v8 = vld [vmem:[%s9755_s4] sm:$0xff] }
  0xcd   : > { %4587 = vmatprep.mubr.f32.mxu1 %v7575_v0  ;;  %7372 = vmatprep.subr.bf16.mxu0 %v7371_v20  ;;  %v7415_v20 = vpack.c.bf16 %v4919_v13, %v4887_v12  ;;  %v4867_v12 = vld [vmem:[%s8498_s19 + $0x188] sm:$0xff] }
  0xce   : > { %6826 = vmatmul.mubr.msk.f32.vlgmr.msra.gmra.mrb[88].mxu0 %vm442_vm3, %v8165_v59  ;;  %7382 = vmatprep.subr.bf16.mxu1 %v7381_v23  ;;  %v7425_v23 = vpack.c.bf16 %v4921_v16, %v4889_v15  ;;  %v4869_v15 = vld [vmem:[%s8498_s19 + $0x198] sm:$0xff] }
  0xcf   : > { %6830 = vmatmul.mubr.msk.f32.vlgmr.msra.gmra.mrb[88].mxu1 %vm442_vm3, %v8165_v59  ;;  %7374 = vmatpush1.bf16.msra.mxu0 %v7373_v26  ;;  %v7418_v26 = vpack.c.bf16 %v4918_v19, %v4886_v18  ;;  %v4866_v18 = vld [vmem:[%s8498_s19 + $0x180] sm:$0xff] }
  0xd0   : > { %7384 = vmatpush1.bf16.msra.mxu1 %v7383_v30  ;;  %4516 = vmatprep.mubr.f32.mxu0 %v7575_v0  ;;  %v7428_v30 = vpack.c.bf16 %v4920_v22, %v4888_v21  ;;  %v4836_v21 = vld [vmem:[%s8498_s19 + $0x90] sm:$0xff] }
  0xd1   : > { %4593 = vmatprep.mubr.f32.mxu1 %v7575_v0  ;;  %7377 = vmatprep.subr.msk.bf16.mxu0 %vm7634_vm2, %v7375_v33  ;;  %v7431_v33 = vpack.c.bf16 %v4859_v25, %v4827_v24  ;;  %v4868_v22 = vld [vmem:[%s8498_s19 + $0x190] sm:$0xff]  ;;  %v8682_v25 = vld [vmem:[%s9755_s4 + $0x8] sm:$0xff] }
  0xd2   : > { %6827 = vmatmul.mubr.msk.f32.gmra.mrb[90].mxu0 %vm442_vm3, %v8186_v10  ;;  %7387 = vmatprep.subr.msk.bf16.mxu1 %vm7634_vm2, %v7385_v36  ;;  %v7441_v36 = vpack.c.bf16 %v4861_v29, %v4829_v27  ;;  %v4899_v27 = vld [vmem:[%s8498_s19 + $0x288] sm:$0xff] }
  0xd3   : > { %6831 = vmatmul.mubr.msk.f32.gmra.mrb[90].mxu1 %vm442_vm3, %v8186_v10  ;;  %7380 = vmatpush1.bf16.msk.msra.mxu0 %vm7634_vm2, %v7378_v39  ;;  %v7433_v39 = vpack.c.bf16 %v4858_v32, %v4826_v31  ;;  %v4931_v29 = vld [vmem:[%s8498_s19 + $0x388] sm:$0x7]  ;;  %v4901_v32 = vld [vmem:[%s8498_s19 + $0x298] sm:$0xff] }
  0xd4   : > { %7390 = vmatpush1.bf16.msk.msra.mxu1 %vm7634_vm2, %v7388_v42  ;;  %4664 = vmatprep.mubr.f32.mxu0 %v7575_v0  ;;  %v7443_v42 = vpack.c.bf16 %v4860_v35, %v4828_v34  ;;  %v7483_v34 = vpack.c.bf16 %v4868_v22, %v4836_v21  ;;  %v4898_v35 = vld [vmem:[%s8498_s19 + $0x280] sm:$0xff] }
  0xd5   : > { %4741 = vmatprep.mubr.f32.mxu1 %v7575_v0  ;;  %7392 = vmatprep.subr.bf16.mxu0 %v7391_v28  ;;  %v7435_v28 = vpack.c.bf16 %v4923_v38, %v4891_v37  ;;  %v7475_v38 = vpack.c.bf16 %v4931_v29, %v4899_v27  ;;  %v4842_v22 = vld [vmem:[%s8498_s19 + $0xc0] sm:$0xff] }
  0xd6   : > { %6834 = vmatmul.mubr.msk.f32.vlgmr.msra.gmra.mrb[92].mxu0 %vm442_vm3, %v8165_v59  ;;  %7402 = vmatprep.subr.bf16.mxu1 %v7401_v47  ;;  %v7445_v47 = vpack.c.bf16 %v4925_v41, %v4893_v40  ;;  %v4932_v40 = vld [vmem:[%s8498_s19 + $0x390] sm:$0x7] }
  0xd7   : > { %6838 = vmatmul.mubr.msk.f32.vlgmr.msra.gmra.mrb[92].mxu1 %vm442_vm3, %v8165_v59  ;;  %7394 = vmatpush1.bf16.msra.mxu0 %v7393_v50  ;;  %v7438_v50 = vpack.c.bf16 %v4922_v44, %v4890_v43  ;;  %v4839_v44 = vld [vmem:[%s8498_s19 + $0xa8] sm:$0xff] }
  0xd8   : > { %7404 = vmatpush1.bf16.msra.mxu1 %v7403_v54  ;;  %4670 = vmatprep.mubr.f32.mxu0 %v7575_v0  ;;  %v7448_v54 = vpack.c.bf16 %v4924_v46, %v4892_v45 }
  0xd9   : > { %4747 = vmatprep.mubr.f32.mxu1 %v7575_v0  ;;  %7397 = vmatprep.subr.msk.bf16.mxu0 %vm7634_vm2, %v7395_v51  ;;  %v4832_v51 = vld [vmem:[%s8498_s19 + $0x70] sm:$0xff] }
  0xda   : > { %6835 = vmatmul.mubr.msk.f32.gmra.mrb[94].mxu0 %vm442_vm3, %v8186_v10  ;;  %7407 = vmatprep.subr.msk.bf16.mxu1 %vm7634_vm2, %v7405_v60  ;;  %v4895_v60 = vld [vmem:[%s8498_s19 + $0x268] sm:$0xff]  ;;  %v7463_v3 = vpack.c.bf16 %v4864_v57, %v4832_v51 }
  0xdb   : > { %6839 = vmatmul.mubr.msk.f32.gmra.mrb[94].mxu1 %vm442_vm3, %v8186_v10  ;;  %7400 = vmatpush1.bf16.msk.msra.mxu0 %vm7634_vm2, %v7398_v63  ;;  %v4897_v63 = vld [vmem:[%s8498_s19 + $0x278] sm:$0xff] }
  0xdc   : > { %7410 = vmatpush1.bf16.msk.msra.mxu1 %vm7634_vm2, %v7408_v4  ;;  %5106 = vmatprep.mubr.f32.mxu0 %v7575_v0  ;;  %v4894_v4 = vld [vmem:[%s8498_s19 + $0x260] sm:$0xff]  ;;  %v7465_v9 = vpack.c.bf16 %v4929_v2, %v4897_v63  ;;  %v4905_v63 = vld [vmem:[%s8498_s19 + $0x2b8] sm:$0xff] }
  0xdd   : > { %5183 = vmatprep.mubr.f32.mxu1 %v7575_v0  ;;  %7412 = vmatprep.subr.bf16.mxu0 %v7411_v7  ;;  %v4928_v7 = vld [vmem:[%s8498_s19 + $0x370] sm:$0x7]  ;;  %v7458_v13 = vpack.c.bf16 %v4926_v5, %v4894_v4  ;;  %v4937_v2 = vld [vmem:[%s8498_s19 + $0x3b8] sm:$0x7]  ;;  %v4902_v4 = vld [vmem:[%s8498_s19 + $0x2a0] sm:$0xff] }
  0xde   : > { %6842 = vmatmul.mubr.msk.f32.vlgmr.msra.gmra.mrb[96].mxu0 %vm442_vm3, %v8165_v59  ;;  %7422 = vmatprep.subr.bf16.mxu1 %v7421_v11  ;;  %v4835_v11 = vld [vmem:[%s8498_s19 + $0x88] sm:$0xff]  ;;  %v7468_v16 = vpack.c.bf16 %v4928_v7, %v4896_v6  ;;  %v4934_v5 = vld [vmem:[%s8498_s19 + $0x3a0] sm:$0x7]  ;;  %v4904_v7 = vld [vmem:[%s8498_s19 + $0x2b0] sm:$0xff] }
  0xdf   : > { %6846 = vmatmul.mubr.msk.f32.vlgmr.msra.gmra.mrb[96].mxu1 %vm442_vm3, %v8165_v59  ;;  %7414 = vmatpush1.bf16.msra.mxu0 %v7413_v14  ;;  %v4837_v14 = vld [vmem:[%s8498_s19 + $0x98] sm:$0xff] }
  0xe0   : > { %7424 = vmatpush1.bf16.msra.mxu1 %v7423_v17  ;;  %5112 = vmatprep.mubr.f32.mxu0 %v7575_v0  ;;  %v4834_v17 = vld [vmem:[%s8498_s19 + $0x80] sm:$0xff] }
  0xe1   : > { %5189 = vmatprep.mubr.f32.mxu1 %v7575_v0  ;;  %7417 = vmatprep.subr.msk.bf16.mxu0 %vm7634_vm2, %v7415_v20  ;;  %v7471_v20 = vpack.c.bf16 %v4867_v12, %v4835_v11  ;;  %v7473_v31 = vpack.c.bf16 %v4866_v18, %v4834_v17  ;;  %v7498_v17 = vpack.c.bf16 %v4934_v5, %v4902_v4  ;;  %v4845_v18 = vld [vmem:[%s8498_s19 + $0xd8] sm:$0xff]  ;;  %v4846_v4 = vld [vmem:[%s8498_s19 + $0xe0] sm:$0xff] }
  0xe2   : > { %6843 = vmatmul.mubr.msk.f32.gmra.mrb[98].mxu0 %vm442_vm3, %v8186_v10  ;;  %7427 = vmatprep.subr.msk.bf16.mxu1 %vm7634_vm2, %v7425_v23  ;;  %v4878_v5 = vld [vmem:[%s8498_s19 + $0x1e0] sm:$0xff] }
  0xe3   : > { %6847 = vmatmul.mubr.msk.f32.gmra.mrb[98].mxu1 %vm442_vm3, %v8186_v10  ;;  %7420 = vmatpush1.bf16.msk.msra.mxu0 %vm7634_vm2, %v7418_v26  ;;  %v7481_v26 = vpack.c.bf16 %v4869_v15, %v4837_v14  ;;  %v4843_v14 = vld [vmem:[%s8498_s19 + $0xc8] sm:$0xff] }
  0xe4   : > { %7430 = vmatpush1.bf16.msk.msra.mxu1 %vm7634_vm2, %v7428_v30  ;;  %5260 = vmatprep.mubr.f32.mxu0 %v7575_v0  ;;  %v4875_v15 = vld [vmem:[%s8498_s19 + $0x1c8] sm:$0xff] }
  0xe5   : > { %5337 = vmatprep.mubr.f32.mxu1 %v7575_v0  ;;  %7432 = vmatprep.subr.bf16.mxu0 %v7431_v33  ;;  %v4933_v33 = vld [vmem:[%s8498_s19 + $0x398] sm:$0x7]  ;;  %v7511_v29 = vpack.c.bf16 %v4875_v15, %v4843_v14 }
  0xe6   : > { %6850 = vmatmul.mubr.msk.f32.vlgmr.msra.gmra.mrb[100].mxu0 %vm442_vm3, %v8165_v59  ;;  %7442 = vmatprep.subr.bf16.mxu1 %v7441_v36  ;;  %v4930_v36 = vld [vmem:[%s8498_s19 + $0x380] sm:$0x7]  ;;  %v7485_v43 = vpack.c.bf16 %v4933_v33, %v4901_v32  ;;  %v4876_v32 = vld [vmem:[%s8498_s19 + $0x1d0] sm:$0xff] }
  0xe7   : > { %6854 = vmatmul.mubr.msk.f32.vlgmr.msra.gmra.mrb[100].mxu1 %vm442_vm3, %v8165_v59  ;;  %7434 = vmatpush1.bf16.msra.mxu0 %v7433_v39  ;;  %v7451_v59 = vpack.c.bf16 %v4863_v49, %v4831_v48  ;;  %v4900_v39 = vld [vmem:[%s8498_s19 + $0x290] sm:$0xff]  ;;  %v7478_v46 = vpack.c.bf16 %v4930_v36, %v4898_v35  ;;  %v4873_v48 = vld [vmem:[%s8498_s19 + $0x1b8] sm:$0xff]  ;;  %v4907_v36 = vld [vmem:[%s8498_s19 + $0x2c8] sm:$0xff] }
  0xe8   : > { %7444 = vmatpush1.bf16.msra.mxu1 %v7443_v42  ;;  %5266 = vmatprep.mubr.f32.mxu0 %v7575_v0  ;;  %v7488_v49 = vpack.c.bf16 %v4932_v40, %v4900_v39 }
  0xe9   : > { %5343 = vmatprep.mubr.f32.mxu1 %v7575_v0  ;;  %7437 = vmatprep.subr.msk.bf16.mxu0 %vm7634_vm2, %v7435_v28  ;;  %v4871_v28 = vld [vmem:[%s8498_s19 + $0x1a8] sm:$0xff] }
  0xea   : > { %6851 = vmatmul.mubr.msk.f32.gmra.mrb[102].mxu0 %vm442_vm3, %v8186_v10  ;;  %7447 = vmatprep.subr.msk.bf16.mxu1 %vm7634_vm2, %v7445_v47  ;;  %v4841_v47 = vld [vmem:[%s8498_s19 + $0xb8] sm:$0xff] }
  0xeb   : > { %6855 = vmatmul.mubr.msk.f32.gmra.mrb[102].mxu1 %vm442_vm3, %v8186_v10  ;;  %7440 = vmatpush1.bf16.msk.msra.mxu0 %vm7634_vm2, %v7438_v50  ;;  %v7455_v10 = vpack.c.bf16 %v4927_v61, %v4895_v60  ;;  %v4838_v50 = vld [vmem:[%s8498_s19 + $0xa0] sm:$0xff]  ;;  %v7501_v57 = vpack.c.bf16 %v4873_v48, %v4841_v47  ;;  %v4935_v60 = vld [vmem:[%s8498_s19 + $0x3a8] sm:$0x7] }
  0xec   : > { %7450 = vmatpush1.bf16.msk.msra.mxu1 %vm7634_vm2, %v7448_v54  ;;  %5414 = vmatprep.mubr.f32.mxu0 %v7575_v0  ;;  %v7491_v54 = vpack.c.bf16 %v4871_v28, %v4839_v44  ;;  %v4941_v44 = vld [vmem:[%s8498_s19 + $0x3d8] sm:$0x7]  ;;  %v4938_v47 = vld [vmem:[%s8498_s19 + $0x3c0] sm:$0x7] }
  0xed   : > { %5491 = vmatprep.mubr.f32.mxu1 %v7575_v0  ;;  %7452 = vmatprep.subr.bf16.mxu0 %v7451_v59 }
  0xee   : > { %6858 = vmatmul.mubr.msk.f32.vlgmr.msra.gmra.mrb[104].mxu0 %vm442_vm3, %v8655_v8  ;;  %7462 = vmatprep.subr.bf16.mxu1 %v7461_v58  ;;  %v4903_v58 = vld [vmem:[%s8498_s19 + $0x2a8] sm:$0xff] }
  0xef   : > { %6862 = vmatmul.mubr.msk.f32.vlgmr.msra.gmra.mrb[104].mxu1 %vm442_vm3, %v8655_v8  ;;  %7454 = vmatpush1.bf16.msra.mxu0 %v7453_v62  ;;  %v7493_v62 = vpack.c.bf16 %v4870_v52, %v4838_v50  ;;  %v7495_v6 = vpack.c.bf16 %v4935_v60, %v4903_v58  ;;  %v4908_v50 = vld [vmem:[%s8498_s19 + $0x2d0] sm:$0xff]  ;;  %v4879_v58 = vld [vmem:[%s8498_s19 + $0x1e8] sm:$0xff] }
  0xf0   : > { %7464 = vmatpush1.bf16.msra.mxu1 %v7463_v3  ;;  %5420 = vmatprep.mubr.f32.mxu0 %v7575_v0  ;;  %v7503_v3 = vpack.c.bf16 %v4872_v56, %v4840_v55  ;;  %v4940_v52 = vld [vmem:[%s8498_s19 + $0x3d0] sm:$0x7] }
  0xf1   : > { %v8668_v19 = vpop.f32.mrb[0].mxu0  ;;  %5497 = vmatprep.mubr.f32.mxu1 %v7575_v0  ;;  %7457 = vmatprep.subr.msk.bf16.mxu0 %vm7634_vm2, %v7455_v10 }
  0xf2   : > { %9841 = vst [vmem:[#allocation2_spill] sm:$0xff] %v8668_v19  ;;  %v8675_v23 = vpop.f32.mrb[0].mxu1  ;;  %v8677_v24 = vpop.f32.mrb[1].mxu0  ;;  %6859 = vmatmul.mubr.msk.f32.gmra.mrb[106].mxu0 %vm442_vm3, %v8682_v25  ;;  %7467 = vmatprep.subr.msk.bf16.mxu1 %vm7634_vm2, %v7465_v9  ;;  %v4936_v9 = vld [vmem:[%s8498_s19 + $0x3b0] sm:$0x7] }
  0xf3   : > { %v8690_v30 = vpop.f32.mrb[1].mxu1  ;;  %6863 = vmatmul.mubr.msk.f32.gmra.mrb[106].mxu1 %vm442_vm3, %v8682_v25  ;;  %7460 = vmatpush1.bf16.msk.msra.mxu0 %vm7634_vm2, %v7458_v13  ;;  %v7505_v13 = vpack.c.bf16 %v4937_v2, %v4905_v63  ;;  %v7508_v21 = vpack.c.bf16 %v4936_v9, %v4904_v7  ;;  %v4849_v63 = vld [vmem:[%s8498_s19 + $0xf8] sm:$0xff]  ;;  %v4848_v9 = vld [vmem:[%s8498_s19 + $0xf0] sm:$0xff] }
  0xf4   : > { %7470 = vmatpush1.bf16.msk.msra.mxu1 %vm7634_vm2, %v7468_v16  ;;  %5568 = vmatprep.mubr.f32.mxu0 %v7575_v0  ;;  %v4881_v2 = vld [vmem:[%s8498_s19 + $0x1f8] sm:$0xff] }
  0xf5   : > { %v8703_v37 = vpop.f32.mrb[2].mxu0  ;;  %5645 = vmatprep.mubr.f32.mxu1 %v7575_v0  ;;  %7472 = vmatprep.subr.bf16.mxu0 %v7471_v20  ;;  %v4877_v20 = vld [vmem:[%s8498_s19 + $0x1d8] sm:$0xff] }
  0xf6   : > { %9842 = vst [vmem:[#allocation3_spill] sm:$0xff] %v8703_v37  ;;  %v8708_v41 = vpop.f32.mrb[2].mxu1  ;;  %v8710_v42 = vpop.f32.mrb[3].mxu0  ;;  %6866 = vmatmul.mubr.msk.f32.vlgmr.msra.gmra.mrb[108].mxu0 %vm442_vm3, %v8655_v8  ;;  %7482 = vmatprep.subr.bf16.mxu1 %v7481_v26  ;;  %v4874_v26 = vld [vmem:[%s8498_s19 + $0x1c0] sm:$0xff]  ;;  %v7521_v35 = vpack.c.bf16 %v4877_v20, %v4845_v18  ;;  %v4911_v18 = vld [vmem:[%s8498_s19 + $0x2e8] sm:$0xff] }
  0xf7   : > { %v8716_v45 = vpop.f32.mrb[3].mxu1  ;;  %6870 = vmatmul.mubr.msk.f32.vlgmr.msra.gmra.mrb[108].mxu1 %vm442_vm3, %v8655_v8  ;;  %7474 = vmatpush1.bf16.msra.mxu0 %v7473_v31  ;;  %v4844_v31 = vld [vmem:[%s8498_s19 + $0xd0] sm:$0xff]  ;;  %v7513_v40 = vpack.c.bf16 %v4874_v26, %v4842_v22  ;;  %v4943_v20 = vld [vmem:[%s8498_s19 + $0x3e8] sm:$0x7]  ;;  %v7533_v22 = vpack.c.bf16 %v4878_v5, %v4846_v4  ;;  %v4913_v26 = vld [vmem:[%s8498_s19 + $0x2f8] sm:$0xff] }
  0xf8   : > { %7484 = vmatpush1.bf16.msra.mxu1 %v7483_v34  ;;  %5574 = vmatprep.mubr.f32.mxu0 %v7575_v0  ;;  %v7523_v28 = vpack.c.bf16 %v4876_v32, %v4844_v31  ;;  %v4910_v32 = vld [vmem:[%s8498_s19 + $0x2e0] sm:$0xff] }
  0xf9   : > { %v8725_v53 = vpop.f32.mrb[4].mxu0  ;;  %5651 = vmatprep.mubr.f32.mxu1 %v7575_v0  ;;  %7477 = vmatprep.subr.msk.bf16.mxu0 %vm7634_vm2, %v7475_v38  ;;  %v4939_v38 = vld [vmem:[%s8498_s19 + $0x3c8] sm:$0x7] }
  0xfa   : > { %9843 = vst [vmem:[#allocation4_spill] sm:$0xff] %v8725_v53  ;;  %v8732_v59 = vpop.f32.mrb[4].mxu1  ;;  %v8734_v51 = vpop.f32.mrb[5].mxu0  ;;  %6867 = vmatmul.mubr.msk.f32.gmra.mrb[110].mxu0 %vm442_vm3, %v8682_v25  ;;  %7487 = vmatprep.subr.msk.bf16.mxu1 %vm7634_vm2, %v7485_v43  ;;  %v4909_v43 = vld [vmem:[%s8498_s19 + $0x2d8] sm:$0xff] }
  0xfb   : > { %v8742_v61 = vpop.f32.mrb[5].mxu1  ;;  %6871 = vmatmul.mubr.msk.f32.gmra.mrb[110].mxu1 %vm442_vm3, %v8682_v25  ;;  %7480 = vmatpush1.bf16.msk.msra.mxu0 %vm7634_vm2, %v7478_v46  ;;  %v4906_v46 = vld [vmem:[%s8498_s19 + $0x2c0] sm:$0xff]  ;;  %v7525_v56 = vpack.c.bf16 %v4941_v44, %v4909_v43  ;;  %v4944_v43 = vld [vmem:[%s8498_s19 + $0x3f0] sm:$0x7] }
  0xfc   : > { %7490 = vmatpush1.bf16.msk.msra.mxu1 %vm7634_vm2, %v7488_v49  ;;  %5722 = vmatprep.mubr.f32.mxu0 %v7575_v0  ;;  %v7515_v49 = vpack.c.bf16 %v4939_v38, %v4907_v36  ;;  %v7535_v38 = vpack.c.bf16 %v4943_v20, %v4911_v18 }
  0xfd   : > { %v8755_v10 = vpop.f32.mrb[6].mxu0  ;;  %5799 = vmatprep.mubr.f32.mxu1 %v7575_v0  ;;  %7492 = vmatprep.subr.bf16.mxu0 %v7491_v54 }
  0xfe   : > { %9844 = vst [vmem:[#allocation5_spill] sm:$0xff] %v8755_v10  ;;  %v8760_v11 = vpop.f32.mrb[6].mxu1  ;;  %v8762_v12 = vpop.f32.mrb[7].mxu0  ;;  %6874 = vmatmul.mubr.msk.f32.vlgmr.msra.gmra.mrb[112].mxu0 %vm442_vm3, %v8655_v8  ;;  %7502 = vmatprep.subr.bf16.mxu1 %v7501_v57  ;;  %v4847_v57 = vld [vmem:[%s8498_s19 + $0xe8] sm:$0xff] }
  0xff   : > { %v8768_v16 = vpop.f32.mrb[7].mxu1  ;;  %6878 = vmatmul.mubr.msk.f32.vlgmr.msra.gmra.mrb[112].mxu1 %vm442_vm3, %v8655_v8  ;;  %7494 = vmatpush1.bf16.msra.mxu0 %v7493_v62  ;;  %v7518_v62 = vpack.c.bf16 %v4938_v47, %v4906_v46  ;;  %v7531_v7 = vpack.c.bf16 %v4879_v58, %v4847_v57 }
 0x100   : > { %7504 = vmatpush1.bf16.msra.mxu1 %v7503_v3  ;;  %5728 = vmatprep.mubr.f32.mxu0 %v7575_v0  ;;  %v7528_v3 = vpack.c.bf16 %v4940_v52, %v4908_v50 }
 0x101   : > { %v8777_v27 = vpop.f32.mrb[8].mxu0  ;;  %5805 = vmatprep.mubr.f32.mxu1 %v7575_v0  ;;  %7497 = vmatprep.subr.msk.bf16.mxu0 %vm7634_vm2, %v7495_v6 }
 0x102   : > { %9845 = vst [vmem:[#allocation6_spill] sm:$0xff] %v8777_v27  ;;  %v8784_v33 = vpop.f32.mrb[8].mxu1  ;;  %v8786_v34 = vpop.f32.mrb[9].mxu0  ;;  %6875 = vmatmul.mubr.msk.f32.gmra.mrb[114].mxu0 %vm442_vm3, %v8682_v25  ;;  %7507 = vmatprep.subr.msk.bf16.mxu1 %vm7634_vm2, %v7505_v13  ;;  %v4880_v13 = vld [vmem:[%s8498_s19 + $0x1f0] sm:$0xff] }
 0x103   : > { %v8794_v39 = vpop.f32.mrb[9].mxu1  ;;  %6879 = vmatmul.mubr.msk.f32.gmra.mrb[114].mxu1 %vm442_vm3, %v8682_v25  ;;  %7500 = vmatpush1.bf16.msk.msra.mxu0 %vm7634_vm2, %v7498_v17  ;;  %v7541_v17 = vpack.c.bf16 %v4881_v2, %v4849_v63  ;;  %v7543_v31 = vpack.c.bf16 %v4880_v13, %v4848_v9  ;;  %v7577_v2 = vmov 0  }
 0x104   : > { %7510 = vmatpush1.bf16.msk.msra.mxu1 %vm7634_vm2, %v7508_v21  ;;  %5876 = vmatprep.mubr.f32.mxu0 %v7575_v0 }
 0x105   : > { %v8807_v48 = vpop.f32.mrb[10].mxu0  ;;  %5953 = vmatprep.mubr.f32.mxu1 %v7575_v0  ;;  %7512 = vmatprep.subr.bf16.mxu0 %v7511_v29  ;;  %v4945_v29 = vld [vmem:[%s8498_s19 + $0x3f8] sm:$0x7] }
 0x106   : > { %9846 = vst [vmem:[#allocation7_spill] sm:$0xff] %v8807_v48  ;;  %v8812_v54 = vpop.f32.mrb[10].mxu1  ;;  %v8814_v55 = vpop.f32.mrb[11].mxu0  ;;  %6882 = vmatmul.mubr.msk.f32.vlgmr.msra.gmra.mrb[116].mxu0 %vm442_vm3, %v8655_v8  ;;  %7522 = vmatprep.subr.bf16.mxu1 %v7521_v35  ;;  %v4942_v35 = vld [vmem:[%s8498_s19 + $0x3e0] sm:$0x7]  ;;  %v7545_v46 = vpack.c.bf16 %v4945_v29, %v4913_v26 }
 0x107   : > { %v8820_v60 = vpop.f32.mrb[11].mxu1  ;;  %6886 = vmatmul.mubr.msk.f32.vlgmr.msra.gmra.mrb[116].mxu1 %vm442_vm3, %v8655_v8  ;;  %7514 = vmatpush1.bf16.msra.mxu0 %v7513_v40  ;;  %v4912_v40 = vld [vmem:[%s8498_s19 + $0x2f0] sm:$0xff] }
 0x108   : > { %7524 = vmatpush1.bf16.msra.mxu1 %v7523_v28  ;;  %5882 = vmatprep.mubr.f32.mxu0 %v7575_v0  ;;  %v7548_v50 = vpack.c.bf16 %v4944_v43, %v4912_v40 }
 0x109   : > { %v8829_v6 = vpop.f32.mrb[12].mxu0  ;;  %5959 = vmatprep.mubr.f32.mxu1 %v7575_v0  ;;  %7517 = vmatprep.subr.msk.bf16.mxu0 %vm7634_vm2, %v7515_v49  ;;  %v7538_v49 = vpack.c.bf16 %v4942_v35, %v4910_v32 }
 0x10a   : > { %9847 = vst [vmem:[#allocation8_spill] sm:$0xff] %v8829_v6  ;;  %v8836_v14 = vpop.f32.mrb[12].mxu1  ;;  %v8838_v15 = vpop.f32.mrb[13].mxu0  ;;  %6883 = vmatmul.mubr.msk.f32.gmra.mrb[118].mxu0 %vm442_vm3, %v8682_v25  ;;  %7527 = vmatprep.subr.msk.bf16.mxu1 %vm7634_vm2, %v7525_v56 }
 0x10b   : > { %v8846_v21 = vpop.f32.mrb[13].mxu1  ;;  %6887 = vmatmul.mubr.msk.f32.gmra.mrb[118].mxu1 %vm442_vm3, %v8682_v25  ;;  %7520 = vmatpush1.bf16.msk.msra.mxu0 %vm7634_vm2, %v7518_v62  ;;  %v6338_v62 = vld [vmem:[%s9756_s5] sm:$0xff] }
 0x10c   : > { %7530 = vmatpush1.bf16.msk.msra.mxu1 %vm7634_vm2, %v7528_v3  ;;  %6030 = vmatprep.mubr.f32.mxu0 %v7575_v0 }
 0x10d   : > { %v8859_v36 = vpop.f32.mrb[14].mxu0  ;;  %6107 = vmatprep.mubr.f32.mxu1 %v7575_v0  ;;  %7532 = vmatprep.subr.bf16.mxu0 %v7531_v7 }
 0x10e   : > { %9848 = vst [vmem:[#allocation9_spill] sm:$0xff] %v8859_v36  ;;  %v8864_v44 = vpop.f32.mrb[14].mxu1  ;;  %v8866_v28 = vpop.f32.mrb[15].mxu0  ;;  %6890 = vmatmul.mubr.msk.f32.vlgmr.msra.gmra.mrb[120].mxu0 %vm442_vm3, %v8655_v8  ;;  %7542 = vmatprep.subr.bf16.mxu1 %v7541_v17 }
 0x10f   : > { %v8870_v47 = vpop.f32.mrb[15].mxu1  ;;  %6894 = vmatmul.mubr.msk.f32.vlgmr.msra.gmra.mrb[120].mxu1 %vm442_vm3, %v8655_v8  ;;  %7534 = vmatpush1.bf16.msra.mxu0 %v7533_v22 }
 0x110   : > { %7544 = vmatpush1.bf16.msra.mxu1 %v7543_v31  ;;  %6036 = vmatprep.mubr.f32.mxu0 %v7575_v0 }
 0x111   : > { %v8875_v52 = vpop.f32.mrb[16].mxu0  ;;  %6113 = vmatprep.mubr.f32.mxu1 %v7575_v0  ;;  %7537 = vmatprep.subr.msk.bf16.mxu0 %vm7634_vm2, %v7535_v38 }
 0x112   : > { %9849 = vst [vmem:[#allocation10_spill] sm:$0xff] %v8875_v52  ;;  %v8880_v56 = vpop.f32.mrb[16].mxu1  ;;  %v8882_v57 = vpop.f32.mrb[17].mxu0  ;;  %6891 = vmatmul.mubr.msk.f32.gmra.mrb[122].mxu0 %vm442_vm3, %v8682_v25  ;;  %7547 = vmatprep.subr.msk.bf16.mxu1 %vm7634_vm2, %v7545_v46 }
 0x113   : > { %v8888_v58 = vpop.f32.mrb[17].mxu1  ;;  %6895 = vmatmul.mubr.msk.f32.gmra.mrb[122].mxu1 %vm442_vm3, %v8682_v25  ;;  %7540 = vmatpush1.bf16.msk.msra.mxu0 %vm7634_vm2, %v7538_v49 }
 0x114   : > { %7550 = vmatpush1.bf16.msk.msra.mxu1 %vm7634_vm2, %v7548_v50  ;;  %6184 = vmatprep.mubr.f32.mxu0 %v7575_v0 }
 0x115   : > { %v8900_v63 = vpop.f32.mrb[18].mxu0  ;;  %6261 = vmatprep.mubr.f32.mxu1 %v7575_v0  ;;  %7562 = vset.pattern.permute.xlu0 %v7577_v2 }
 0x116   : > { %9850 = vst [vmem:[#allocation11_spill] sm:$0xff] %v8900_v63  ;;  %v8903_v3 = vpop.f32.mrb[18].mxu1  ;;  %v8905_v4 = vpop.f32.mrb[19].mxu0  ;;  %6898 = vmatmul.mubr.msk.f32.vlgmr.msra.gmra.mrb[124].mxu0 %vm442_vm3, %v8655_v8  ;;  %6342 = vperm.xlu0 %7562, %v6338_v62  }
 0x117   : > { %v8909_v5 = vpop.f32.mrb[19].mxu1  ;;  %6902 = vmatmul.mubr.msk.f32.vlgmr.msra.gmra.mrb[124].mxu1 %vm442_vm3, %v8655_v8  ;;  %6190 = vmatprep.mubr.f32.mxu0 %v7575_v0 }
 0x118   : > { %6267 = vmatprep.mubr.f32.mxu1 %v7575_v0 }
 0x119   : > { %v8918_v7 = vpop.f32.mrb[20].mxu0 }
 0x11a   : > { %9851 = vst [vmem:[#allocation12_spill] sm:$0xff] %v8918_v7  ;;  %v8920_v9 = vpop.f32.mrb[20].mxu1  ;;  %v8922_v13 = vpop.f32.mrb[21].mxu0  ;;  %6899 = vmatmul.mubr.msk.f32.gmra.mrb[126].mxu0 %vm442_vm3, %v8682_v25  ;;  %6347 = vperm.xlu0 %7562, %v6339_v1  }
 0x11b   : > { %v8926_v17 = vpop.f32.mrb[21].mxu1  ;;  %6903 = vmatmul.mubr.msk.f32.gmra.mrb[126].mxu1 %vm442_vm3, %v8682_v25 }
 0x11d   : > { %v8930_v8 = vpop.f32.mrb[22].mxu0 }
 0x11e   : > { %9852 = vst [vmem:[#allocation13_spill] sm:$0xff] %v8930_v8  ;;  %v8932_v18 = vpop.f32.mrb[22].mxu1  ;;  %v8934_v0 = vpop.f32.mrb[23].mxu0 }
 0x11f   : > { %v8936_v20 = vpop.f32.mrb[23].mxu1 }
 0x120   : > { %9853 = vst [vmem:[#allocation14_spill] sm:$0xff] %v8936_v20 }
 0x121   : > { %v8938_v22 = vpop.f32.mrb[24].mxu0 }
 0x122   : > { %9854 = vst [vmem:[#allocation15_spill] sm:$0xff] %v8938_v22  ;;  %v8940_v26 = vpop.f32.mrb[24].mxu1  ;;  %v8942_v29 = vpop.f32.mrb[25].mxu0 }
 0x123   : > { %9855 = vst [vmem:[#allocation16_spill] sm:$0xff] %v8940_v26  ;;  %9856 = vst [vmem:[#allocation17_spill] sm:$0xff] %v8942_v29  ;;  %v8944_v31 = vpop.f32.mrb[25].mxu1 }
 0x124   : > { %9857 = vst [vmem:[#allocation18_spill] sm:$0xff] %v8944_v31 }
 0x125   : > { %v8946_v32 = vpop.f32.mrb[26].mxu0 }
 0x126   : > { %9858 = vst [vmem:[#allocation19_spill] sm:$0xff] %v8946_v32  ;;  %v8948_v35 = vpop.f32.mrb[26].mxu1  ;;  %v8950_v25 = vpop.f32.mrb[27].mxu0 }
 0x127   : > { %9859 = vst [vmem:[#allocation20_spill] sm:$0xff] %v8948_v35  ;;  %9860 = vst [vmem:[#allocation21_spill] sm:$0xff] %v8950_v25  ;;  %v8952_v38 = vpop.f32.mrb[27].mxu1  ;;  %v9931_v25 = vld [vmem:[#allocation2_spill] sm:$0xff] }
 0x128   : > { %9861 = vst [vmem:[#allocation22_spill] sm:$0xff] %v8952_v38 }
 0x129   : > { %v8954_v40 = vpop.f32.mrb[28].mxu0 }
 0x12a   : > { %9862 = vst [vmem:[#allocation23_spill] sm:$0xff] %v8954_v40  ;;  %v8956_v43 = vpop.f32.mrb[28].mxu1  ;;  %v8958_v46 = vpop.f32.mrb[29].mxu0 }
 0x12b   : > { %9863 = vst [vmem:[#allocation24_spill] sm:$0xff] %v8956_v43  ;;  %9864 = vst [vmem:[#allocation25_spill] sm:$0xff] %v8958_v46  ;;  %v8960_v49 = vpop.f32.mrb[29].mxu1 }
 0x12c   : > { %9865 = vst [vmem:[#allocation26_spill] sm:$0xff] %v8960_v49 }
 0x12d   : > { %v8962_v50 = vpop.f32.mrb[30].mxu0 }
 0x12e   : > { %9866 = vst [vmem:[#allocation27_spill] sm:$0xff] %v8962_v50  ;;  %v8964_v62 = vpop.f32.mrb[30].mxu1  ;;  %v8966_v2 = vpop.f32.mrb[31].mxu0 }
 0x12f   : > { %9867 = vst [vmem:[#allocation28_spill] sm:$0xff] %v8964_v62  ;;  %9868 = vst [vmem:[#allocation29_spill] sm:$0xff] %v8966_v2  ;;  %v8968_v1 = vpop.f32.mrb[31].mxu1 }
 0x130   : > { %9869 = vst [vmem:[#allocation30_spill] sm:$0xff] %v8968_v1 }
 0x131   : > { %v8970_v35 = vpop.f32.mrb[32].mxu0 }
 0x132   : > { %9870 = vst [vmem:[#allocation31_spill] sm:$0xff] %v8970_v35  ;;  %v8974_v40 = vpop.f32.mrb[32].mxu1  ;;  %v8976_v43 = vpop.f32.mrb[33].mxu0 }
 0x133   : > { %9871 = vst [vmem:[#allocation32_spill] sm:$0xff] %v8976_v43  ;;  %v8982_v62 = vpop.f32.mrb[33].mxu1  ;;  %v9935_v26 = vmax.f32 %v8675_v23, %v8974_v40 }
 0x134   : > { %9872 = vst [vmem:[#allocation33_spill] sm:$0xff] %v8982_v62 }
 0x135   : > { %v8986_v2 = vpop.f32.mrb[34].mxu0 }
 0x136   : > { %9873 = vst [vmem:[#allocation34_spill] sm:$0xff] %v8986_v2  ;;  %v8990_v35 = vpop.f32.mrb[34].mxu1  ;;  %v8992_v19 = vpop.f32.mrb[35].mxu0 }
 0x137   : > { %9874 = vst [vmem:[#allocation35_spill] sm:$0xff] %v8992_v19  ;;  %v8998_v43 = vpop.f32.mrb[35].mxu1 }
 0x138   : > { %9875 = vst [vmem:[#allocation36_spill] sm:$0xff] %v8998_v43 }
 0x139   : > { %v9002_v62 = vpop.f32.mrb[36].mxu0 }
 0x13a   : > { %9876 = vst [vmem:[#allocation37_spill] sm:$0xff] %v9002_v62  ;;  %v9006_v2 = vpop.f32.mrb[36].mxu1  ;;  %v9008_v37 = vpop.f32.mrb[37].mxu0  ;;  %v9936_v50 = vld [vmem:[#allocation32_spill] sm:$0xff] }
 0x13b   : > { %9877 = vst [vmem:[#allocation38_spill] sm:$0xff] %v9008_v37  ;;  %v9014_v19 = vpop.f32.mrb[37].mxu1  ;;  %v9938_v1 = vld [vmem:[#allocation33_spill] sm:$0xff] }
 0x13c   : > { %9878 = vst [vmem:[#allocation39_spill] sm:$0xff] %v9014_v19 }
 0x13d   : > { %v9018_v43 = vpop.f32.mrb[38].mxu0 }
 0x13e   : > { %9879 = vst [vmem:[#allocation40_spill] sm:$0xff] %v9018_v43  ;;  %v9022_v62 = vpop.f32.mrb[38].mxu1  ;;  %v9024_v53 = vpop.f32.mrb[39].mxu0 }
 0x13f   : > { %9880 = vst [vmem:[#allocation41_spill] sm:$0xff] %v9024_v53  ;;  %v9030_v37 = vpop.f32.mrb[39].mxu1 }
 0x140   : > { %9881 = vst [vmem:[#allocation42_spill] sm:$0xff] %v9030_v37 }
 0x141   : > { %v9034_v19 = vpop.f32.mrb[40].mxu0 }
 0x142   : > { %9882 = vst [vmem:[#allocation43_spill] sm:$0xff] %v9034_v19  ;;  %v9038_v43 = vpop.f32.mrb[40].mxu1  ;;  %v9040_v10 = vpop.f32.mrb[41].mxu0 }
 0x143   : > { %9883 = vst [vmem:[#allocation44_spill] sm:$0xff] %v9040_v10  ;;  %v9046_v53 = vpop.f32.mrb[41].mxu1 }
 0x144   : > { %9884 = vst [vmem:[#allocation45_spill] sm:$0xff] %v9046_v53 }
 0x145   : > { %v9050_v37 = vpop.f32.mrb[42].mxu0 }
 0x146   : > { %9885 = vst [vmem:[#allocation46_spill] sm:$0xff] %v9050_v37  ;;  %v9054_v19 = vpop.f32.mrb[42].mxu1  ;;  %v9056_v27 = vpop.f32.mrb[43].mxu0 }
 0x147   : > { %9886 = vst [vmem:[#allocation47_spill] sm:$0xff] %v9056_v27  ;;  %v9062_v10 = vpop.f32.mrb[43].mxu1 }
 0x148   : > { %9887 = vst [vmem:[#allocation48_spill] sm:$0xff] %v9062_v10 }
 0x149   : > { %v9066_v53 = vpop.f32.mrb[44].mxu0 }
 0x14a   : > { %9888 = vst [vmem:[#allocation49_spill] sm:$0xff] %v9066_v53  ;;  %v9070_v37 = vpop.f32.mrb[44].mxu1  ;;  %v9072_v48 = vpop.f32.mrb[45].mxu0 }
 0x14b   : > { %9889 = vst [vmem:[#allocation50_spill] sm:$0xff] %v9072_v48  ;;  %v9078_v27 = vpop.f32.mrb[45].mxu1 }
 0x14c   : > { %9890 = vst [vmem:[#allocation51_spill] sm:$0xff] %v9078_v27 }
 0x14d   : > { %v9082_v10 = vpop.f32.mrb[46].mxu0 }
 0x14e   : > { %9891 = vst [vmem:[#allocation52_spill] sm:$0xff] %v9082_v10  ;;  %v9086_v53 = vpop.f32.mrb[46].mxu1  ;;  %v9088_v6 = vpop.f32.mrb[47].mxu0 }
 0x14f   : > { %9892 = vst [vmem:[#allocation53_spill] sm:$0xff] %v9088_v6  ;;  %v9094_v48 = vpop.f32.mrb[47].mxu1 }
 0x150   : > { %9893 = vst [vmem:[#allocation54_spill] sm:$0xff] %v9094_v48 }
 0x151   : > { %v9098_v27 = vpop.f32.mrb[48].mxu0 }
 0x152   : > { %9894 = vst [vmem:[#allocation55_spill] sm:$0xff] %v9098_v27  ;;  %v9102_v10 = vpop.f32.mrb[48].mxu1  ;;  %v9104_v36 = vpop.f32.mrb[49].mxu0 }
 0x153   : > { %9895 = vst [vmem:[#allocation56_spill] sm:$0xff] %v9104_v36  ;;  %v9110_v6 = vpop.f32.mrb[49].mxu1 }
 0x154   : > { %9896 = vst [vmem:[#allocation57_spill] sm:$0xff] %v9110_v6 }
 0x155   : > { %v9114_v48 = vpop.f32.mrb[50].mxu0 }
 0x156   : > { %9897 = vst [vmem:[#allocation58_spill] sm:$0xff] %v9114_v48  ;;  %v9118_v27 = vpop.f32.mrb[50].mxu1  ;;  %v9120_v52 = vpop.f32.mrb[51].mxu0 }
 0x157   : > { %9898 = vst [vmem:[#allocation59_spill] sm:$0xff] %v9120_v52  ;;  %v9126_v36 = vpop.f32.mrb[51].mxu1 }
 0x158   : > { %9899 = vst [vmem:[#allocation60_spill] sm:$0xff] %v9126_v36 }
 0x159   : > { %v9130_v6 = vpop.f32.mrb[52].mxu0 }
 0x15a   : > { %9900 = vst [vmem:[#allocation61_spill] sm:$0xff] %v9130_v6  ;;  %v9134_v48 = vpop.f32.mrb[52].mxu1  ;;  %v9136_v63 = vpop.f32.mrb[53].mxu0 }
 0x15b   : > { %9901 = vst [vmem:[#allocation62_spill] sm:$0xff] %v9136_v63  ;;  %v9142_v52 = vpop.f32.mrb[53].mxu1 }
 0x15c   : > { %9902 = vst [vmem:[#allocation63_spill] sm:$0xff] %v9142_v52 }
 0x15d   : > { %v9146_v36 = vpop.f32.mrb[54].mxu0 }
 0x15e   : > { %9903 = vst [vmem:[#allocation64_spill] sm:$0xff] %v9146_v36  ;;  %v9150_v6 = vpop.f32.mrb[54].mxu1  ;;  %v9152_v7 = vpop.f32.mrb[55].mxu0 }
 0x15f   : > { %9904 = vst [vmem:[#allocation65_spill] sm:$0xff] %v9152_v7  ;;  %v9158_v63 = vpop.f32.mrb[55].mxu1 }
 0x160   : > { %9905 = vst [vmem:[#allocation66_spill] sm:$0xff] %v9158_v63 }
 0x161   : > { %v9162_v52 = vpop.f32.mrb[56].mxu0 }
 0x162   : > { %9906 = vst [vmem:[#allocation67_spill] sm:$0xff] %v9162_v52  ;;  %v9166_v36 = vpop.f32.mrb[56].mxu1  ;;  %v9168_v8 = vpop.f32.mrb[57].mxu0 }
 0x163   : > { %9907 = vst [vmem:[#allocation68_spill] sm:$0xff] %v9166_v36  ;;  %9908 = vst [vmem:[#allocation69_spill] sm:$0xff] %v9168_v8  ;;  %v9174_v7 = vpop.f32.mrb[57].mxu1  ;;  %v9932_v36 = vld [vmem:[#allocation31_spill] sm:$0xff] }
 0x164   : > { %9909 = vst [vmem:[#allocation70_spill] sm:$0xff] %v9174_v7  ;;  %v9933_v20 = vmax.f32 %v9931_v25, %v9932_v36 }
 0x165   : > { %v9178_v63 = vpop.f32.mrb[58].mxu0 }
 0x166   : > { %9910 = vst [vmem:[#allocation71_spill] sm:$0xff] %v9178_v63  ;;  %v9182_v52 = vpop.f32.mrb[58].mxu1  ;;  %v9184_v22 = vpop.f32.mrb[59].mxu0 }
 0x167   : > { %9911 = vst [vmem:[#allocation72_spill] sm:$0xff] %v9182_v52  ;;  %9912 = vst [vmem:[#allocation73_spill] sm:$0xff] %v9184_v22  ;;  %v9190_v8 = vpop.f32.mrb[59].mxu1  ;;  %v9927_v52 = vld [vmem:[#allocation28_spill] sm:$0xff] }
 0x168   : > { %9914 = vst [vmem:[#allocation74_spill] sm:$0xff] %v9190_v8 }
 0x169   : > { %v9194_v7 = vpop.f32.mrb[60].mxu0 }
 0x16a   : > { %9916 = vst [vmem:[#allocation75_spill] sm:$0xff] %v9194_v7  ;;  %v9198_v63 = vpop.f32.mrb[60].mxu1  ;;  %v9200_v32 = vpop.f32.mrb[61].mxu0 }
 0x16b   : > { %9918 = vst [vmem:[#allocation76_spill] sm:$0xff] %v9198_v63  ;;  %9919 = vst [vmem:[#allocation77_spill] sm:$0xff] %v9200_v32  ;;  %v9206_v22 = vpop.f32.mrb[61].mxu1 }
 0x16c   : > { %9921 = vst [vmem:[#allocation78_spill] sm:$0xff] %v9206_v22 }
 0x16d   : > { %v9210_v8 = vpop.f32.mrb[62].mxu0 }
 0x16e   : > { %9923 = vst [vmem:[#allocation79_spill] sm:$0xff] %v9210_v8  ;;  %v9214_v7 = vpop.f32.mrb[62].mxu1  ;;  %v9216_v31 = vpop.f32.mrb[63].mxu0 }
 0x16f   : > { %9925 = vst [vmem:[#allocation80_spill] sm:$0xff] %v9214_v7  ;;  %9926 = vst [vmem:[#allocation81_spill] sm:$0xff] %v9216_v31  ;;  %v9222_v32 = vpop.f32.mrb[63].mxu1  ;;  %v9937_v31 = vmax.f32 %v8677_v24, %v9936_v50 }
 0x170   : > { %9929 = vst [vmem:[#allocation28_spill] sm:$0xff] %v9222_v32  ;;  %v9939_v32 = vmax.f32 %v8690_v30, %v9938_v1 }
 0x171   : > { %v3588_v22 = vpop.f32.mrb[64].mxu0 }
 0x172   : > { %v9229_v38 = vmax.f32 %v9933_v20, %v3588_v22  ;;  %v3665_v8 = vpop.f32.mrb[64].mxu1  ;;  %v3590_v29 = vpop.f32.mrb[65].mxu0  ;;  %v9940_v20 = vld [vmem:[#allocation3_spill] sm:$0xff]  ;;  %v9941_v22 = vld [vmem:[#allocation34_spill] sm:$0xff] }
 0x173   : > { %v9234_v49 = vmax.f32 %v9935_v26, %v3665_v8  ;;  %v9239_v63 = vmax.f32 %v9937_v31, %v3590_v29  ;;  %v3667_v7 = vpop.f32.mrb[65].mxu1  ;;  %v9942_v25 = vmax.f32 %v9940_v20, %v9941_v22  ;;  %v9943_v26 = vmax.f32 %v8708_v41, %v8990_v35  ;;  %v9944_v29 = vld [vmem:[#allocation35_spill] sm:$0xff]  ;;  %v9949_v20 = vld [vmem:[#allocation37_spill] sm:$0xff] }
 0x174   : > { %9934 = vst [vmem:[#allocation2_spill] sm:$0xff] %v9229_v38  ;;  %v9244_v46 = vmax.f32 %v9939_v32, %v3667_v7  ;;  %v9945_v31 = vmax.f32 %v8710_v42, %v9944_v29  ;;  %v9946_v7 = vld [vmem:[#allocation36_spill] sm:$0xff] }
 0x175   : > { %v3594_v36 = vpop.f32.mrb[66].mxu0  ;;  %v9947_v32 = vmax.f32 %v8716_v45, %v9946_v7 }
 0x176   : > { %v9249_v38 = vmax.f32 %v9942_v25, %v3594_v36  ;;  %v3671_v23 = vpop.f32.mrb[66].mxu1  ;;  %v3596_v8 = vpop.f32.mrb[67].mxu0  ;;  %v9948_v36 = vld [vmem:[#allocation4_spill] sm:$0xff] }
 0x177   : > { %v9254_v24 = vmax.f32 %v9943_v26, %v3671_v23  ;;  %v9259_v40 = vmax.f32 %v9945_v31, %v3596_v8  ;;  %v3673_v30 = vpop.f32.mrb[67].mxu1  ;;  %v9950_v22 = vmax.f32 %v9948_v36, %v9949_v20  ;;  %v9951_v23 = vmax.f32 %v8732_v59, %v9006_v2  ;;  %v9952_v8 = vld [vmem:[#allocation38_spill] sm:$0xff]  ;;  %v9954_v31 = vld [vmem:[#allocation39_spill] sm:$0xff]  ;;  %v9957_v36 = vld [vmem:[#allocation40_spill] sm:$0xff] }
 0x178   : > { %v9264_v50 = vmax.f32 %v9947_v32, %v3673_v30  ;;  %v9953_v26 = vmax.f32 %v8734_v51, %v9952_v8  ;;  %v9955_v30 = vmax.f32 %v8742_v61, %v9954_v31 }
 0x179   : > { %v3742_v1 = vpop.f32.mrb[68].mxu0 }
 0x17a   : > { %v9269_v25 = vmax.f32 %v9950_v22, %v3742_v1  ;;  %v3819_v41 = vpop.f32.mrb[68].mxu1  ;;  %v3744_v35 = vpop.f32.mrb[69].mxu0  ;;  %v9956_v1 = vld [vmem:[#allocation5_spill] sm:$0xff] }
 0x17b   : > { %v9274_v42 = vmax.f32 %v9951_v23, %v3819_v41  ;;  %v9279_v29 = vmax.f32 %v9953_v26, %v3744_v35  ;;  %v3821_v45 = vpop.f32.mrb[69].mxu1  ;;  %v9958_v20 = vmax.f32 %v9956_v1, %v9957_v36  ;;  %v9959_v41 = vmax.f32 %v8760_v11, %v9022_v62  ;;  %v9960_v35 = vld [vmem:[#allocation41_spill] sm:$0xff]  ;;  %v9962_v26 = vld [vmem:[#allocation42_spill] sm:$0xff]  ;;  %v9965_v1 = vld [vmem:[#allocation43_spill] sm:$0xff] }
 0x17c   : > { %v9284_v7 = vmax.f32 %v9955_v30, %v3821_v45  ;;  %v9961_v23 = vmax.f32 %v8762_v12, %v9960_v35  ;;  %v9963_v45 = vmax.f32 %v8768_v16, %v9962_v26 }
 0x17d   : > { %v3748_v32 = vpop.f32.mrb[70].mxu0 }
 0x17e   : > { %v9289_v22 = vmax.f32 %v9958_v20, %v3748_v32  ;;  %v3825_v59 = vpop.f32.mrb[70].mxu1  ;;  %v3750_v2 = vpop.f32.mrb[71].mxu0  ;;  %v9964_v32 = vld [vmem:[#allocation6_spill] sm:$0xff] }
 0x17f   : > { %v9294_v51 = vmax.f32 %v9959_v41, %v3825_v59  ;;  %v9299_v8 = vmax.f32 %v9961_v23, %v3750_v2  ;;  %v3827_v61 = vpop.f32.mrb[71].mxu1  ;;  %v9966_v36 = vmax.f32 %v9964_v32, %v9965_v1  ;;  %v9967_v59 = vmax.f32 %v8784_v33, %v9038_v43  ;;  %v9968_v2 = vld [vmem:[#allocation44_spill] sm:$0xff]  ;;  %v9970_v23 = vld [vmem:[#allocation45_spill] sm:$0xff]  ;;  %v9973_v32 = vld [vmem:[#allocation46_spill] sm:$0xff] }
 0x180   : > { %v9304_v31 = vmax.f32 %v9963_v45, %v3827_v61  ;;  %v9969_v41 = vmax.f32 %v8786_v34, %v9968_v2  ;;  %v9971_v61 = vmax.f32 %v8794_v39, %v9970_v23 }
 0x181   : > { %v3896_v30 = vpop.f32.mrb[72].mxu0 }
 0x182   : > { %v9309_v20 = vmax.f32 %v9966_v36, %v3896_v30  ;;  %v3973_v11 = vpop.f32.mrb[72].mxu1  ;;  %v3898_v62 = vpop.f32.mrb[73].mxu0  ;;  %v9972_v30 = vld [vmem:[#allocation7_spill] sm:$0xff] }
 0x183   : > { %v9314_v12 = vmax.f32 %v9967_v59, %v3973_v11  ;;  %v9319_v35 = vmax.f32 %v9969_v41, %v3898_v62  ;;  %v3975_v16 = vpop.f32.mrb[73].mxu1  ;;  %v9974_v1 = vmax.f32 %v9972_v30, %v9973_v32  ;;  %v9975_v11 = vmax.f32 %v8812_v54, %v9054_v19  ;;  %v9976_v62 = vld [vmem:[#allocation47_spill] sm:$0xff]  ;;  %v9978_v41 = vld [vmem:[#allocation48_spill] sm:$0xff]  ;;  %v9981_v30 = vld [vmem:[#allocation49_spill] sm:$0xff] }
 0x184   : > { %v9324_v26 = vmax.f32 %v9971_v61, %v3975_v16  ;;  %v9977_v59 = vmax.f32 %v8814_v55, %v9976_v62  ;;  %v9979_v16 = vmax.f32 %v8820_v60, %v9978_v41 }
 0x185   : > { %v3902_v45 = vpop.f32.mrb[74].mxu0 }
 0x186   : > { %v9329_v36 = vmax.f32 %v9974_v1, %v3902_v45  ;;  %v3979_v33 = vpop.f32.mrb[74].mxu1  ;;  %v3904_v43 = vpop.f32.mrb[75].mxu0  ;;  %v9980_v45 = vld [vmem:[#allocation8_spill] sm:$0xff] }
 0x187   : > { %v9334_v34 = vmax.f32 %v9975_v11, %v3979_v33  ;;  %v9339_v2 = vmax.f32 %v9977_v59, %v3904_v43  ;;  %v3981_v39 = vpop.f32.mrb[75].mxu1  ;;  %v9982_v32 = vmax.f32 %v9980_v45, %v9981_v30  ;;  %v9983_v33 = vmax.f32 %v8836_v14, %v9070_v37  ;;  %v9984_v43 = vld [vmem:[#allocation50_spill] sm:$0xff]  ;;  %v9986_v59 = vld [vmem:[#allocation51_spill] sm:$0xff]  ;;  %v9989_v45 = vld [vmem:[#allocation52_spill] sm:$0xff] }
 0x188   : > { %v9344_v23 = vmax.f32 %v9979_v16, %v3981_v39  ;;  %v9985_v11 = vmax.f32 %v8838_v15, %v9984_v43  ;;  %v9987_v39 = vmax.f32 %v8846_v21, %v9986_v59 }
 0x189   : > { %v4050_v61 = vpop.f32.mrb[76].mxu0 }
 0x18a   : > { %v9349_v1 = vmax.f32 %v9982_v32, %v4050_v61  ;;  %v4127_v19 = vpop.f32.mrb[76].mxu1  ;;  %v4052_v54 = vpop.f32.mrb[77].mxu0  ;;  %v9988_v61 = vld [vmem:[#allocation9_spill] sm:$0xff] }
 0x18b   : > { %v9354_v55 = vmax.f32 %v9983_v33, %v4127_v19  ;;  %v9359_v62 = vmax.f32 %v9985_v11, %v4052_v54  ;;  %v4129_v60 = vpop.f32.mrb[77].mxu1  ;;  %v9990_v30 = vmax.f32 %v9988_v61, %v9989_v45  ;;  %v9991_v19 = vmax.f32 %v8864_v44, %v9086_v53  ;;  %v9992_v54 = vld [vmem:[#allocation53_spill] sm:$0xff]  ;;  %v9994_v11 = vld [vmem:[#allocation54_spill] sm:$0xff]  ;;  %v9997_v61 = vld [vmem:[#allocation55_spill] sm:$0xff] }
 0x18c   : > { %v9364_v41 = vmax.f32 %v9987_v39, %v4129_v60  ;;  %v9993_v33 = vmax.f32 %v8866_v28, %v9992_v54  ;;  %v9995_v60 = vmax.f32 %v8870_v47, %v9994_v11 }
 0x18d   : > { %v4056_v16 = vpop.f32.mrb[78].mxu0 }
 0x18e   : > { %v9369_v32 = vmax.f32 %v9990_v30, %v4056_v16  ;;  %v4133_v37 = vpop.f32.mrb[78].mxu1  ;;  %v4058_v14 = vpop.f32.mrb[79].mxu0  ;;  %v9996_v16 = vld [vmem:[#allocation10_spill] sm:$0xff] }
 0x18f   : > { %v9374_v15 = vmax.f32 %v9991_v19, %v4133_v37  ;;  %v9379_v43 = vmax.f32 %v9993_v33, %v4058_v14  ;;  %v4135_v21 = vpop.f32.mrb[79].mxu1  ;;  %v9998_v45 = vmax.f32 %v9996_v16, %v9997_v61  ;;  %v9999_v37 = vmax.f32 %v8880_v56, %v9102_v10  ;;  %v10000_v14 = vld [vmem:[#allocation56_spill] sm:$0xff]  ;;  %v10002_v33 = vld [vmem:[#allocation57_spill] sm:$0xff]  ;;  %v10005_v16 = vld [vmem:[#allocation58_spill] sm:$0xff] }
 0x190   : > { %v9384_v59 = vmax.f32 %v9995_v60, %v4135_v21  ;;  %v10001_v19 = vmax.f32 %v8882_v57, %v10000_v14  ;;  %v10003_v21 = vmax.f32 %v8888_v58, %v10002_v33 }
 0x191   : > { %v4204_v39 = vpop.f32.mrb[80].mxu0 }
 0x192   : > { %v9389_v30 = vmax.f32 %v9998_v45, %v4204_v39  ;;  %v4281_v53 = vpop.f32.mrb[80].mxu1  ;;  %v4206_v44 = vpop.f32.mrb[81].mxu0  ;;  %v10004_v39 = vld [vmem:[#allocation11_spill] sm:$0xff] }
 0x193   : > { %v9394_v28 = vmax.f32 %v9999_v37, %v4281_v53  ;;  %v9399_v54 = vmax.f32 %v10001_v19, %v4206_v44  ;;  %v4283_v47 = vpop.f32.mrb[81].mxu1  ;;  %v10006_v61 = vmax.f32 %v10004_v39, %v10005_v16  ;;  %v10007_v53 = vmax.f32 %v8903_v3, %v9118_v27  ;;  %v10008_v44 = vld [vmem:[#allocation59_spill] sm:$0xff]  ;;  %v10010_v19 = vld [vmem:[#allocation60_spill] sm:$0xff]  ;;  %v10013_v39 = vld [vmem:[#allocation61_spill] sm:$0xff] }
 0x194   : > { %v9404_v11 = vmax.f32 %v10003_v21, %v4283_v47  ;;  %v10009_v37 = vmax.f32 %v8905_v4, %v10008_v44  ;;  %v10011_v47 = vmax.f32 %v8909_v5, %v10010_v19 }
 0x195   : > { %v4210_v60 = vpop.f32.mrb[82].mxu0 }
 0x196   : > { %v9409_v45 = vmax.f32 %v10006_v61, %v4210_v60  ;;  %v4287_v10 = vpop.f32.mrb[82].mxu1  ;;  %v4212_v56 = vpop.f32.mrb[83].mxu0  ;;  %v10012_v60 = vld [vmem:[#allocation12_spill] sm:$0xff] }
 0x197   : > { %v9414_v57 = vmax.f32 %v10007_v53, %v4287_v10  ;;  %v9419_v14 = vmax.f32 %v10009_v37, %v4212_v56  ;;  %v4289_v58 = vpop.f32.mrb[83].mxu1  ;;  %v10014_v16 = vmax.f32 %v10012_v60, %v10013_v39  ;;  %v10015_v10 = vmax.f32 %v8920_v9, %v9134_v48  ;;  %v10016_v56 = vld [vmem:[#allocation62_spill] sm:$0xff]  ;;  %v10018_v37 = vld [vmem:[#allocation63_spill] sm:$0xff]  ;;  %v10021_v60 = vld [vmem:[#allocation64_spill] sm:$0xff] }
 0x198   : > { %v9424_v33 = vmax.f32 %v10011_v47, %v4289_v58  ;;  %v10017_v53 = vmax.f32 %v8922_v13, %v10016_v56  ;;  %v10019_v58 = vmax.f32 %v8926_v17, %v10018_v37 }
 0x199   : > { %v4358_v21 = vpop.f32.mrb[84].mxu0 }
 0x19a   : > { %v9429_v61 = vmax.f32 %v10014_v16, %v4358_v21  ;;  %v4435_v27 = vpop.f32.mrb[84].mxu1  ;;  %v4360_v3 = vpop.f32.mrb[85].mxu0  ;;  %v10020_v21 = vld [vmem:[#allocation13_spill] sm:$0xff] }
 0x19b   : > { %v9434_v4 = vmax.f32 %v10015_v10, %v4435_v27  ;;  %v9439_v44 = vmax.f32 %v10017_v53, %v4360_v3  ;;  %v4437_v5 = vpop.f32.mrb[85].mxu1  ;;  %v10022_v39 = vmax.f32 %v10020_v21, %v10021_v60  ;;  %v10024_v27 = vmax.f32 %v8932_v18, %v9150_v6  ;;  %v10026_v3 = vld [vmem:[#allocation65_spill] sm:$0xff]  ;;  %v10029_v53 = vld [vmem:[#allocation14_spill] sm:$0xff]  ;;  %v10033_v21 = vld [vmem:[#allocation15_spill] sm:$0xff] }
 0x19c   : > { %v9444_v19 = vmax.f32 %v10019_v58, %v4437_v5  ;;  %v10027_v10 = vmax.f32 %v8934_v0, %v10026_v3  ;;  %v10030_v5 = vld [vmem:[#allocation66_spill] sm:$0xff]  ;;  %v10034_v60 = vld [vmem:[#allocation67_spill] sm:$0xff]  ;;  %v10042_v3 = vld [vmem:[#allocation69_spill] sm:$0xff] }
 0x19d   : > { %v4364_v47 = vpop.f32.mrb[86].mxu0  ;;  %v10031_v37 = vmax.f32 %v10029_v53, %v10030_v5  ;;  %v10045_v53 = vld [vmem:[#allocation18_spill] sm:$0xff] }
 0x19e   : > { %v9449_v16 = vmax.f32 %v10022_v39, %v4364_v47  ;;  %v4441_v48 = vpop.f32.mrb[86].mxu1  ;;  %v4366_v9 = vpop.f32.mrb[87].mxu0  ;;  %v10035_v39 = vmax.f32 %v10033_v21, %v10034_v60  ;;  %v10046_v5 = vld [vmem:[#allocation70_spill] sm:$0xff]  ;;  %v10049_v21 = vld [vmem:[#allocation19_spill] sm:$0xff] }
 0x19f   : > { %v9454_v13 = vmax.f32 %v10024_v27, %v4441_v48  ;;  %v9459_v56 = vmax.f32 %v10027_v10, %v4366_v9  ;;  %v4443_v17 = vpop.f32.mrb[87].mxu1  ;;  %v10037_v48 = vld [vmem:[#allocation16_spill] sm:$0xff]  ;;  %v10041_v9 = vld [vmem:[#allocation17_spill] sm:$0xff]  ;;  %v10050_v60 = vld [vmem:[#allocation71_spill] sm:$0xff] }
 0x1a0   : > { %10023 = vst [vmem:[#allocation31_spill] sm:$0xff] %v9449_v16  ;;  %v9464_v58 = vmax.f32 %v10031_v37, %v4443_v17  ;;  %v10038_v27 = vld [vmem:[#allocation68_spill] sm:$0xff]  ;;  %v10043_v10 = vmax.f32 %v10041_v9, %v10042_v3  ;;  %v10047_v37 = vmax.f32 %v10045_v53, %v10046_v5  ;;  %v10058_v3 = vld [vmem:[#allocation73_spill] sm:$0xff]  ;;  %v10061_v53 = vld [vmem:[#allocation22_spill] sm:$0xff] }
 0x1a1   : > { %10025 = vst [vmem:[#allocation32_spill] sm:$0xff] %v9454_v13  ;;  %10028 = vst [vmem:[#allocation33_spill] sm:$0xff] %v9459_v56  ;;  %v4512_v47 = vpop.f32.mrb[88].mxu0  ;;  %v10039_v13 = vmax.f32 %v10037_v48, %v10038_v27  ;;  %v10054_v27 = vld [vmem:[#allocation72_spill] sm:$0xff]  ;;  %v10062_v5 = vld [vmem:[#allocation74_spill] sm:$0xff] }
 0x1a2   : > { %10032 = vst [vmem:[#allocation3_spill] sm:$0xff] %v9464_v58  ;;  %v9469_v16 = vmax.f32 %v10035_v39, %v4512_v47  ;;  %v4589_v6 = vpop.f32.mrb[88].mxu1  ;;  %v4514_v18 = vpop.f32.mrb[89].mxu0  ;;  %v10051_v39 = vmax.f32 %v10049_v21, %v10050_v60  ;;  %v10065_v21 = vld [vmem:[#allocation23_spill] sm:$0xff] }
 0x1a3   : > { %v9474_v0 = vmax.f32 %v10039_v13, %v4589_v6  ;;  %v9479_v56 = vmax.f32 %v10043_v10, %v4514_v18  ;;  %v4591_v17 = vpop.f32.mrb[89].mxu1  ;;  %v10053_v6 = vld [vmem:[#allocation20_spill] sm:$0xff]  ;;  %v10057_v18 = vld [vmem:[#allocation21_spill] sm:$0xff]  ;;  %v10066_v60 = vld [vmem:[#allocation75_spill] sm:$0xff] }
 0x1a4   : > { %10036 = vst [vmem:[#allocation34_spill] sm:$0xff] %v9469_v16  ;;  %v9484_v58 = vmax.f32 %v10047_v37, %v4591_v17  ;;  %v10059_v10 = vmax.f32 %v10057_v18, %v10058_v3  ;;  %v10063_v37 = vmax.f32 %v10061_v53, %v10062_v5  ;;  %v10073_v3 = vld [vmem:[#allocation77_spill] sm:$0xff]  ;;  %v10076_v53 = vld [vmem:[#allocation26_spill] sm:$0xff] }
 0x1a5   : > { %10040 = vst [vmem:[#allocation35_spill] sm:$0xff] %v9474_v0  ;;  %10044 = vst [vmem:[#allocation36_spill] sm:$0xff] %v9479_v56  ;;  %v4518_v47 = vpop.f32.mrb[90].mxu0  ;;  %v10055_v0 = vmax.f32 %v10053_v6, %v10054_v27  ;;  %v10070_v27 = vld [vmem:[#allocation76_spill] sm:$0xff]  ;;  %v10077_v5 = vld [vmem:[#allocation78_spill] sm:$0xff] }
 0x1a6   : > { %10048 = vst [vmem:[#allocation4_spill] sm:$0xff] %v9484_v58  ;;  %v9489_v16 = vmax.f32 %v10051_v39, %v4518_v47  ;;  %v4595_v48 = vpop.f32.mrb[90].mxu1  ;;  %v4520_v13 = vpop.f32.mrb[91].mxu0  ;;  %v10067_v39 = vmax.f32 %v10065_v21, %v10066_v60  ;;  %v10080_v60 = vld [vmem:[#allocation27_spill] sm:$0xff] }
 0x1a7   : > { %v9494_v9 = vmax.f32 %v10055_v0, %v4595_v48  ;;  %v9499_v56 = vmax.f32 %v10059_v10, %v4520_v13  ;;  %v4597_v17 = vpop.f32.mrb[91].mxu1  ;;  %v10069_v48 = vld [vmem:[#allocation24_spill] sm:$0xff]  ;;  %v10072_v13 = vld [vmem:[#allocation25_spill] sm:$0xff] }
 0x1a8   : > { %10052 = vst [vmem:[#allocation37_spill] sm:$0xff] %v9489_v16  ;;  %v9504_v58 = vmax.f32 %v10063_v37, %v4597_v17  ;;  %v10074_v10 = vmax.f32 %v10072_v13, %v10073_v3  ;;  %v10078_v37 = vmax.f32 %v10076_v53, %v10077_v5  ;;  %v10086_v13 = vld [vmem:[#allocation29_spill] sm:$0xff]  ;;  %v9541_v53 = vpop.permute.xlu0 %6342  ;;  %v10089_v5 = vld [vmem:[#allocation30_spill] sm:$0xff] }
 0x1a9   : > { %10056 = vst [vmem:[#allocation38_spill] sm:$0xff] %v9494_v9  ;;  %10060 = vst [vmem:[#allocation39_spill] sm:$0xff] %v9499_v56  ;;  %v4666_v47 = vpop.f32.mrb[92].mxu0  ;;  %v10071_v9 = vmax.f32 %v10069_v48, %v10070_v27  ;;  %v10084_v48 = vld [vmem:[#allocation80_spill] sm:$0xff]  ;;  %v10087_v3 = vld [vmem:[#allocation81_spill] sm:$0xff] }
 0x1aa   : > { %10064 = vst [vmem:[#allocation5_spill] sm:$0xff] %v9504_v58  ;;  %v9509_v16 = vmax.f32 %v10067_v39, %v4666_v47  ;;  %v4743_v6 = vpop.f32.mrb[92].mxu1  ;;  %v4668_v0 = vpop.f32.mrb[93].mxu0  ;;  %v10081_v39 = vld [vmem:[#allocation79_spill] sm:$0xff]  ;;  %v10085_v27 = vmax.f32 %v9927_v52, %v10084_v48 }
 0x1ab   : > { %v9514_v18 = vmax.f32 %v10071_v9, %v4743_v6  ;;  %v9519_v56 = vmax.f32 %v10074_v10, %v4668_v0  ;;  %v4745_v17 = vpop.f32.mrb[93].mxu1  ;;  %v10088_v10 = vmax.f32 %v10086_v13, %v10087_v3 }
 0x1ac   : > { %10068 = vst [vmem:[#allocation40_spill] sm:$0xff] %v9509_v16  ;;  %v9524_v21 = vmax.f32 %v10078_v37, %v4745_v17  ;;  %v10082_v16 = vmax.f32 %v10080_v60, %v10081_v39  ;;  %v10090_v37 = vld [vmem:[#allocation28_spill] sm:$0xff]  ;;  %v10092_v39 = vld [vmem:[#allocation2_spill] sm:$0xff] }
 0x1ad   : > { %10075 = vst [vmem:[#allocation41_spill] sm:$0xff] %v9519_v56  ;;  %v4672_v47 = vpop.f32.mrb[94].mxu0  ;;  %v10091_v60 = vmax.f32 %v10089_v5, %v10090_v37 }
 0x1ae   : > { %10079 = vst [vmem:[#allocation42_spill] sm:$0xff] %v9524_v21  ;;  %v9529_v58 = vmax.f32 %v10082_v16, %v4672_v47  ;;  %v4749_v9 = vpop.f32.mrb[94].mxu1  ;;  %v4674_v6 = vpop.f32.mrb[95].mxu0 }
 0x1af   : > { %v9534_v0 = vmax.f32 %v10085_v27, %v4749_v9  ;;  %v9539_v56 = vmax.f32 %v10088_v10, %v4674_v6  ;;  %v4751_v17 = vpop.f32.mrb[95].mxu1 }
 0x1b0   : > { %10083 = vst [vmem:[#allocation6_spill] sm:$0xff] %v9529_v58  ;;  %v9546_v16 = vmax.f32 %v10091_v60, %v4751_v17 }
 0x1b1   : > { %v5108_v47 = vpop.f32.mrb[96].mxu0 }
 0x1b2   : > { %v6274_v58 = vmax.f32 %v10092_v39, %v5108_v47  ;;  %v5185_v21 = vpop.f32.mrb[96].mxu1  ;;  %v5110_v52 = vpop.f32.mrb[97].mxu0 }
 0x1b3   : > { %v6276_v9 = vmax.f32 %v9234_v49, %v5185_v21  ;;  %v6275_v48 = vmax.f32 %v9239_v63, %v5110_v52  ;;  %v5187_v6 = vpop.f32.mrb[97].mxu1  ;;  %v9561_v49 = vpop.permute.xlu0 %6347 }
 0x1b4   : > { %v6277_v27 = vmax.f32 %v9244_v46, %v5187_v6  ;;  %v6350_v13 = vadd.f32 %v9541_v53, %v6274_v58 }
 0x1b5   : > { %v6351_v3 = vadd.f32 %v9541_v53, %v6275_v48  ;;  %v6352_v10 = vadd.f32 %v9541_v53, %v6276_v9  ;;  %v5114_v17 = vpop.f32.mrb[98].mxu0 }
 0x1b6   : > { %v6353_v63 = vadd.f32 %v9541_v53, %v6277_v27  ;;  %v6414_v46 = vmax.f32 %v6350_v13, 0.0  ;;  %v6306_v58 = vmax.f32 %v9249_v38, %v5114_v17  ;;  %v5191_v21 = vpop.f32.mrb[98].mxu1  ;;  %v5116_v5 = vpop.f32.mrb[99].mxu0 }
 0x1b7   : > { %v6415_v37 = vmax.f32 %v6351_v3, 0.0  ;;  %v6416_v60 = vmax.f32 %v6352_v10, 0.0  ;;  %v6308_v47 = vmax.f32 %v9254_v24, %v5191_v21  ;;  %v6307_v39 = vmax.f32 %v9259_v40, %v5116_v5  ;;  %v5193_v52 = vpop.f32.mrb[99].mxu1 }
 0x1b8   : > { %v6417_v9 = vmax.f32 %v6353_v63, 0.0  ;;  %6478 = vst [vmem:[%s9557_s9] sm:$0xff] %v6414_v46  ;;  %v6309_v48 = vmax.f32 %v9264_v50, %v5193_v52  ;;  %v6382_v6 = vadd.f32 %v9561_v49, %v6306_v58 }
 0x1b9   : > { %6479 = vst [vmem:[%s9557_s9 + $0x8] sm:$0xff] %v6415_v37  ;;  %6480 = vst [vmem:[%s9557_s9 + $0x10] sm:$0xff] %v6416_v60  ;;  %v6383_v38 = vadd.f32 %v9561_v49, %v6307_v39  ;;  %v6384_v27 = vadd.f32 %v9561_v49, %v6308_v47  ;;  %v5262_v13 = vpop.f32.mrb[100].mxu0 }
 0x1ba   : > { %6481 = vst [vmem:[%s9557_s9 + $0x18] sm:$0xff] %v6417_v9  ;;  %v6385_v24 = vadd.f32 %v9561_v49, %v6309_v48  ;;  %v6446_v40 = vmax.f32 %v6382_v6, 0.0  ;;  %v6278_v3 = vmax.f32 %v9269_v25, %v5262_v13  ;;  %v5339_v10 = vpop.f32.mrb[100].mxu1  ;;  %v5264_v50 = vpop.f32.mrb[101].mxu0 }
 0x1bb   : > { %v6447_v17 = vmax.f32 %v6383_v38, 0.0  ;;  %v6448_v63 = vmax.f32 %v6384_v27, 0.0  ;;  %v6280_v46 = vmax.f32 %v9274_v42, %v5339_v10  ;;  %v6279_v58 = vmax.f32 %v9279_v29, %v5264_v50  ;;  %v5341_v21 = vpop.f32.mrb[101].mxu1 }
 0x1bc   : > { %v6449_v5 = vmax.f32 %v6385_v24, 0.0  ;;  %6510 = vst [vmem:[%s9557_s9 + $0x100] sm:$0xff] %v6446_v40  ;;  %v6354_v37 = vadd.f32 %v9541_v53, %v6278_v3  ;;  %v6281_v60 = vmax.f32 %v9284_v7, %v5341_v21 }
 0x1bd   : > { %6511 = vst [vmem:[%s9557_s9 + $0x108] sm:$0xff] %v6447_v17  ;;  %6512 = vst [vmem:[%s9557_s9 + $0x110] sm:$0xff] %v6448_v63  ;;  %v6356_v25 = vadd.f32 %v9541_v53, %v6280_v46  ;;  %v6355_v47 = vadd.f32 %v9541_v53, %v6279_v58  ;;  %v5268_v39 = vpop.f32.mrb[102].mxu0 }
 0x1be   : > { %6513 = vst [vmem:[%s9557_s9 + $0x118] sm:$0xff] %v6449_v5  ;;  %v6418_v42 = vmax.f32 %v6354_v37, 0.0  ;;  %v6357_v29 = vadd.f32 %v9541_v53, %v6281_v60  ;;  %v6310_v52 = vmax.f32 %v9289_v22, %v5268_v39  ;;  %v5345_v9 = vpop.f32.mrb[102].mxu1  ;;  %v5270_v48 = vpop.f32.mrb[103].mxu0 }
 0x1bf   : > { %v6420_v7 = vmax.f32 %v6356_v25, 0.0  ;;  %v6419_v6 = vmax.f32 %v6355_v47, 0.0  ;;  %v6312_v38 = vmax.f32 %v9294_v51, %v5345_v9  ;;  %v6311_v27 = vmax.f32 %v9299_v8, %v5270_v48  ;;  %v5347_v13 = vpop.f32.mrb[103].mxu1 }
 0x1c0   : > { %6482 = vst [vmem:[%s9557_s9 + $0x20] sm:$0xff] %v6418_v42  ;;  %v6421_v24 = vmax.f32 %v6357_v29, 0.0  ;;  %v6386_v40 = vadd.f32 %v9561_v49, %v6310_v52  ;;  %v6313_v3 = vmax.f32 %v9304_v31, %v5347_v13 }
 0x1c1   : > { %6484 = vst [vmem:[%s9557_s9 + $0x30] sm:$0xff] %v6420_v7  ;;  %6483 = vst [vmem:[%s9557_s9 + $0x28] sm:$0xff] %v6419_v6  ;;  %v6388_v22 = vadd.f32 %v9561_v49, %v6312_v38  ;;  %v6387_v10 = vadd.f32 %v9561_v49, %v6311_v27  ;;  %v5416_v50 = vpop.f32.mrb[104].mxu0 }
 0x1c2   : > { %6485 = vst [vmem:[%s9557_s9 + $0x38] sm:$0xff] %v6421_v24  ;;  %v6450_v51 = vmax.f32 %v6386_v40, 0.0  ;;  %v6389_v8 = vadd.f32 %v9561_v49, %v6313_v3  ;;  %v6282_v17 = vmax.f32 %v9309_v20, %v5416_v50  ;;  %v5493_v63 = vpop.f32.mrb[104].mxu1  ;;  %v5418_v46 = vpop.f32.mrb[105].mxu0 }
 0x1c3   : > { %v6452_v31 = vmax.f32 %v6388_v22, 0.0  ;;  %v6451_v58 = vmax.f32 %v6387_v10, 0.0  ;;  %v6284_v21 = vmax.f32 %v9314_v12, %v5493_v63  ;;  %v6283_v5 = vmax.f32 %v9319_v35, %v5418_v46  ;;  %v5495_v37 = vpop.f32.mrb[105].mxu1 }
 0x1c4   : > { %6514 = vst [vmem:[%s9557_s9 + $0x120] sm:$0xff] %v6450_v51  ;;  %v6453_v60 = vmax.f32 %v6389_v8, 0.0  ;;  %v6358_v25 = vadd.f32 %v9541_v53, %v6282_v17  ;;  %v6285_v47 = vmax.f32 %v9324_v26, %v5495_v37 }
 0x1c5   : > { %6516 = vst [vmem:[%s9557_s9 + $0x130] sm:$0xff] %v6452_v31  ;;  %6515 = vst [vmem:[%s9557_s9 + $0x128] sm:$0xff] %v6451_v58  ;;  %v6360_v20 = vadd.f32 %v9541_v53, %v6284_v21  ;;  %v6359_v39 = vadd.f32 %v9541_v53, %v6283_v5  ;;  %v5422_v42 = vpop.f32.mrb[106].mxu0 }
 0x1c6   : > { %6517 = vst [vmem:[%s9557_s9 + $0x138] sm:$0xff] %v6453_v60  ;;  %v6422_v12 = vmax.f32 %v6358_v25, 0.0  ;;  %v6361_v35 = vadd.f32 %v9541_v53, %v6285_v47  ;;  %v6314_v29 = vmax.f32 %v9329_v36, %v5422_v42  ;;  %v5499_v52 = vpop.f32.mrb[106].mxu1  ;;  %v5424_v9 = vpop.f32.mrb[107].mxu0 }
 0x1c7   : > { %v6424_v26 = vmax.f32 %v6360_v20, 0.0  ;;  %v6423_v48 = vmax.f32 %v6359_v39, 0.0  ;;  %v6316_v7 = vmax.f32 %v9334_v34, %v5499_v52  ;;  %v6315_v6 = vmax.f32 %v9339_v2, %v5424_v9  ;;  %v5501_v38 = vpop.f32.mrb[107].mxu1 }
 0x1c8   : > { %6486 = vst [vmem:[%s9557_s9 + $0x40] sm:$0xff] %v6422_v12  ;;  %v6425_v27 = vmax.f32 %v6361_v35, 0.0  ;;  %v6390_v13 = vadd.f32 %v9561_v49, %v6314_v29  ;;  %v6317_v24 = vmax.f32 %v9344_v23, %v5501_v38 }
 0x1c9   : > { %6488 = vst [vmem:[%s9557_s9 + $0x50] sm:$0xff] %v6424_v26  ;;  %6487 = vst [vmem:[%s9557_s9 + $0x48] sm:$0xff] %v6423_v48  ;;  %v6392_v36 = vadd.f32 %v9561_v49, %v6316_v7  ;;  %v6391_v40 = vadd.f32 %v9561_v49, %v6315_v6  ;;  %v5570_v3 = vpop.f32.mrb[108].mxu0 }
 0x1ca   : > { %6489 = vst [vmem:[%s9557_s9 + $0x58] sm:$0xff] %v6425_v27  ;;  %v6454_v34 = vmax.f32 %v6390_v13, 0.0  ;;  %v6393_v2 = vadd.f32 %v9561_v49, %v6317_v24  ;;  %v6286_v22 = vmax.f32 %v9349_v1, %v5570_v3  ;;  %v5647_v10 = vpop.f32.mrb[108].mxu1  ;;  %v5572_v50 = vpop.f32.mrb[109].mxu0 }
 0x1cb   : > { %v6456_v23 = vmax.f32 %v6392_v36, 0.0  ;;  %v6455_v51 = vmax.f32 %v6391_v40, 0.0  ;;  %v6288_v8 = vmax.f32 %v9354_v55, %v5647_v10  ;;  %v6287_v17 = vmax.f32 %v9359_v62, %v5572_v50  ;;  %v5649_v63 = vpop.f32.mrb[109].mxu1 }
 0x1cc   : > { %6518 = vst [vmem:[%s9557_s9 + $0x140] sm:$0xff] %v6454_v34  ;;  %v6457_v46 = vmax.f32 %v6393_v2, 0.0  ;;  %v6362_v31 = vadd.f32 %v9541_v53, %v6286_v22  ;;  %v6289_v58 = vmax.f32 %v9364_v41, %v5649_v63 }
 0x1cd   : > { %6520 = vst [vmem:[%s9557_s9 + $0x150] sm:$0xff] %v6456_v23  ;;  %6519 = vst [vmem:[%s9557_s9 + $0x148] sm:$0xff] %v6455_v51  ;;  %v6364_v1 = vadd.f32 %v9541_v53, %v6288_v8  ;;  %v6363_v21 = vadd.f32 %v9541_v53, %v6287_v17  ;;  %v5576_v5 = vpop.f32.mrb[110].mxu0 }
 0x1ce   : > { %6521 = vst [vmem:[%s9557_s9 + $0x158] sm:$0xff] %v6457_v46  ;;  %v6426_v55 = vmax.f32 %v6362_v31, 0.0  ;;  %v6365_v62 = vadd.f32 %v9541_v53, %v6289_v58  ;;  %v6318_v37 = vmax.f32 %v9369_v32, %v5576_v5  ;;  %v5653_v60 = vpop.f32.mrb[110].mxu1  ;;  %v5578_v25 = vpop.f32.mrb[111].mxu0 }
 0x1cf   : > { %v6428_v41 = vmax.f32 %v6364_v1, 0.0  ;;  %v6427_v47 = vmax.f32 %v6363_v21, 0.0  ;;  %v6320_v20 = vmax.f32 %v9374_v15, %v5653_v60  ;;  %v6319_v39 = vmax.f32 %v9379_v43, %v5578_v25  ;;  %v5655_v42 = vpop.f32.mrb[111].mxu1 }
 0x1d0   : > { %6490 = vst [vmem:[%s9557_s9 + $0x60] sm:$0xff] %v6426_v55  ;;  %v6429_v12 = vmax.f32 %v6365_v62, 0.0  ;;  %v6394_v35 = vadd.f32 %v9561_v49, %v6318_v37  ;;  %v6321_v29 = vmax.f32 %v9384_v59, %v5655_v42  ;;  %v10093_v42 = vld [vmem:[#allocation31_spill] sm:$0xff] }
 0x1d1   : > { %6492 = vst [vmem:[%s9557_s9 + $0x70] sm:$0xff] %v6428_v41  ;;  %6491 = vst [vmem:[%s9557_s9 + $0x68] sm:$0xff] %v6427_v47  ;;  %v6396_v32 = vadd.f32 %v9561_v49, %v6320_v20  ;;  %v6395_v52 = vadd.f32 %v9561_v49, %v6319_v39  ;;  %v5724_v9 = vpop.f32.mrb[112].mxu0 }
 0x1d2   : > { %6493 = vst [vmem:[%s9557_s9 + $0x78] sm:$0xff] %v6429_v12  ;;  %v6458_v15 = vmax.f32 %v6394_v35, 0.0  ;;  %v6397_v43 = vadd.f32 %v9561_v49, %v6321_v29  ;;  %v6290_v26 = vmax.f32 %v9389_v30, %v5724_v9  ;;  %v5801_v48 = vpop.f32.mrb[112].mxu1  ;;  %v5726_v7 = vpop.f32.mrb[113].mxu0 }
 0x1d3   : > { %v6460_v59 = vmax.f32 %v6396_v32, 0.0  ;;  %v6459_v6 = vmax.f32 %v6395_v52, 0.0  ;;  %v6292_v38 = vmax.f32 %v9394_v28, %v5801_v48  ;;  %v6291_v27 = vmax.f32 %v9399_v54, %v5726_v7  ;;  %v5803_v13 = vpop.f32.mrb[113].mxu1  ;;  %v10094_v52 = vld [vmem:[#allocation32_spill] sm:$0xff] }
 0x1d4   : > { %6522 = vst [vmem:[%s9557_s9 + $0x160] sm:$0xff] %v6458_v15  ;;  %v6461_v24 = vmax.f32 %v6397_v43, 0.0  ;;  %v6366_v36 = vadd.f32 %v9541_v53, %v6290_v26  ;;  %v6293_v40 = vmax.f32 %v9404_v11, %v5803_v13  ;;  %v10095_v15 = vld [vmem:[#allocation33_spill] sm:$0xff] }
 0x1d5   : > { %6524 = vst [vmem:[%s9557_s9 + $0x170] sm:$0xff] %v6460_v59  ;;  %6523 = vst [vmem:[%s9557_s9 + $0x168] sm:$0xff] %v6459_v6  ;;  %v6368_v30 = vadd.f32 %v9541_v53, %v6292_v38  ;;  %v6367_v3 = vadd.f32 %v9541_v53, %v6291_v27  ;;  %v5730_v34 = vpop.f32.mrb[114].mxu0  ;;  %v10096_v59 = vld [vmem:[#allocation3_spill] sm:$0xff] }
 0x1d6   : > { %6525 = vst [vmem:[%s9557_s9 + $0x178] sm:$0xff] %v6461_v24  ;;  %v6430_v28 = vmax.f32 %v6366_v36, 0.0  ;;  %v6369_v54 = vadd.f32 %v9541_v53, %v6293_v40  ;;  %v6322_v2 = vmax.f32 %v9409_v45, %v5730_v34  ;;  %v5807_v22 = vpop.f32.mrb[114].mxu1  ;;  %v5732_v10 = vpop.f32.mrb[115].mxu0  ;;  %v10097_v40 = vld [vmem:[#allocation34_spill] sm:$0xff] }
 0x1d7   : > { %v6432_v11 = vmax.f32 %v6368_v30, 0.0  ;;  %v6431_v50 = vmax.f32 %v6367_v3, 0.0  ;;  %v6324_v23 = vmax.f32 %v9414_v57, %v5807_v22  ;;  %v6323_v51 = vmax.f32 %v9419_v14, %v5732_v10  ;;  %v5809_v8 = vpop.f32.mrb[115].mxu1  ;;  %v10099_v10 = vld [vmem:[#allocation36_spill] sm:$0xff] }
 0x1d8   : > { %6494 = vst [vmem:[%s9557_s9 + $0x80] sm:$0xff] %v6430_v28  ;;  %v6433_v17 = vmax.f32 %v6369_v54, 0.0  ;;  %v6398_v63 = vadd.f32 %v9561_v49, %v6322_v2  ;;  %v6325_v46 = vmax.f32 %v9424_v33, %v5809_v8  ;;  %v10098_v2 = vld [vmem:[#allocation35_spill] sm:$0xff]  ;;  %v10100_v8 = vld [vmem:[#allocation4_spill] sm:$0xff] }
 0x1d9   : > { %6496 = vst [vmem:[%s9557_s9 + $0x90] sm:$0xff] %v6432_v11  ;;  %6495 = vst [vmem:[%s9557_s9 + $0x88] sm:$0xff] %v6431_v50  ;;  %v6400_v45 = vadd.f32 %v9561_v49, %v6324_v23  ;;  %v6399_v31 = vadd.f32 %v9561_v49, %v6323_v51  ;;  %v5878_v58 = vpop.f32.mrb[116].mxu0 }
 0x1da   : > { %6497 = vst [vmem:[%s9557_s9 + $0x98] sm:$0xff] %v6433_v17  ;;  %v6462_v57 = vmax.f32 %v6398_v63, 0.0  ;;  %v6401_v14 = vadd.f32 %v9561_v49, %v6325_v46  ;;  %v6294_v1 = vmax.f32 %v9429_v61, %v5878_v58  ;;  %v5955_v21 = vpop.f32.mrb[116].mxu1  ;;  %v5880_v5 = vpop.f32.mrb[117].mxu0 }
 0x1db   : > { %v6464_v33 = vmax.f32 %v6400_v45, 0.0  ;;  %v6463_v55 = vmax.f32 %v6399_v31, 0.0  ;;  %v6296_v62 = vmax.f32 %v9434_v4, %v5955_v21  ;;  %v6295_v37 = vmax.f32 %v9439_v44, %v5880_v5  ;;  %v5957_v60 = vpop.f32.mrb[117].mxu1 }
 0x1dc   : > { %6526 = vst [vmem:[%s9557_s9 + $0x180] sm:$0xff] %v6462_v57  ;;  %v6465_v25 = vmax.f32 %v6401_v14, 0.0  ;;  %v6370_v41 = vadd.f32 %v9541_v53, %v6294_v1  ;;  %v6297_v47 = vmax.f32 %v9444_v19, %v5957_v60  ;;  %v10101_v57 = vld [vmem:[#allocation37_spill] sm:$0xff] }
 0x1dd   : > { %6528 = vst [vmem:[%s9557_s9 + $0x190] sm:$0xff] %v6464_v33  ;;  %6527 = vst [vmem:[%s9557_s9 + $0x188] sm:$0xff] %v6463_v55  ;;  %v6372_v61 = vadd.f32 %v9541_v53, %v6296_v62  ;;  %v6371_v20 = vadd.f32 %v9541_v53, %v6295_v37  ;;  %v5884_v39 = vpop.f32.mrb[118].mxu0  ;;  %v10102_v55 = vld [vmem:[#allocation38_spill] sm:$0xff]  ;;  %v10103_v37 = vld [vmem:[#allocation39_spill] sm:$0xff] }
 0x1de   : > { %6529 = vst [vmem:[%s9557_s9 + $0x198] sm:$0xff] %v6465_v25  ;;  %v6434_v4 = vmax.f32 %v6370_v41, 0.0  ;;  %v6373_v44 = vadd.f32 %v9541_v53, %v6297_v47  ;;  %v6326_v12 = vmax.f32 %v10093_v42, %v5884_v39  ;;  %v5961_v35 = vpop.f32.mrb[118].mxu1  ;;  %v5886_v29 = vpop.f32.mrb[119].mxu0 }
 0x1df   : > { %v6436_v19 = vmax.f32 %v6372_v61, 0.0  ;;  %v6435_v32 = vmax.f32 %v6371_v20, 0.0  ;;  %v6328_v9 = vmax.f32 %v10094_v52, %v5961_v35  ;;  %v6327_v43 = vmax.f32 %v10095_v15, %v5886_v29  ;;  %v5963_v26 = vpop.f32.mrb[119].mxu1  ;;  %v10104_v61 = vld [vmem:[#allocation5_spill] sm:$0xff]  ;;  %v10105_v35 = vld [vmem:[#allocation40_spill] sm:$0xff] }
 0x1e0   : > { %6498 = vst [vmem:[%s9557_s9 + $0xa0] sm:$0xff] %v6434_v4  ;;  %v6437_v48 = vmax.f32 %v6373_v44, 0.0  ;;  %v6402_v7 = vadd.f32 %v9561_v49, %v6326_v12  ;;  %v6329_v6 = vmax.f32 %v10096_v59, %v5963_v26 }
 0x1e1   : > { %6500 = vst [vmem:[%s9557_s9 + $0xb0] sm:$0xff] %v6436_v19  ;;  %6499 = vst [vmem:[%s9557_s9 + $0xa8] sm:$0xff] %v6435_v32  ;;  %v6404_v38 = vadd.f32 %v9561_v49, %v6328_v9  ;;  %v6403_v27 = vadd.f32 %v9561_v49, %v6327_v43  ;;  %v6032_v13 = vpop.f32.mrb[120].mxu0  ;;  %v10106_v43 = vld [vmem:[#allocation41_spill] sm:$0xff] }
 0x1e2   : > { %6501 = vst [vmem:[%s9557_s9 + $0xb8] sm:$0xff] %v6437_v48  ;;  %v6466_v24 = vmax.f32 %v6402_v7, 0.0  ;;  %v6405_v36 = vadd.f32 %v9561_v49, %v6329_v6  ;;  %v6298_v30 = vmax.f32 %v10097_v40, %v6032_v13  ;;  %v6109_v3 = vpop.f32.mrb[120].mxu1  ;;  %v6034_v34 = vpop.f32.mrb[121].mxu0  ;;  %v10107_v6 = vld [vmem:[#allocation42_spill] sm:$0xff] }
 0x1e3   : > { %v6468_v28 = vmax.f32 %v6404_v38, 0.0  ;;  %v6467_v54 = vmax.f32 %v6403_v27, 0.0  ;;  %v6300_v22 = vmax.f32 %v10098_v2, %v6109_v3  ;;  %v6299_v11 = vmax.f32 %v10099_v10, %v6034_v34  ;;  %v6111_v50 = vpop.f32.mrb[121].mxu1  ;;  %v10108_v40 = vld [vmem:[#allocation6_spill] sm:$0xff] }
 0x1e4   : > { %6530 = vst [vmem:[%s9557_s9 + $0x1a0] sm:$0xff] %v6466_v24  ;;  %v6469_v23 = vmax.f32 %v6405_v36, 0.0  ;;  %v6374_v51 = vadd.f32 %v9541_v53, %v6298_v30  ;;  %v6301_v17 = vmax.f32 %v10100_v8, %v6111_v50 }
 0x1e5   : > { %6532 = vst [vmem:[%s9557_s9 + $0x1b0] sm:$0xff] %v6468_v28  ;;  %6531 = vst [vmem:[%s9557_s9 + $0x1a8] sm:$0xff] %v6467_v54  ;;  %v6376_v63 = vadd.f32 %v9541_v53, %v6300_v22  ;;  %v6375_v46 = vadd.f32 %v9541_v53, %v6299_v11  ;;  %v6038_v45 = vpop.f32.mrb[122].mxu0 }
 0x1e6   : > { %6533 = vst [vmem:[%s9557_s9 + $0x1b8] sm:$0xff] %v6469_v23  ;;  %v6438_v31 = vmax.f32 %v6374_v51, 0.0  ;;  %v6377_v58 = vadd.f32 %v9541_v53, %v6301_v17  ;;  %v6330_v14 = vmax.f32 %v10101_v57, %v6038_v45  ;;  %v6115_v1 = vpop.f32.mrb[122].mxu1  ;;  %v6040_v21 = vpop.f32.mrb[123].mxu0 }
 0x1e7   : > { %v6440_v5 = vmax.f32 %v6376_v63, 0.0  ;;  %v6439_v33 = vmax.f32 %v6375_v46, 0.0  ;;  %v6332_v62 = vmax.f32 %v10102_v55, %v6115_v1  ;;  %v6331_v60 = vmax.f32 %v10103_v37, %v6040_v21  ;;  %v6117_v25 = vpop.f32.mrb[123].mxu1 }
 0x1e8   : > { %6502 = vst [vmem:[%s9557_s9 + $0xc0] sm:$0xff] %v6438_v31  ;;  %v6441_v41 = vmax.f32 %v6377_v58, 0.0  ;;  %v6406_v47 = vadd.f32 %v9561_v49, %v6330_v14  ;;  %v6333_v20 = vmax.f32 %v10104_v61, %v6117_v25 }
 0x1e9   : > { %6504 = vst [vmem:[%s9557_s9 + $0xd0] sm:$0xff] %v6440_v5  ;;  %6503 = vst [vmem:[%s9557_s9 + $0xc8] sm:$0xff] %v6439_v33  ;;  %v6408_v39 = vadd.f32 %v9561_v49, %v6332_v62  ;;  %v6407_v4 = vadd.f32 %v9561_v49, %v6331_v60  ;;  %v6186_v44 = vpop.f32.mrb[124].mxu0 }
 0x1ea   : > { %6505 = vst [vmem:[%s9557_s9 + $0xd8] sm:$0xff] %v6441_v41  ;;  %v6470_v42 = vmax.f32 %v6406_v47, 0.0  ;;  %v6409_v12 = vadd.f32 %v9561_v49, %v6333_v20  ;;  %v6302_v29 = vmax.f32 %v10105_v35, %v6186_v44  ;;  %v6263_v19 = vpop.f32.mrb[124].mxu1  ;;  %v6188_v32 = vpop.f32.mrb[125].mxu0 }
 0x1eb   : > { %v6472_v52 = vmax.f32 %v6408_v39, 0.0  ;;  %v6471_v9 = vmax.f32 %v6407_v4, 0.0  ;;  %v6304_v15 = vmax.f32 %v9514_v18, %v6263_v19  ;;  %v6303_v26 = vmax.f32 %v10106_v43, %v6188_v32  ;;  %v6265_v48 = vpop.f32.mrb[125].mxu1 }
 0x1ec   : > { %6534 = vst [vmem:[%s9557_s9 + $0x1c0] sm:$0xff] %v6470_v42  ;;  %v6473_v7 = vmax.f32 %v6409_v12, 0.0  ;;  %v6378_v59 = vadd.f32 %v9541_v53, %v6302_v29  ;;  %v6305_v38 = vmax.f32 %v10107_v6, %v6265_v48 }
 0x1ed   : > { %6536 = vst [vmem:[%s9557_s9 + $0x1d0] sm:$0xff] %v6472_v52  ;;  %6535 = vst [vmem:[%s9557_s9 + $0x1c8] sm:$0xff] %v6471_v9  ;;  %v6380_v27 = vadd.f32 %v9541_v53, %v6304_v15  ;;  %v6379_v13 = vadd.f32 %v9541_v53, %v6303_v26  ;;  %v6192_v24 = vpop.f32.mrb[126].mxu0 }
 0x1ee   : > { %6537 = vst [vmem:[%s9557_s9 + $0x1d8] sm:$0xff] %v6473_v7  ;;  %v6442_v18 = vmax.f32 %v6378_v59, 0.0  ;;  %v6381_v36 = vadd.f32 %v9541_v53, %v6305_v38  ;;  %v6334_v30 = vmax.f32 %v10108_v40, %v6192_v24  ;;  %v6269_v3 = vpop.f32.mrb[126].mxu1  ;;  %v6194_v34 = vpop.f32.mrb[127].mxu0 }
 0x1ef   : > { %v6444_v28 = vmax.f32 %v6380_v27, 0.0  ;;  %v6443_v54 = vmax.f32 %v6379_v13, 0.0  ;;  %v6336_v2 = vmax.f32 %v9534_v0, %v6269_v3  ;;  %v6335_v22 = vmax.f32 %v9539_v56, %v6194_v34  ;;  %v6271_v10 = vpop.f32.mrb[127].mxu1 }
 0x1f0   : > { %6506 = vst [vmem:[%s9557_s9 + $0xe0] sm:$0xff] %v6442_v18  ;;  %v6445_v11 = vmax.f32 %v6381_v36, 0.0  ;;  %v6410_v53 = vadd.f32 %v9561_v49, %v6334_v30  ;;  %v6337_v50 = vmax.f32 %v9546_v16, %v6271_v10 }
 0x1f1   : > { %6508 = vst [vmem:[%s9557_s9 + $0xf0] sm:$0xff] %v6444_v28  ;;  %6507 = vst [vmem:[%s9557_s9 + $0xe8] sm:$0xff] %v6443_v54  ;;  %v6412_v23 = vadd.f32 %v9561_v49, %v6336_v2  ;;  %v6411_v51 = vadd.f32 %v9561_v49, %v6335_v22 }
 0x1f2   : > { %6509 = vst [vmem:[%s9557_s9 + $0xf8] sm:$0xff] %v6445_v11  ;;  %v6474_v0 = vmax.f32 %v6410_v53, 0.0  ;;  %v6413_v56 = vadd.f32 %v9561_v49, %v6337_v50 }
 0x1f3   : > { %v6476_v8 = vmax.f32 %v6412_v23, 0.0  ;;  %v6475_v17 = vmax.f32 %v6411_v51, 0.0 }
 0x1f4   : > { %6538 = vst [vmem:[%s9557_s9 + $0x1e0] sm:$0xff] %v6474_v0  ;;  %v6477_v63 = vmax.f32 %v6413_v56, 0.0 }
 0x1f5   : > { %6540 = vst [vmem:[%s9557_s9 + $0x1f0] sm:$0xff] %v6476_v8  ;;  %6539 = vst [vmem:[%s9557_s9 + $0x1e8] sm:$0xff] %v6475_v17 }
 0x1f6   : > { %6541 = vst [vmem:[%s9557_s9 + $0x1f8] sm:$0xff] %v6477_v63 }
 0x1f7 PF: > { %s16_s21 = sadd.s32 1, %s7573_s21  }
 0x1f8   : > { %p13_p4 = scmp.ge.s32.totalorder %s16_s21, 4  }
 0x1fa   :  { %15 = sbr.rel (!%p13_p4) target bundleno = 1 (0x1), region = 83 }

// kernel: flip_detection_forward.4
= control target key start
LH: loop header
LB: loop body
LE: loop exit
PB: predicated region body
PF: predicated region fallthrough
CT: control target
= control target key end

     0   :  { %s3359_s21 = smov 0   ;;  %s4722_s0 = inlined_call_operand.vmem [shape: f32[2,144,1024], index: 0, kind: input, shape index: {}]   ;;  %s4723_s1 = inlined_call_operand.vmem [shape: f32[2,144,1024], index: 1, kind: input, shape index: {}]   ;;  %s4724_s2 = inlined_call_operand.vmem [shape: f32[2,144,1024], index: 2, kind: input, shape index: {}]   ;;  %s4725_s3 = inlined_call_operand.vmem [shape: f32[2,144,1024], index: 3, kind: input, shape index: {}]   ;;  %s4726_s4 = inlined_call_operand.vmem [shape: f32[32,144], index: 4, kind: input, shape index: {}]   ;;  %s4727_s5 = inlined_call_operand.vmem [shape: f32[32,1], index: 5, kind: input, shape index: {}]   ;;  %s4728_s6 = inlined_call_operand.vmem [shape: f32[2,32,1024], index: 6, kind: output, shape index: {}]  }
   0x1 LB: > { %s2640_s22 = sadd.s32 4294967295, %s3321_s21   ;;  %p2644_p0 = scmp.ge.s32.totalorder %s3321_s21, 1  ;;  %s3321_s21 = sphi %s3359_s21, %s16_s21  }
   0x2   : > { %p242_p1 = scmp.lt.s32.totalorder %s3321_s21, 3 }
   0x4   : > { %p243_p2 = pnand %p2644_p0, %p242_p1 }
   0x6   : > { %246 = sbr.rel (%p243_p2) target bundleno = 544 (0x220), region = 44 }
   0xd   : > { %p287_p3 = scmp.lt.s32.totalorder %s2640_s22, 1  ;;  %v3370_v0 = vld [vmem:[%s4726_s4 + $0x8] sm:$0xff]  ;;  %vm464_vm0 = vcmask 130048  }
   0xe   : > { %2651 = vmatprep.mubr.msk.f32.mxu0 %vm464_vm0, %v3370_v0  ;;  %2655 = vmatprep.mubr.msk.f32.mxu1 %vm464_vm0, %v3370_v0 }
   0xf   : > { %s4798_s22 = smov (!%p287_p3, %s2640_s22), 1 }
  0x10   : > { %s3379_s25 = smul.u32 1152, %s4798_s22  ;;  %s2717_s11 = sshll.u32 %s4798_s22, 8 }
  0x11   : > { %s4620_s14 = scalar_lea.vmem %s4728_s6, %s2717_s11 }
  0x12   : > { %s3385_s28 = scalar_lea.vmem %s4722_s0, %s3379_s25  ;;  %s3590_s23 = scalar_lea.vmem %s4723_s1, %s3379_s25 }
  0x13   : > { %v321_v1 = vld [vmem:[%s3385_s28 + $0x8] sm:$0xff]  ;;  %v323_v3 = vld [vmem:[%s3385_s28 + $0x18] sm:$0xff]  ;;  %v320_v6 = vld [vmem:[%s3385_s28] sm:$0xff]  ;;  %s3793_s29 = scalar_lea.vmem %s4724_s2, %s3379_s25  ;;  %s4026_s24 = scalar_lea.vmem %s4725_s3, %s3379_s25 }
  0x14   : > { %v329_v2 = vld [vmem:[%s3385_s28 + $0x48] sm:$0xff]  ;;  %v331_v5 = vld [vmem:[%s3385_s28 + $0x58] sm:$0xff]  ;;  %v328_v7 = vld [vmem:[%s3385_s28 + $0x40] sm:$0xff] }
  0x15   : > { %v2718_v4 = vpack.c.bf16 %v329_v2, %v321_v1  ;;  %v2754_v8 = vpack.c.bf16 %v331_v5, %v323_v3  ;;  %v2720_v9 = vpack.c.bf16 %v328_v7, %v320_v6  ;;  %v322_v10 = vld [vmem:[%s3385_s28 + $0x10] sm:$0xff]  ;;  %v337_v12 = vld [vmem:[%s3385_s28 + $0x88] sm:$0xff]  ;;  %v339_v15 = vld [vmem:[%s3385_s28 + $0x98] sm:$0xff] }
  0x16   : > { %v330_v11 = vld [vmem:[%s3385_s28 + $0x50] sm:$0xff]  ;;  %v345_v14 = vld [vmem:[%s3385_s28 + $0xc8] sm:$0xff]  ;;  %v347_v16 = vld [vmem:[%s3385_s28 + $0xd8] sm:$0xff] }
  0x17   : > { %2719 = vmatprep.subr.bf16.mxu0 %v2718_v4  ;;  %v2756_v13 = vpack.c.bf16 %v330_v11, %v322_v10  ;;  %2755 = vmatprep.subr.bf16.mxu1 %v2754_v8  ;;  %v2722_v17 = vpack.c.bf16 %v345_v14, %v337_v12  ;;  %v2758_v18 = vpack.c.bf16 %v347_v16, %v339_v15  ;;  %v336_v19 = vld [vmem:[%s3385_s28 + $0x80] sm:$0xff]  ;;  %v338_v21 = vld [vmem:[%s3385_s28 + $0x90] sm:$0xff]  ;;  %v353_v24 = vld [vmem:[%s3385_s28 + $0x108] sm:$0xff] }
  0x18   : > { %2721 = vmatpush1.bf16.msra.mxu0 %v2720_v9  ;;  %v344_v20 = vld [vmem:[%s3385_s28 + $0xc0] sm:$0xff]  ;;  %v346_v23 = vld [vmem:[%s3385_s28 + $0xd0] sm:$0xff]  ;;  %v361_v25 = vld [vmem:[%s3385_s28 + $0x148] sm:$0xff] }
  0x19   : > { %2757 = vmatpush1.bf16.msra.mxu1 %v2756_v13  ;;  %v2724_v22 = vpack.c.bf16 %v344_v20, %v336_v19  ;;  %2723 = vmatprep.subr.bf16.mxu0 %v2722_v17  ;;  %v2760_v26 = vpack.c.bf16 %v346_v23, %v338_v21  ;;  %v2726_v27 = vpack.c.bf16 %v361_v25, %v353_v24  ;;  %v355_v28 = vld [vmem:[%s3385_s28 + $0x118] sm:$0xff]  ;;  %v352_v30 = vld [vmem:[%s3385_s28 + $0x100] sm:$0xff]  ;;  %v354_v33 = vld [vmem:[%s3385_s28 + $0x110] sm:$0xff] }
  0x1a   : > { %2759 = vmatprep.subr.bf16.mxu1 %v2758_v18  ;;  %v363_v29 = vld [vmem:[%s3385_s28 + $0x158] sm:$0xff]  ;;  %v360_v32 = vld [vmem:[%s3385_s28 + $0x140] sm:$0xff]  ;;  %v362_v34 = vld [vmem:[%s3385_s28 + $0x150] sm:$0xff] }
  0x1b   : > { %v2762_v31 = vpack.c.bf16 %v363_v29, %v355_v28  ;;  %v2728_v35 = vpack.c.bf16 %v360_v32, %v352_v30  ;;  %v369_v36 = vld [vmem:[%s3385_s28 + $0x188] sm:$0xff]  ;;  %v371_v38 = vld [vmem:[%s3385_s28 + $0x198] sm:$0xff]  ;;  %v2764_v39 = vpack.c.bf16 %v362_v34, %v354_v33  ;;  %v368_v42 = vld [vmem:[%s3385_s28 + $0x180] sm:$0xff] }
  0x1c   : > { %2725 = vmatpush1.bf16.msra.mxu0 %v2724_v22  ;;  %v377_v37 = vld [vmem:[%s3385_s28 + $0x1c8] sm:$0xff]  ;;  %v379_v41 = vld [vmem:[%s3385_s28 + $0x1d8] sm:$0xff]  ;;  %v376_v43 = vld [vmem:[%s3385_s28 + $0x1c0] sm:$0xff] }
  0x1d   : > { %2761 = vmatpush1.bf16.msra.mxu1 %v2760_v26  ;;  %2727 = vmatprep.subr.bf16.mxu0 %v2726_v27  ;;  %v2730_v40 = vpack.c.bf16 %v377_v37, %v369_v36  ;;  %v2766_v44 = vpack.c.bf16 %v379_v41, %v371_v38  ;;  %v370_v45 = vld [vmem:[%s3385_s28 + $0x190] sm:$0xff]  ;;  %v385_v47 = vld [vmem:[%s3385_s28 + $0x208] sm:$0xff]  ;;  %v387_v49 = vld [vmem:[%s3385_s28 + $0x218] sm:$0xff]  ;;  %v2732_v51 = vpack.c.bf16 %v376_v43, %v368_v42 }
  0x1e   : > { %2763 = vmatprep.subr.bf16.mxu1 %v2762_v31  ;;  %v378_v46 = vld [vmem:[%s3385_s28 + $0x1d0] sm:$0xff]  ;;  %v393_v48 = vld [vmem:[%s3385_s28 + $0x248] sm:$0xff]  ;;  %v395_v50 = vld [vmem:[%s3385_s28 + $0x258] sm:$0xff] }
  0x1f   : > { %v2768_v52 = vpack.c.bf16 %v378_v46, %v370_v45  ;;  %v2734_v53 = vpack.c.bf16 %v393_v48, %v385_v47  ;;  %v384_v54 = vld [vmem:[%s3385_s28 + $0x200] sm:$0xff]  ;;  %v386_v56 = vld [vmem:[%s3385_s28 + $0x210] sm:$0xff]  ;;  %v2770_v57 = vpack.c.bf16 %v395_v50, %v387_v49  ;;  %v401_v59 = vld [vmem:[%s3385_s28 + $0x288] sm:$0xff] }
  0x20   : > { %2729 = vmatpush1.bf16.msra.mxu0 %v2728_v35  ;;  %v392_v55 = vld [vmem:[%s3385_s28 + $0x240] sm:$0xff]  ;;  %v394_v58 = vld [vmem:[%s3385_s28 + $0x250] sm:$0xff]  ;;  %v409_v60 = vld [vmem:[%s3385_s28 + $0x2c8] sm:$0xff] }
  0x21   : > { %2765 = vmatpush1.bf16.msra.mxu1 %v2764_v39  ;;  %2731 = vmatprep.subr.bf16.mxu0 %v2730_v40  ;;  %v403_v61 = vld [vmem:[%s3385_s28 + $0x298] sm:$0xff]  ;;  %v2736_v63 = vpack.c.bf16 %v392_v55, %v384_v54  ;;  %v2772_v1 = vpack.c.bf16 %v394_v58, %v386_v56  ;;  %v2738_v2 = vpack.c.bf16 %v409_v60, %v401_v59  ;;  %v400_v3 = vld [vmem:[%s3385_s28 + $0x280] sm:$0xff]  ;;  %v402_v5 = vld [vmem:[%s3385_s28 + $0x290] sm:$0xff] }
  0x22   : > { %2767 = vmatprep.subr.bf16.mxu1 %v2766_v44  ;;  %v411_v62 = vld [vmem:[%s3385_s28 + $0x2d8] sm:$0xff]  ;;  %v408_v4 = vld [vmem:[%s3385_s28 + $0x2c0] sm:$0xff]  ;;  %v410_v7 = vld [vmem:[%s3385_s28 + $0x2d0] sm:$0xff] }
  0x23   : > { %v2774_v6 = vpack.c.bf16 %v411_v62, %v403_v61  ;;  %v417_v8 = vld [vmem:[%s3385_s28 + $0x308] sm:$0xff]  ;;  %v419_v10 = vld [vmem:[%s3385_s28 + $0x318] sm:$0xff]  ;;  %v2740_v12 = vpack.c.bf16 %v408_v4, %v400_v3  ;;  %v2776_v13 = vpack.c.bf16 %v410_v7, %v402_v5  ;;  %v416_v15 = vld [vmem:[%s3385_s28 + $0x300] sm:$0xff] }
  0x24   : > { %2733 = vmatpush1.bf16.msra.mxu0 %v2732_v51  ;;  %v425_v9 = vld [vmem:[%s3385_s28 + $0x348] sm:$0xff]  ;;  %v427_v11 = vld [vmem:[%s3385_s28 + $0x358] sm:$0xff]  ;;  %v424_v16 = vld [vmem:[%s3385_s28 + $0x340] sm:$0xff] }
  0x25   : > { %2769 = vmatpush1.bf16.msra.mxu1 %v2768_v52  ;;  %2735 = vmatprep.subr.bf16.mxu0 %v2734_v53  ;;  %v2742_v14 = vpack.c.bf16 %v425_v9, %v417_v8  ;;  %v418_v17 = vld [vmem:[%s3385_s28 + $0x310] sm:$0xff]  ;;  %v2778_v18 = vpack.c.bf16 %v427_v11, %v419_v10  ;;  %v433_v20 = vld [vmem:[%s3385_s28 + $0x388] sm:$0xff]  ;;  %v435_v22 = vld [vmem:[%s3385_s28 + $0x398] sm:$0xff]  ;;  %v2744_v24 = vpack.c.bf16 %v424_v16, %v416_v15 }
  0x26   : > { %2771 = vmatprep.subr.bf16.mxu1 %v2770_v57  ;;  %v426_v19 = vld [vmem:[%s3385_s28 + $0x350] sm:$0xff]  ;;  %v441_v21 = vld [vmem:[%s3385_s28 + $0x3c8] sm:$0xff]  ;;  %v443_v23 = vld [vmem:[%s3385_s28 + $0x3d8] sm:$0xff] }
  0x27   : > { %v2780_v25 = vpack.c.bf16 %v426_v19, %v418_v17  ;;  %v2746_v26 = vpack.c.bf16 %v441_v21, %v433_v20  ;;  %v432_v27 = vld [vmem:[%s3385_s28 + $0x380] sm:$0xff]  ;;  %v434_v29 = vld [vmem:[%s3385_s28 + $0x390] sm:$0xff]  ;;  %v2782_v30 = vpack.c.bf16 %v443_v23, %v435_v22  ;;  %v449_v32 = vld [vmem:[%s3385_s28 + $0x408] sm:$0xff] }
  0x28   : > { %2737 = vmatpush1.bf16.msra.mxu0 %v2736_v63  ;;  %v440_v28 = vld [vmem:[%s3385_s28 + $0x3c0] sm:$0xff]  ;;  %v442_v31 = vld [vmem:[%s3385_s28 + $0x3d0] sm:$0xff]  ;;  %v457_v33 = vld [vmem:[%s3385_s28 + $0x448] sm:$0xff] }
  0x29   : > { %2773 = vmatpush1.bf16.msra.mxu1 %v2772_v1  ;;  %2739 = vmatprep.subr.bf16.mxu0 %v2738_v2  ;;  %v451_v34 = vld [vmem:[%s3385_s28 + $0x418] sm:$0xff]  ;;  %v2748_v36 = vpack.c.bf16 %v440_v28, %v432_v27  ;;  %v2784_v37 = vpack.c.bf16 %v442_v31, %v434_v29  ;;  %v2750_v38 = vpack.c.bf16 %v457_v33, %v449_v32  ;;  %v448_v39 = vld [vmem:[%s3385_s28 + $0x400] sm:$0xff]  ;;  %v450_v41 = vld [vmem:[%s3385_s28 + $0x410] sm:$0xff] }
  0x2a   : > { %2775 = vmatprep.subr.bf16.mxu1 %v2774_v6  ;;  %v459_v35 = vld [vmem:[%s3385_s28 + $0x458] sm:$0xff]  ;;  %v456_v40 = vld [vmem:[%s3385_s28 + $0x440] sm:$0xff]  ;;  %v458_v43 = vld [vmem:[%s3385_s28 + $0x450] sm:$0xff] }
  0x2b   : > { %v2786_v42 = vpack.c.bf16 %v459_v35, %v451_v34  ;;  %v325_v44 = vld [vmem:[%s3385_s28 + $0x28] sm:$0xff]  ;;  %v327_v46 = vld [vmem:[%s3385_s28 + $0x38] sm:$0xff]  ;;  %v2752_v48 = vpack.c.bf16 %v456_v40, %v448_v39  ;;  %v2788_v49 = vpack.c.bf16 %v458_v43, %v450_v41  ;;  %v324_v51 = vld [vmem:[%s3385_s28 + $0x20] sm:$0xff] }
  0x2c   : > { %2741 = vmatpush1.bf16.msra.mxu0 %v2740_v12  ;;  %v333_v45 = vld [vmem:[%s3385_s28 + $0x68] sm:$0xff]  ;;  %v335_v47 = vld [vmem:[%s3385_s28 + $0x78] sm:$0xff]  ;;  %v332_v52 = vld [vmem:[%s3385_s28 + $0x60] sm:$0xff] }
  0x2d   : > { %2777 = vmatpush1.bf16.msra.mxu1 %v2776_v13  ;;  %2743 = vmatprep.subr.bf16.mxu0 %v2742_v14  ;;  %v2790_v50 = vpack.c.bf16 %v333_v45, %v325_v44  ;;  %v326_v53 = vld [vmem:[%s3385_s28 + $0x30] sm:$0xff]  ;;  %v2826_v54 = vpack.c.bf16 %v335_v47, %v327_v46  ;;  %v341_v56 = vld [vmem:[%s3385_s28 + $0xa8] sm:$0xff]  ;;  %v343_v58 = vld [vmem:[%s3385_s28 + $0xb8] sm:$0xff]  ;;  %v2792_v61 = vpack.c.bf16 %v332_v52, %v324_v51 }
  0x2e   : > { %2779 = vmatprep.subr.bf16.mxu1 %v2778_v18  ;;  %v334_v55 = vld [vmem:[%s3385_s28 + $0x70] sm:$0xff]  ;;  %v349_v57 = vld [vmem:[%s3385_s28 + $0xe8] sm:$0xff]  ;;  %v351_v59 = vld [vmem:[%s3385_s28 + $0xf8] sm:$0xff] }
  0x2f   : > { %v3474_v60 = vld [vmem:[%s4726_s4] sm:$0xff]  ;;  %v2828_v62 = vpack.c.bf16 %v334_v55, %v326_v53  ;;  %v2794_v63 = vpack.c.bf16 %v349_v57, %v341_v56  ;;  %v342_v3 = vld [vmem:[%s3385_s28 + $0xb0] sm:$0xff]  ;;  %v2830_v4 = vpack.c.bf16 %v351_v59, %v343_v58  ;;  %v357_v6 = vld [vmem:[%s3385_s28 + $0x128] sm:$0xff] }
  0x30   : > { %2745 = vmatpush1.bf16.msra.mxu0 %v2744_v24  ;;  %v340_v1 = vld [vmem:[%s3385_s28 + $0xa0] sm:$0xff]  ;;  %v350_v5 = vld [vmem:[%s3385_s28 + $0xf0] sm:$0xff]  ;;  %v365_v7 = vld [vmem:[%s3385_s28 + $0x168] sm:$0xff] }
  0x31   : > { %2781 = vmatpush1.bf16.msra.mxu1 %v2780_v25  ;;  %2747 = vmatprep.subr.bf16.mxu0 %v2746_v26  ;;  %v348_v2 = vld [vmem:[%s3385_s28 + $0xe0] sm:$0xff]  ;;  %v359_v8 = vld [vmem:[%s3385_s28 + $0x138] sm:$0xff]  ;;  %v3494_v12 = vld [vmem:[%s4726_s4 + $0x10] sm:$0xff]  ;;  %v2832_v13 = vpack.c.bf16 %v350_v5, %v342_v3  ;;  %v2798_v14 = vpack.c.bf16 %v365_v7, %v357_v6 }
  0x32   : > { %2783 = vmatprep.subr.bf16.mxu1 %v2782_v30  ;;  %v367_v9 = vld [vmem:[%s3385_s28 + $0x178] sm:$0xff]  ;;  %v2796_v11 = vpack.c.bf16 %v348_v2, %v340_v1  ;;  %v356_v15 = vld [vmem:[%s3385_s28 + $0x120] sm:$0xff]  ;;  %v358_v17 = vld [vmem:[%s3385_s28 + $0x130] sm:$0xff] }
  0x33   : > { %v3488_v10 = vld [vmem:[%s4726_s4 + $0x18] sm:$0xff]  ;;  %v364_v16 = vld [vmem:[%s3385_s28 + $0x160] sm:$0xff]  ;;  %v2834_v18 = vpack.c.bf16 %v367_v9, %v359_v8  ;;  %v366_v19 = vld [vmem:[%s3385_s28 + $0x170] sm:$0xff] }
  0x34   : > { %2749 = vmatpush1.bf16.msra.mxu0 %v2748_v36  ;;  %v373_v20 = vld [vmem:[%s3385_s28 + $0x1a8] sm:$0xff]  ;;  %v375_v22 = vld [vmem:[%s3385_s28 + $0x1b8] sm:$0xff]  ;;  %v2800_v25 = vpack.c.bf16 %v364_v16, %v356_v15  ;;  %v3518_v26 = vld [vmem:[%s4726_s4 + $0x20] sm:$0xff]  ;;  %v2836_v27 = vpack.c.bf16 %v366_v19, %v358_v17 }
  0x35   : > { %2785 = vmatpush1.bf16.msra.mxu1 %v2784_v37  ;;  %2751 = vmatprep.subr.bf16.mxu0 %v2750_v38  ;;  %v381_v21 = vld [vmem:[%s3385_s28 + $0x1e8] sm:$0xff]  ;;  %v383_v23 = vld [vmem:[%s3385_s28 + $0x1f8] sm:$0xff]  ;;  %v372_v29 = vld [vmem:[%s3385_s28 + $0x1a0] sm:$0xff] }
  0x36   : > { %2787 = vmatprep.subr.bf16.mxu1 %v2786_v42  ;;  %v3512_v24 = vld [vmem:[%s4726_s4 + $0x28] sm:$0xff]  ;;  %v2802_v28 = vpack.c.bf16 %v381_v21, %v373_v20  ;;  %v380_v30 = vld [vmem:[%s3385_s28 + $0x1e0] sm:$0xff]  ;;  %v374_v31 = vld [vmem:[%s3385_s28 + $0x1b0] sm:$0xff]  ;;  %v2838_v32 = vpack.c.bf16 %v383_v23, %v375_v22 }
  0x37   : > { %v382_v33 = vld [vmem:[%s3385_s28 + $0x1f0] sm:$0xff]  ;;  %v389_v34 = vld [vmem:[%s3385_s28 + $0x228] sm:$0xff]  ;;  %v391_v36 = vld [vmem:[%s3385_s28 + $0x238] sm:$0xff]  ;;  %v2804_v39 = vpack.c.bf16 %v380_v30, %v372_v29 }
  0x38   : > { %2753 = vmatpush1.bf16.msra.mxu0 %v2752_v48  ;;  %v397_v35 = vld [vmem:[%s3385_s28 + $0x268] sm:$0xff]  ;;  %v399_v37 = vld [vmem:[%s3385_s28 + $0x278] sm:$0xff]  ;;  %v3542_v40 = vld [vmem:[%s4726_s4 + $0x30] sm:$0xff]  ;;  %v2840_v41 = vpack.c.bf16 %v382_v33, %v374_v31 }
  0x39   : > { %2789 = vmatpush1.bf16.msra.mxu1 %v2788_v49  ;;  %2791 = vmatprep.subr.bf16.mxu0 %v2790_v50  ;;  %v3536_v38 = vld [vmem:[%s4726_s4 + $0x38] sm:$0xff]  ;;  %v2806_v42 = vpack.c.bf16 %v397_v35, %v389_v34  ;;  %v388_v43 = vld [vmem:[%s3385_s28 + $0x220] sm:$0xff]  ;;  %v390_v45 = vld [vmem:[%s3385_s28 + $0x230] sm:$0xff]  ;;  %v2842_v46 = vpack.c.bf16 %v399_v37, %v391_v36 }
  0x3a   : > { %2827 = vmatprep.subr.bf16.mxu1 %v2826_v54  ;;  %v396_v44 = vld [vmem:[%s3385_s28 + $0x260] sm:$0xff]  ;;  %v398_v47 = vld [vmem:[%s3385_s28 + $0x270] sm:$0xff]  ;;  %v405_v48 = vld [vmem:[%s3385_s28 + $0x2a8] sm:$0xff] }
  0x3b   : > { %542 = vmatmul.mubr.f32.vlgmr.msra.gmra.mrb[0].mxu0 %v3474_v60  ;;  %v413_v49 = vld [vmem:[%s3385_s28 + $0x2e8] sm:$0xff]  ;;  %v407_v50 = vld [vmem:[%s3385_s28 + $0x2b8] sm:$0xff]  ;;  %v2808_v52 = vpack.c.bf16 %v396_v44, %v388_v43  ;;  %v2844_v53 = vpack.c.bf16 %v398_v47, %v390_v45  ;;  %v404_v55 = vld [vmem:[%s3385_s28 + $0x2a0] sm:$0xff] }
  0x3c   : > { %631 = vmatmul.mubr.f32.vlgmr.msra.gmra.mrb[0].mxu1 %v3474_v60  ;;  %2793 = vmatpush1.bf16.msra.mxu0 %v2792_v61  ;;  %v415_v51 = vld [vmem:[%s3385_s28 + $0x2f8] sm:$0xff]  ;;  %v2810_v54 = vpack.c.bf16 %v413_v49, %v405_v48  ;;  %v412_v56 = vld [vmem:[%s3385_s28 + $0x2e0] sm:$0xff]  ;;  %v406_v57 = vld [vmem:[%s3385_s28 + $0x2b0] sm:$0xff] }
  0x3d   : > { %2829 = vmatpush1.bf16.msra.mxu1 %v2828_v62  ;;  %2795 = vmatprep.subr.bf16.mxu0 %v2794_v63  ;;  %v2846_v58 = vpack.c.bf16 %v415_v51, %v407_v50  ;;  %v414_v59 = vld [vmem:[%s3385_s28 + $0x2f0] sm:$0xff]  ;;  %v421_v61 = vld [vmem:[%s3385_s28 + $0x328] sm:$0xff]  ;;  %v423_v63 = vld [vmem:[%s3385_s28 + $0x338] sm:$0xff]  ;;  %v2812_v2 = vpack.c.bf16 %v412_v56, %v404_v55 }
  0x3e   : > { %2831 = vmatprep.subr.bf16.mxu1 %v2830_v4  ;;  %2652 = vmatprep.mubr.msk.f32.mxu0 %vm464_vm0, %v3488_v10  ;;  %v429_v62 = vld [vmem:[%s3385_s28 + $0x368] sm:$0xff]  ;;  %v431_v1 = vld [vmem:[%s3385_s28 + $0x378] sm:$0xff]  ;;  %v2848_v3 = vpack.c.bf16 %v414_v59, %v406_v57  ;;  %v420_v5 = vld [vmem:[%s3385_s28 + $0x320] sm:$0xff] }
  0x3f   : > { %2656 = vmatprep.mubr.msk.f32.mxu1 %vm464_vm0, %v3488_v10  ;;  %548 = vmatmul.mubr.f32.gmra.mrb[2].mxu0 %v3494_v12  ;;  %v2814_v4 = vpack.c.bf16 %v429_v62, %v421_v61  ;;  %v428_v6 = vld [vmem:[%s3385_s28 + $0x360] sm:$0xff]  ;;  %v422_v7 = vld [vmem:[%s3385_s28 + $0x330] sm:$0xff]  ;;  %v2850_v8 = vpack.c.bf16 %v431_v1, %v423_v63  ;;  %v447_v15 = vld [vmem:[%s3385_s28 + $0x3f8] sm:$0xff] }
  0x40   : > { %2797 = vmatpush1.bf16.msra.mxu0 %v2796_v11  ;;  %637 = vmatmul.mubr.f32.gmra.mrb[2].mxu1 %v3494_v12  ;;  %v430_v9 = vld [vmem:[%s3385_s28 + $0x370] sm:$0xff]  ;;  %v437_v11 = vld [vmem:[%s3385_s28 + $0x3a8] sm:$0xff]  ;;  %v2816_v16 = vpack.c.bf16 %v428_v6, %v420_v5  ;;  %v436_v19 = vld [vmem:[%s3385_s28 + $0x3a0] sm:$0xff] }
  0x41   : > { %2833 = vmatpush1.bf16.msra.mxu1 %v2832_v13  ;;  %2799 = vmatprep.subr.bf16.mxu0 %v2798_v14  ;;  %v445_v13 = vld [vmem:[%s3385_s28 + $0x3e8] sm:$0xff]  ;;  %v439_v14 = vld [vmem:[%s3385_s28 + $0x3b8] sm:$0xff]  ;;  %v2852_v17 = vpack.c.bf16 %v430_v9, %v422_v7  ;;  %v444_v20 = vld [vmem:[%s3385_s28 + $0x3e0] sm:$0xff] }
  0x42   : > { %2835 = vmatprep.subr.bf16.mxu1 %v2834_v18  ;;  %2653 = vmatprep.mubr.msk.f32.mxu0 %vm464_vm0, %v3512_v24  ;;  %v2818_v18 = vpack.c.bf16 %v445_v13, %v437_v11  ;;  %v438_v21 = vld [vmem:[%s3385_s28 + $0x3b0] sm:$0xff]  ;;  %v2854_v22 = vpack.c.bf16 %v447_v15, %v439_v14  ;;  %v463_v29 = vld [vmem:[%s3385_s28 + $0x478] sm:$0xff]  ;;  %v2820_v30 = vpack.c.bf16 %v444_v20, %v436_v19  ;;  %v452_v33 = vld [vmem:[%s3385_s28 + $0x420] sm:$0xff] }
  0x43   : > { %2657 = vmatprep.mubr.msk.f32.mxu1 %vm464_vm0, %v3512_v24  ;;  %554 = vmatmul.mubr.f32.gmra.mrb[4].mxu0 %v3518_v26  ;;  %v446_v23 = vld [vmem:[%s3385_s28 + $0x3f0] sm:$0xff]  ;;  %v460_v34 = vld [vmem:[%s3385_s28 + $0x460] sm:$0xff]  ;;  %v844_v43 = vld [vmem:[%s3590_s23 + $0x58] sm:$0xff] }
  0x44   : > { %2801 = vmatpush1.bf16.msra.mxu0 %v2800_v25  ;;  %643 = vmatmul.mubr.f32.gmra.mrb[4].mxu1 %v3518_v26  ;;  %v453_v25 = vld [vmem:[%s3385_s28 + $0x428] sm:$0xff]  ;;  %v2856_v31 = vpack.c.bf16 %v446_v23, %v438_v21  ;;  %v454_v35 = vld [vmem:[%s3385_s28 + $0x430] sm:$0xff]  ;;  %v2824_v44 = vpack.c.bf16 %v460_v34, %v452_v33  ;;  %v833_v47 = vld [vmem:[%s3590_s23] sm:$0xff] }
  0x45   : > { %2837 = vmatpush1.bf16.msra.mxu1 %v2836_v27  ;;  %2803 = vmatprep.subr.bf16.mxu0 %v2802_v28  ;;  %v461_v27 = vld [vmem:[%s3385_s28 + $0x468] sm:$0xff]  ;;  %v455_v28 = vld [vmem:[%s3385_s28 + $0x438] sm:$0xff]  ;;  %v462_v37 = vld [vmem:[%s3385_s28 + $0x470] sm:$0xff] }
  0x46   : > { %2839 = vmatprep.subr.bf16.mxu1 %v2838_v32  ;;  %2654 = vmatprep.mubr.msk.f32.mxu0 %vm464_vm0, %v3536_v38  ;;  %v2822_v32 = vpack.c.bf16 %v461_v27, %v453_v25  ;;  %v2858_v36 = vpack.c.bf16 %v463_v29, %v455_v28  ;;  %v2860_v45 = vpack.c.bf16 %v462_v37, %v454_v35  ;;  %v841_v48 = vld [vmem:[%s3590_s23 + $0x40] sm:$0xff]  ;;  %v835_v49 = vld [vmem:[%s3590_s23 + $0x10] sm:$0xff]  ;;  %v860_v55 = vld [vmem:[%s3590_s23 + $0xd8] sm:$0xff] }
  0x47   : > { %2658 = vmatprep.mubr.msk.f32.mxu1 %vm464_vm0, %v3536_v38  ;;  %560 = vmatmul.mubr.f32.gmra.mrb[6].mxu0 %v3542_v40  ;;  %v843_v51 = vld [vmem:[%s3590_s23 + $0x50] sm:$0xff]  ;;  %v2864_v56 = vpack.c.bf16 %v841_v48, %v833_v47  ;;  %v849_v59 = vld [vmem:[%s3590_s23 + $0x80] sm:$0xff]  ;;  %v876_v5 = vld [vmem:[%s3590_s23 + $0x158] sm:$0xff] }
  0x48   : > { %2805 = vmatpush1.bf16.msra.mxu0 %v2804_v39  ;;  %649 = vmatmul.mubr.f32.gmra.mrb[6].mxu1 %v3542_v40  ;;  %v834_v39 = vld [vmem:[%s3590_s23 + $0x8] sm:$0xff]  ;;  %v2900_v57 = vpack.c.bf16 %v843_v51, %v835_v49  ;;  %v857_v61 = vld [vmem:[%s3590_s23 + $0xc0] sm:$0xff]  ;;  %v851_v62 = vld [vmem:[%s3590_s23 + $0x90] sm:$0xff] }
  0x49   : > { %2841 = vmatpush1.bf16.msra.mxu1 %v2840_v41  ;;  %2807 = vmatprep.subr.bf16.mxu0 %v2806_v42  ;;  %v842_v41 = vld [vmem:[%s3590_s23 + $0x48] sm:$0xff]  ;;  %v836_v42 = vld [vmem:[%s3590_s23 + $0x18] sm:$0xff]  ;;  %v859_v1 = vld [vmem:[%s3590_s23 + $0xd0] sm:$0xff]  ;;  %v2868_v6 = vpack.c.bf16 %v857_v61, %v849_v59 }
  0x4a   : > { %2843 = vmatprep.subr.bf16.mxu1 %v2842_v46  ;;  %2659 = vmatprep.mubr.msk.f32.mxu0 %vm464_vm0, %v3370_v0  ;;  %v2862_v46 = vpack.c.bf16 %v842_v41, %v834_v39  ;;  %v2898_v50 = vpack.c.bf16 %v844_v43, %v836_v42  ;;  %v2904_v7 = vpack.c.bf16 %v859_v1, %v851_v62  ;;  %v865_v9 = vld [vmem:[%s3590_s23 + $0x100] sm:$0xff]  ;;  %v867_v13 = vld [vmem:[%s3590_s23 + $0x110] sm:$0xff]  ;;  %v892_v19 = vld [vmem:[%s3590_s23 + $0x1d8] sm:$0xff] }
  0x4b   : > { %2663 = vmatprep.mubr.msk.f32.mxu1 %vm464_vm0, %v3370_v0  ;;  %v873_v11 = vld [vmem:[%s3590_s23 + $0x140] sm:$0xff]  ;;  %v875_v15 = vld [vmem:[%s3590_s23 + $0x150] sm:$0xff]  ;;  %v908_v33 = vld [vmem:[%s3590_s23 + $0x258] sm:$0xff] }
  0x4c   : > { %2809 = vmatpush1.bf16.msra.mxu0 %v2808_v52  ;;  %v850_v52 = vld [vmem:[%s3590_s23 + $0x88] sm:$0xff]  ;;  %v2872_v20 = vpack.c.bf16 %v873_v11, %v865_v9  ;;  %v2908_v21 = vpack.c.bf16 %v875_v15, %v867_v13  ;;  %v881_v23 = vld [vmem:[%s3590_s23 + $0x180] sm:$0xff]  ;;  %v883_v27 = vld [vmem:[%s3590_s23 + $0x190] sm:$0xff] }
  0x4d   : > { %2845 = vmatpush1.bf16.msra.mxu1 %v2844_v53  ;;  %2811 = vmatprep.subr.bf16.mxu0 %v2810_v54  ;;  %v858_v53 = vld [vmem:[%s3590_s23 + $0xc8] sm:$0xff]  ;;  %v852_v54 = vld [vmem:[%s3590_s23 + $0x98] sm:$0xff]  ;;  %v889_v25 = vld [vmem:[%s3590_s23 + $0x1c0] sm:$0xff] }
  0x4e   : > { %2847 = vmatprep.subr.bf16.mxu1 %v2846_v58  ;;  %v2866_v58 = vpack.c.bf16 %v858_v53, %v850_v52  ;;  %v2902_v63 = vpack.c.bf16 %v860_v55, %v852_v54  ;;  %v891_v29 = vld [vmem:[%s3590_s23 + $0x1d0] sm:$0xff]  ;;  %v2876_v34 = vpack.c.bf16 %v889_v25, %v881_v23  ;;  %v897_v37 = vld [vmem:[%s3590_s23 + $0x200] sm:$0xff]  ;;  %v924_v47 = vld [vmem:[%s3590_s23 + $0x2d8] sm:$0xff] }
  0x4f   : > { %v2912_v35 = vpack.c.bf16 %v891_v29, %v883_v27  ;;  %v905_v39 = vld [vmem:[%s3590_s23 + $0x240] sm:$0xff]  ;;  %v899_v41 = vld [vmem:[%s3590_s23 + $0x210] sm:$0xff]  ;;  %v940_v59 = vld [vmem:[%s3590_s23 + $0x358] sm:$0xff] }
  0x50   : > { %2813 = vmatpush1.bf16.msra.mxu0 %v2812_v2  ;;  %v866_v2 = vld [vmem:[%s3590_s23 + $0x108] sm:$0xff]  ;;  %v907_v43 = vld [vmem:[%s3590_s23 + $0x250] sm:$0xff]  ;;  %v2880_v48 = vpack.c.bf16 %v905_v39, %v897_v37  ;;  %v913_v51 = vld [vmem:[%s3590_s23 + $0x280] sm:$0xff] }
  0x51   : > { %2849 = vmatpush1.bf16.msra.mxu1 %v2848_v3  ;;  %2815 = vmatprep.subr.bf16.mxu0 %v2814_v4  ;;  %v874_v3 = vld [vmem:[%s3590_s23 + $0x148] sm:$0xff]  ;;  %v868_v4 = vld [vmem:[%s3590_s23 + $0x118] sm:$0xff]  ;;  %v2916_v49 = vpack.c.bf16 %v907_v43, %v899_v41  ;;  %v921_v52 = vld [vmem:[%s3590_s23 + $0x2c0] sm:$0xff] }
  0x52   : > { %2851 = vmatprep.subr.bf16.mxu1 %v2850_v8  ;;  %v2870_v8 = vpack.c.bf16 %v874_v3, %v866_v2  ;;  %v2906_v14 = vpack.c.bf16 %v876_v5, %v868_v4  ;;  %v915_v53 = vld [vmem:[%s3590_s23 + $0x290] sm:$0xff]  ;;  %v2884_v61 = vpack.c.bf16 %v921_v52, %v913_v51  ;;  %v929_v1 = vld [vmem:[%s3590_s23 + $0x300] sm:$0xff]  ;;  %v864_v51 = vld [vmem:[%s3590_s23 + $0xf8] sm:$0xff] }
  0x53   : > { %v923_v55 = vld [vmem:[%s3590_s23 + $0x2d0] sm:$0xff]  ;;  %v937_v2 = vld [vmem:[%s3590_s23 + $0x340] sm:$0xff] }
  0x54   : > { %2817 = vmatpush1.bf16.msra.mxu0 %v2816_v16  ;;  %v882_v16 = vld [vmem:[%s3590_s23 + $0x188] sm:$0xff]  ;;  %v2920_v62 = vpack.c.bf16 %v923_v55, %v915_v53  ;;  %v931_v3 = vld [vmem:[%s3590_s23 + $0x310] sm:$0xff]  ;;  %v2888_v9 = vpack.c.bf16 %v937_v2, %v929_v1  ;;  %v953_v15 = vld [vmem:[%s3590_s23 + $0x3c0] sm:$0xff] }
  0x55   : > { %2853 = vmatpush1.bf16.msra.mxu1 %v2852_v17  ;;  %2819 = vmatprep.subr.bf16.mxu0 %v2818_v18  ;;  %v890_v17 = vld [vmem:[%s3590_s23 + $0x1c8] sm:$0xff]  ;;  %v884_v18 = vld [vmem:[%s3590_s23 + $0x198] sm:$0xff]  ;;  %v939_v5 = vld [vmem:[%s3590_s23 + $0x350] sm:$0xff] }
  0x56   : > { %2855 = vmatprep.subr.bf16.mxu1 %v2854_v22  ;;  %v2874_v22 = vpack.c.bf16 %v890_v17, %v882_v16  ;;  %v2910_v28 = vpack.c.bf16 %v892_v19, %v884_v18  ;;  %v2924_v11 = vpack.c.bf16 %v939_v5, %v931_v3  ;;  %v947_v16 = vld [vmem:[%s3590_s23 + $0x390] sm:$0xff]  ;;  %v962_v19 = vld [vmem:[%s3590_s23 + $0x408] sm:$0xff]  ;;  %v969_v29 = vld [vmem:[%s3590_s23 + $0x440] sm:$0xff] }
  0x57   : > { %v955_v18 = vld [vmem:[%s3590_s23 + $0x3d0] sm:$0xff]  ;;  %v845_v43 = vld [vmem:[%s3590_s23 + $0x60] sm:$0xff]  ;;  %v880_v1 = vld [vmem:[%s3590_s23 + $0x178] sm:$0xff] }
  0x58   : > { %2821 = vmatpush1.bf16.msra.mxu0 %v2820_v30  ;;  %v898_v30 = vld [vmem:[%s3590_s23 + $0x208] sm:$0xff]  ;;  %v2928_v25 = vpack.c.bf16 %v955_v18, %v947_v16  ;;  %v853_v53 = vld [vmem:[%s3590_s23 + $0xa0] sm:$0xff]  ;;  %v887_v18 = vld [vmem:[%s3590_s23 + $0x1b0] sm:$0xff] }
  0x59   : > { %2857 = vmatpush1.bf16.msra.mxu1 %v2856_v31  ;;  %2823 = vmatprep.subr.bf16.mxu0 %v2822_v32  ;;  %v906_v31 = vld [vmem:[%s3590_s23 + $0x248] sm:$0xff]  ;;  %v900_v32 = vld [vmem:[%s3590_s23 + $0x218] sm:$0xff]  ;;  %v869_v3 = vld [vmem:[%s3590_s23 + $0x120] sm:$0xff] }
  0x5a   : > { %2859 = vmatprep.subr.bf16.mxu1 %v2858_v36  ;;  %v2878_v36 = vpack.c.bf16 %v906_v31, %v898_v30  ;;  %v2914_v42 = vpack.c.bf16 %v908_v33, %v900_v32  ;;  %v963_v30 = vld [vmem:[%s3590_s23 + $0x410] sm:$0xff]  ;;  %v838_v33 = vld [vmem:[%s3590_s23 + $0x28] sm:$0xff]  ;;  %v885_v16 = vld [vmem:[%s3590_s23 + $0x1a0] sm:$0xff] }
  0x5b   : > { %v971_v32 = vld [vmem:[%s3590_s23 + $0x450] sm:$0xff] }
  0x5c   : > { %2825 = vmatpush1.bf16.msra.mxu0 %v2824_v44  ;;  %v914_v44 = vld [vmem:[%s3590_s23 + $0x288] sm:$0xff]  ;;  %v2932_v39 = vpack.c.bf16 %v971_v32, %v963_v30  ;;  %v909_v32 = vld [vmem:[%s3590_s23 + $0x260] sm:$0xff] }
  0x5d   : > { %2861 = vmatpush1.bf16.msra.mxu1 %v2860_v45  ;;  %2863 = vmatprep.subr.bf16.mxu0 %v2862_v46  ;;  %v922_v45 = vld [vmem:[%s3590_s23 + $0x2c8] sm:$0xff]  ;;  %v916_v46 = vld [vmem:[%s3590_s23 + $0x298] sm:$0xff] }
  0x5e   : > { %2899 = vmatprep.subr.bf16.mxu1 %v2898_v50  ;;  %v2882_v50 = vpack.c.bf16 %v922_v45, %v914_v44  ;;  %v2918_v54 = vpack.c.bf16 %v924_v47, %v916_v46  ;;  %v839_v45 = vld [vmem:[%s3590_s23 + $0x30] sm:$0xff]  ;;  %v854_v47 = vld [vmem:[%s3590_s23 + $0xa8] sm:$0xff] }
  0x5f   : > { %720 = vmatmul.mubr.f32.vlgmr.msra.gmra.mrb[8].mxu0 %v3474_v60  ;;  %v847_v46 = vld [vmem:[%s3590_s23 + $0x70] sm:$0xff] }
  0x60   : > { %809 = vmatmul.mubr.f32.vlgmr.msra.gmra.mrb[8].mxu1 %v3474_v60  ;;  %2865 = vmatpush1.bf16.msra.mxu0 %v2864_v56  ;;  %v930_v56 = vld [vmem:[%s3590_s23 + $0x308] sm:$0xff]  ;;  %v2972_v52 = vpack.c.bf16 %v847_v46, %v839_v45  ;;  %v917_v45 = vld [vmem:[%s3590_s23 + $0x2a0] sm:$0xff] }
  0x61   : > { %2901 = vmatpush1.bf16.msra.mxu1 %v2900_v57  ;;  %2867 = vmatprep.subr.bf16.mxu0 %v2866_v58  ;;  %v938_v57 = vld [vmem:[%s3590_s23 + $0x348] sm:$0xff]  ;;  %v932_v58 = vld [vmem:[%s3590_s23 + $0x318] sm:$0xff]  ;;  %v925_v46 = vld [vmem:[%s3590_s23 + $0x2e0] sm:$0xff] }
  0x62   : > { %2903 = vmatprep.subr.bf16.mxu1 %v2902_v63  ;;  %2660 = vmatprep.mubr.msk.f32.mxu0 %vm464_vm0, %v3488_v10  ;;  %v2886_v63 = vpack.c.bf16 %v938_v57, %v930_v56  ;;  %v2922_v4 = vpack.c.bf16 %v940_v59, %v932_v58  ;;  %v855_v56 = vld [vmem:[%s3590_s23 + $0xb0] sm:$0xff]  ;;  %v870_v59 = vld [vmem:[%s3590_s23 + $0x128] sm:$0xff] }
  0x63   : > { %2664 = vmatprep.mubr.msk.f32.mxu1 %vm464_vm0, %v3488_v10  ;;  %726 = vmatmul.mubr.f32.gmra.mrb[10].mxu0 %v3494_v12  ;;  %v863_v57 = vld [vmem:[%s3590_s23 + $0xf0] sm:$0xff] }
  0x64   : > { %2869 = vmatpush1.bf16.msra.mxu0 %v2868_v6  ;;  %815 = vmatmul.mubr.f32.gmra.mrb[10].mxu1 %v3494_v12  ;;  %v946_v6 = vld [vmem:[%s3590_s23 + $0x388] sm:$0xff]  ;;  %v2976_v2 = vpack.c.bf16 %v863_v57, %v855_v56 }
  0x65   : > { %2905 = vmatpush1.bf16.msra.mxu1 %v2904_v7  ;;  %2871 = vmatprep.subr.bf16.mxu0 %v2870_v8  ;;  %v948_v7 = vld [vmem:[%s3590_s23 + $0x398] sm:$0xff] }
  0x66   : > { %2907 = vmatprep.subr.bf16.mxu1 %v2906_v14  ;;  %2661 = vmatprep.mubr.msk.f32.mxu0 %vm464_vm0, %v3512_v24  ;;  %v956_v8 = vld [vmem:[%s3590_s23 + $0x3d8] sm:$0xff]  ;;  %v945_v14 = vld [vmem:[%s3590_s23 + $0x380] sm:$0xff] }
  0x67   : > { %2665 = vmatprep.mubr.msk.f32.mxu1 %vm464_vm0, %v3512_v24  ;;  %732 = vmatmul.mubr.f32.gmra.mrb[12].mxu0 %v3518_v26  ;;  %v2926_v17 = vpack.c.bf16 %v956_v8, %v948_v7  ;;  %v2892_v23 = vpack.c.bf16 %v953_v15, %v945_v14  ;;  %v886_v8 = vld [vmem:[%s3590_s23 + $0x1a8] sm:$0xff]  ;;  %v896_v14 = vld [vmem:[%s3590_s23 + $0x1f8] sm:$0xff] }
  0x68   : > { %2873 = vmatpush1.bf16.msra.mxu0 %v2872_v20  ;;  %821 = vmatmul.mubr.f32.gmra.mrb[12].mxu1 %v3518_v26  ;;  %v970_v20 = vld [vmem:[%s3590_s23 + $0x448] sm:$0xff] }
  0x69   : > { %2909 = vmatpush1.bf16.msra.mxu1 %v2908_v21  ;;  %2875 = vmatprep.subr.bf16.mxu0 %v2874_v22  ;;  %v964_v21 = vld [vmem:[%s3590_s23 + $0x418] sm:$0xff]  ;;  %v2894_v27 = vpack.c.bf16 %v970_v20, %v962_v19  ;;  %v895_v20 = vld [vmem:[%s3590_s23 + $0x1f0] sm:$0xff] }
  0x6a   : > { %2911 = vmatprep.subr.bf16.mxu1 %v2910_v28  ;;  %2662 = vmatprep.mubr.msk.f32.mxu0 %vm464_vm0, %v3536_v38  ;;  %v972_v22 = vld [vmem:[%s3590_s23 + $0x458] sm:$0xff]  ;;  %v961_v28 = vld [vmem:[%s3590_s23 + $0x400] sm:$0xff] }
  0x6b   : > { %2666 = vmatprep.mubr.msk.f32.mxu1 %vm464_vm0, %v3536_v38  ;;  %738 = vmatmul.mubr.f32.gmra.mrb[14].mxu0 %v3542_v40  ;;  %v2930_v31 = vpack.c.bf16 %v972_v22, %v964_v21  ;;  %v2896_v37 = vpack.c.bf16 %v969_v29, %v961_v28  ;;  %v902_v21 = vld [vmem:[%s3590_s23 + $0x228] sm:$0xff]  ;;  %v2984_v29 = vpack.c.bf16 %v895_v20, %v887_v18 }
  0x6c   : > { %2877 = vmatpush1.bf16.msra.mxu0 %v2876_v34  ;;  %827 = vmatmul.mubr.f32.gmra.mrb[14].mxu1 %v3542_v40  ;;  %v846_v34 = vld [vmem:[%s3590_s23 + $0x68] sm:$0xff] }
  0x6d   : > { %2913 = vmatpush1.bf16.msra.mxu1 %v2912_v35  ;;  %2879 = vmatprep.subr.bf16.mxu0 %v2878_v36  ;;  %v840_v35 = vld [vmem:[%s3590_s23 + $0x38] sm:$0xff]  ;;  %v2934_v41 = vpack.c.bf16 %v846_v34, %v838_v33  ;;  %v910_v22 = vld [vmem:[%s3590_s23 + $0x268] sm:$0xff]  ;;  %v903_v33 = vld [vmem:[%s3590_s23 + $0x230] sm:$0xff] }
  0x6e   : > { %2915 = vmatprep.subr.bf16.mxu1 %v2914_v42  ;;  %2667 = vmatprep.mubr.msk.f32.mxu0 %vm464_vm0, %v3370_v0  ;;  %v848_v36 = vld [vmem:[%s3590_s23 + $0x78] sm:$0xff]  ;;  %v837_v42 = vld [vmem:[%s3590_s23 + $0x20] sm:$0xff]  ;;  %v2950_v30 = vpack.c.bf16 %v910_v22, %v902_v21 }
  0x6f   : > { %2671 = vmatprep.mubr.msk.f32.mxu1 %vm464_vm0, %v3370_v0  ;;  %v954_v0 = vld [vmem:[%s3590_s23 + $0x3c8] sm:$0xff]  ;;  %v2970_v44 = vpack.c.bf16 %v848_v36, %v840_v35  ;;  %v911_v35 = vld [vmem:[%s3590_s23 + $0x270] sm:$0xff]  ;;  %v965_v21 = vld [vmem:[%s3590_s23 + $0x420] sm:$0xff] }
  0x70   : > { %2881 = vmatpush1.bf16.msra.mxu0 %v2880_v48  ;;  %v2890_v13 = vpack.c.bf16 %v954_v0, %v946_v6  ;;  %v862_v48 = vld [vmem:[%s3590_s23 + $0xe8] sm:$0xff]  ;;  %v871_v6 = vld [vmem:[%s3590_s23 + $0x130] sm:$0xff]  ;;  %v973_v22 = vld [vmem:[%s3590_s23 + $0x460] sm:$0xff] }
  0x71   : > { %2917 = vmatpush1.bf16.msra.mxu1 %v2916_v49  ;;  %2883 = vmatprep.subr.bf16.mxu0 %v2882_v50  ;;  %v2936_v49 = vpack.c.bf16 %v845_v43, %v837_v42  ;;  %v856_v50 = vld [vmem:[%s3590_s23 + $0xb8] sm:$0xff]  ;;  %v2938_v55 = vpack.c.bf16 %v862_v48, %v854_v47  ;;  %v879_v0 = vld [vmem:[%s3590_s23 + $0x170] sm:$0xff]  ;;  %v918_v36 = vld [vmem:[%s3590_s23 + $0x2a8] sm:$0xff]  ;;  %v2988_v43 = vpack.c.bf16 %v911_v35, %v903_v33 }
  0x72   : > { %2919 = vmatprep.subr.bf16.mxu1 %v2918_v54  ;;  %v861_v54 = vld [vmem:[%s3590_s23 + $0xe0] sm:$0xff]  ;;  %v2974_v58 = vpack.c.bf16 %v864_v51, %v856_v50  ;;  %v2980_v15 = vpack.c.bf16 %v879_v0, %v871_v6  ;;  %v919_v47 = vld [vmem:[%s3590_s23 + $0x2b0] sm:$0xff]  ;;  %v934_v50 = vld [vmem:[%s3590_s23 + $0x328] sm:$0xff] }
  0x73   : > { %v942_v51 = vld [vmem:[%s3590_s23 + $0x368] sm:$0xff]  ;;  %v1365_v35 = vld [vmem:[%s3793_s29] sm:$0xff] }
  0x74   : > { %2885 = vmatpush1.bf16.msra.mxu0 %v2884_v61  ;;  %v878_v61 = vld [vmem:[%s3590_s23 + $0x168] sm:$0xff]  ;;  %v2958_v57 = vpack.c.bf16 %v942_v51, %v934_v50  ;;  %v1383_v51 = vld [vmem:[%s3793_s29 + $0x90] sm:$0xff] }
  0x75   : > { %2921 = vmatpush1.bf16.msra.mxu1 %v2920_v62  ;;  %2887 = vmatprep.subr.bf16.mxu0 %v2886_v63  ;;  %v2940_v62 = vpack.c.bf16 %v861_v54, %v853_v53  ;;  %v872_v63 = vld [vmem:[%s3590_s23 + $0x138] sm:$0xff]  ;;  %v2942_v5 = vpack.c.bf16 %v878_v61, %v870_v59  ;;  %v941_v59 = vld [vmem:[%s3590_s23 + $0x360] sm:$0xff]  ;;  %v935_v61 = vld [vmem:[%s3590_s23 + $0x330] sm:$0xff] }
  0x76   : > { %2923 = vmatprep.subr.bf16.mxu1 %v2922_v4  ;;  %v877_v4 = vld [vmem:[%s3590_s23 + $0x160] sm:$0xff]  ;;  %v2978_v7 = vpack.c.bf16 %v880_v1, %v872_v63  ;;  %v936_v53 = vld [vmem:[%s3590_s23 + $0x338] sm:$0xff]  ;;  %v943_v63 = vld [vmem:[%s3590_s23 + $0x370] sm:$0xff] }
  0x77   : > { %v944_v54 = vld [vmem:[%s3590_s23 + $0x378] sm:$0xff]  ;;  %v950_v1 = vld [vmem:[%s3590_s23 + $0x3a8] sm:$0xff]  ;;  %v2996_v6 = vpack.c.bf16 %v943_v63, %v935_v61  ;;  %v1405_v63 = vld [vmem:[%s3793_s29 + $0x140] sm:$0xff] }
  0x78   : > { %2889 = vmatpush1.bf16.msra.mxu0 %v2888_v9  ;;  %v894_v9 = vld [vmem:[%s3590_s23 + $0x1e8] sm:$0xff] }
  0x79   : > { %2925 = vmatpush1.bf16.msra.mxu1 %v2924_v11  ;;  %2891 = vmatprep.subr.bf16.mxu0 %v2890_v13  ;;  %v2944_v11 = vpack.c.bf16 %v877_v4, %v869_v3  ;;  %v888_v13 = vld [vmem:[%s3590_s23 + $0x1b8] sm:$0xff]  ;;  %v2946_v19 = vpack.c.bf16 %v894_v9, %v886_v8  ;;  %v957_v8 = vld [vmem:[%s3590_s23 + $0x3e0] sm:$0xff]  ;;  %v951_v9 = vld [vmem:[%s3590_s23 + $0x3b0] sm:$0xff] }
  0x7a   : > { %2927 = vmatprep.subr.bf16.mxu1 %v2926_v17  ;;  %v893_v17 = vld [vmem:[%s3590_s23 + $0x1e0] sm:$0xff]  ;;  %v952_v3 = vld [vmem:[%s3590_s23 + $0x3b8] sm:$0xff] }
  0x7b   : > { %v2948_v28 = vpack.c.bf16 %v893_v17, %v885_v16  ;;  %v960_v4 = vld [vmem:[%s3590_s23 + $0x3f8] sm:$0xff] }
  0x7c   : > { %2893 = vmatpush1.bf16.msra.mxu0 %v2892_v23  ;;  %v2982_v23 = vpack.c.bf16 %v896_v14, %v888_v13  ;;  %v959_v13 = vld [vmem:[%s3590_s23 + $0x3f0] sm:$0xff]  ;;  %v966_v14 = vld [vmem:[%s3590_s23 + $0x428] sm:$0xff]  ;;  %v968_v16 = vld [vmem:[%s3590_s23 + $0x438] sm:$0xff] }
  0x7d   : > { %2929 = vmatpush1.bf16.msra.mxu1 %v2928_v25  ;;  %2895 = vmatprep.subr.bf16.mxu0 %v2894_v27  ;;  %v904_v25 = vld [vmem:[%s3590_s23 + $0x238] sm:$0xff] }
  0x7e   : > { %2931 = vmatprep.subr.bf16.mxu1 %v2930_v31  ;;  %v912_v27 = vld [vmem:[%s3590_s23 + $0x278] sm:$0xff]  ;;  %v901_v31 = vld [vmem:[%s3590_s23 + $0x220] sm:$0xff] }
  0x7f   : > { %v2986_v34 = vpack.c.bf16 %v912_v27, %v904_v25  ;;  %v2952_v42 = vpack.c.bf16 %v909_v32, %v901_v31  ;;  %v976_v17 = vld [vmem:[%s3590_s23 + $0x478] sm:$0xff]  ;;  %v975_v27 = vld [vmem:[%s3590_s23 + $0x470] sm:$0xff]  ;;  %v2968_v32 = vpack.c.bf16 %v973_v22, %v965_v21  ;;  %v1429_v21 = vld [vmem:[%s3793_s29 + $0x200] sm:$0xff] }
  0x80   : > { %2897 = vmatpush1.bf16.msra.mxu0 %v2896_v37  ;;  %v926_v37 = vld [vmem:[%s3590_s23 + $0x2e8] sm:$0xff]  ;;  %v3002_v25 = vpack.c.bf16 %v976_v17, %v968_v16  ;;  %v1376_v31 = vld [vmem:[%s3793_s29 + $0x58] sm:$0xff]  ;;  %v1437_v22 = vld [vmem:[%s3793_s29 + $0x240] sm:$0xff] }
  0x81   : > { %2933 = vmatpush1.bf16.msra.mxu1 %v2932_v39  ;;  %2935 = vmatprep.subr.bf16.mxu0 %v2934_v41  ;;  %v920_v39 = vld [vmem:[%s3590_s23 + $0x2b8] sm:$0xff] }
  0x82   : > { %2971 = vmatprep.subr.bf16.mxu1 %v2970_v44  ;;  %v928_v41 = vld [vmem:[%s3590_s23 + $0x2f8] sm:$0xff]  ;;  %v2954_v44 = vpack.c.bf16 %v926_v37, %v918_v36  ;;  %v1373_v36 = vld [vmem:[%s3793_s29 + $0x40] sm:$0xff] }
  0x83   : > { %1042 = vmatmul.mubr.f32.vlgmr.msra.gmra.mrb[16].mxu0 %v3474_v60  ;;  %v2990_v48 = vpack.c.bf16 %v928_v41, %v920_v39  ;;  %v1367_v39 = vld [vmem:[%s3793_s29 + $0x10] sm:$0xff]  ;;  %v1432_v17 = vld [vmem:[%s3793_s29 + $0x218] sm:$0xff] }
  0x84   : > { %1131 = vmatmul.mubr.f32.vlgmr.msra.gmra.mrb[16].mxu1 %v3474_v60  ;;  %2937 = vmatpush1.bf16.msra.mxu0 %v2936_v49  ;;  %v927_v49 = vld [vmem:[%s3590_s23 + $0x2f0] sm:$0xff] }
  0x85   : > { %2973 = vmatpush1.bf16.msra.mxu1 %v2972_v52  ;;  %2668 = vmatprep.mubr.msk.f32.mxu0 %vm464_vm0, %v3488_v10  ;;  %v3765_v52 = vld [vmem:[%s4726_s4 + $0x8] sm:$0xff]  ;;  %v2992_v56 = vpack.c.bf16 %v927_v49, %v919_v47  ;;  %v1375_v41 = vld [vmem:[%s3793_s29 + $0x50] sm:$0xff]  ;;  %v1389_v49 = vld [vmem:[%s3793_s29 + $0xc0] sm:$0xff] }
  0x86   : > { %2672 = vmatprep.mubr.msk.f32.mxu1 %vm464_vm0, %v3488_v10  ;;  %2939 = vmatprep.subr.bf16.mxu0 %v2938_v55  ;;  %v2956_v55 = vpack.c.bf16 %v925_v46, %v917_v45  ;;  %v1384_v45 = vld [vmem:[%s3793_s29 + $0x98] sm:$0xff]  ;;  %v3044_v47 = vpack.c.bf16 %v1375_v41, %v1367_v39  ;;  %v1462_v39 = vld [vmem:[%s3793_s29 + $0x308] sm:$0xff] }
  0x87   : > { %1048 = vmatmul.mubr.f32.gmra.mrb[18].mxu0 %v3494_v12  ;;  %2975 = vmatprep.subr.bf16.mxu1 %v2974_v58  ;;  %v933_v58 = vld [vmem:[%s3590_s23 + $0x320] sm:$0xff]  ;;  %v1392_v46 = vld [vmem:[%s3793_s29 + $0xd8] sm:$0xff]  ;;  %v1470_v41 = vld [vmem:[%s3793_s29 + $0x348] sm:$0xff] }
  0x88   : > { %1137 = vmatmul.mubr.f32.gmra.mrb[18].mxu1 %v3494_v12  ;;  %2941 = vmatpush1.bf16.msra.mxu0 %v2940_v62  ;;  %v2994_v62 = vpack.c.bf16 %v944_v54, %v936_v53  ;;  %v1391_v53 = vld [vmem:[%s3793_s29 + $0xd0] sm:$0xff]  ;;  %v3046_v54 = vpack.c.bf16 %v1392_v46, %v1384_v45  ;;  %v3030_v45 = vpack.c.bf16 %v1470_v41, %v1462_v39  ;;  %v1461_v46 = vld [vmem:[%s3793_s29 + $0x300] sm:$0xff]  ;;  %v1404_v41 = vld [vmem:[%s3793_s29 + $0x138] sm:$0xff] }
  0x89   : > { %2977 = vmatpush1.bf16.msra.mxu1 %v2976_v2  ;;  %2669 = vmatprep.mubr.msk.f32.mxu0 %vm464_vm0, %v3512_v24  ;;  %v958_v2 = vld [vmem:[%s3590_s23 + $0x3e8] sm:$0xff]  ;;  %v3048_v61 = vpack.c.bf16 %v1391_v53, %v1383_v51 }
  0x8a   : > { %2673 = vmatprep.mubr.msk.f32.mxu1 %vm464_vm0, %v3512_v24  ;;  %2943 = vmatprep.subr.bf16.mxu0 %v2942_v5  ;;  %v2960_v5 = vpack.c.bf16 %v941_v59, %v933_v58  ;;  %v2962_v0 = vpack.c.bf16 %v958_v2, %v950_v1  ;;  %v1400_v58 = vld [vmem:[%s3793_s29 + $0x118] sm:$0xff]  ;;  %v1399_v1 = vld [vmem:[%s3793_s29 + $0x110] sm:$0xff]  ;;  %v1478_v51 = vld [vmem:[%s3793_s29 + $0x388] sm:$0xff] }
  0x8b   : > { %1054 = vmatmul.mubr.f32.gmra.mrb[20].mxu0 %v3518_v26  ;;  %2979 = vmatprep.subr.bf16.mxu1 %v2978_v7  ;;  %v949_v7 = vld [vmem:[%s3590_s23 + $0x3a0] sm:$0xff]  ;;  %v1408_v59 = vld [vmem:[%s3793_s29 + $0x158] sm:$0xff]  ;;  %v1407_v2 = vld [vmem:[%s3793_s29 + $0x150] sm:$0xff] }
  0x8c   : > { %1143 = vmatmul.mubr.f32.gmra.mrb[20].mxu1 %v3518_v26  ;;  %2945 = vmatpush1.bf16.msra.mxu0 %v2944_v11  ;;  %v2998_v11 = vpack.c.bf16 %v960_v4, %v952_v3  ;;  %v2964_v18 = vpack.c.bf16 %v957_v8, %v949_v7  ;;  %v3050_v3 = vpack.c.bf16 %v1408_v59, %v1400_v58  ;;  %v1414_v4 = vld [vmem:[%s3793_s29 + $0x188] sm:$0xff]  ;;  %v1413_v8 = vld [vmem:[%s3793_s29 + $0x180] sm:$0xff] }
  0x8d   : > { %2981 = vmatpush1.bf16.msra.mxu1 %v2980_v15  ;;  %2670 = vmatprep.mubr.msk.f32.mxu0 %vm464_vm0, %v3536_v38  ;;  %v974_v15 = vld [vmem:[%s3590_s23 + $0x468] sm:$0xff]  ;;  %v3052_v7 = vpack.c.bf16 %v1407_v2, %v1399_v1  ;;  %v1477_v59 = vld [vmem:[%s3793_s29 + $0x380] sm:$0xff] }
  0x8e   : > { %2674 = vmatprep.mubr.msk.f32.mxu1 %vm464_vm0, %v3536_v38  ;;  %2947 = vmatprep.subr.bf16.mxu0 %v2946_v19  ;;  %v3000_v19 = vpack.c.bf16 %v959_v13, %v951_v9  ;;  %v2966_v20 = vpack.c.bf16 %v974_v15, %v966_v14  ;;  %v1421_v9 = vld [vmem:[%s3793_s29 + $0x1c0] sm:$0xff]  ;;  %v1423_v13 = vld [vmem:[%s3793_s29 + $0x1d0] sm:$0xff]  ;;  %v1430_v14 = vld [vmem:[%s3793_s29 + $0x208] sm:$0xff] }
  0x8f   : > { %1060 = vmatmul.mubr.f32.gmra.mrb[22].mxu0 %v3542_v40  ;;  %2983 = vmatprep.subr.bf16.mxu1 %v2982_v23  ;;  %v967_v23 = vld [vmem:[%s3590_s23 + $0x430] sm:$0xff]  ;;  %v1438_v15 = vld [vmem:[%s3793_s29 + $0x248] sm:$0xff] }
  0x90   : > { %1149 = vmatmul.mubr.f32.gmra.mrb[22].mxu1 %v3542_v40  ;;  %2949 = vmatpush1.bf16.msra.mxu0 %v2948_v28  ;;  %v1366_v28 = vld [vmem:[%s3793_s29 + $0x8] sm:$0xff]  ;;  %v3004_v33 = vpack.c.bf16 %v975_v27, %v967_v23  ;;  %v1431_v23 = vld [vmem:[%s3793_s29 + $0x210] sm:$0xff] }
  0x91   : > { %2985 = vmatpush1.bf16.msra.mxu1 %v2984_v29  ;;  %2951 = vmatprep.subr.bf16.mxu0 %v2950_v30  ;;  %v1374_v29 = vld [vmem:[%s3793_s29 + $0x48] sm:$0xff]  ;;  %v1368_v30 = vld [vmem:[%s3793_s29 + $0x18] sm:$0xff] }
  0x92   : > { %2987 = vmatprep.subr.bf16.mxu1 %v2986_v34  ;;  %2675 = vmatprep.mubr.msk.f32.mxu0 %vm464_vm0, %v3765_v52  ;;  %v3006_v34 = vpack.c.bf16 %v1374_v29, %v1366_v28  ;;  %v3042_v37 = vpack.c.bf16 %v1376_v31, %v1368_v30  ;;  %v1446_v27 = vld [vmem:[%s3793_s29 + $0x288] sm:$0xff]  ;;  %v1448_v29 = vld [vmem:[%s3793_s29 + $0x298] sm:$0xff] }
  0x93   : > { %2679 = vmatprep.mubr.msk.f32.mxu1 %vm464_vm0, %v3765_v52  ;;  %v1454_v28 = vld [vmem:[%s3793_s29 + $0x2c8] sm:$0xff]  ;;  %v1456_v30 = vld [vmem:[%s3793_s29 + $0x2d8] sm:$0xff] }
  0x94   : > { %2953 = vmatpush1.bf16.msra.mxu0 %v2952_v42  ;;  %v1382_v42 = vld [vmem:[%s3793_s29 + $0x88] sm:$0xff] }
  0x95   : > { %2989 = vmatpush1.bf16.msra.mxu1 %v2988_v43  ;;  %2955 = vmatprep.subr.bf16.mxu0 %v2954_v44  ;;  %v1390_v43 = vld [vmem:[%s3793_s29 + $0xc8] sm:$0xff]  ;;  %v3008_v44 = vpack.c.bf16 %v1373_v36, %v1365_v35  ;;  %v1447_v35 = vld [vmem:[%s3793_s29 + $0x290] sm:$0xff]  ;;  %v3062_v36 = vpack.c.bf16 %v1456_v30, %v1448_v29  ;;  %v1385_v30 = vld [vmem:[%s3793_s29 + $0xa0] sm:$0xff] }
  0x96   : > { %2991 = vmatprep.subr.bf16.mxu1 %v2990_v48  ;;  %v1381_v48 = vld [vmem:[%s3793_s29 + $0x80] sm:$0xff]  ;;  %v3010_v50 = vpack.c.bf16 %v1390_v43, %v1382_v42  ;;  %v1472_v42 = vld [vmem:[%s3793_s29 + $0x358] sm:$0xff]  ;;  %v1486_v53 = vld [vmem:[%s3793_s29 + $0x3c8] sm:$0xff] }
  0x97   : > { %v3034_v58 = vpack.c.bf16 %v1486_v53, %v1478_v51  ;;  %v1494_v1 = vld [vmem:[%s3793_s29 + $0x408] sm:$0xff] }
  0x98   : > { %2957 = vmatpush1.bf16.msra.mxu0 %v2956_v55  ;;  %v1398_v55 = vld [vmem:[%s3793_s29 + $0x108] sm:$0xff] }
  0x99   : > { %2993 = vmatpush1.bf16.msra.mxu1 %v2992_v56  ;;  %2959 = vmatprep.subr.bf16.mxu0 %v2958_v57  ;;  %v1406_v56 = vld [vmem:[%s3793_s29 + $0x148] sm:$0xff]  ;;  %v3012_v57 = vpack.c.bf16 %v1389_v49, %v1381_v48  ;;  %v1463_v48 = vld [vmem:[%s3793_s29 + $0x310] sm:$0xff] }
  0x9a   : > { %2995 = vmatprep.subr.bf16.mxu1 %v2994_v62  ;;  %v1397_v62 = vld [vmem:[%s3793_s29 + $0x100] sm:$0xff]  ;;  %v1502_v2 = vld [vmem:[%s3793_s29 + $0x448] sm:$0xff] }
  0x9b   : > { %v1418_v51 = vld [vmem:[%s3793_s29 + $0x1a8] sm:$0xff] }
  0x9c   : > { %2961 = vmatpush1.bf16.msra.mxu0 %v2960_v5  ;;  %v1422_v5 = vld [vmem:[%s3793_s29 + $0x1c8] sm:$0xff] }
  0x9d   : > { %2997 = vmatpush1.bf16.msra.mxu1 %v2996_v6  ;;  %2963 = vmatprep.subr.bf16.mxu0 %v2962_v0  ;;  %v1416_v6 = vld [vmem:[%s3793_s29 + $0x198] sm:$0xff]  ;;  %v1426_v53 = vld [vmem:[%s3793_s29 + $0x1e8] sm:$0xff] }
  0x9e   : > { %2999 = vmatprep.subr.bf16.mxu1 %v2998_v11  ;;  %v1424_v0 = vld [vmem:[%s3793_s29 + $0x1d8] sm:$0xff]  ;;  %v1415_v11 = vld [vmem:[%s3793_s29 + $0x190] sm:$0xff] }
  0x9f   : > { %v3054_v16 = vpack.c.bf16 %v1424_v0, %v1416_v6  ;;  %v3038_v6 = vpack.c.bf16 %v1502_v2, %v1494_v1  ;;  %v1493_v0 = vld [vmem:[%s3793_s29 + $0x400] sm:$0xff]  ;;  %v1434_v1 = vld [vmem:[%s3793_s29 + $0x228] sm:$0xff] }
  0xa0   : > { %2965 = vmatpush1.bf16.msra.mxu0 %v2964_v18  ;;  %v1440_v18 = vld [vmem:[%s3793_s29 + $0x258] sm:$0xff]  ;;  %v1442_v2 = vld [vmem:[%s3793_s29 + $0x268] sm:$0xff] }
  0xa1   : > { %3001 = vmatpush1.bf16.msra.mxu1 %v3000_v19  ;;  %2967 = vmatprep.subr.bf16.mxu0 %v2966_v20  ;;  %v3056_v19 = vpack.c.bf16 %v1423_v13, %v1415_v11  ;;  %v3022_v20 = vpack.c.bf16 %v1438_v15, %v1430_v14  ;;  %v1503_v11 = vld [vmem:[%s3793_s29 + $0x450] sm:$0xff]  ;;  %v1378_v13 = vld [vmem:[%s3793_s29 + $0x68] sm:$0xff]  ;;  %v1372_v14 = vld [vmem:[%s3793_s29 + $0x38] sm:$0xff] }
  0xa2   : > { %3003 = vmatprep.subr.bf16.mxu1 %v3002_v25  ;;  %v3058_v25 = vpack.c.bf16 %v1440_v18, %v1432_v17  ;;  %v1380_v15 = vld [vmem:[%s3793_s29 + $0x78] sm:$0xff] }
  0xa4   : > { %2969 = vmatpush1.bf16.msra.mxu0 %v2968_v32  ;;  %v3026_v32 = vpack.c.bf16 %v1454_v28, %v1446_v27  ;;  %v1388_v27 = vld [vmem:[%s3793_s29 + $0xb8] sm:$0xff] }
  0xa5   : > { %3005 = vmatpush1.bf16.msra.mxu1 %v3004_v33  ;;  %3007 = vmatprep.subr.bf16.mxu0 %v3006_v34  ;;  %v1445_v33 = vld [vmem:[%s3793_s29 + $0x280] sm:$0xff]  ;;  %v1396_v28 = vld [vmem:[%s3793_s29 + $0xf8] sm:$0xff] }
  0xa6   : > { %3043 = vmatprep.subr.bf16.mxu1 %v3042_v37  ;;  %v1453_v34 = vld [vmem:[%s3793_s29 + $0x2c0] sm:$0xff]  ;;  %v1455_v37 = vld [vmem:[%s3793_s29 + $0x2d0] sm:$0xff] }
  0xa7   : > { %1220 = vmatmul.mubr.f32.vlgmr.msra.gmra.mrb[24].mxu0 %v3474_v60  ;;  %v3028_v43 = vpack.c.bf16 %v1453_v34, %v1445_v33  ;;  %v1395_v33 = vld [vmem:[%s3793_s29 + $0xf0] sm:$0xff]  ;;  %v3914_v34 = vld [vmem:[%s4726_s4] sm:$0xff] }
  0xa8   : > { %1309 = vmatmul.mubr.f32.vlgmr.msra.gmra.mrb[24].mxu1 %v3474_v60  ;;  %3009 = vmatpush1.bf16.msra.mxu0 %v3008_v44  ;;  %v3014_v60 = vpack.c.bf16 %v1406_v56, %v1398_v55  ;;  %v3064_v44 = vpack.c.bf16 %v1455_v37, %v1447_v35  ;;  %v1488_v55 = vld [vmem:[%s3793_s29 + $0x3d8] sm:$0xff]  ;;  %v3118_v35 = vpack.c.bf16 %v1396_v28, %v1388_v27  ;;  %v1410_v37 = vld [vmem:[%s3793_s29 + $0x168] sm:$0xff]  ;;  %v1459_v27 = vld [vmem:[%s3793_s29 + $0x2f0] sm:$0xff] }
  0xa9   : > { %3045 = vmatpush1.bf16.msra.mxu1 %v3044_v47  ;;  %2676 = vmatprep.mubr.msk.f32.mxu0 %vm464_vm0, %v3488_v10  ;;  %v1469_v47 = vld [vmem:[%s3793_s29 + $0x340] sm:$0xff]  ;;  %v1466_v28 = vld [vmem:[%s3793_s29 + $0x328] sm:$0xff] }
  0xaa   : > { %2680 = vmatprep.mubr.msk.f32.mxu1 %vm464_vm0, %v3488_v10  ;;  %3011 = vmatprep.subr.bf16.mxu0 %v3010_v50  ;;  %v3016_v10 = vpack.c.bf16 %v1405_v63, %v1397_v62  ;;  %v1471_v50 = vld [vmem:[%s3793_s29 + $0x350] sm:$0xff]  ;;  %v3032_v56 = vpack.c.bf16 %v1469_v47, %v1461_v46 }
  0xab   : > { %1226 = vmatmul.mubr.f32.gmra.mrb[26].mxu0 %v3494_v12  ;;  %3047 = vmatprep.subr.bf16.mxu1 %v3046_v54  ;;  %v1480_v54 = vld [vmem:[%s3793_s29 + $0x398] sm:$0xff]  ;;  %v1479_v62 = vld [vmem:[%s3793_s29 + $0x390] sm:$0xff] }
  0xac   : > { %1315 = vmatmul.mubr.f32.gmra.mrb[26].mxu1 %v3494_v12  ;;  %3013 = vmatpush1.bf16.msra.mxu0 %v3012_v57  ;;  %v3018_v12 = vpack.c.bf16 %v1422_v5, %v1414_v4  ;;  %v3068_v57 = vpack.c.bf16 %v1471_v50, %v1463_v48  ;;  %v3070_v63 = vpack.c.bf16 %v1488_v55, %v1480_v54  ;;  %v1504_v4 = vld [vmem:[%s3793_s29 + $0x458] sm:$0xff]  ;;  %v1403_v47 = vld [vmem:[%s3793_s29 + $0x130] sm:$0xff] }
  0xad   : > { %3049 = vmatpush1.bf16.msra.mxu1 %v3048_v61  ;;  %2677 = vmatprep.mubr.msk.f32.mxu0 %vm464_vm0, %v3512_v24  ;;  %v1485_v61 = vld [vmem:[%s3793_s29 + $0x3c0] sm:$0xff]  ;;  %v1411_v48 = vld [vmem:[%s3793_s29 + $0x170] sm:$0xff]  ;;  %v1420_v55 = vld [vmem:[%s3793_s29 + $0x1b8] sm:$0xff] }
  0xae   : > { %2681 = vmatprep.mubr.msk.f32.mxu1 %vm464_vm0, %v3512_v24  ;;  %3015 = vmatprep.subr.bf16.mxu0 %v3014_v60  ;;  %v3020_v24 = vpack.c.bf16 %v1421_v9, %v1413_v8  ;;  %v1487_v60 = vld [vmem:[%s3793_s29 + $0x3d0] sm:$0xff]  ;;  %v3036_v5 = vpack.c.bf16 %v1485_v61, %v1477_v59  ;;  %v1417_v59 = vld [vmem:[%s3793_s29 + $0x1a0] sm:$0xff] }
  0xaf   : > { %1232 = vmatmul.mubr.f32.gmra.mrb[28].mxu0 %v3518_v26  ;;  %3051 = vmatprep.subr.bf16.mxu1 %v3050_v3  ;;  %v1496_v3 = vld [vmem:[%s3793_s29 + $0x418] sm:$0xff]  ;;  %v1495_v8 = vld [vmem:[%s3793_s29 + $0x410] sm:$0xff]  ;;  %v1425_v61 = vld [vmem:[%s3793_s29 + $0x1e0] sm:$0xff] }
  0xb0   : > { %1321 = vmatmul.mubr.f32.gmra.mrb[28].mxu1 %v3518_v26  ;;  %3017 = vmatpush1.bf16.msra.mxu0 %v3016_v10  ;;  %v1439_v26 = vld [vmem:[%s3793_s29 + $0x250] sm:$0xff]  ;;  %v3072_v10 = vpack.c.bf16 %v1487_v60, %v1479_v62  ;;  %v3074_v9 = vpack.c.bf16 %v1504_v4, %v1496_v3  ;;  %v3076_v17 = vpack.c.bf16 %v1503_v11, %v1495_v8  ;;  %v3964_v3 = vld [vmem:[%s4726_s4 + $0x20] sm:$0xff] }
  0xb1   : > { %3053 = vmatpush1.bf16.msra.mxu1 %v3052_v7  ;;  %2678 = vmatprep.mubr.msk.f32.mxu0 %vm464_vm0, %v3536_v38  ;;  %v3060_v31 = vpack.c.bf16 %v1439_v26, %v1431_v23  ;;  %v1501_v7 = vld [vmem:[%s3793_s29 + $0x440] sm:$0xff]  ;;  %v1386_v23 = vld [vmem:[%s3793_s29 + $0xa8] sm:$0xff]  ;;  %v1419_v62 = vld [vmem:[%s3793_s29 + $0x1b0] sm:$0xff]  ;;  %v3094_v8 = vpack.c.bf16 %v1442_v2, %v1434_v1 }
  0xb2   : > { %2682 = vmatprep.mubr.msk.f32.mxu1 %vm464_vm0, %v3536_v38  ;;  %3019 = vmatprep.subr.bf16.mxu0 %v3018_v12  ;;  %v3024_v38 = vpack.c.bf16 %v1437_v22, %v1429_v21  ;;  %v1370_v12 = vld [vmem:[%s3793_s29 + $0x28] sm:$0xff]  ;;  %v1371_v21 = vld [vmem:[%s3793_s29 + $0x30] sm:$0xff]  ;;  %v1441_v11 = vld [vmem:[%s3793_s29 + $0x260] sm:$0xff] }
  0xb3   : > { %1238 = vmatmul.mubr.f32.gmra.mrb[30].mxu0 %v3542_v40  ;;  %3055 = vmatprep.subr.bf16.mxu1 %v3054_v16  ;;  %v3040_v16 = vpack.c.bf16 %v1501_v7, %v1493_v0  ;;  %v3078_v18 = vpack.c.bf16 %v1378_v13, %v1370_v12  ;;  %v1379_v22 = vld [vmem:[%s3793_s29 + $0x70] sm:$0xff]  ;;  %v3973_v0 = vld [vmem:[%s4726_s4 + $0x38] sm:$0xff] }
  0xb4   : > { %1327 = vmatmul.mubr.f32.gmra.mrb[30].mxu1 %v3542_v40  ;;  %3021 = vmatpush1.bf16.msra.mxu0 %v3020_v24  ;;  %v1464_v40 = vld [vmem:[%s3793_s29 + $0x318] sm:$0xff]  ;;  %v1369_v24 = vld [vmem:[%s3793_s29 + $0x20] sm:$0xff]  ;;  %v3116_v29 = vpack.c.bf16 %v1379_v22, %v1371_v21  ;;  %v1427_v60 = vld [vmem:[%s3793_s29 + $0x1f0] sm:$0xff] }
  0xb5   : > { %3057 = vmatpush1.bf16.msra.mxu1 %v3056_v19  ;;  %3023 = vmatprep.subr.bf16.mxu0 %v3022_v20  ;;  %v3066_v49 = vpack.c.bf16 %v1472_v42, %v1464_v40  ;;  %v1377_v19 = vld [vmem:[%s3793_s29 + $0x60] sm:$0xff]  ;;  %v3114_v20 = vpack.c.bf16 %v1380_v15, %v1372_v14  ;;  %v1412_v40 = vld [vmem:[%s3793_s29 + $0x178] sm:$0xff]  ;;  %v3128_v7 = vpack.c.bf16 %v1427_v60, %v1419_v62  ;;  %v1435_v12 = vld [vmem:[%s3793_s29 + $0x230] sm:$0xff] }
  0xb6   : > { %3059 = vmatprep.subr.bf16.mxu1 %v3058_v25  ;;  %2683 = vmatprep.mubr.msk.f32.mxu0 %vm464_vm0, %v3765_v52  ;;  %v1394_v25 = vld [vmem:[%s3793_s29 + $0xe8] sm:$0xff]  ;;  %v3080_v26 = vpack.c.bf16 %v1377_v19, %v1369_v24  ;;  %v3925_v42 = vld [vmem:[%s4726_s4 + $0x18] sm:$0xff]  ;;  %v3122_v50 = vpack.c.bf16 %v1412_v40, %v1404_v41  ;;  %v1443_v14 = vld [vmem:[%s3793_s29 + $0x270] sm:$0xff] }
  0xb7   : > { %2687 = vmatprep.mubr.msk.f32.mxu1 %vm464_vm0, %v3765_v52  ;;  %v1450_v15 = vld [vmem:[%s3793_s29 + $0x2a8] sm:$0xff]  ;;  %v1460_v24 = vld [vmem:[%s3793_s29 + $0x2f8] sm:$0xff]  ;;  %v1449_v22 = vld [vmem:[%s3793_s29 + $0x2a0] sm:$0xff] }
  0xb8   : > { %3025 = vmatpush1.bf16.msra.mxu0 %v3024_v38  ;;  %v1393_v38 = vld [vmem:[%s3793_s29 + $0xe0] sm:$0xff]  ;;  %v1475_v41 = vld [vmem:[%s3793_s29 + $0x370] sm:$0xff]  ;;  %v1482_v40 = vld [vmem:[%s3793_s29 + $0x3a8] sm:$0xff] }
  0xb9   : > { %3061 = vmatpush1.bf16.msra.mxu1 %v3060_v31  ;;  %3027 = vmatprep.subr.bf16.mxu0 %v3026_v32  ;;  %v3082_v31 = vpack.c.bf16 %v1394_v25, %v1386_v23  ;;  %v1387_v32 = vld [vmem:[%s3793_s29 + $0xb0] sm:$0xff]  ;;  %v3084_v39 = vpack.c.bf16 %v1393_v38, %v1385_v30  ;;  %v1457_v23 = vld [vmem:[%s3793_s29 + $0x2e0] sm:$0xff]  ;;  %v1468_v30 = vld [vmem:[%s3793_s29 + $0x338] sm:$0xff] }
  0xba   : > { %3063 = vmatprep.subr.bf16.mxu1 %v3062_v36  ;;  %v1402_v36 = vld [vmem:[%s3793_s29 + $0x128] sm:$0xff]  ;;  %v1451_v25 = vld [vmem:[%s3793_s29 + $0x2b0] sm:$0xff]  ;;  %v1476_v38 = vld [vmem:[%s3793_s29 + $0x378] sm:$0xff] }
  0xbb   : > { %v3086_v46 = vpack.c.bf16 %v1410_v37, %v1402_v36  ;;  %v1473_v36 = vld [vmem:[%s3793_s29 + $0x360] sm:$0xff]  ;;  %v1467_v37 = vld [vmem:[%s3793_s29 + $0x330] sm:$0xff] }
  0xbc   : > { %3029 = vmatpush1.bf16.msra.mxu0 %v3028_v43  ;;  %v3120_v43 = vpack.c.bf16 %v1395_v33, %v1387_v32  ;;  %v3136_v32 = vpack.c.bf16 %v1459_v27, %v1451_v25  ;;  %v1505_v60 = vld [vmem:[%s3793_s29 + $0x460] sm:$0xff]  ;;  %v1914_v25 = vld [vmem:[%s4026_s24 + $0x88] sm:$0xff] }
  0xbd   : > { %3065 = vmatpush1.bf16.msra.mxu1 %v3064_v44  ;;  %3031 = vmatprep.subr.bf16.mxu0 %v3030_v45  ;;  %v1401_v44 = vld [vmem:[%s3793_s29 + $0x120] sm:$0xff] }
  0xbe   : > { %3067 = vmatprep.subr.bf16.mxu1 %v3066_v49  ;;  %v1409_v45 = vld [vmem:[%s3793_s29 + $0x160] sm:$0xff]  ;;  %v3938_v49 = vld [vmem:[%s4726_s4 + $0x10] sm:$0xff] }
  0xbf   : > { %v3088_v54 = vpack.c.bf16 %v1409_v45, %v1401_v44  ;;  %v1484_v44 = vld [vmem:[%s3793_s29 + $0x3b8] sm:$0xff] }
  0xc0   : > { %3033 = vmatpush1.bf16.msra.mxu0 %v3032_v56  ;;  %v1428_v56 = vld [vmem:[%s3793_s29 + $0x1f8] sm:$0xff] }
  0xc1   : > { %3069 = vmatpush1.bf16.msra.mxu1 %v3068_v57  ;;  %3035 = vmatprep.subr.bf16.mxu0 %v3034_v58  ;;  %v3949_v57 = vld [vmem:[%s4726_s4 + $0x28] sm:$0xff]  ;;  %v3124_v58 = vpack.c.bf16 %v1411_v48, %v1403_v47  ;;  %v3126_v4 = vpack.c.bf16 %v1428_v56, %v1420_v55  ;;  %v1492_v45 = vld [vmem:[%s3793_s29 + $0x3f8] sm:$0xff]  ;;  %v3140_v47 = vpack.c.bf16 %v1475_v41, %v1467_v37  ;;  %v1491_v55 = vld [vmem:[%s3793_s29 + $0x3f0] sm:$0xff] }
  0xc2   : > { %3071 = vmatprep.subr.bf16.mxu1 %v3070_v63  ;;  %v3090_v63 = vpack.c.bf16 %v1426_v53, %v1418_v51  ;;  %v1489_v51 = vld [vmem:[%s3793_s29 + $0x3e0] sm:$0xff]  ;;  %v1483_v53 = vld [vmem:[%s3793_s29 + $0x3b0] sm:$0xff]  ;;  %v1498_v56 = vld [vmem:[%s3793_s29 + $0x428] sm:$0xff] }
  0xc3   : > { %v3144_v1 = vpack.c.bf16 %v1491_v55, %v1483_v53  ;;  %v1930_v37 = vld [vmem:[%s4026_s24 + $0x108] sm:$0xff] }
  0xc4   : > { %3037 = vmatpush1.bf16.msra.mxu0 %v3036_v5  ;;  %v1436_v5 = vld [vmem:[%s3793_s29 + $0x238] sm:$0xff]  ;;  %v1946_v53 = vld [vmem:[%s4026_s24 + $0x188] sm:$0xff] }
  0xc5   : > { %3073 = vmatpush1.bf16.msra.mxu1 %v3072_v10  ;;  %3039 = vmatprep.subr.bf16.mxu0 %v3038_v6  ;;  %v1444_v10 = vld [vmem:[%s3793_s29 + $0x278] sm:$0xff]  ;;  %v3092_v6 = vpack.c.bf16 %v1425_v61, %v1417_v59 }
  0xc6   : > { %3075 = vmatprep.subr.bf16.mxu1 %v3074_v9  ;;  %v1433_v9 = vld [vmem:[%s3793_s29 + $0x220] sm:$0xff]  ;;  %v3130_v13 = vpack.c.bf16 %v1444_v10, %v1436_v5  ;;  %v1500_v59 = vld [vmem:[%s3793_s29 + $0x438] sm:$0xff]  ;;  %v2431_v10 = vld [vmem:[%s4727_s5 + $0x10] sm:$0xff] }
  0xc7   : > { %v3096_v19 = vpack.c.bf16 %v1441_v11, %v1433_v9  ;;  %v1508_v61 = vld [vmem:[%s3793_s29 + $0x478] sm:$0xff]  ;;  %v2429_v5 = vld [vmem:[%s4727_s5] sm:$0xff]  ;;  %v1906_v9 = vld [vmem:[%s4026_s24 + $0x48] sm:$0xff]  ;;  %v3323_v11 = vmov 0  }
  0xc8   : > { %3041 = vmatpush1.bf16.msra.mxu0 %v3040_v16  ;;  %v1458_v16 = vld [vmem:[%s3793_s29 + $0x2e8] sm:$0xff]  ;;  %3304 = vset.pattern.permute.xlu0 %v3323_v11 }
  0xc9   : > { %3077 = vmatpush1.bf16.msra.mxu1 %v3076_v17  ;;  %3079 = vmatprep.subr.bf16.mxu0 %v3078_v18  ;;  %v3988_v17 = vld [vmem:[%s4726_s4 + $0x30] sm:$0xff]  ;;  %v1452_v18 = vld [vmem:[%s3793_s29 + $0x2b8] sm:$0xff]  ;;  %v3098_v21 = vpack.c.bf16 %v1458_v16, %v1450_v15  ;;  %v2430_v15 = vld [vmem:[%s4727_s5 + $0x8] sm:$0xff] }
  0xca   : > { %3115 = vmatprep.subr.bf16.mxu1 %v3114_v20  ;;  %v3132_v20 = vpack.c.bf16 %v1443_v14, %v1435_v12  ;;  %v1900_v12 = vld [vmem:[%s4026_s24 + $0x18] sm:$0xff]  ;;  %2435 = vperm.xlu0 %3304, %v2429_v5  }
  0xcb   : > { %1574 = vmatmul.mubr.f32.vlgmr.msra.gmra.mrb[32].mxu0 %v3914_v34  ;;  %3305 = vset.pattern.permute.xlu1 %v3323_v11  ;;  %v1961_v11 = vld [vmem:[%s4026_s24 + $0x200] sm:$0xff] }
  0xcc   : > { %1663 = vmatmul.mubr.f32.vlgmr.msra.gmra.mrb[32].mxu1 %v3914_v34  ;;  %3081 = vmatpush1.bf16.msra.mxu0 %v3080_v26  ;;  %v3134_v26 = vpack.c.bf16 %v1460_v24, %v1452_v18  ;;  %v1897_v24 = vld [vmem:[%s4026_s24] sm:$0xff] }
  0xcd   : > { %3117 = vmatpush1.bf16.msra.mxu1 %v3116_v29  ;;  %2684 = vmatprep.mubr.msk.f32.mxu0 %vm464_vm0, %v3925_v42  ;;  %v1474_v29 = vld [vmem:[%s3793_s29 + $0x368] sm:$0xff] }
  0xce   : > { %2688 = vmatprep.mubr.msk.f32.mxu1 %vm464_vm0, %v3925_v42  ;;  %3083 = vmatprep.subr.bf16.mxu0 %v3082_v31  ;;  %v3100_v31 = vpack.c.bf16 %v1457_v23, %v1449_v22  ;;  %v3102_v33 = vpack.c.bf16 %v1474_v29, %v1466_v28  ;;  %v1899_v22 = vld [vmem:[%s4026_s24 + $0x10] sm:$0xff]  ;;  %v1916_v28 = vld [vmem:[%s4026_s24 + $0x98] sm:$0xff] }
  0xcf   : > { %1580 = vmatmul.mubr.f32.gmra.mrb[34].mxu0 %v3938_v49  ;;  %3119 = vmatprep.subr.bf16.mxu1 %v3118_v35  ;;  %v1465_v35 = vld [vmem:[%s3793_s29 + $0x320] sm:$0xff]  ;;  %v1907_v23 = vld [vmem:[%s4026_s24 + $0x50] sm:$0xff]  ;;  %v1924_v29 = vld [vmem:[%s4026_s24 + $0xd8] sm:$0xff] }
  0xd0   : > { %1669 = vmatmul.mubr.f32.gmra.mrb[34].mxu1 %v3938_v49  ;;  %3085 = vmatpush1.bf16.msra.mxu0 %v3084_v39  ;;  %v3138_v39 = vpack.c.bf16 %v1476_v38, %v1468_v30  ;;  %v3188_v30 = vpack.c.bf16 %v1907_v23, %v1899_v22  ;;  %v1913_v38 = vld [vmem:[%s4026_s24 + $0x80] sm:$0xff] }
  0xd1   : > { %3121 = vmatpush1.bf16.msra.mxu1 %v3120_v43  ;;  %2685 = vmatprep.mubr.msk.f32.mxu0 %vm464_vm0, %v3949_v57  ;;  %v1490_v43 = vld [vmem:[%s3793_s29 + $0x3e8] sm:$0xff]  ;;  %v1977_v23 = vld [vmem:[%s4026_s24 + $0x280] sm:$0xff] }
  0xd2   : > { %2689 = vmatprep.mubr.msk.f32.mxu1 %vm464_vm0, %v3949_v57  ;;  %3087 = vmatprep.subr.bf16.mxu0 %v3086_v46  ;;  %v3104_v46 = vpack.c.bf16 %v1473_v36, %v1465_v35  ;;  %v3106_v48 = vpack.c.bf16 %v1490_v43, %v1482_v40  ;;  %v1923_v35 = vld [vmem:[%s4026_s24 + $0xd0] sm:$0xff]  ;;  %v3190_v36 = vpack.c.bf16 %v1924_v29, %v1916_v28  ;;  %v1932_v40 = vld [vmem:[%s4026_s24 + $0x118] sm:$0xff]  ;;  %v1994_v29 = vld [vmem:[%s4026_s24 + $0x308] sm:$0xff] }
  0xd3   : > { %1586 = vmatmul.mubr.f32.gmra.mrb[36].mxu0 %v3964_v3  ;;  %3123 = vmatprep.subr.bf16.mxu1 %v3122_v50  ;;  %v1481_v50 = vld [vmem:[%s3793_s29 + $0x3a0] sm:$0xff]  ;;  %v1940_v43 = vld [vmem:[%s4026_s24 + $0x158] sm:$0xff]  ;;  %v1987_v28 = vld [vmem:[%s4026_s24 + $0x2d0] sm:$0xff] }
  0xd4   : > { %1675 = vmatmul.mubr.f32.gmra.mrb[36].mxu1 %v3964_v3  ;;  %3089 = vmatpush1.bf16.msra.mxu0 %v3088_v54  ;;  %v3142_v54 = vpack.c.bf16 %v1492_v45, %v1484_v44  ;;  %v3108_v62 = vpack.c.bf16 %v1489_v51, %v1481_v50  ;;  %v1929_v45 = vld [vmem:[%s4026_s24 + $0x100] sm:$0xff]  ;;  %v1939_v50 = vld [vmem:[%s4026_s24 + $0x150] sm:$0xff]  ;;  %v3194_v51 = vpack.c.bf16 %v1940_v43, %v1932_v40  ;;  %v2010_v43 = vld [vmem:[%s4026_s24 + $0x388] sm:$0xff] }
  0xd5   : > { %3125 = vmatpush1.bf16.msra.mxu1 %v3124_v58  ;;  %2686 = vmatprep.mubr.msk.f32.mxu0 %vm464_vm0, %v3973_v0  ;;  %v1506_v58 = vld [vmem:[%s3793_s29 + $0x468] sm:$0xff]  ;;  %v2003_v40 = vld [vmem:[%s4026_s24 + $0x350] sm:$0xff] }
  0xd6   : > { %2690 = vmatprep.mubr.msk.f32.mxu1 %vm464_vm0, %v3973_v0  ;;  %3091 = vmatprep.subr.bf16.mxu0 %v3090_v63  ;;  %v1497_v63 = vld [vmem:[%s3793_s29 + $0x420] sm:$0xff]  ;;  %v3110_v2 = vpack.c.bf16 %v1506_v58, %v1498_v56  ;;  %v1948_v56 = vld [vmem:[%s4026_s24 + $0x198] sm:$0xff] }
  0xd7   : > { %1592 = vmatmul.mubr.f32.gmra.mrb[38].mxu0 %v3988_v17  ;;  %3127 = vmatprep.subr.bf16.mxu1 %v3126_v4  ;;  %v1499_v4 = vld [vmem:[%s3793_s29 + $0x430] sm:$0xff]  ;;  %v3112_v14 = vpack.c.bf16 %v1505_v60, %v1497_v63  ;;  %v1956_v58 = vld [vmem:[%s4026_s24 + $0x1d8] sm:$0xff] }
  0xd8   : > { %1681 = vmatmul.mubr.f32.gmra.mrb[38].mxu1 %v3988_v17  ;;  %3093 = vmatpush1.bf16.msra.mxu0 %v3092_v6  ;;  %v3146_v6 = vpack.c.bf16 %v1508_v61, %v1500_v59  ;;  %v1945_v61 = vld [vmem:[%s4026_s24 + $0x180] sm:$0xff]  ;;  %v1947_v63 = vld [vmem:[%s4026_s24 + $0x190] sm:$0xff]  ;;  %v3198_v5 = vpack.c.bf16 %v1956_v58, %v1948_v56  ;;  %v2026_v56 = vld [vmem:[%s4026_s24 + $0x408] sm:$0xff] }
  0xd9   : > { %3129 = vmatpush1.bf16.msra.mxu1 %v3128_v7  ;;  %3095 = vmatprep.subr.bf16.mxu0 %v3094_v8  ;;  %v1507_v7 = vld [vmem:[%s3793_s29 + $0x470] sm:$0xff]  ;;  %v1898_v8 = vld [vmem:[%s4026_s24 + $0x8] sm:$0xff] }
  0xda   : > { %3131 = vmatprep.subr.bf16.mxu1 %v3130_v13  ;;  %2691 = vmatprep.mubr.msk.f32.mxu0 %vm464_vm0, %v3765_v52  ;;  %v1908_v13 = vld [vmem:[%s4026_s24 + $0x58] sm:$0xff]  ;;  %v3148_v16 = vpack.c.bf16 %v1507_v7, %v1499_v4  ;;  %v3150_v18 = vpack.c.bf16 %v1906_v9, %v1898_v8  ;;  %v1970_v4 = vld [vmem:[%s4026_s24 + $0x248] sm:$0xff] }
  0xdb   : > { %2695 = vmatprep.mubr.msk.f32.mxu1 %vm464_vm0, %v3765_v52  ;;  %2445 = vperm.xlu1 %3305, %v2431_v10   ;;  %v1964_v10 = vld [vmem:[%s4026_s24 + $0x218] sm:$0xff]  ;;  %v2034_v58 = vld [vmem:[%s4026_s24 + $0x448] sm:$0xff] }
  0xdc   : > { %3097 = vmatpush1.bf16.msra.mxu0 %v3096_v19  ;;  %v1905_v19 = vld [vmem:[%s4026_s24 + $0x40] sm:$0xff]  ;;  %2440 = vperm.xlu0 %3304, %v2430_v15   ;;  %v1971_v15 = vld [vmem:[%s4026_s24 + $0x250] sm:$0xff] }
  0xdd   : > { %3133 = vmatpush1.bf16.msra.mxu1 %v3132_v20  ;;  %3099 = vmatprep.subr.bf16.mxu0 %v3098_v21  ;;  %v2432_v20 = vld [vmem:[%s4727_s5 + $0x18] sm:$0xff]  ;;  %v3186_v21 = vpack.c.bf16 %v1908_v13, %v1900_v12  ;;  %v3152_v27 = vpack.c.bf16 %v1905_v19, %v1897_v24  ;;  %v1969_v12 = vld [vmem:[%s4026_s24 + $0x240] sm:$0xff]  ;;  %v1963_v13 = vld [vmem:[%s4026_s24 + $0x210] sm:$0xff] }
  0xde   : > { %3135 = vmatprep.subr.bf16.mxu1 %v3134_v26  ;;  %v1922_v26 = vld [vmem:[%s4026_s24 + $0xc8] sm:$0xff]  ;;  %v1980_v24 = vld [vmem:[%s4026_s24 + $0x298] sm:$0xff] }
  0xdf   : > { %2450 = vperm.xlu1 %3305, %v2432_v20   ;;  %v1988_v19 = vld [vmem:[%s4026_s24 + $0x2d8] sm:$0xff]  ;;  %v3168_v20 = vpack.c.bf16 %v1969_v12, %v1961_v11 }
  0xe0   : > { %3101 = vmatpush1.bf16.msra.mxu0 %v3100_v31  ;;  %v1921_v31 = vld [vmem:[%s4026_s24 + $0xc0] sm:$0xff] }
  0xe1   : > { %3137 = vmatpush1.bf16.msra.mxu1 %v3136_v32  ;;  %3103 = vmatprep.subr.bf16.mxu0 %v3102_v33  ;;  %v3154_v32 = vpack.c.bf16 %v1922_v26, %v1914_v25  ;;  %v1915_v33 = vld [vmem:[%s4026_s24 + $0x90] sm:$0xff]  ;;  %v3156_v41 = vpack.c.bf16 %v1921_v31, %v1913_v38  ;;  %v1985_v25 = vld [vmem:[%s4026_s24 + $0x2c0] sm:$0xff]  ;;  %v1996_v38 = vld [vmem:[%s4026_s24 + $0x318] sm:$0xff] }
  0xe2   : > { %3139 = vmatprep.subr.bf16.mxu1 %v3138_v39  ;;  %v1938_v39 = vld [vmem:[%s4026_s24 + $0x148] sm:$0xff]  ;;  %v3192_v44 = vpack.c.bf16 %v1923_v35, %v1915_v33  ;;  %v1979_v26 = vld [vmem:[%s4026_s24 + $0x290] sm:$0xff]  ;;  %v2004_v31 = vld [vmem:[%s4026_s24 + $0x358] sm:$0xff] }
  0xe3   : > { %v3208_v33 = vpack.c.bf16 %v1987_v28, %v1979_v26  ;;  %v1928_v28 = vld [vmem:[%s4026_s24 + $0xf8] sm:$0xff] }
  0xe4   : > { %3105 = vmatpush1.bf16.msra.mxu0 %v3104_v46  ;;  %v1937_v46 = vld [vmem:[%s4026_s24 + $0x140] sm:$0xff] }
  0xe5   : > { %3141 = vmatpush1.bf16.msra.mxu1 %v3140_v47  ;;  %3107 = vmatprep.subr.bf16.mxu0 %v3106_v48  ;;  %v3158_v47 = vpack.c.bf16 %v1938_v39, %v1930_v37  ;;  %v1931_v48 = vld [vmem:[%s4026_s24 + $0x110] sm:$0xff]  ;;  %v3160_v55 = vpack.c.bf16 %v1937_v46, %v1929_v45  ;;  %v2001_v37 = vld [vmem:[%s4026_s24 + $0x340] sm:$0xff]  ;;  %v2020_v45 = vld [vmem:[%s4026_s24 + $0x3d8] sm:$0xff] }
  0xe6   : > { %3143 = vmatprep.subr.bf16.mxu1 %v3142_v54  ;;  %v1954_v54 = vld [vmem:[%s4026_s24 + $0x1c8] sm:$0xff]  ;;  %v3196_v59 = vpack.c.bf16 %v1939_v50, %v1931_v48  ;;  %v1995_v39 = vld [vmem:[%s4026_s24 + $0x310] sm:$0xff]  ;;  %v2009_v50 = vld [vmem:[%s4026_s24 + $0x380] sm:$0xff] }
  0xe7   : > { %v3162_v60 = vpack.c.bf16 %v1954_v54, %v1946_v53  ;;  %v2011_v53 = vld [vmem:[%s4026_s24 + $0x390] sm:$0xff] }
  0xe8   : > { %3109 = vmatpush1.bf16.msra.mxu0 %v3108_v62  ;;  %v1953_v62 = vld [vmem:[%s4026_s24 + $0x1c0] sm:$0xff] }
  0xe9   : > { %3145 = vmatpush1.bf16.msra.mxu1 %v3144_v1  ;;  %3111 = vmatprep.subr.bf16.mxu0 %v3110_v2  ;;  %v1955_v1 = vld [vmem:[%s4026_s24 + $0x1d0] sm:$0xff]  ;;  %v1962_v2 = vld [vmem:[%s4026_s24 + $0x208] sm:$0xff]  ;;  %v3164_v7 = vpack.c.bf16 %v1953_v62, %v1945_v61  ;;  %v2036_v61 = vld [vmem:[%s4026_s24 + $0x458] sm:$0xff] }
  0xea   : > { %3147 = vmatprep.subr.bf16.mxu1 %v3146_v6  ;;  %v1972_v6 = vld [vmem:[%s4026_s24 + $0x258] sm:$0xff]  ;;  %v3200_v8 = vpack.c.bf16 %v1955_v1, %v1947_v63  ;;  %v3166_v9 = vpack.c.bf16 %v1970_v4, %v1962_v2  ;;  %v2025_v1 = vld [vmem:[%s4026_s24 + $0x400] sm:$0xff]  ;;  %v2027_v4 = vld [vmem:[%s4026_s24 + $0x410] sm:$0xff] }
  0xeb   : > { %v2033_v2 = vld [vmem:[%s4026_s24 + $0x440] sm:$0xff] }
  0xec   : > { %3113 = vmatpush1.bf16.msra.mxu0 %v3112_v14  ;;  %v3202_v14 = vpack.c.bf16 %v1972_v6, %v1964_v10  ;;  %v2035_v10 = vld [vmem:[%s4026_s24 + $0x450] sm:$0xff]  ;;  %v1902_v6 = vld [vmem:[%s4026_s24 + $0x28] sm:$0xff]  ;;  %v3184_v11 = vpack.c.bf16 %v2033_v2, %v2025_v1 }
  0xed   : > { %3149 = vmatpush1.bf16.msra.mxu1 %v3148_v16  ;;  %3151 = vmatprep.subr.bf16.mxu0 %v3150_v18  ;;  %v1978_v16 = vld [vmem:[%s4026_s24 + $0x288] sm:$0xff]  ;;  %v3220_v12 = vpack.c.bf16 %v2035_v10, %v2027_v4  ;;  %v1949_v4 = vld [vmem:[%s4026_s24 + $0x1a0] sm:$0xff]  ;;  %v1951_v10 = vld [vmem:[%s4026_s24 + $0x1b0] sm:$0xff] }
  0xee   : > { %3187 = vmatprep.subr.bf16.mxu1 %v3186_v21  ;;  %v1986_v18 = vld [vmem:[%s4026_s24 + $0x2c8] sm:$0xff]  ;;  %v3204_v21 = vpack.c.bf16 %v1971_v15, %v1963_v13  ;;  %v1909_v15 = vld [vmem:[%s4026_s24 + $0x60] sm:$0xff] }
  0xef   : > { %1752 = vmatmul.mubr.f32.vlgmr.msra.gmra.mrb[40].mxu0 %v3914_v34  ;;  %v3170_v22 = vpack.c.bf16 %v1986_v18, %v1978_v16 }
  0xf0   : > { %1841 = vmatmul.mubr.f32.vlgmr.msra.gmra.mrb[40].mxu1 %v3914_v34  ;;  %3153 = vmatpush1.bf16.msra.mxu0 %v3152_v27  ;;  %v3206_v27 = vpack.c.bf16 %v1988_v19, %v1980_v24  ;;  %v1903_v24 = vld [vmem:[%s4026_s24 + $0x30] sm:$0xff] }
  0xf1   : > { %3189 = vmatpush1.bf16.msra.mxu1 %v3188_v30  ;;  %2692 = vmatprep.mubr.msk.f32.mxu0 %vm464_vm0, %v3925_v42  ;;  %v2002_v30 = vld [vmem:[%s4026_s24 + $0x348] sm:$0xff]  ;;  %v1911_v19 = vld [vmem:[%s4026_s24 + $0x70] sm:$0xff] }
  0xf2   : > { %2696 = vmatprep.mubr.msk.f32.mxu1 %vm464_vm0, %v3925_v42  ;;  %3155 = vmatprep.subr.bf16.mxu0 %v3154_v32  ;;  %v3172_v32 = vpack.c.bf16 %v1985_v25, %v1977_v23  ;;  %v3174_v35 = vpack.c.bf16 %v2002_v30, %v1994_v29  ;;  %v1926_v23 = vld [vmem:[%s4026_s24 + $0xe8] sm:$0xff]  ;;  %v3260_v29 = vpack.c.bf16 %v1911_v19, %v1903_v24  ;;  %v1917_v30 = vld [vmem:[%s4026_s24 + $0xa0] sm:$0xff] }
  0xf3   : > { %1758 = vmatmul.mubr.f32.gmra.mrb[42].mxu0 %v3938_v49  ;;  %3191 = vmatprep.subr.bf16.mxu1 %v3190_v36  ;;  %v1993_v36 = vld [vmem:[%s4026_s24 + $0x300] sm:$0xff] }
  0xf4   : > { %1847 = vmatmul.mubr.f32.gmra.mrb[42].mxu1 %v3938_v49  ;;  %3157 = vmatpush1.bf16.msra.mxu0 %v3156_v41  ;;  %v3210_v41 = vpack.c.bf16 %v2004_v31, %v1996_v38  ;;  %v3176_v46 = vpack.c.bf16 %v2001_v37, %v1993_v36  ;;  %v1925_v38 = vld [vmem:[%s4026_s24 + $0xe0] sm:$0xff]  ;;  %v1934_v37 = vld [vmem:[%s4026_s24 + $0x128] sm:$0xff] }
  0xf5   : > { %3193 = vmatpush1.bf16.msra.mxu1 %v3192_v44  ;;  %2693 = vmatprep.mubr.msk.f32.mxu0 %vm464_vm0, %v3949_v57  ;;  %v2012_v44 = vld [vmem:[%s4026_s24 + $0x398] sm:$0xff] }
  0xf6   : > { %2697 = vmatprep.mubr.msk.f32.mxu1 %vm464_vm0, %v3949_v57  ;;  %3159 = vmatprep.subr.bf16.mxu0 %v3158_v47  ;;  %v3212_v47 = vpack.c.bf16 %v2003_v40, %v1995_v39  ;;  %v3214_v54 = vpack.c.bf16 %v2020_v45, %v2012_v44  ;;  %v1942_v39 = vld [vmem:[%s4026_s24 + $0x168] sm:$0xff]  ;;  %v1944_v44 = vld [vmem:[%s4026_s24 + $0x178] sm:$0xff] }
  0xf7   : > { %1764 = vmatmul.mubr.f32.gmra.mrb[44].mxu0 %v3964_v3  ;;  %3195 = vmatprep.subr.bf16.mxu1 %v3194_v51  ;;  %v2017_v51 = vld [vmem:[%s4026_s24 + $0x3c0] sm:$0xff] }
  0xf8   : > { %1853 = vmatmul.mubr.f32.gmra.mrb[44].mxu1 %v3964_v3  ;;  %3161 = vmatpush1.bf16.msra.mxu0 %v3160_v55  ;;  %v2019_v55 = vld [vmem:[%s4026_s24 + $0x3d0] sm:$0xff]  ;;  %v3180_v62 = vpack.c.bf16 %v2017_v51, %v2009_v50  ;;  %v3230_v50 = vpack.c.bf16 %v1942_v39, %v1934_v37 }
  0xf9   : > { %3197 = vmatpush1.bf16.msra.mxu1 %v3196_v59  ;;  %2694 = vmatprep.mubr.msk.f32.mxu0 %vm464_vm0, %v3973_v0  ;;  %v2028_v59 = vld [vmem:[%s4026_s24 + $0x418] sm:$0xff]  ;;  %v3216_v63 = vpack.c.bf16 %v2019_v55, %v2011_v53  ;;  %v1935_v51 = vld [vmem:[%s4026_s24 + $0x130] sm:$0xff] }
  0xfa   : > { %2698 = vmatprep.mubr.msk.f32.mxu1 %vm464_vm0, %v3973_v0  ;;  %3163 = vmatprep.subr.bf16.mxu0 %v3162_v60  ;;  %v3182_v60 = vpack.c.bf16 %v2034_v58, %v2026_v56  ;;  %v1943_v53 = vld [vmem:[%s4026_s24 + $0x170] sm:$0xff]  ;;  %v1950_v56 = vld [vmem:[%s4026_s24 + $0x1a8] sm:$0xff] }
  0xfb   : > { %1770 = vmatmul.mubr.f32.gmra.mrb[46].mxu0 %v3988_v17  ;;  %3199 = vmatprep.subr.bf16.mxu1 %v3198_v5  ;;  %v3218_v5 = vpack.c.bf16 %v2036_v61, %v2028_v59  ;;  %v1958_v58 = vld [vmem:[%s4026_s24 + $0x1e8] sm:$0xff]  ;;  %v3268_v2 = vpack.c.bf16 %v1943_v53, %v1935_v51  ;;  %v2000_v53 = vld [vmem:[%s4026_s24 + $0x338] sm:$0xff] }
  0xfc   : > { %1859 = vmatmul.mubr.f32.gmra.mrb[46].mxu1 %v3988_v17  ;;  %3165 = vmatpush1.bf16.msra.mxu0 %v3164_v7  ;;  %v1910_v7 = vld [vmem:[%s4026_s24 + $0x68] sm:$0xff] }
  0xfd   : > { %3201 = vmatpush1.bf16.msra.mxu1 %v3200_v8  ;;  %3167 = vmatprep.subr.bf16.mxu0 %v3166_v9  ;;  %v1904_v8 = vld [vmem:[%s4026_s24 + $0x38] sm:$0xff]  ;;  %v3222_v13 = vpack.c.bf16 %v1910_v7, %v1902_v6  ;;  %v3234_v6 = vpack.c.bf16 %v1958_v58, %v1950_v56  ;;  %v1959_v7 = vld [vmem:[%s4026_s24 + $0x1f0] sm:$0xff]  ;;  %v3314_v51 = vld [vmem:[%s4726_s4 + $0x8] sm:$0xff] }
  0xfe   : > { %3203 = vmatprep.subr.bf16.mxu1 %v3202_v14  ;;  %2699 = vmatprep.mubr.msk.f32.mxu0 %vm464_vm0, %v3765_v52  ;;  %v1912_v9 = vld [vmem:[%s4026_s24 + $0x78] sm:$0xff]  ;;  %v1901_v14 = vld [vmem:[%s4026_s24 + $0x20] sm:$0xff] }
  0xff   : > { %2703 = vmatprep.mubr.msk.f32.mxu1 %vm464_vm0, %v3765_v52  ;;  %v2018_v52 = vld [vmem:[%s4026_s24 + $0x3c8] sm:$0xff]  ;;  %v3258_v18 = vpack.c.bf16 %v1912_v9, %v1904_v8  ;;  %v3224_v26 = vpack.c.bf16 %v1909_v15, %v1901_v14  ;;  %v1976_v14 = vld [vmem:[%s4026_s24 + $0x278] sm:$0xff] }
 0x100   : > { %3169 = vmatpush1.bf16.msra.mxu0 %v3168_v20  ;;  %v3178_v48 = vpack.c.bf16 %v2018_v52, %v2010_v43  ;;  %v3228_v43 = vpack.c.bf16 %v1925_v38, %v1917_v30  ;;  %v1936_v52 = vld [vmem:[%s4026_s24 + $0x138] sm:$0xff]  ;;  %v1966_v8 = vld [vmem:[%s4026_s24 + $0x228] sm:$0xff]  ;;  %v1975_v30 = vld [vmem:[%s4026_s24 + $0x270] sm:$0xff] }
 0x101   : > { %3205 = vmatpush1.bf16.msra.mxu1 %v3204_v21  ;;  %3171 = vmatprep.subr.bf16.mxu0 %v3170_v22  ;;  %v1918_v22 = vld [vmem:[%s4026_s24 + $0xa8] sm:$0xff]  ;;  %v3266_v55 = vpack.c.bf16 %v1944_v44, %v1936_v52  ;;  %v1989_v52 = vld [vmem:[%s4026_s24 + $0x2e0] sm:$0xff]  ;;  %v1983_v44 = vld [vmem:[%s4026_s24 + $0x2b0] sm:$0xff] }
 0x102   : > { %3207 = vmatprep.subr.bf16.mxu1 %v3206_v27  ;;  %v1920_v27 = vld [vmem:[%s4026_s24 + $0xb8] sm:$0xff]  ;;  %v3226_v31 = vpack.c.bf16 %v1926_v23, %v1918_v22  ;;  %v1974_v9 = vld [vmem:[%s4026_s24 + $0x268] sm:$0xff]  ;;  %v3272_v22 = vpack.c.bf16 %v1959_v7, %v1951_v10 }
 0x103   : > { %v3262_v36 = vpack.c.bf16 %v1928_v28, %v1920_v27  ;;  %v3238_v23 = vpack.c.bf16 %v1974_v9, %v1966_v8  ;;  %v1973_v27 = vld [vmem:[%s4026_s24 + $0x260] sm:$0xff]  ;;  %v1967_v28 = vld [vmem:[%s4026_s24 + $0x230] sm:$0xff]  ;;  %v1982_v38 = vld [vmem:[%s4026_s24 + $0x2a8] sm:$0xff] }
 0x104   : > { %3173 = vmatpush1.bf16.msra.mxu0 %v3172_v32  ;;  %v1919_v32 = vld [vmem:[%s4026_s24 + $0xb0] sm:$0xff]  ;;  %v3276_v37 = vpack.c.bf16 %v1975_v30, %v1967_v28  ;;  %v2014_v10 = vld [vmem:[%s4026_s24 + $0x3a8] sm:$0xff]  ;;  %v2016_v7 = vld [vmem:[%s4026_s24 + $0x3b8] sm:$0xff] }
 0x105   : > { %3209 = vmatpush1.bf16.msra.mxu1 %v3208_v33  ;;  %3175 = vmatprep.subr.bf16.mxu0 %v3174_v35  ;;  %v1927_v33 = vld [vmem:[%s4026_s24 + $0xf0] sm:$0xff]  ;;  %v2024_v8 = vld [vmem:[%s4026_s24 + $0x3f8] sm:$0xff]  ;;  %v2038_v28 = vld [vmem:[%s4026_s24 + $0x468] sm:$0xff] }
 0x106   : > { %3211 = vmatprep.subr.bf16.mxu1 %v3210_v41  ;;  %v2040_v30 = vld [vmem:[%s4026_s24 + $0x478] sm:$0xff] }
 0x108   : > { %3177 = vmatpush1.bf16.msra.mxu0 %v3176_v46  ;;  %v3264_v46 = vpack.c.bf16 %v1927_v33, %v1919_v32  ;;  %v1984_v32 = vld [vmem:[%s4026_s24 + $0x2b8] sm:$0xff] }
 0x109   : > { %3213 = vmatpush1.bf16.msra.mxu1 %v3212_v47  ;;  %3179 = vmatprep.subr.bf16.mxu0 %v3178_v48  ;;  %v1933_v47 = vld [vmem:[%s4026_s24 + $0x120] sm:$0xff]  ;;  %v1992_v33 = vld [vmem:[%s4026_s24 + $0x2f8] sm:$0xff] }
 0x10a   : > { %3215 = vmatprep.subr.bf16.mxu1 %v3214_v54  ;;  %v1941_v48 = vld [vmem:[%s4026_s24 + $0x160] sm:$0xff] }
 0x10c   : > { %3181 = vmatpush1.bf16.msra.mxu0 %v3180_v62  ;;  %v3232_v62 = vpack.c.bf16 %v1941_v48, %v1933_v47  ;;  %v1991_v47 = vld [vmem:[%s4026_s24 + $0x2f0] sm:$0xff]  ;;  %v1998_v48 = vld [vmem:[%s4026_s24 + $0x328] sm:$0xff] }
 0x10d   : > { %3217 = vmatpush1.bf16.msra.mxu1 %v3216_v63  ;;  %3183 = vmatprep.subr.bf16.mxu0 %v3182_v60  ;;  %v1952_v63 = vld [vmem:[%s4026_s24 + $0x1b8] sm:$0xff]  ;;  %v3280_v58 = vpack.c.bf16 %v1991_v47, %v1983_v44 }
 0x10e   : > { %v4146_v16 = vpop.f32.mrb[0].mxu0  ;;  %3219 = vmatprep.subr.bf16.mxu1 %v3218_v5  ;;  %v1960_v60 = vld [vmem:[%s4026_s24 + $0x1f8] sm:$0xff]  ;;  %v1957_v5 = vld [vmem:[%s4026_s24 + $0x1e0] sm:$0xff] }
 0x10f   : > { %v4150_v20 = vpop.f32.mrb[0].mxu1  ;;  %v4152_v21 = vpop.f32.mrb[1].mxu0  ;;  %v3236_v24 = vpack.c.bf16 %v1957_v5, %v1949_v4  ;;  %v2007_v5 = vld [vmem:[%s4026_s24 + $0x370] sm:$0xff] }
 0x110   : > { %v4156_v25 = vpop.f32.mrb[1].mxu1  ;;  %3185 = vmatpush1.bf16.msra.mxu0 %v3184_v11 }
 0x111   : > { %3221 = vmatpush1.bf16.msra.mxu1 %v3220_v12  ;;  %3223 = vmatprep.subr.bf16.mxu0 %v3222_v13  ;;  %v3270_v12 = vpack.c.bf16 %v1960_v60, %v1952_v63  ;;  %v1968_v13 = vld [vmem:[%s4026_s24 + $0x238] sm:$0xff]  ;;  %v1997_v63 = vld [vmem:[%s4026_s24 + $0x320] sm:$0xff] }
 0x112   : > { %3259 = vmatprep.subr.bf16.mxu1 %v3258_v18  ;;  %v4164_v35 = vpop.f32.mrb[2].mxu0  ;;  %v2005_v60 = vld [vmem:[%s4026_s24 + $0x360] sm:$0xff] }
 0x113   : > { %2106 = vmatmul.mubr.f32.vlgmr.msra.gmra.mrb[48].mxu0 %v3914_v34  ;;  %v4169_v41 = vpop.f32.mrb[2].mxu1  ;;  %v4171_v40 = vpop.f32.mrb[3].mxu0  ;;  %v3248_v9 = vpack.c.bf16 %v2005_v60, %v1997_v63 }
 0x114   : > { %2195 = vmatmul.mubr.f32.vlgmr.msra.gmra.mrb[48].mxu1 %v3914_v34  ;;  %3225 = vmatpush1.bf16.msra.mxu0 %v3224_v26  ;;  %v4176_v45 = vpop.f32.mrb[3].mxu1  ;;  %v1965_v26 = vld [vmem:[%s4026_s24 + $0x220] sm:$0xff] }
 0x115   : > { %3261 = vmatpush1.bf16.msra.mxu1 %v3260_v29  ;;  %2700 = vmatprep.mubr.msk.f32.mxu0 %vm464_vm0, %v3925_v42  ;;  %v3274_v29 = vpack.c.bf16 %v1976_v14, %v1968_v13  ;;  %v2013_v14 = vld [vmem:[%s4026_s24 + $0x3a0] sm:$0xff] }
 0x116   : > { %2704 = vmatprep.mubr.msk.f32.mxu1 %vm464_vm0, %v3925_v42  ;;  %3227 = vmatprep.subr.bf16.mxu0 %v3226_v31  ;;  %v4186_v54 = vpop.f32.mrb[4].mxu0  ;;  %v1990_v31 = vld [vmem:[%s4026_s24 + $0x2e8] sm:$0xff] }
 0x117   : > { %2112 = vmatmul.mubr.f32.gmra.mrb[50].mxu0 %v3938_v49  ;;  %3263 = vmatprep.subr.bf16.mxu1 %v3262_v36  ;;  %v4191_v59 = vpop.f32.mrb[4].mxu1  ;;  %v4193_v61 = vpop.f32.mrb[5].mxu0  ;;  %v3240_v36 = vpack.c.bf16 %v1973_v27, %v1965_v26  ;;  %v3242_v39 = vpack.c.bf16 %v1990_v31, %v1982_v38  ;;  %v2023_v26 = vld [vmem:[%s4026_s24 + $0x3f0] sm:$0xff]  ;;  %v2030_v27 = vld [vmem:[%s4026_s24 + $0x428] sm:$0xff] }
 0x118   : > { %2201 = vmatmul.mubr.f32.gmra.mrb[50].mxu1 %v3938_v49  ;;  %3229 = vmatpush1.bf16.msra.mxu0 %v3228_v43  ;;  %v4198_v1 = vpop.f32.mrb[5].mxu1  ;;  %v1981_v43 = vld [vmem:[%s4026_s24 + $0x2a0] sm:$0xff] }
 0x119   : > { %3265 = vmatpush1.bf16.msra.mxu1 %v3264_v46  ;;  %2701 = vmatprep.mubr.msk.f32.mxu0 %vm464_vm0, %v3949_v57  ;;  %v3278_v46 = vpack.c.bf16 %v1992_v33, %v1984_v32  ;;  %v3244_v56 = vpack.c.bf16 %v1989_v52, %v1981_v43  ;;  %v3254_v32 = vpack.c.bf16 %v2038_v28, %v2030_v27  ;;  %v2029_v33 = vld [vmem:[%s4026_s24 + $0x420] sm:$0xff]  ;;  %v2039_v43 = vld [vmem:[%s4026_s24 + $0x470] sm:$0xff] }
 0x11a   : > { %2705 = vmatprep.mubr.msk.f32.mxu1 %vm464_vm0, %v3949_v57  ;;  %3231 = vmatprep.subr.bf16.mxu0 %v3230_v50  ;;  %v4210_v11 = vpop.f32.mrb[6].mxu0  ;;  %v2006_v50 = vld [vmem:[%s4026_s24 + $0x368] sm:$0xff] }
 0x11b   : > { %2118 = vmatmul.mubr.f32.gmra.mrb[52].mxu0 %v3964_v3  ;;  %3267 = vmatprep.subr.bf16.mxu1 %v3266_v55  ;;  %v4215_v15 = vpop.f32.mrb[6].mxu1  ;;  %v4217_v18 = vpop.f32.mrb[7].mxu0  ;;  %v2008_v55 = vld [vmem:[%s4026_s24 + $0x378] sm:$0xff] }
 0x11c   : > { %2207 = vmatmul.mubr.f32.gmra.mrb[52].mxu1 %v3964_v3  ;;  %3233 = vmatpush1.bf16.msra.mxu0 %v3232_v62  ;;  %v4220_v19 = vpop.f32.mrb[7].mxu1  ;;  %v3246_v62 = vpack.c.bf16 %v2006_v50, %v1998_v48  ;;  %v3282_v4 = vpack.c.bf16 %v2008_v55, %v2000_v53 }
 0x11d   : > { %3269 = vmatpush1.bf16.msra.mxu1 %v3268_v2  ;;  %2702 = vmatprep.mubr.msk.f32.mxu0 %vm464_vm0, %v3973_v0  ;;  %v1999_v2 = vld [vmem:[%s4026_s24 + $0x330] sm:$0xff] }
 0x11e   : > { %2706 = vmatprep.mubr.msk.f32.mxu1 %vm464_vm0, %v3973_v0  ;;  %3235 = vmatprep.subr.bf16.mxu0 %v3234_v6  ;;  %v2022_v6 = vld [vmem:[%s4026_s24 + $0x3e8] sm:$0xff] }
 0x11f   : > { %2124 = vmatmul.mubr.f32.gmra.mrb[54].mxu0 %v3988_v17  ;;  %3271 = vmatprep.subr.bf16.mxu1 %v3270_v12  ;;  %v3284_v12 = vpack.c.bf16 %v2007_v5, %v1999_v2  ;;  %v3250_v13 = vpack.c.bf16 %v2022_v6, %v2014_v10 }
 0x120   : > { %2213 = vmatmul.mubr.f32.gmra.mrb[54].mxu1 %v3988_v17  ;;  %3237 = vmatpush1.bf16.msra.mxu0 %v3236_v24  ;;  %v2021_v24 = vld [vmem:[%s4026_s24 + $0x3e0] sm:$0xff] }
 0x121   : > { %3273 = vmatpush1.bf16.msra.mxu1 %v3272_v22  ;;  %3239 = vmatprep.subr.bf16.mxu0 %v3238_v23  ;;  %v2015_v22 = vld [vmem:[%s4026_s24 + $0x3b0] sm:$0xff]  ;;  %v3286_v23 = vpack.c.bf16 %v2024_v8, %v2016_v7  ;;  %v3252_v38 = vpack.c.bf16 %v2021_v24, %v2013_v14 }
 0x122   : > { %3275 = vmatprep.subr.bf16.mxu1 %v3274_v29  ;;  %2707 = vmatprep.mubr.msk.f32.mxu0 %vm464_vm0, %v3314_v51  ;;  %v2032_v29 = vld [vmem:[%s4026_s24 + $0x438] sm:$0xff]  ;;  %v3288_v31 = vpack.c.bf16 %v2023_v26, %v2015_v22 }
 0x123   : > { %2711 = vmatprep.mubr.msk.f32.mxu1 %vm464_vm0, %v3314_v51 }
 0x124   : > { %3241 = vmatpush1.bf16.msra.mxu0 %v3240_v36  ;;  %v2037_v36 = vld [vmem:[%s4026_s24 + $0x460] sm:$0xff] }
 0x125   : > { %3277 = vmatpush1.bf16.msra.mxu1 %v3276_v37  ;;  %3243 = vmatprep.subr.bf16.mxu0 %v3242_v39  ;;  %v3290_v37 = vpack.c.bf16 %v2040_v30, %v2032_v29  ;;  %v2031_v39 = vld [vmem:[%s4026_s24 + $0x430] sm:$0xff]  ;;  %v3256_v52 = vpack.c.bf16 %v2037_v36, %v2029_v33 }
 0x126   : > { %3279 = vmatprep.subr.bf16.mxu1 %v3278_v46  ;;  %v3292_v44 = vpack.c.bf16 %v2039_v43, %v2031_v39 }
 0x128   : > { %3245 = vmatpush1.bf16.msra.mxu0 %v3244_v56 }
 0x129   : > { %3281 = vmatpush1.bf16.msra.mxu1 %v3280_v58  ;;  %3247 = vmatprep.subr.bf16.mxu0 %v3246_v62 }
 0x12a   : > { %3283 = vmatprep.subr.bf16.mxu1 %v3282_v4 }
 0x12c   : > { %3249 = vmatpush1.bf16.msra.mxu0 %v3248_v9 }
 0x12d   : > { %3285 = vmatpush1.bf16.msra.mxu1 %v3284_v12  ;;  %3251 = vmatprep.subr.bf16.mxu0 %v3250_v13 }
 0x12e   : > { %3287 = vmatprep.subr.bf16.mxu1 %v3286_v23 }
 0x130   : > { %3253 = vmatpush1.bf16.msra.mxu0 %v3252_v38 }
 0x131   : > { %3289 = vmatpush1.bf16.msra.mxu1 %v3288_v31  ;;  %3255 = vmatprep.subr.bf16.mxu0 %v3254_v32 }
 0x132   : > { %v4269_v46 = vpop.f32.mrb[8].mxu0  ;;  %3291 = vmatprep.subr.bf16.mxu1 %v3290_v37 }
 0x133   : > { %v4271_v47 = vpop.f32.mrb[8].mxu1  ;;  %v4273_v48 = vpop.f32.mrb[9].mxu0 }
 0x134   : > { %v4275_v50 = vpop.f32.mrb[9].mxu1  ;;  %3257 = vmatpush1.bf16.msra.mxu0 %v3256_v52 }
 0x135   : > { %3293 = vmatpush1.bf16.msra.mxu1 %v3292_v44 }
 0x136   : > { %v4277_v51 = vpop.f32.mrb[10].mxu0 }
 0x137   : > { %2284 = vmatmul.mubr.f32.vlgmr.msra.gmra.mrb[56].mxu0 %v3914_v34  ;;  %v4280_v53 = vpop.f32.mrb[10].mxu1  ;;  %v4282_v55 = vpop.f32.mrb[11].mxu0 }
 0x138   : > { %2373 = vmatmul.mubr.f32.vlgmr.msra.gmra.mrb[56].mxu1 %v3914_v34  ;;  %2708 = vmatprep.mubr.msk.f32.mxu0 %vm464_vm0, %v3925_v42  ;;  %v4287_v56 = vpop.f32.mrb[11].mxu1 }
 0x139   : > { %2712 = vmatprep.mubr.msk.f32.mxu1 %vm464_vm0, %v3925_v42 }
 0x13a   : > { %v4291_v58 = vpop.f32.mrb[12].mxu0 }
 0x13b   : > { %4741 = vst [vmem:[#allocation2_spill] sm:$0xff] %v4291_v58  ;;  %2290 = vmatmul.mubr.f32.gmra.mrb[58].mxu0 %v3938_v49  ;;  %v4294_v62 = vpop.f32.mrb[12].mxu1  ;;  %v4296_v63 = vpop.f32.mrb[13].mxu0 }
 0x13c   : > { %4742 = vst [vmem:[#allocation3_spill] sm:$0xff] %v4296_v63  ;;  %2379 = vmatmul.mubr.f32.gmra.mrb[58].mxu1 %v3938_v49  ;;  %2709 = vmatprep.mubr.msk.f32.mxu0 %vm464_vm0, %v3949_v57  ;;  %v4301_v34 = vpop.f32.mrb[13].mxu1 }
 0x13d   : > { %4743 = vst [vmem:[#allocation4_spill] sm:$0xff] %v4301_v34  ;;  %2713 = vmatprep.mubr.msk.f32.mxu1 %vm464_vm0, %v3949_v57 }
 0x13e   : > { %v4305_v60 = vpop.f32.mrb[14].mxu0 }
 0x13f   : > { %4744 = vst [vmem:[#allocation5_spill] sm:$0xff] %v4305_v60  ;;  %2296 = vmatmul.mubr.f32.gmra.mrb[60].mxu0 %v3964_v3  ;;  %v4308_v42 = vpop.f32.mrb[14].mxu1  ;;  %v4310_v2 = vpop.f32.mrb[15].mxu0 }
 0x140   : > { %4745 = vst [vmem:[#allocation6_spill] sm:$0xff] %v4310_v2  ;;  %2385 = vmatmul.mubr.f32.gmra.mrb[60].mxu1 %v3964_v3  ;;  %2710 = vmatprep.mubr.msk.f32.mxu0 %vm464_vm0, %v3973_v0  ;;  %v4315_v49 = vpop.f32.mrb[15].mxu1 }
 0x141   : > { %2714 = vmatprep.mubr.msk.f32.mxu1 %vm464_vm0, %v3973_v0 }
 0x143   : > { %2302 = vmatmul.mubr.f32.gmra.mrb[62].mxu0 %v3988_v17 }
 0x144   : > { %2391 = vmatmul.mubr.f32.gmra.mrb[62].mxu1 %v3988_v17 }
 0x156   : > { %v4321_v57 = vpop.f32.mrb[16].mxu0 }
 0x157   : > { %v4325_v5 = vpop.f32.mrb[16].mxu1  ;;  %v4327_v3 = vpop.f32.mrb[17].mxu0  ;;  %v4753_v34 = vmax.f32 %v4146_v16, %v4321_v57 }
 0x158   : > { %v4333_v0 = vpop.f32.mrb[17].mxu1  ;;  %v4754_v63 = vmax.f32 %v4150_v20, %v4325_v5  ;;  %v4755_v43 = vmax.f32 %v4152_v21, %v4327_v3 }
 0x159   : > { %v4756_v44 = vmax.f32 %v4156_v25, %v4333_v0 }
 0x15a   : > { %v4337_v7 = vpop.f32.mrb[18].mxu0 }
 0x15b   : > { %v4341_v9 = vpop.f32.mrb[18].mxu1  ;;  %v4343_v12 = vpop.f32.mrb[19].mxu0 }
 0x15c   : > { %v4349_v24 = vpop.f32.mrb[19].mxu1 }
 0x15e   : > { %v4353_v23 = vpop.f32.mrb[20].mxu0 }
 0x15f   : > { %v4357_v27 = vpop.f32.mrb[20].mxu1  ;;  %v4359_v28 = vpop.f32.mrb[21].mxu0  ;;  %v4761_v0 = vmax.f32 %v4186_v54, %v4353_v23 }
 0x160   : > { %v4365_v38 = vpop.f32.mrb[21].mxu1 }
 0x162   : > { %v4369_v32 = vpop.f32.mrb[22].mxu0 }
 0x163   : > { %v4373_v36 = vpop.f32.mrb[22].mxu1  ;;  %v4375_v37 = vpop.f32.mrb[23].mxu0  ;;  %v4765_v23 = vmax.f32 %v4210_v11, %v4369_v32 }
 0x164   : > { %v4381_v52 = vpop.f32.mrb[23].mxu1 }
 0x17a   : > { %v4385_v31 = vpop.f32.mrb[24].mxu0 }
 0x17b   : > { %v4389_v30 = vpop.f32.mrb[24].mxu1  ;;  %v4391_v29 = vpop.f32.mrb[25].mxu0  ;;  %v4769_v32 = vmax.f32 %v4269_v46, %v4385_v31 }
 0x17c   : > { %v4397_v26 = vpop.f32.mrb[25].mxu1 }
 0x17e   : > { %v4401_v22 = vpop.f32.mrb[26].mxu0 }
 0x17f   : > { %v4405_v14 = vpop.f32.mrb[26].mxu1  ;;  %v4407_v13 = vpop.f32.mrb[27].mxu0  ;;  %v4773_v31 = vmax.f32 %v4277_v51, %v4401_v22  ;;  %v4778_v22 = vld [vmem:[#allocation2_spill] sm:$0xff] }
 0x180   : > { %v4413_v8 = vpop.f32.mrb[27].mxu1 }
 0x181   : > { %4746 = vst [vmem:[#allocation7_spill] sm:$0xff] %v4413_v8 }
 0x182   : > { %v4417_v17 = vpop.f32.mrb[28].mxu0 }
 0x183   : > { %4747 = vst [vmem:[#allocation8_spill] sm:$0xff] %v4417_v17  ;;  %v4421_v6 = vpop.f32.mrb[28].mxu1  ;;  %v4423_v10 = vpop.f32.mrb[29].mxu0 }
 0x184   : > { %4748 = vst [vmem:[#allocation9_spill] sm:$0xff] %v4423_v10  ;;  %v4429_v4 = vpop.f32.mrb[29].mxu1 }
 0x185   : > { %4749 = vst [vmem:[#allocation10_spill] sm:$0xff] %v4429_v4 }
 0x186   : > { %v4433_v8 = vpop.f32.mrb[30].mxu0 }
 0x187   : > { %4750 = vst [vmem:[#allocation11_spill] sm:$0xff] %v4433_v8  ;;  %v4437_v17 = vpop.f32.mrb[30].mxu1  ;;  %v4439_v58 = vpop.f32.mrb[31].mxu0 }
 0x188   : > { %4751 = vst [vmem:[#allocation12_spill] sm:$0xff] %v4439_v58  ;;  %v4445_v10 = vpop.f32.mrb[31].mxu1 }
 0x189   : > { %4752 = vst [vmem:[#allocation13_spill] sm:$0xff] %v4445_v10 }
 0x19e   : > { %v1575_v4 = vpop.f32.mrb[32].mxu0 }
 0x19f   : > { %v4452_v33 = vmax.f32 %v4753_v34, %v1575_v4  ;;  %v1664_v8 = vpop.f32.mrb[32].mxu1  ;;  %v1577_v60 = vpop.f32.mrb[33].mxu0  ;;  %v4757_v34 = vmax.f32 %v4164_v35, %v4337_v7  ;;  %v4758_v4 = vmax.f32 %v4169_v41, %v4341_v9  ;;  %v4762_v9 = vmax.f32 %v4191_v59, %v4357_v27 }
 0x1a0   : > { %v4457_v39 = vmax.f32 %v4754_v63, %v1664_v8  ;;  %v4462_v58 = vmax.f32 %v4755_v43, %v1577_v60  ;;  %v1666_v2 = vpop.f32.mrb[33].mxu1  ;;  %v4759_v60 = vmax.f32 %v4171_v40, %v4343_v12  ;;  %v4763_v12 = vmax.f32 %v4193_v61, %v4359_v28 }
 0x1a1   : > { %v4467_v10 = vmax.f32 %v4756_v44, %v1666_v2  ;;  %v4760_v2 = vmax.f32 %v4176_v45, %v4349_v24  ;;  %v4764_v24 = vmax.f32 %v4198_v1, %v4365_v38  ;;  %v4767_v28 = vmax.f32 %v4217_v18, %v4375_v37 }
 0x1a2   : > { %v1581_v16 = vpop.f32.mrb[34].mxu0  ;;  %v4768_v38 = vmax.f32 %v4220_v19, %v4381_v52  ;;  %v4771_v37 = vmax.f32 %v4273_v48, %v4391_v29  ;;  %v4772_v52 = vmax.f32 %v4275_v50, %v4397_v26  ;;  %v4775_v29 = vmax.f32 %v4282_v55, %v4407_v13  ;;  %v4776_v26 = vld [vmem:[#allocation7_spill] sm:$0xff] }
 0x1a3   : > { %v4472_v57 = vmax.f32 %v4757_v34, %v1581_v16  ;;  %v1670_v20 = vpop.f32.mrb[34].mxu1  ;;  %v1583_v63 = vpop.f32.mrb[35].mxu0  ;;  %v4766_v34 = vmax.f32 %v4215_v15, %v4373_v36  ;;  %v4782_v13 = vld [vmem:[#allocation3_spill] sm:$0xff] }
 0x1a4   : > { %v4477_v21 = vmax.f32 %v4758_v4, %v1670_v20  ;;  %v4482_v5 = vmax.f32 %v4759_v60, %v1583_v63  ;;  %v1672_v25 = vpop.f32.mrb[35].mxu1  ;;  %v4770_v60 = vmax.f32 %v4271_v47, %v4389_v30 }
 0x1a5   : > { %v4487_v3 = vmax.f32 %v4760_v2, %v1672_v25 }
 0x1a6   : > { %v1587_v35 = vpop.f32.mrb[36].mxu0 }
 0x1a7   : > { %v4492_v7 = vmax.f32 %v4761_v0, %v1587_v35  ;;  %v1676_v41 = vpop.f32.mrb[36].mxu1  ;;  %v1589_v8 = vpop.f32.mrb[37].mxu0  ;;  %v4774_v0 = vmax.f32 %v4280_v53, %v4405_v14 }
 0x1a8   : > { %v4497_v40 = vmax.f32 %v4762_v9, %v1676_v41  ;;  %v4502_v43 = vmax.f32 %v4763_v12, %v1589_v8  ;;  %v1678_v45 = vpop.f32.mrb[37].mxu1  ;;  %v4777_v8 = vmax.f32 %v4287_v56, %v4776_v26  ;;  %v4779_v12 = vld [vmem:[#allocation8_spill] sm:$0xff]  ;;  %v4609_v26 = vpop.permute.xlu0 %2435 }
 0x1a9   : > { %v4507_v44 = vmax.f32 %v4764_v24, %v1678_v45  ;;  %v4780_v45 = vmax.f32 %v4778_v22, %v4779_v12 }
 0x1aa   : > { %v1593_v54 = vpop.f32.mrb[38].mxu0 }
 0x1ab   : > { %v4512_v16 = vmax.f32 %v4765_v23, %v1593_v54  ;;  %v1682_v59 = vpop.f32.mrb[38].mxu1  ;;  %v1595_v27 = vpop.f32.mrb[39].mxu0  ;;  %v4781_v54 = vmax.f32 %v4294_v62, %v4421_v6  ;;  %v4783_v23 = vld [vmem:[#allocation9_spill] sm:$0xff] }
 0x1ac   : > { %v4517_v61 = vmax.f32 %v4766_v34, %v1682_v59  ;;  %v4522_v20 = vmax.f32 %v4767_v28, %v1595_v27  ;;  %v1684_v1 = vpop.f32.mrb[39].mxu1  ;;  %v4784_v59 = vmax.f32 %v4782_v13, %v4783_v23  ;;  %v4785_v34 = vld [vmem:[#allocation4_spill] sm:$0xff]  ;;  %v4786_v28 = vld [vmem:[#allocation10_spill] sm:$0xff]  ;;  %v4624_v13 = vpop.permute.xlu0 %2440 }
 0x1ad   : > { %v4527_v63 = vmax.f32 %v4768_v38, %v1684_v1  ;;  %v4787_v1 = vmax.f32 %v4785_v34, %v4786_v28 }
 0x1c2   : > { %v1753_v11 = vpop.f32.mrb[40].mxu0 }
 0x1c3   : > { %v4532_v4 = vmax.f32 %v4769_v32, %v1753_v11  ;;  %v1842_v15 = vpop.f32.mrb[40].mxu1  ;;  %v1755_v36 = vpop.f32.mrb[41].mxu0  ;;  %v4788_v32 = vld [vmem:[#allocation5_spill] sm:$0xff] }
 0x1c4   : > { %v4537_v18 = vmax.f32 %v4770_v60, %v1842_v15  ;;  %v4542_v25 = vmax.f32 %v4771_v37, %v1755_v36  ;;  %v1844_v19 = vpop.f32.mrb[41].mxu1  ;;  %v4789_v15 = vld [vmem:[#allocation11_spill] sm:$0xff]  ;;  %v4791_v37 = vmax.f32 %v4308_v42, %v4437_v17 }
 0x1c5   : > { %v4547_v2 = vmax.f32 %v4772_v52, %v1844_v19  ;;  %v4790_v36 = vmax.f32 %v4788_v32, %v4789_v15  ;;  %v4792_v52 = vld [vmem:[#allocation6_spill] sm:$0xff]  ;;  %v4630_v32 = vpop.permute.xlu1 %2445 }
 0x1c6   : > { %v1759_v46 = vpop.f32.mrb[42].mxu0 }
 0x1c7   : > { %v4552_v35 = vmax.f32 %v4773_v31, %v1759_v46  ;;  %v1848_v47 = vpop.f32.mrb[42].mxu1  ;;  %v1761_v30 = vpop.f32.mrb[43].mxu0  ;;  %v4793_v46 = vld [vmem:[#allocation12_spill] sm:$0xff] }
 0x1c8   : > { %v4557_v48 = vmax.f32 %v4774_v0, %v1848_v47  ;;  %v4562_v41 = vmax.f32 %v4775_v29, %v1761_v30  ;;  %v1850_v50 = vpop.f32.mrb[43].mxu1  ;;  %v4794_v31 = vmax.f32 %v4792_v52, %v4793_v46  ;;  %v4795_v0 = vld [vmem:[#allocation13_spill] sm:$0xff] }
 0x1c9   : > { %v4567_v9 = vmax.f32 %v4777_v8, %v1850_v50  ;;  %v4796_v29 = vmax.f32 %v4315_v49, %v4795_v0 }
 0x1ca   : > { %v1765_v51 = vpop.f32.mrb[44].mxu0 }
 0x1cb   : > { %v4572_v24 = vmax.f32 %v4780_v45, %v1765_v51  ;;  %v1854_v53 = vpop.f32.mrb[44].mxu1  ;;  %v1767_v14 = vpop.f32.mrb[45].mxu0 }
 0x1cc   : > { %v4577_v55 = vmax.f32 %v4781_v54, %v1854_v53  ;;  %v4582_v27 = vmax.f32 %v4784_v59, %v1767_v14  ;;  %v1856_v56 = vpop.f32.mrb[45].mxu1 }
 0x1cd   : > { %v4587_v38 = vmax.f32 %v4787_v1, %v1856_v56 }
 0x1ce   : > { %v1771_v11 = vpop.f32.mrb[46].mxu0 }
 0x1cf   : > { %v4592_v60 = vmax.f32 %v4790_v36, %v1771_v11  ;;  %v1860_v62 = vpop.f32.mrb[46].mxu1  ;;  %v1773_v6 = vpop.f32.mrb[47].mxu0 }
 0x1d0   : > { %v4597_v19 = vmax.f32 %v4791_v37, %v1860_v62  ;;  %v4602_v47 = vmax.f32 %v4794_v31, %v1773_v6  ;;  %v1862_v30 = vpop.f32.mrb[47].mxu1 }
 0x1d1   : > { %v4607_v50 = vmax.f32 %v4796_v29, %v1862_v30 }
 0x1e6   : > { %v2107_v8 = vpop.f32.mrb[48].mxu0 }
 0x1e7   : > { %v2397_v51 = vmax.f32 %v4452_v33, %v2107_v8  ;;  %v2196_v22 = vpop.f32.mrb[48].mxu1  ;;  %v2109_v42 = vpop.f32.mrb[49].mxu0 }
 0x1e8   : > { %v2399_v17 = vmax.f32 %v4457_v39, %v2196_v22  ;;  %v2398_v12 = vmax.f32 %v4462_v58, %v2109_v42  ;;  %v2198_v45 = vpop.f32.mrb[49].mxu1 }
 0x1e9   : > { %v2400_v53 = vmax.f32 %v4467_v10, %v2198_v45  ;;  %v2453_v14 = vadd.f32 %v4609_v26, %v2397_v51  ;;  %v4651_v45 = vpop.permute.xlu1 %2450 }
 0x1ea   : > { %v2454_v49 = vadd.f32 %v4609_v26, %v2398_v12  ;;  %v2455_v33 = vadd.f32 %v4609_v26, %v2399_v17  ;;  %v2113_v54 = vpop.f32.mrb[50].mxu0 }
 0x1eb   : > { %v2456_v58 = vadd.f32 %v4609_v26, %v2400_v53  ;;  %v2485_v10 = vmax.f32 %v2453_v14, 0.0  ;;  %v2405_v39 = vmax.f32 %v4472_v57, %v2113_v54  ;;  %v2202_v23 = vpop.f32.mrb[50].mxu1  ;;  %v2115_v59 = vpop.f32.mrb[51].mxu0 }
 0x1ec   : > { %v2486_v56 = vmax.f32 %v2454_v49, 0.0  ;;  %v2487_v34 = vmax.f32 %v2455_v33, 0.0  ;;  %v2407_v28 = vmax.f32 %v4477_v21, %v2202_v23  ;;  %v2406_v1 = vmax.f32 %v4482_v5, %v2115_v59  ;;  %v2204_v11 = vpop.f32.mrb[51].mxu1 }
 0x1ed   : > { %v2488_v15 = vmax.f32 %v2456_v58, 0.0  ;;  %2517 = vst [vmem:[%s4620_s14] sm:$0xff] %v2485_v10  ;;  %v2408_v36 = vmax.f32 %v4487_v3, %v2204_v11  ;;  %v2461_v62 = vadd.f32 %v4624_v13, %v2405_v39 }
 0x1ee   : > { %2518 = vst [vmem:[%s4620_s14 + $0x8] sm:$0xff] %v2486_v56  ;;  %2519 = vst [vmem:[%s4620_s14 + $0x10] sm:$0xff] %v2487_v34  ;;  %v2462_v57 = vadd.f32 %v4624_v13, %v2406_v1  ;;  %v2463_v6 = vadd.f32 %v4624_v13, %v2407_v28  ;;  %v2119_v37 = vpop.f32.mrb[52].mxu0 }
 0x1ef   : > { %2520 = vst [vmem:[%s4620_s14 + $0x18] sm:$0xff] %v2488_v15  ;;  %v2464_v21 = vadd.f32 %v4624_v13, %v2408_v36  ;;  %v2493_v5 = vmax.f32 %v2461_v62, 0.0  ;;  %v2413_v52 = vmax.f32 %v4492_v7, %v2119_v37  ;;  %v2208_v46 = vpop.f32.mrb[52].mxu1  ;;  %v2121_v3 = vpop.f32.mrb[53].mxu0 }
 0x1f0   : > { %v2494_v31 = vmax.f32 %v2462_v57, 0.0  ;;  %v2495_v30 = vmax.f32 %v2463_v6, 0.0  ;;  %v2415_v0 = vmax.f32 %v4497_v40, %v2208_v46  ;;  %v2414_v29 = vmax.f32 %v4502_v43, %v2121_v3  ;;  %v2210_v8 = vpop.f32.mrb[53].mxu1 }
 0x1f1   : > { %v2496_v51 = vmax.f32 %v2464_v21, 0.0  ;;  %2525 = vst [vmem:[%s4620_s14 + $0x40] sm:$0xff] %v2493_v5  ;;  %v2416_v22 = vmax.f32 %v4507_v44, %v2210_v8  ;;  %v2469_v42 = vadd.f32 %v4630_v32, %v2413_v52 }
 0x1f2   : > { %2526 = vst [vmem:[%s4620_s14 + $0x48] sm:$0xff] %v2494_v31  ;;  %2527 = vst [vmem:[%s4620_s14 + $0x50] sm:$0xff] %v2495_v30  ;;  %v2470_v7 = vadd.f32 %v4630_v32, %v2414_v29  ;;  %v2471_v17 = vadd.f32 %v4630_v32, %v2415_v0  ;;  %v2125_v12 = vpop.f32.mrb[54].mxu0 }
 0x1f3   : > { %2528 = vst [vmem:[%s4620_s14 + $0x58] sm:$0xff] %v2496_v51  ;;  %v2472_v40 = vadd.f32 %v4630_v32, %v2416_v22  ;;  %v2501_v43 = vmax.f32 %v2469_v42, 0.0  ;;  %v2421_v44 = vmax.f32 %v4512_v16, %v2125_v12  ;;  %v2214_v53 = vpop.f32.mrb[54].mxu1  ;;  %v2127_v14 = vpop.f32.mrb[55].mxu0 }
 0x1f4   : > { %v2502_v49 = vmax.f32 %v2470_v7, 0.0  ;;  %v2503_v33 = vmax.f32 %v2471_v17, 0.0  ;;  %v2423_v54 = vmax.f32 %v4517_v61, %v2214_v53  ;;  %v2422_v58 = vmax.f32 %v4522_v20, %v2127_v14  ;;  %v2216_v10 = vpop.f32.mrb[55].mxu1 }
 0x1f5   : > { %v2504_v39 = vmax.f32 %v2472_v40, 0.0  ;;  %2533 = vst [vmem:[%s4620_s14 + $0x80] sm:$0xff] %v2501_v43  ;;  %v2424_v23 = vmax.f32 %v4527_v63, %v2216_v10  ;;  %v2477_v16 = vadd.f32 %v4651_v45, %v2421_v44 }
 0x1f6   : > { %2534 = vst [vmem:[%s4620_s14 + $0x88] sm:$0xff] %v2502_v49  ;;  %2535 = vst [vmem:[%s4620_s14 + $0x90] sm:$0xff] %v2503_v33  ;;  %v2478_v59 = vadd.f32 %v4651_v45, %v2422_v58  ;;  %v2479_v56 = vadd.f32 %v4651_v45, %v2423_v54 }
 0x1f7   : > { %2536 = vst [vmem:[%s4620_s14 + $0x98] sm:$0xff] %v2504_v39  ;;  %v2480_v61 = vadd.f32 %v4651_v45, %v2424_v23  ;;  %v2509_v20 = vmax.f32 %v2477_v16, 0.0 }
 0x1f8   : > { %v2510_v34 = vmax.f32 %v2478_v59, 0.0  ;;  %v2511_v28 = vmax.f32 %v2479_v56, 0.0 }
 0x1f9   : > { %v2512_v1 = vmax.f32 %v2480_v61, 0.0  ;;  %2541 = vst [vmem:[%s4620_s14 + $0xc0] sm:$0xff] %v2509_v20 }
 0x1fa   : > { %2542 = vst [vmem:[%s4620_s14 + $0xc8] sm:$0xff] %v2510_v34  ;;  %2543 = vst [vmem:[%s4620_s14 + $0xd0] sm:$0xff] %v2511_v28 }
 0x1fb   : > { %2544 = vst [vmem:[%s4620_s14 + $0xd8] sm:$0xff] %v2512_v1 }
 0x20a   : > { %v2285_v63 = vpop.f32.mrb[56].mxu0 }
 0x20b   : > { %v2401_v11 = vmax.f32 %v4532_v4, %v2285_v63  ;;  %v2374_v15 = vpop.f32.mrb[56].mxu1  ;;  %v2287_v36 = vpop.f32.mrb[57].mxu0 }
 0x20c   : > { %v2403_v62 = vmax.f32 %v4537_v18, %v2374_v15  ;;  %v2402_v57 = vmax.f32 %v4542_v25, %v2287_v36  ;;  %v2376_v6 = vpop.f32.mrb[57].mxu1 }
 0x20d   : > { %v2457_v37 = vadd.f32 %v4609_v26, %v2401_v11  ;;  %v2404_v21 = vmax.f32 %v4547_v2, %v2376_v6 }
 0x20e   : > { %v2459_v5 = vadd.f32 %v4609_v26, %v2403_v62  ;;  %v2458_v52 = vadd.f32 %v4609_v26, %v2402_v57  ;;  %v2291_v46 = vpop.f32.mrb[58].mxu0 }
 0x20f   : > { %v2489_v4 = vmax.f32 %v2457_v37, 0.0  ;;  %v2460_v3 = vadd.f32 %v4609_v26, %v2404_v21  ;;  %v2409_v18 = vmax.f32 %v4552_v35, %v2291_v46  ;;  %v2380_v31 = vpop.f32.mrb[58].mxu1  ;;  %v2293_v25 = vpop.f32.mrb[59].mxu0 }
 0x210   : > { %v2491_v30 = vmax.f32 %v2459_v5, 0.0  ;;  %v2490_v0 = vmax.f32 %v2458_v52, 0.0  ;;  %v2411_v29 = vmax.f32 %v4557_v48, %v2380_v31  ;;  %v2410_v2 = vmax.f32 %v4562_v41, %v2293_v25  ;;  %v2382_v8 = vpop.f32.mrb[59].mxu1 }
 0x211   : > { %2521 = vst [vmem:[%s4620_s14 + $0x20] sm:$0xff] %v2489_v4  ;;  %v2492_v51 = vmax.f32 %v2460_v3, 0.0  ;;  %v2465_v22 = vadd.f32 %v4624_v13, %v2409_v18  ;;  %v2412_v42 = vmax.f32 %v4567_v9, %v2382_v8 }
 0x212   : > { %2523 = vst [vmem:[%s4620_s14 + $0x30] sm:$0xff] %v2491_v30  ;;  %2522 = vst [vmem:[%s4620_s14 + $0x28] sm:$0xff] %v2490_v0  ;;  %v2467_v35 = vadd.f32 %v4624_v13, %v2411_v29  ;;  %v2466_v26 = vadd.f32 %v4624_v13, %v2410_v2  ;;  %v2297_v7 = vpop.f32.mrb[60].mxu0 }
 0x213   : > { %2524 = vst [vmem:[%s4620_s14 + $0x38] sm:$0xff] %v2492_v51  ;;  %v2497_v48 = vmax.f32 %v2465_v22, 0.0  ;;  %v2468_v41 = vadd.f32 %v4624_v13, %v2412_v42  ;;  %v2417_v17 = vmax.f32 %v4572_v24, %v2297_v7  ;;  %v2386_v12 = vpop.f32.mrb[60].mxu1  ;;  %v2299_v40 = vpop.f32.mrb[61].mxu0 }
 0x214   : > { %v2499_v9 = vmax.f32 %v2467_v35, 0.0  ;;  %v2498_v43 = vmax.f32 %v2466_v26, 0.0  ;;  %v2419_v44 = vmax.f32 %v4577_v55, %v2386_v12  ;;  %v2418_v53 = vmax.f32 %v4582_v27, %v2299_v40  ;;  %v2388_v14 = vpop.f32.mrb[61].mxu1 }
 0x215   : > { %2529 = vst [vmem:[%s4620_s14 + $0x60] sm:$0xff] %v2497_v48  ;;  %v2500_v49 = vmax.f32 %v2468_v41, 0.0  ;;  %v2473_v33 = vadd.f32 %v4630_v32, %v2417_v17  ;;  %v2420_v54 = vmax.f32 %v4587_v38, %v2388_v14 }
 0x216   : > { %2531 = vst [vmem:[%s4620_s14 + $0x70] sm:$0xff] %v2499_v9  ;;  %2530 = vst [vmem:[%s4620_s14 + $0x68] sm:$0xff] %v2498_v43  ;;  %v2475_v24 = vadd.f32 %v4630_v32, %v2419_v44  ;;  %v2474_v13 = vadd.f32 %v4630_v32, %v2418_v53  ;;  %v2303_v58 = vpop.f32.mrb[62].mxu0 }
 0x217   : > { %2532 = vst [vmem:[%s4620_s14 + $0x78] sm:$0xff] %v2500_v49  ;;  %v2505_v55 = vmax.f32 %v2473_v33, 0.0  ;;  %v2476_v27 = vadd.f32 %v4630_v32, %v2420_v54  ;;  %v2425_v10 = vmax.f32 %v4592_v60, %v2303_v58  ;;  %v2392_v39 = vpop.f32.mrb[62].mxu1  ;;  %v2305_v23 = vpop.f32.mrb[63].mxu0 }
 0x218   : > { %v2507_v38 = vmax.f32 %v2475_v24, 0.0  ;;  %v2506_v16 = vmax.f32 %v2474_v13, 0.0  ;;  %v2427_v59 = vmax.f32 %v4597_v19, %v2392_v39  ;;  %v2426_v56 = vmax.f32 %v4602_v47, %v2305_v23  ;;  %v2394_v61 = vpop.f32.mrb[63].mxu1 }
 0x219   : > { %2537 = vst [vmem:[%s4620_s14 + $0xa0] sm:$0xff] %v2505_v55  ;;  %v2508_v20 = vmax.f32 %v2476_v27, 0.0  ;;  %v2481_v32 = vadd.f32 %v4651_v45, %v2425_v10  ;;  %v2428_v60 = vmax.f32 %v4607_v50, %v2394_v61 }
 0x21a   : > { %2539 = vst [vmem:[%s4620_s14 + $0xb0] sm:$0xff] %v2507_v38  ;;  %2538 = vst [vmem:[%s4620_s14 + $0xa8] sm:$0xff] %v2506_v16  ;;  %v2483_v34 = vadd.f32 %v4651_v45, %v2427_v59  ;;  %v2482_v28 = vadd.f32 %v4651_v45, %v2426_v56 }
 0x21b   : > { %2540 = vst [vmem:[%s4620_s14 + $0xb8] sm:$0xff] %v2508_v20  ;;  %v2513_v19 = vmax.f32 %v2481_v32, 0.0  ;;  %v2484_v47 = vadd.f32 %v4651_v45, %v2428_v60 }
 0x21c   : > { %v2515_v1 = vmax.f32 %v2483_v34, 0.0  ;;  %v2514_v63 = vmax.f32 %v2482_v28, 0.0 }
 0x21d   : > { %2545 = vst [vmem:[%s4620_s14 + $0xe0] sm:$0xff] %v2513_v19  ;;  %v2516_v11 = vmax.f32 %v2484_v47, 0.0 }
 0x21e   : > { %2547 = vst [vmem:[%s4620_s14 + $0xf0] sm:$0xff] %v2515_v1  ;;  %2546 = vst [vmem:[%s4620_s14 + $0xe8] sm:$0xff] %v2514_v63 }
 0x21f   : > { %2548 = vst [vmem:[%s4620_s14 + $0xf8] sm:$0xff] %v2516_v11 }
 0x220 PF: > { %s16_s21 = sadd.s32 1, %s3321_s21  }
 0x221   : > { %p13_p4 = scmp.ge.s32.totalorder %s16_s21, 4  }
 0x223   :  { %15 = sbr.rel (!%p13_p4) target bundleno = 1 (0x1), region = 83 }

// kernel: flip_detection_forward.5
= control target key start
LH: loop header
LB: loop body
LE: loop exit
PB: predicated region body
PF: predicated region fallthrough
CT: control target
= control target key end

     0   :  { %s15653_s20 = smov 0   ;;  %s16928_s0 = inlined_call_operand.vmem [shape: f32[2,32768], index: 0, kind: input, shape index: {}]   ;;  %s16929_s1 = inlined_call_operand.vmem [shape: bf16[32768,128], index: 1, kind: input, shape index: {}]   ;;  %s16930_s2 = inlined_call_operand.vmem [shape: f32[1,128], index: 2, kind: input, shape index: {}]   ;;  %s16931_s3 = inlined_call_operand.vmem [shape: f32[128,1], index: 3, kind: input, shape index: {}]   ;;  %s16932_s4 = inlined_call_operand.<no memory space> [shape: f32[1,1], index: 4, kind: input, shape index: {}]   ;;  %s16933_s5 = inlined_call_operand.vmem [shape: f32[2,1], index: 5, kind: output, shape index: {}]  }
   0x1   :  { %v10_v0 = vstv %s16932_s4 }
   0x2   :  { %11 = vst [vmem:[#allocation3] sm:$0x1] %v10_v0 }
   0x3 LB: > { %s15659_s21 = sadd.s32 4294967295, %s15613_s20   ;;  %p12017_p0 = scmp.ge.s32.totalorder %s15613_s20, 1  ;;  %s15613_s20 = sphi %s15653_s20, %s17_s20  }
   0x4   : > { %p196_p1 = scmp.lt.s32.totalorder %s15613_s20, 3 }
   0x6   : > { %p197_p2 = pnand %p12017_p0, %p196_p1 }
   0x7   : > { %s12018_s4 = sshll.u32 (!%p197_p2), %s15659_s21, 7  ;;  %s12020_s22 = sshll.u32 (!%p197_p2), %s15659_s21, 11 }
   0x8   : > { %200 = sbr.rel (%p197_p2) target bundleno = 1516 (0x5ec), region = 40  ;;  %p225_p3 = scmp.lt.s32.totalorder (!%p197_p2), %s12018_s4, 255 }
   0x9   : > { %p231_p4 = scmp.lt.s32.totalorder (!%p197_p2), %s12020_s22, 4095  ;;  %p12022_p5 = scmp.ne.s32.totalorder (!%p197_p2), %s15659_s21, 0 }
   0xf   : > { %s16935_s4 = smov (!%p225_p3, %s12018_s4), 255  ;;  %s16937_s22 = smov (!%p231_p4, %s12020_s22), 4095 }
  0x10   : > { %s12019_s23 = sshll.u32 %s16935_s4, 1  ;;  %s12021_s27 = sshll.u32 %s16937_s22, 2  ;;  %v15615_v1 = vmov (!%p12022_p5), 0.0  }
  0x11   : > { %s15668_s26 = scalar_lea.vmem %s16928_s0, %s12019_s23  ;;  %s15673_s30 = scalar_lea.vmem %s16929_s1, %s12021_s27  ;;  %241 = vst [vmem:[#allocation2] sm:$0x3] (!%p12022_p5), %v15615_v1 }
  0x12   : > { %240 = sbr.rel (%p12022_p5) target bundleno = 25 (0x19), region = 44 }
  0x19 PF: > { %v14549_v2 = vld [vmem:[%s15673_s30 + $0x40] sm:$0xff]   ;;  %v14553_v6 = vld [vmem:[%s15673_s30 + $0x48] sm:$0xff]   ;;  %v14557_v10 = vld [vmem:[%s15673_s30 + $0x50] sm:$0xff]   ;;  %v311_v30 = vlaneseq  ;;  %v15616_v38 = vmov 1983009808   ;;  %p13047_p6 = scmp.ne.s32.totalorder %s15659_s21, 1 }
  0x1a   : > { %v14550_v3 = vld [vmem:[%s15673_s30 + $0xc0] sm:$0xff]   ;;  %13052 = vmatprep.subr.bf16.mxu0 %v14549_v2  ;;  %v14554_v7 = vld [vmem:[%s15673_s30 + $0xc8] sm:$0xff]   ;;  %v14558_v11 = vld [vmem:[%s15673_s30 + $0xd0] sm:$0xff]   ;;  %v309_v39 = vunpack.c.l.s4 %v15616_v38  ;;  %vm15618_vm0 = vmmov (!%p13047_p6), 0   ;;  %vm11972_vm1 = vcmask (!%p13047_p6), 1024  }
  0x1b   : > { %v14551_v4 = vld [vmem:[%s15673_s30] sm:$0xff]   ;;  %13074 = vmatprep.subr.bf16.mxu1 %v14550_v3  ;;  %v14555_v8 = vld [vmem:[%s15673_s30 + $0x8] sm:$0xff]   ;;  %v14559_v12 = vld [vmem:[%s15673_s30 + $0x10] sm:$0xff]   ;;  %v312_v35 = vshrl.u32 %v311_v30, 7 }
  0x1c   : > { %v14552_v5 = vld [vmem:[%s15673_s30 + $0x80] sm:$0xff]   ;;  %13053 = vmatpush3.bf16.msra.mxu0 %v14551_v4  ;;  %v14556_v9 = vld [vmem:[%s15673_s30 + $0x88] sm:$0xff]   ;;  %v14560_v13 = vld [vmem:[%s15673_s30 + $0x90] sm:$0xff]   ;;  %v310_v41 = vunpack.c.0.s8 %v309_v39 }
  0x1d   : > { %13075 = vmatpush3.bf16.msra.mxu1 %v14552_v5  ;;  %13054 = vmatprep.subr.bf16.mxu0 %v14553_v6  ;;  %v14561_v14 = vld [vmem:[%s15673_s30 + $0x58] sm:$0xff]   ;;  %v14565_v18 = vld [vmem:[%s15673_s30 + $0x60] sm:$0xff]   ;;  %v14569_v22 = vld [vmem:[%s15673_s30 + $0x68] sm:$0xff]  }
  0x1e   : > { %13076 = vmatprep.subr.bf16.mxu1 %v14554_v7  ;;  %v14562_v15 = vld [vmem:[%s15673_s30 + $0xd8] sm:$0xff]   ;;  %v14566_v19 = vld [vmem:[%s15673_s30 + $0xe0] sm:$0xff]   ;;  %v14570_v23 = vld [vmem:[%s15673_s30 + $0xe8] sm:$0xff]   ;;  %v15711_v43 = vsub.s32 %v310_v41, %v312_v35 }
  0x1f   : > { %v14563_v16 = vld [vmem:[%s15673_s30 + $0x18] sm:$0xff]   ;;  %v14567_v20 = vld [vmem:[%s15673_s30 + $0x20] sm:$0xff]   ;;  %v14571_v24 = vld [vmem:[%s15673_s30 + $0x28] sm:$0xff]  }
  0x20   : > { %13055 = vmatpush3.bf16.msra.mxu0 %v14555_v8  ;;  %v14564_v17 = vld [vmem:[%s15673_s30 + $0x98] sm:$0xff]   ;;  %v14568_v21 = vld [vmem:[%s15673_s30 + $0xa0] sm:$0xff]   ;;  %v14572_v25 = vld [vmem:[%s15673_s30 + $0xa8] sm:$0xff]  }
  0x21   : > { %13077 = vmatpush3.bf16.msra.mxu1 %v14556_v9  ;;  %13056 = vmatprep.subr.bf16.mxu0 %v14557_v10  ;;  %v14573_v26 = vld [vmem:[%s15673_s30 + $0x70] sm:$0xff]   ;;  %v14577_v31 = vld [vmem:[%s15673_s30 + $0x78] sm:$0xff]   ;;  %v243_v36 = vld [vmem:[%s15668_s26] sm:$0xff] }
  0x22   : > { %13078 = vmatprep.subr.bf16.mxu1 %v14558_v11  ;;  %v14574_v27 = vld [vmem:[%s15673_s30 + $0xf0] sm:$0xff]   ;;  %v14578_v32 = vld [vmem:[%s15673_s30 + $0xf8] sm:$0xff]   ;;  %v14582_v37 = vld [vmem:[%s15673_s30 + $0x140] sm:$0xff]   ;;  %v307_v42 = vcombine.high %v243_v36, %v243_v36  ;;  %v314_v44 = vrot.slane %v243_v36, %v15711_v43 }
  0x23   : > { %v14575_v28 = vld [vmem:[%s15673_s30 + $0x30] sm:$0xff]   ;;  %v14579_v33 = vld [vmem:[%s15673_s30 + $0x38] sm:$0xff]   ;;  %v14583_v40 = vld [vmem:[%s15673_s30 + $0x1c0] sm:$0xff]  }
  0x24   : > { %13057 = vmatpush3.bf16.msra.mxu0 %v14559_v12  ;;  %v14576_v29 = vld [vmem:[%s15673_s30 + $0xb0] sm:$0xff]   ;;  %v14580_v34 = vld [vmem:[%s15673_s30 + $0xb8] sm:$0xff]   ;;  %v321_v45 = vrot.slane %v307_v42, %v15711_v43  ;;  %v322_v46 = vcombine.high %v314_v44, %v314_v44  ;;  %v14584_v48 = vld [vmem:[%s15673_s30 + $0x100] sm:$0xff]   ;;  %v979_v49 = vpack.c.bf16 %v314_v44, %v314_v44 }
  0x25   : > { %13079 = vmatpush3.bf16.msra.mxu1 %v14560_v13  ;;  %13058 = vmatprep.subr.bf16.mxu0 %v14561_v14  ;;  %v14585_v51 = vld [vmem:[%s15673_s30 + $0x180] sm:$0xff]   ;;  %v14586_v54 = vld [vmem:[%s15673_s30 + $0x148] sm:$0xff]   ;;  %v14590_v58 = vld [vmem:[%s15673_s30 + $0x150] sm:$0xff]  }
  0x26   : > { %13080 = vmatprep.subr.bf16.mxu1 %v14562_v15  ;;  %v323_v47 = vcombine.high %v321_v45, %v321_v45  ;;  %v981_v50 = vpack.c.bf16 %v321_v45, %v321_v45  ;;  %v980_v52 = vpack.c.bf16 %v322_v46, %v322_v46  ;;  %v14587_v55 = vld [vmem:[%s15673_s30 + $0x1c8] sm:$0xff]   ;;  %v14591_v59 = vld [vmem:[%s15673_s30 + $0x1d0] sm:$0xff]   ;;  %v14594_v62 = vld [vmem:[%s15673_s30 + $0x158] sm:$0xff]  }
  0x27   : > { %v14588_v56 = vld [vmem:[%s15673_s30 + $0x108] sm:$0xff]   ;;  %v14592_v60 = vld [vmem:[%s15673_s30 + $0x110] sm:$0xff]   ;;  %v14595_v63 = vld [vmem:[%s15673_s30 + $0x1d8] sm:$0xff]  }
  0x28   : > { %13059 = vmatpush3.bf16.msra.mxu0 %v14563_v16  ;;  %v982_v53 = vpack.c.bf16 %v323_v47, %v323_v47  ;;  %9331 = vmatprep.mubr.bf16.mxu0 %v980_v52  ;;  %v14589_v57 = vld [vmem:[%s15673_s30 + $0x188] sm:$0xff]   ;;  %v14593_v61 = vld [vmem:[%s15673_s30 + $0x190] sm:$0xff]   ;;  %v14596_v0 = vld [vmem:[%s15673_s30 + $0x118] sm:$0xff]  }
  0x29   : > { %13081 = vmatpush3.bf16.msra.mxu1 %v14564_v17  ;;  %13060 = vmatprep.subr.bf16.mxu0 %v14565_v18  ;;  %v14597_v1 = vld [vmem:[%s15673_s30 + $0x198] sm:$0xff]   ;;  %v14598_v2 = vld [vmem:[%s15673_s30 + $0x160] sm:$0xff]   ;;  %v14602_v6 = vld [vmem:[%s15673_s30 + $0x168] sm:$0xff]  }
  0x2a   : > { %13082 = vmatprep.subr.bf16.mxu1 %v14566_v19  ;;  %9371 = vmatprep.mubr.bf16.mxu1 %v982_v53  ;;  %v14599_v3 = vld [vmem:[%s15673_s30 + $0x1e0] sm:$0xff]   ;;  %v14603_v7 = vld [vmem:[%s15673_s30 + $0x1e8] sm:$0xff]   ;;  %v14606_v10 = vld [vmem:[%s15673_s30 + $0x170] sm:$0xff]  }
  0x2b   : > { %v14600_v4 = vld [vmem:[%s15673_s30 + $0x120] sm:$0xff]   ;;  %v14604_v8 = vld [vmem:[%s15673_s30 + $0x128] sm:$0xff]   ;;  %v14607_v11 = vld [vmem:[%s15673_s30 + $0x1f0] sm:$0xff]  }
  0x2c   : > { %13061 = vmatpush3.bf16.msra.mxu0 %v14567_v20  ;;  %v14601_v5 = vld [vmem:[%s15673_s30 + $0x1a0] sm:$0xff]   ;;  %v14605_v9 = vld [vmem:[%s15673_s30 + $0x1a8] sm:$0xff]   ;;  %v14608_v13 = vld [vmem:[%s15673_s30 + $0x130] sm:$0xff]  }
  0x2d   : > { %13083 = vmatpush3.bf16.msra.mxu1 %v14568_v21  ;;  %13062 = vmatprep.subr.bf16.mxu0 %v14569_v22  ;;  %v244_v12 = vld [vmem:[%s15668_s26 + $0x8] sm:$0xff]  ;;  %v14609_v16 = vld [vmem:[%s15673_s30 + $0x1b0] sm:$0xff]   ;;  %v14610_v17 = vld [vmem:[%s15673_s30 + $0x178] sm:$0xff]  }
  0x2e   : > { %13084 = vmatprep.subr.bf16.mxu1 %v14570_v23  ;;  %v331_v14 = vrot.slane %v244_v12, %v15711_v43  ;;  %v324_v15 = vcombine.high %v244_v12, %v244_v12  ;;  %v14611_v20 = vld [vmem:[%s15673_s30 + $0x1f8] sm:$0xff]   ;;  %v14622_v35 = vld [vmem:[%s15673_s30 + $0x288] sm:$0xff]   ;;  %v14623_v36 = vld [vmem:[%s15673_s30 + $0x250] sm:$0xff]  }
  0x2f   : > { %v14612_v21 = vld [vmem:[%s15673_s30 + $0x138] sm:$0xff]   ;;  %v14625_v38 = vld [vmem:[%s15673_s30 + $0x210] sm:$0xff]   ;;  %v14631_v45 = vld [vmem:[%s15673_s30 + $0x260] sm:$0xff]  }
  0x30   : > { %13063 = vmatpush3.bf16.msra.mxu0 %v14571_v24  ;;  %v339_v18 = vcombine.high %v331_v14, %v331_v14  ;;  %v338_v19 = vrot.slane %v324_v15, %v15711_v43  ;;  %v14613_v24 = vld [vmem:[%s15673_s30 + $0x1b8] sm:$0xff]   ;;  %v14626_v39 = vld [vmem:[%s15673_s30 + $0x290] sm:$0xff]   ;;  %v14632_v46 = vld [vmem:[%s15673_s30 + $0x2e0] sm:$0xff]  }
  0x31   : > { %13085 = vmatpush3.bf16.msra.mxu1 %v14572_v25  ;;  %13064 = vmatprep.subr.bf16.mxu0 %v14573_v26  ;;  %v14615_v26 = vld [vmem:[%s15673_s30 + $0x240] sm:$0xff]   ;;  %v14628_v41 = vld [vmem:[%s15673_s30 + $0x2d8] sm:$0xff]   ;;  %v14638_v52 = vld [vmem:[%s15673_s30 + $0x2a8] sm:$0xff]  }
  0x32   : > { %13086 = vmatprep.subr.bf16.mxu1 %v14574_v27  ;;  %v984_v22 = vpack.c.bf16 %v339_v18, %v339_v18  ;;  %v340_v23 = vcombine.high %v338_v19, %v338_v19  ;;  %v14616_v27 = vld [vmem:[%s15673_s30 + $0x2c0] sm:$0xff]   ;;  %v985_v30 = vpack.c.bf16 %v338_v19, %v338_v19  ;;  %v14629_v42 = vld [vmem:[%s15673_s30 + $0x218] sm:$0xff]   ;;  %v14639_v53 = vld [vmem:[%s15673_s30 + $0x270] sm:$0xff]  }
  0x33   : > { %v14630_v44 = vld [vmem:[%s15673_s30 + $0x298] sm:$0xff]   ;;  %v14633_v47 = vld [vmem:[%s15673_s30 + $0x220] sm:$0xff]   ;;  %v14653_v12 = vld [vmem:[%s15673_s30 + $0x3c8] sm:$0xff]  }
  0x34   : > { %13065 = vmatpush3.bf16.msra.mxu0 %v14575_v28  ;;  %v986_v25 = vpack.c.bf16 %v340_v23, %v340_v23  ;;  %v14617_v28 = vld [vmem:[%s15673_s30 + $0x200] sm:$0xff]   ;;  %v14656_v15 = vld [vmem:[%s15673_s30 + $0x350] sm:$0xff]   ;;  %v14660_v19 = vld [vmem:[%s15673_s30 + $0x358] sm:$0xff]  }
  0x35   : > { %13087 = vmatpush3.bf16.msra.mxu1 %v14576_v29  ;;  %13066 = vmatprep.subr.bf16.mxu0 %v14577_v31  ;;  %v983_v29 = vpack.c.bf16 %v331_v14, %v331_v14  ;;  %v14618_v31 = vld [vmem:[%s15673_s30 + $0x280] sm:$0xff]   ;;  %v14655_v14 = vld [vmem:[%s15673_s30 + $0x388] sm:$0xff]   ;;  %v14659_v18 = vld [vmem:[%s15673_s30 + $0x390] sm:$0xff]  }
  0x36   : > { %13088 = vmatprep.subr.bf16.mxu1 %v14578_v32  ;;  %v14619_v32 = vld [vmem:[%s15673_s30 + $0x248] sm:$0xff]   ;;  %v14664_v23 = vld [vmem:[%s15673_s30 + $0x360] sm:$0xff]  }
  0x38   : > { %13067 = vmatpush3.bf16.msra.mxu0 %v14579_v33  ;;  %v14620_v33 = vld [vmem:[%s15673_s30 + $0x2c8] sm:$0xff]  }
  0x39   : > { %13089 = vmatpush3.bf16.msra.mxu1 %v14580_v34  ;;  %13096 = vmatprep.subr.bf16.mxu0 %v14582_v37  ;;  %v14621_v34 = vld [vmem:[%s15673_s30 + $0x208] sm:$0xff]   ;;  %v14624_v37 = vld [vmem:[%s15673_s30 + $0x2d0] sm:$0xff]  }
  0x3a   : > { %13118 = vmatprep.subr.bf16.mxu1 %v14583_v40  ;;  %v14627_v40 = vld [vmem:[%s15673_s30 + $0x258] sm:$0xff]  }
  0x3b   : > { %9332 = vmatmul.mubr.bf16.vlgmr.msra.gmra.mrb[0].mxu0 %v979_v49  ;;  %v14635_v49 = vld [vmem:[%s15673_s30 + $0x268] sm:$0xff]  }
  0x3c   : > { %9372 = vmatmul.mubr.bf16.vlgmr.msra.gmra.mrb[0].mxu1 %v981_v50  ;;  %13097 = vmatpush3.bf16.msra.mxu0 %v14584_v48  ;;  %v14634_v48 = vld [vmem:[%s15673_s30 + $0x2a0] sm:$0xff]   ;;  %v14636_v50 = vld [vmem:[%s15673_s30 + $0x2e8] sm:$0xff]  }
  0x3d   : > { %13119 = vmatpush3.bf16.msra.mxu1 %v14585_v51  ;;  %13098 = vmatprep.subr.bf16.mxu0 %v14586_v54  ;;  %v14637_v51 = vld [vmem:[%s15673_s30 + $0x228] sm:$0xff]   ;;  %v14640_v54 = vld [vmem:[%s15673_s30 + $0x2f0] sm:$0xff]  }
  0x3e   : > { %13120 = vmatprep.subr.bf16.mxu1 %v14587_v55  ;;  %9411 = vmatprep.mubr.bf16.mxu0 %v984_v22  ;;  %v245_v55 = vld [vmem:[%s15668_s26 + $0x10] sm:$0xff]  ;;  %v14663_v22 = vld [vmem:[%s15673_s30 + $0x398] sm:$0xff]  }
  0x3f   : > { %9451 = vmatprep.mubr.bf16.mxu1 %v986_v25  ;;  %v14666_v25 = vld [vmem:[%s15673_s30 + $0x320] sm:$0xff]  }
  0x40   : > { %13099 = vmatpush3.bf16.msra.mxu0 %v14588_v56  ;;  %v14641_v56 = vld [vmem:[%s15673_s30 + $0x230] sm:$0xff]  }
  0x41   : > { %13121 = vmatpush3.bf16.msra.mxu1 %v14589_v57  ;;  %13100 = vmatprep.subr.bf16.mxu0 %v14590_v58  ;;  %v348_v57 = vrot.slane %v245_v55, %v15711_v43  ;;  %v341_v58 = vcombine.high %v245_v55, %v245_v55  ;;  %v14686_v55 = vld [vmem:[%s15673_s30 + $0x4c8] sm:$0xff]  }
  0x42   : > { %13122 = vmatprep.subr.bf16.mxu1 %v14591_v59  ;;  %v14642_v59 = vld [vmem:[%s15673_s30 + $0x2b0] sm:$0xff]  }
  0x44   : > { %13101 = vmatpush3.bf16.msra.mxu0 %v14592_v60  ;;  %v14643_v60 = vld [vmem:[%s15673_s30 + $0x278] sm:$0xff]  }
  0x45   : > { %13123 = vmatpush3.bf16.msra.mxu1 %v14593_v61  ;;  %13102 = vmatprep.subr.bf16.mxu0 %v14594_v62  ;;  %v356_v61 = vcombine.high %v348_v57, %v348_v57  ;;  %v355_v62 = vrot.slane %v341_v58, %v15711_v43  ;;  %v14689_v58 = vld [vmem:[%s15673_s30 + $0x450] sm:$0xff]  }
  0x46   : > { %13124 = vmatprep.subr.bf16.mxu1 %v14595_v63  ;;  %v14644_v63 = vld [vmem:[%s15673_s30 + $0x2f8] sm:$0xff]  }
  0x48   : > { %13103 = vmatpush3.bf16.msra.mxu0 %v14596_v0  ;;  %v14645_v0 = vld [vmem:[%s15673_s30 + $0x238] sm:$0xff]  }
  0x49   : > { %13125 = vmatpush3.bf16.msra.mxu1 %v14597_v1  ;;  %13104 = vmatprep.subr.bf16.mxu0 %v14598_v2  ;;  %v988_v1 = vpack.c.bf16 %v356_v61, %v356_v61  ;;  %v357_v2 = vcombine.high %v355_v62, %v355_v62  ;;  %v14692_v61 = vld [vmem:[%s15673_s30 + $0x490] sm:$0xff]  }
  0x4a   : > { %13126 = vmatprep.subr.bf16.mxu1 %v14599_v3  ;;  %v14646_v3 = vld [vmem:[%s15673_s30 + $0x2b8] sm:$0xff]  }
  0x4c   : > { %13105 = vmatpush3.bf16.msra.mxu0 %v14600_v4  ;;  %v990_v4 = vpack.c.bf16 %v357_v2, %v357_v2  ;;  %v14697_v2 = vld [vmem:[%s15673_s30 + $0x460] sm:$0xff]  }
  0x4d   : > { %13127 = vmatpush3.bf16.msra.mxu1 %v14601_v5  ;;  %13106 = vmatprep.subr.bf16.mxu0 %v14602_v6  ;;  %v14648_v5 = vld [vmem:[%s15673_s30 + $0x340] sm:$0xff]  }
  0x4e   : > { %13128 = vmatprep.subr.bf16.mxu1 %v14603_v7  ;;  %v14649_v6 = vld [vmem:[%s15673_s30 + $0x3c0] sm:$0xff]  }
  0x4f   : > { %v14650_v7 = vld [vmem:[%s15673_s30 + $0x300] sm:$0xff]  }
  0x50   : > { %13107 = vmatpush3.bf16.msra.mxu0 %v14604_v8  ;;  %v987_v8 = vpack.c.bf16 %v348_v57, %v348_v57  ;;  %v14688_v57 = vld [vmem:[%s15673_s30 + $0x488] sm:$0xff]  }
  0x51   : > { %13129 = vmatpush3.bf16.msra.mxu1 %v14605_v9  ;;  %13108 = vmatprep.subr.bf16.mxu0 %v14606_v10  ;;  %v989_v9 = vpack.c.bf16 %v355_v62, %v355_v62  ;;  %v14651_v10 = vld [vmem:[%s15673_s30 + $0x380] sm:$0xff]   ;;  %v14693_v62 = vld [vmem:[%s15673_s30 + $0x458] sm:$0xff]  }
  0x52   : > { %13130 = vmatprep.subr.bf16.mxu1 %v14607_v11  ;;  %v14652_v11 = vld [vmem:[%s15673_s30 + $0x348] sm:$0xff]  }
  0x54   : > { %13109 = vmatpush3.bf16.msra.mxu0 %v14608_v13  ;;  %v14654_v13 = vld [vmem:[%s15673_s30 + $0x308] sm:$0xff]  }
  0x55   : > { %13131 = vmatpush3.bf16.msra.mxu1 %v14609_v16  ;;  %13110 = vmatprep.subr.bf16.mxu0 %v14610_v17  ;;  %v14657_v16 = vld [vmem:[%s15673_s30 + $0x3d0] sm:$0xff]  }
  0x56   : > { %13132 = vmatprep.subr.bf16.mxu1 %v14611_v20  ;;  %v14658_v17 = vld [vmem:[%s15673_s30 + $0x310] sm:$0xff]   ;;  %v14661_v20 = vld [vmem:[%s15673_s30 + $0x3d8] sm:$0xff]  }
  0x58   : > { %13111 = vmatpush3.bf16.msra.mxu0 %v14612_v21  ;;  %v14662_v21 = vld [vmem:[%s15673_s30 + $0x318] sm:$0xff]  }
  0x59   : > { %13133 = vmatpush3.bf16.msra.mxu1 %v14613_v24  ;;  %13140 = vmatprep.subr.bf16.mxu0 %v14615_v26  ;;  %v14665_v24 = vld [vmem:[%s15673_s30 + $0x3e0] sm:$0xff]  }
  0x5a   : > { %13162 = vmatprep.subr.bf16.mxu1 %v14616_v27  ;;  %v14667_v26 = vld [vmem:[%s15673_s30 + $0x3a0] sm:$0xff]   ;;  %v14668_v27 = vld [vmem:[%s15673_s30 + $0x368] sm:$0xff]  }
  0x5b   : > { %9412 = vmatmul.mubr.bf16.vlgmr.msra.gmra.mrb[4].mxu0 %v983_v29  ;;  %v14670_v29 = vld [vmem:[%s15673_s30 + $0x328] sm:$0xff]  }
  0x5c   : > { %9452 = vmatmul.mubr.bf16.vlgmr.msra.gmra.mrb[4].mxu1 %v985_v30  ;;  %13141 = vmatpush3.bf16.msra.mxu0 %v14617_v28  ;;  %v14669_v28 = vld [vmem:[%s15673_s30 + $0x3e8] sm:$0xff]  }
  0x5d   : > { %13163 = vmatpush3.bf16.msra.mxu1 %v14618_v31  ;;  %13142 = vmatprep.subr.bf16.mxu0 %v14619_v32  ;;  %v14671_v30 = vld [vmem:[%s15673_s30 + $0x3a8] sm:$0xff]   ;;  %v14672_v31 = vld [vmem:[%s15673_s30 + $0x370] sm:$0xff]  }
  0x5e   : > { %13164 = vmatprep.subr.bf16.mxu1 %v14620_v33  ;;  %9491 = vmatprep.mubr.bf16.mxu0 %v988_v1  ;;  %v14673_v32 = vld [vmem:[%s15673_s30 + $0x3f0] sm:$0xff]   ;;  %v14696_v1 = vld [vmem:[%s15673_s30 + $0x498] sm:$0xff]  }
  0x5f   : > { %9531 = vmatprep.mubr.bf16.mxu1 %v990_v4  ;;  %v14674_v33 = vld [vmem:[%s15673_s30 + $0x330] sm:$0xff]   ;;  %v14699_v4 = vld [vmem:[%s15673_s30 + $0x420] sm:$0xff]  }
  0x60   : > { %13143 = vmatpush3.bf16.msra.mxu0 %v14621_v34  ;;  %v246_v34 = vld [vmem:[%s15668_s26 + $0x18] sm:$0xff] }
  0x61   : > { %13165 = vmatpush3.bf16.msra.mxu1 %v14622_v35  ;;  %13144 = vmatprep.subr.bf16.mxu0 %v14623_v36  ;;  %v14675_v35 = vld [vmem:[%s15673_s30 + $0x3b0] sm:$0xff]   ;;  %v365_v36 = vrot.slane %v246_v34, %v15711_v43 }
  0x62   : > { %13166 = vmatprep.subr.bf16.mxu1 %v14624_v37  ;;  %v358_v37 = vcombine.high %v246_v34, %v246_v34  ;;  %v14720_v34 = vld [vmem:[%s15673_s30 + $0x508] sm:$0xff]  }
  0x64   : > { %13145 = vmatpush3.bf16.msra.mxu0 %v14625_v38  ;;  %v14676_v38 = vld [vmem:[%s15673_s30 + $0x378] sm:$0xff]  }
  0x65   : > { %13167 = vmatpush3.bf16.msra.mxu1 %v14626_v39  ;;  %13146 = vmatprep.subr.bf16.mxu0 %v14627_v40  ;;  %v14677_v39 = vld [vmem:[%s15673_s30 + $0x3f8] sm:$0xff]   ;;  %v373_v40 = vcombine.high %v365_v36, %v365_v36 }
  0x66   : > { %13168 = vmatprep.subr.bf16.mxu1 %v14628_v41  ;;  %v372_v41 = vrot.slane %v358_v37, %v15711_v43  ;;  %v14723_v37 = vld [vmem:[%s15673_s30 + $0x5d0] sm:$0xff]  }
  0x68   : > { %13147 = vmatpush3.bf16.msra.mxu0 %v14629_v42  ;;  %v14678_v42 = vld [vmem:[%s15673_s30 + $0x338] sm:$0xff]  }
  0x69   : > { %13169 = vmatpush3.bf16.msra.mxu1 %v14630_v44  ;;  %13148 = vmatprep.subr.bf16.mxu0 %v14631_v45  ;;  %v14679_v44 = vld [vmem:[%s15673_s30 + $0x3b8] sm:$0xff]   ;;  %v992_v45 = vpack.c.bf16 %v373_v40, %v373_v40 }
  0x6a   : > { %13170 = vmatprep.subr.bf16.mxu1 %v14632_v46  ;;  %v374_v46 = vcombine.high %v372_v41, %v372_v41  ;;  %v14726_v40 = vld [vmem:[%s15673_s30 + $0x558] sm:$0xff]  }
  0x6c   : > { %13149 = vmatpush3.bf16.msra.mxu0 %v14633_v47  ;;  %v14681_v47 = vld [vmem:[%s15673_s30 + $0x440] sm:$0xff]  }
  0x6d   : > { %13171 = vmatpush3.bf16.msra.mxu1 %v14634_v48  ;;  %13150 = vmatprep.subr.bf16.mxu0 %v14635_v49  ;;  %v994_v48 = vpack.c.bf16 %v374_v46, %v374_v46  ;;  %v14682_v49 = vld [vmem:[%s15673_s30 + $0x4c0] sm:$0xff]  }
  0x6e   : > { %13172 = vmatprep.subr.bf16.mxu1 %v14636_v50  ;;  %v14683_v50 = vld [vmem:[%s15673_s30 + $0x400] sm:$0xff]  }
  0x6f   : > { %v14731_v46 = vld [vmem:[%s15673_s30 + $0x5e0] sm:$0xff]  }
  0x70   : > { %13151 = vmatpush3.bf16.msra.mxu0 %v14637_v51  ;;  %v991_v51 = vpack.c.bf16 %v365_v36, %v365_v36  ;;  %v14722_v36 = vld [vmem:[%s15673_s30 + $0x550] sm:$0xff]  }
  0x71   : > { %13173 = vmatpush3.bf16.msra.mxu1 %v14638_v52  ;;  %13152 = vmatprep.subr.bf16.mxu0 %v14639_v53  ;;  %v993_v52 = vpack.c.bf16 %v372_v41, %v372_v41  ;;  %v14684_v53 = vld [vmem:[%s15673_s30 + $0x480] sm:$0xff]   ;;  %v14727_v41 = vld [vmem:[%s15673_s30 + $0x5d8] sm:$0xff]  }
  0x72   : > { %13174 = vmatprep.subr.bf16.mxu1 %v14640_v54  ;;  %v14685_v54 = vld [vmem:[%s15673_s30 + $0x448] sm:$0xff]  }
  0x74   : > { %13153 = vmatpush3.bf16.msra.mxu0 %v14641_v56  ;;  %v14687_v56 = vld [vmem:[%s15673_s30 + $0x408] sm:$0xff]  }
  0x75   : > { %13175 = vmatpush3.bf16.msra.mxu1 %v14642_v59  ;;  %13154 = vmatprep.subr.bf16.mxu0 %v14643_v60  ;;  %v14690_v59 = vld [vmem:[%s15673_s30 + $0x4d0] sm:$0xff]  }
  0x76   : > { %13176 = vmatprep.subr.bf16.mxu1 %v14644_v63  ;;  %v14691_v60 = vld [vmem:[%s15673_s30 + $0x410] sm:$0xff]   ;;  %v14694_v63 = vld [vmem:[%s15673_s30 + $0x4d8] sm:$0xff]  }
  0x78   : > { %13155 = vmatpush3.bf16.msra.mxu0 %v14645_v0  ;;  %v14695_v0 = vld [vmem:[%s15673_s30 + $0x418] sm:$0xff]  }
  0x79   : > { %13177 = vmatpush3.bf16.msra.mxu1 %v14646_v3  ;;  %13184 = vmatprep.subr.bf16.mxu0 %v14648_v5  ;;  %v14698_v3 = vld [vmem:[%s15673_s30 + $0x4e0] sm:$0xff]  }
  0x7a   : > { %13206 = vmatprep.subr.bf16.mxu1 %v14649_v6  ;;  %v14700_v5 = vld [vmem:[%s15673_s30 + $0x4a0] sm:$0xff]   ;;  %v14701_v6 = vld [vmem:[%s15673_s30 + $0x468] sm:$0xff]  }
  0x7b   : > { %9492 = vmatmul.mubr.bf16.vlgmr.msra.gmra.mrb[8].mxu0 %v987_v8  ;;  %v14703_v8 = vld [vmem:[%s15673_s30 + $0x428] sm:$0xff]  }
  0x7c   : > { %9532 = vmatmul.mubr.bf16.vlgmr.msra.gmra.mrb[8].mxu1 %v989_v9  ;;  %13185 = vmatpush3.bf16.msra.mxu0 %v14650_v7  ;;  %v14702_v7 = vld [vmem:[%s15673_s30 + $0x4e8] sm:$0xff]  }
  0x7d   : > { %13207 = vmatpush3.bf16.msra.mxu1 %v14651_v10  ;;  %13186 = vmatprep.subr.bf16.mxu0 %v14652_v11  ;;  %v14704_v9 = vld [vmem:[%s15673_s30 + $0x4a8] sm:$0xff]   ;;  %v14705_v10 = vld [vmem:[%s15673_s30 + $0x470] sm:$0xff]  }
  0x7e   : > { %13208 = vmatprep.subr.bf16.mxu1 %v14653_v12  ;;  %9571 = vmatprep.mubr.bf16.mxu0 %v992_v45  ;;  %v14706_v11 = vld [vmem:[%s15673_s30 + $0x4f0] sm:$0xff]   ;;  %v14730_v45 = vld [vmem:[%s15673_s30 + $0x560] sm:$0xff]  }
  0x7f   : > { %9611 = vmatprep.mubr.bf16.mxu1 %v994_v48  ;;  %v14707_v12 = vld [vmem:[%s15673_s30 + $0x430] sm:$0xff]   ;;  %v14733_v48 = vld [vmem:[%s15673_s30 + $0x5a0] sm:$0xff]  }
  0x80   : > { %13187 = vmatpush3.bf16.msra.mxu0 %v14654_v13  ;;  %v247_v13 = vld [vmem:[%s15668_s26 + $0x20] sm:$0xff] }
  0x81   : > { %13209 = vmatpush3.bf16.msra.mxu1 %v14655_v14  ;;  %13188 = vmatprep.subr.bf16.mxu0 %v14656_v15  ;;  %v14708_v14 = vld [vmem:[%s15673_s30 + $0x4b0] sm:$0xff]   ;;  %v382_v15 = vrot.slane %v247_v13, %v15711_v43 }
  0x82   : > { %13210 = vmatprep.subr.bf16.mxu1 %v14657_v16  ;;  %v375_v16 = vcombine.high %v247_v13, %v247_v13  ;;  %v14753_v13 = vld [vmem:[%s15673_s30 + $0x608] sm:$0xff]  }
  0x84   : > { %13189 = vmatpush3.bf16.msra.mxu0 %v14658_v17  ;;  %v14709_v17 = vld [vmem:[%s15673_s30 + $0x478] sm:$0xff]  }
  0x85   : > { %13211 = vmatpush3.bf16.msra.mxu1 %v14659_v18  ;;  %13190 = vmatprep.subr.bf16.mxu0 %v14660_v19  ;;  %v14710_v18 = vld [vmem:[%s15673_s30 + $0x4f8] sm:$0xff]   ;;  %v390_v19 = vcombine.high %v382_v15, %v382_v15 }
  0x86   : > { %13212 = vmatprep.subr.bf16.mxu1 %v14661_v20  ;;  %v389_v20 = vrot.slane %v375_v16, %v15711_v43  ;;  %v14756_v16 = vld [vmem:[%s15673_s30 + $0x6d0] sm:$0xff]  }
  0x88   : > { %13191 = vmatpush3.bf16.msra.mxu0 %v14662_v21  ;;  %v14711_v21 = vld [vmem:[%s15673_s30 + $0x438] sm:$0xff]  }
  0x89   : > { %13213 = vmatpush3.bf16.msra.mxu1 %v14663_v22  ;;  %13192 = vmatprep.subr.bf16.mxu0 %v14664_v23  ;;  %v14712_v22 = vld [vmem:[%s15673_s30 + $0x4b8] sm:$0xff]   ;;  %v996_v23 = vpack.c.bf16 %v390_v19, %v390_v19 }
  0x8a   : > { %13214 = vmatprep.subr.bf16.mxu1 %v14665_v24  ;;  %v391_v24 = vcombine.high %v389_v20, %v389_v20  ;;  %v14759_v19 = vld [vmem:[%s15673_s30 + $0x658] sm:$0xff]  }
  0x8c   : > { %13193 = vmatpush3.bf16.msra.mxu0 %v14666_v25  ;;  %v14714_v25 = vld [vmem:[%s15673_s30 + $0x540] sm:$0xff]  }
  0x8d   : > { %13215 = vmatpush3.bf16.msra.mxu1 %v14667_v26  ;;  %13194 = vmatprep.subr.bf16.mxu0 %v14668_v27  ;;  %v998_v26 = vpack.c.bf16 %v391_v24, %v391_v24  ;;  %v14715_v27 = vld [vmem:[%s15673_s30 + $0x5c0] sm:$0xff]  }
  0x8e   : > { %13216 = vmatprep.subr.bf16.mxu1 %v14669_v28  ;;  %v14716_v28 = vld [vmem:[%s15673_s30 + $0x500] sm:$0xff]  }
  0x8f   : > { %v14764_v24 = vld [vmem:[%s15673_s30 + $0x6e0] sm:$0xff]  }
  0x90   : > { %13195 = vmatpush3.bf16.msra.mxu0 %v14670_v29  ;;  %v995_v29 = vpack.c.bf16 %v382_v15, %v382_v15  ;;  %v14755_v15 = vld [vmem:[%s15673_s30 + $0x650] sm:$0xff]  }
  0x91   : > { %13217 = vmatpush3.bf16.msra.mxu1 %v14671_v30  ;;  %13196 = vmatprep.subr.bf16.mxu0 %v14672_v31  ;;  %v997_v30 = vpack.c.bf16 %v389_v20, %v389_v20  ;;  %v14717_v31 = vld [vmem:[%s15673_s30 + $0x580] sm:$0xff]   ;;  %v14760_v20 = vld [vmem:[%s15673_s30 + $0x6d8] sm:$0xff]  }
  0x92   : > { %13218 = vmatprep.subr.bf16.mxu1 %v14673_v32  ;;  %v14718_v32 = vld [vmem:[%s15673_s30 + $0x548] sm:$0xff]  }
  0x94   : > { %13197 = vmatpush3.bf16.msra.mxu0 %v14674_v33  ;;  %v14719_v33 = vld [vmem:[%s15673_s30 + $0x5c8] sm:$0xff]  }
  0x95   : > { %13219 = vmatpush3.bf16.msra.mxu1 %v14675_v35  ;;  %13198 = vmatprep.subr.bf16.mxu0 %v14676_v38  ;;  %v14721_v35 = vld [vmem:[%s15673_s30 + $0x588] sm:$0xff]   ;;  %v14724_v38 = vld [vmem:[%s15673_s30 + $0x510] sm:$0xff]  }
  0x96   : > { %13220 = vmatprep.subr.bf16.mxu1 %v14677_v39  ;;  %v14725_v39 = vld [vmem:[%s15673_s30 + $0x590] sm:$0xff]  }
  0x98   : > { %13199 = vmatpush3.bf16.msra.mxu0 %v14678_v42  ;;  %v14728_v42 = vld [vmem:[%s15673_s30 + $0x518] sm:$0xff]  }
  0x99   : > { %13221 = vmatpush3.bf16.msra.mxu1 %v14679_v44  ;;  %13228 = vmatprep.subr.bf16.mxu0 %v14681_v47  ;;  %v14729_v44 = vld [vmem:[%s15673_s30 + $0x598] sm:$0xff]   ;;  %v14732_v47 = vld [vmem:[%s15673_s30 + $0x520] sm:$0xff]  }
  0x9a   : > { %13250 = vmatprep.subr.bf16.mxu1 %v14682_v49  ;;  %v14734_v49 = vld [vmem:[%s15673_s30 + $0x568] sm:$0xff]  }
  0x9b   : > { %9572 = vmatmul.mubr.bf16.vlgmr.msra.gmra.mrb[12].mxu0 %v991_v51  ;;  %v14736_v51 = vld [vmem:[%s15673_s30 + $0x528] sm:$0xff]  }
  0x9c   : > { %9612 = vmatmul.mubr.bf16.vlgmr.msra.gmra.mrb[12].mxu1 %v993_v52  ;;  %13229 = vmatpush3.bf16.msra.mxu0 %v14683_v50  ;;  %v14735_v50 = vld [vmem:[%s15673_s30 + $0x5e8] sm:$0xff]  }
  0x9d   : > { %13251 = vmatpush3.bf16.msra.mxu1 %v14684_v53  ;;  %13230 = vmatprep.subr.bf16.mxu0 %v14685_v54  ;;  %v14737_v52 = vld [vmem:[%s15673_s30 + $0x5a8] sm:$0xff]   ;;  %v14738_v53 = vld [vmem:[%s15673_s30 + $0x570] sm:$0xff]  }
  0x9e   : > { %13252 = vmatprep.subr.bf16.mxu1 %v14686_v55  ;;  %9651 = vmatprep.mubr.bf16.mxu0 %v996_v23  ;;  %v14739_v54 = vld [vmem:[%s15673_s30 + $0x5f0] sm:$0xff]   ;;  %v14763_v23 = vld [vmem:[%s15673_s30 + $0x660] sm:$0xff]  }
  0x9f   : > { %9691 = vmatprep.mubr.bf16.mxu1 %v998_v26  ;;  %v14740_v55 = vld [vmem:[%s15673_s30 + $0x530] sm:$0xff]   ;;  %v14766_v26 = vld [vmem:[%s15673_s30 + $0x6a0] sm:$0xff]  }
  0xa0   : > { %13231 = vmatpush3.bf16.msra.mxu0 %v14687_v56  ;;  %v248_v56 = vld [vmem:[%s15668_s26 + $0x28] sm:$0xff] }
  0xa1   : > { %13253 = vmatpush3.bf16.msra.mxu1 %v14688_v57  ;;  %13232 = vmatprep.subr.bf16.mxu0 %v14689_v58  ;;  %v14741_v57 = vld [vmem:[%s15673_s30 + $0x5b0] sm:$0xff]   ;;  %v399_v58 = vrot.slane %v248_v56, %v15711_v43 }
  0xa2   : > { %13254 = vmatprep.subr.bf16.mxu1 %v14690_v59  ;;  %v392_v59 = vcombine.high %v248_v56, %v248_v56  ;;  %v14786_v56 = vld [vmem:[%s15673_s30 + $0x708] sm:$0xff]  }
  0xa4   : > { %13233 = vmatpush3.bf16.msra.mxu0 %v14691_v60  ;;  %v14742_v60 = vld [vmem:[%s15673_s30 + $0x578] sm:$0xff]  }
  0xa5   : > { %13255 = vmatpush3.bf16.msra.mxu1 %v14692_v61  ;;  %13234 = vmatprep.subr.bf16.mxu0 %v14693_v62  ;;  %v14743_v61 = vld [vmem:[%s15673_s30 + $0x5f8] sm:$0xff]   ;;  %v407_v62 = vcombine.high %v399_v58, %v399_v58 }
  0xa6   : > { %13256 = vmatprep.subr.bf16.mxu1 %v14694_v63  ;;  %v406_v63 = vrot.slane %v392_v59, %v15711_v43  ;;  %v14789_v59 = vld [vmem:[%s15673_s30 + $0x7d0] sm:$0xff]  }
  0xa8   : > { %13235 = vmatpush3.bf16.msra.mxu0 %v14695_v0  ;;  %v14744_v0 = vld [vmem:[%s15673_s30 + $0x538] sm:$0xff]  }
  0xa9   : > { %13257 = vmatpush3.bf16.msra.mxu1 %v14696_v1  ;;  %13236 = vmatprep.subr.bf16.mxu0 %v14697_v2  ;;  %v14745_v1 = vld [vmem:[%s15673_s30 + $0x5b8] sm:$0xff]   ;;  %v1000_v2 = vpack.c.bf16 %v407_v62, %v407_v62 }
  0xaa   : > { %13258 = vmatprep.subr.bf16.mxu1 %v14698_v3  ;;  %v408_v3 = vcombine.high %v406_v63, %v406_v63  ;;  %v14792_v62 = vld [vmem:[%s15673_s30 + $0x758] sm:$0xff]  }
  0xac   : > { %13237 = vmatpush3.bf16.msra.mxu0 %v14699_v4  ;;  %v14747_v4 = vld [vmem:[%s15673_s30 + $0x640] sm:$0xff]  }
  0xad   : > { %13259 = vmatpush3.bf16.msra.mxu1 %v14700_v5  ;;  %13238 = vmatprep.subr.bf16.mxu0 %v14701_v6  ;;  %v1002_v5 = vpack.c.bf16 %v408_v3, %v408_v3  ;;  %v14748_v6 = vld [vmem:[%s15673_s30 + $0x6c0] sm:$0xff]  }
  0xae   : > { %13260 = vmatprep.subr.bf16.mxu1 %v14702_v7  ;;  %v14749_v7 = vld [vmem:[%s15673_s30 + $0x600] sm:$0xff]  }
  0xaf   : > { %v14797_v3 = vld [vmem:[%s15673_s30 + $0x7e0] sm:$0xff]  }
  0xb0   : > { %13239 = vmatpush3.bf16.msra.mxu0 %v14703_v8  ;;  %v999_v8 = vpack.c.bf16 %v399_v58, %v399_v58  ;;  %v14788_v58 = vld [vmem:[%s15673_s30 + $0x750] sm:$0xff]  }
  0xb1   : > { %13261 = vmatpush3.bf16.msra.mxu1 %v14704_v9  ;;  %13240 = vmatprep.subr.bf16.mxu0 %v14705_v10  ;;  %v1001_v9 = vpack.c.bf16 %v406_v63, %v406_v63  ;;  %v14750_v10 = vld [vmem:[%s15673_s30 + $0x680] sm:$0xff]   ;;  %v14793_v63 = vld [vmem:[%s15673_s30 + $0x7d8] sm:$0xff]  }
  0xb2   : > { %13262 = vmatprep.subr.bf16.mxu1 %v14706_v11  ;;  %v14751_v11 = vld [vmem:[%s15673_s30 + $0x648] sm:$0xff]  }
  0xb4   : > { %13241 = vmatpush3.bf16.msra.mxu0 %v14707_v12  ;;  %v14752_v12 = vld [vmem:[%s15673_s30 + $0x6c8] sm:$0xff]  }
  0xb5   : > { %13263 = vmatpush3.bf16.msra.mxu1 %v14708_v14  ;;  %13242 = vmatprep.subr.bf16.mxu0 %v14709_v17  ;;  %v14754_v14 = vld [vmem:[%s15673_s30 + $0x688] sm:$0xff]   ;;  %v14757_v17 = vld [vmem:[%s15673_s30 + $0x610] sm:$0xff]  }
  0xb6   : > { %13264 = vmatprep.subr.bf16.mxu1 %v14710_v18  ;;  %v14758_v18 = vld [vmem:[%s15673_s30 + $0x690] sm:$0xff]  }
  0xb8   : > { %13243 = vmatpush3.bf16.msra.mxu0 %v14711_v21  ;;  %v14761_v21 = vld [vmem:[%s15673_s30 + $0x618] sm:$0xff]  }
  0xb9   : > { %13265 = vmatpush3.bf16.msra.mxu1 %v14712_v22  ;;  %13272 = vmatprep.subr.bf16.mxu0 %v14714_v25  ;;  %v14762_v22 = vld [vmem:[%s15673_s30 + $0x698] sm:$0xff]   ;;  %v14765_v25 = vld [vmem:[%s15673_s30 + $0x620] sm:$0xff]  }
  0xba   : > { %13294 = vmatprep.subr.bf16.mxu1 %v14715_v27  ;;  %v14767_v27 = vld [vmem:[%s15673_s30 + $0x668] sm:$0xff]  }
  0xbb   : > { %9652 = vmatmul.mubr.bf16.vlgmr.msra.gmra.mrb[16].mxu0 %v995_v29  ;;  %v14769_v29 = vld [vmem:[%s15673_s30 + $0x628] sm:$0xff]  }
  0xbc   : > { %9692 = vmatmul.mubr.bf16.vlgmr.msra.gmra.mrb[16].mxu1 %v997_v30  ;;  %13273 = vmatpush3.bf16.msra.mxu0 %v14716_v28  ;;  %v14768_v28 = vld [vmem:[%s15673_s30 + $0x6e8] sm:$0xff]  }
  0xbd   : > { %13295 = vmatpush3.bf16.msra.mxu1 %v14717_v31  ;;  %13274 = vmatprep.subr.bf16.mxu0 %v14718_v32  ;;  %v14770_v30 = vld [vmem:[%s15673_s30 + $0x6a8] sm:$0xff]   ;;  %v14771_v31 = vld [vmem:[%s15673_s30 + $0x670] sm:$0xff]  }
  0xbe   : > { %13296 = vmatprep.subr.bf16.mxu1 %v14719_v33  ;;  %9731 = vmatprep.mubr.bf16.mxu0 %v1000_v2  ;;  %v14772_v32 = vld [vmem:[%s15673_s30 + $0x6f0] sm:$0xff]   ;;  %v14796_v2 = vld [vmem:[%s15673_s30 + $0x760] sm:$0xff]  }
  0xbf   : > { %9771 = vmatprep.mubr.bf16.mxu1 %v1002_v5  ;;  %v14773_v33 = vld [vmem:[%s15673_s30 + $0x630] sm:$0xff]   ;;  %v14799_v5 = vld [vmem:[%s15673_s30 + $0x7a0] sm:$0xff]  }
  0xc0   : > { %13275 = vmatpush3.bf16.msra.mxu0 %v14720_v34  ;;  %v14774_v34 = vld [vmem:[%s15673_s30 + $0x6b0] sm:$0xff]  }
  0xc1   : > { %13297 = vmatpush3.bf16.msra.mxu1 %v14721_v35  ;;  %13276 = vmatprep.subr.bf16.mxu0 %v14722_v36  ;;  %v249_v35 = vld [vmem:[%s15668_s26 + $0x30] sm:$0xff]  ;;  %v14775_v36 = vld [vmem:[%s15673_s30 + $0x678] sm:$0xff]  }
  0xc2   : > { %13298 = vmatprep.subr.bf16.mxu1 %v14723_v37  ;;  %v416_v37 = vrot.slane %v249_v35, %v15711_v43 }
  0xc4   : > { %13277 = vmatpush3.bf16.msra.mxu0 %v14724_v38  ;;  %v409_v38 = vcombine.high %v249_v35, %v249_v35  ;;  %v14813_v35 = vld [vmem:[%s15673_s30 + $0x840] sm:$0xff]  }
  0xc5   : > { %13299 = vmatpush3.bf16.msra.mxu1 %v14725_v39  ;;  %13278 = vmatprep.subr.bf16.mxu0 %v14726_v40  ;;  %v14776_v39 = vld [vmem:[%s15673_s30 + $0x6f8] sm:$0xff]  }
  0xc6   : > { %13300 = vmatprep.subr.bf16.mxu1 %v14727_v41  ;;  %v14777_v40 = vld [vmem:[%s15673_s30 + $0x638] sm:$0xff]   ;;  %v424_v41 = vcombine.high %v416_v37, %v416_v37 }
  0xc8   : > { %13279 = vmatpush3.bf16.msra.mxu0 %v14728_v42  ;;  %v423_v42 = vrot.slane %v409_v38, %v15711_v43  ;;  %v14815_v38 = vld [vmem:[%s15673_s30 + $0x800] sm:$0xff]  }
  0xc9   : > { %13301 = vmatpush3.bf16.msra.mxu1 %v14729_v44  ;;  %13280 = vmatprep.subr.bf16.mxu0 %v14730_v45  ;;  %v14778_v44 = vld [vmem:[%s15673_s30 + $0x6b8] sm:$0xff]   ;;  %v1004_v45 = vpack.c.bf16 %v424_v41, %v424_v41 }
  0xca   : > { %13302 = vmatprep.subr.bf16.mxu1 %v14731_v46  ;;  %v425_v46 = vcombine.high %v423_v42, %v423_v42 }
  0xcc   : > { %13281 = vmatpush3.bf16.msra.mxu0 %v14732_v47  ;;  %v14780_v47 = vld [vmem:[%s15673_s30 + $0x740] sm:$0xff]  }
  0xcd   : > { %13303 = vmatpush3.bf16.msra.mxu1 %v14733_v48  ;;  %13282 = vmatprep.subr.bf16.mxu0 %v14734_v49  ;;  %v14781_v48 = vld [vmem:[%s15673_s30 + $0x7c0] sm:$0xff]   ;;  %v1006_v49 = vpack.c.bf16 %v425_v46, %v425_v46  ;;  %v14819_v46 = vld [vmem:[%s15673_s30 + $0x808] sm:$0xff]  }
  0xce   : > { %13304 = vmatprep.subr.bf16.mxu1 %v14735_v50  ;;  %v14782_v50 = vld [vmem:[%s15673_s30 + $0x700] sm:$0xff]  }
  0xd0   : > { %13283 = vmatpush3.bf16.msra.mxu0 %v14736_v51  ;;  %v1003_v51 = vpack.c.bf16 %v416_v37, %v416_v37  ;;  %v14814_v37 = vld [vmem:[%s15673_s30 + $0x8c0] sm:$0xff]  }
  0xd1   : > { %13305 = vmatpush3.bf16.msra.mxu1 %v14737_v52  ;;  %13284 = vmatprep.subr.bf16.mxu0 %v14738_v53  ;;  %v1005_v52 = vpack.c.bf16 %v423_v42, %v423_v42  ;;  %v14783_v53 = vld [vmem:[%s15673_s30 + $0x780] sm:$0xff]  }
  0xd2   : > { %13306 = vmatprep.subr.bf16.mxu1 %v14739_v54  ;;  %v14784_v54 = vld [vmem:[%s15673_s30 + $0x748] sm:$0xff]   ;;  %v14816_v42 = vld [vmem:[%s15673_s30 + $0x880] sm:$0xff]  }
  0xd4   : > { %13285 = vmatpush3.bf16.msra.mxu0 %v14740_v55  ;;  %v14785_v55 = vld [vmem:[%s15673_s30 + $0x7c8] sm:$0xff]  }
  0xd5   : > { %13307 = vmatpush3.bf16.msra.mxu1 %v14741_v57  ;;  %13286 = vmatprep.subr.bf16.mxu0 %v14742_v60  ;;  %v14787_v57 = vld [vmem:[%s15673_s30 + $0x788] sm:$0xff]   ;;  %v14790_v60 = vld [vmem:[%s15673_s30 + $0x710] sm:$0xff]  }
  0xd6   : > { %13308 = vmatprep.subr.bf16.mxu1 %v14743_v61  ;;  %v14791_v61 = vld [vmem:[%s15673_s30 + $0x790] sm:$0xff]  }
  0xd8   : > { %13287 = vmatpush3.bf16.msra.mxu0 %v14744_v0  ;;  %v14794_v0 = vld [vmem:[%s15673_s30 + $0x718] sm:$0xff]  }
  0xd9   : > { %13309 = vmatpush3.bf16.msra.mxu1 %v14745_v1  ;;  %13316 = vmatprep.subr.bf16.mxu0 %v14747_v4  ;;  %v14795_v1 = vld [vmem:[%s15673_s30 + $0x798] sm:$0xff]   ;;  %v14798_v4 = vld [vmem:[%s15673_s30 + $0x720] sm:$0xff]  }
  0xda   : > { %13338 = vmatprep.subr.bf16.mxu1 %v14748_v6  ;;  %v14800_v6 = vld [vmem:[%s15673_s30 + $0x768] sm:$0xff]  }
  0xdb   : > { %9732 = vmatmul.mubr.bf16.vlgmr.msra.gmra.mrb[20].mxu0 %v999_v8  ;;  %v14802_v8 = vld [vmem:[%s15673_s30 + $0x728] sm:$0xff]  }
  0xdc   : > { %9772 = vmatmul.mubr.bf16.vlgmr.msra.gmra.mrb[20].mxu1 %v1001_v9  ;;  %13317 = vmatpush3.bf16.msra.mxu0 %v14749_v7  ;;  %v14801_v7 = vld [vmem:[%s15673_s30 + $0x7e8] sm:$0xff]  }
  0xdd   : > { %13339 = vmatpush3.bf16.msra.mxu1 %v14750_v10  ;;  %13318 = vmatprep.subr.bf16.mxu0 %v14751_v11  ;;  %v14803_v9 = vld [vmem:[%s15673_s30 + $0x7a8] sm:$0xff]   ;;  %v14804_v10 = vld [vmem:[%s15673_s30 + $0x770] sm:$0xff]  }
  0xde   : > { %13340 = vmatprep.subr.bf16.mxu1 %v14752_v12  ;;  %9811 = vmatprep.mubr.bf16.mxu0 %v1004_v45  ;;  %v14805_v11 = vld [vmem:[%s15673_s30 + $0x7f0] sm:$0xff]   ;;  %v14818_v45 = vld [vmem:[%s15673_s30 + $0x8c8] sm:$0xff]  }
  0xdf   : > { %9851 = vmatprep.mubr.bf16.mxu1 %v1006_v49  ;;  %v14822_v49 = vld [vmem:[%s15673_s30 + $0x8d0] sm:$0xff]  }
  0xe0   : > { %13319 = vmatpush3.bf16.msra.mxu0 %v14753_v13 }
  0xe1   : > { %13341 = vmatpush3.bf16.msra.mxu1 %v14754_v14  ;;  %13320 = vmatprep.subr.bf16.mxu0 %v14755_v15  ;;  %v14806_v14 = vld [vmem:[%s15673_s30 + $0x730] sm:$0xff]  }
  0xe2   : > { %13342 = vmatprep.subr.bf16.mxu1 %v14756_v16  ;;  %v14807_v15 = vld [vmem:[%s15673_s30 + $0x7b0] sm:$0xff]  }
  0xe4   : > { %13321 = vmatpush3.bf16.msra.mxu0 %v14757_v17 }
  0xe5   : > { %13343 = vmatpush3.bf16.msra.mxu1 %v14758_v18  ;;  %13322 = vmatprep.subr.bf16.mxu0 %v14759_v19  ;;  %v14808_v18 = vld [vmem:[%s15673_s30 + $0x778] sm:$0xff]  }
  0xe6   : > { %13344 = vmatprep.subr.bf16.mxu1 %v14760_v20  ;;  %v14809_v19 = vld [vmem:[%s15673_s30 + $0x7f8] sm:$0xff]  }
  0xe7   : > { %v250_v20 = vld [vmem:[%s15668_s26 + $0x38] sm:$0xff] }
  0xe8   : > { %13323 = vmatpush3.bf16.msra.mxu0 %v14761_v21 }
  0xe9   : > { %13345 = vmatpush3.bf16.msra.mxu1 %v14762_v22  ;;  %13324 = vmatprep.subr.bf16.mxu0 %v14763_v23 }
  0xea   : > { %13346 = vmatprep.subr.bf16.mxu1 %v14764_v24 }
  0xec   : > { %13325 = vmatpush3.bf16.msra.mxu0 %v14765_v25  ;;  %v433_v25 = vrot.slane %v250_v20, %v15711_v43 }
  0xed   : > { %13347 = vmatpush3.bf16.msra.mxu1 %v14766_v26  ;;  %13326 = vmatprep.subr.bf16.mxu0 %v14767_v27 }
  0xee   : > { %13348 = vmatprep.subr.bf16.mxu1 %v14768_v28  ;;  %v426_v28 = vcombine.high %v250_v20, %v250_v20  ;;  %v14843_v20 = vld [vmem:[%s15673_s30 + $0x838] sm:$0xff]  }
  0xf0   : > { %13327 = vmatpush3.bf16.msra.mxu0 %v14769_v29 }
  0xf1   : > { %13349 = vmatpush3.bf16.msra.mxu1 %v14770_v30  ;;  %13328 = vmatprep.subr.bf16.mxu0 %v14771_v31  ;;  %v14810_v30 = vld [vmem:[%s15673_s30 + $0x738] sm:$0xff]   ;;  %v441_v31 = vcombine.high %v433_v25, %v433_v25 }
  0xf2   : > { %13350 = vmatprep.subr.bf16.mxu1 %v14772_v32  ;;  %v14811_v32 = vld [vmem:[%s15673_s30 + $0x7b8] sm:$0xff]  }
  0xf4   : > { %13329 = vmatpush3.bf16.msra.mxu0 %v14773_v33  ;;  %v440_v33 = vrot.slane %v426_v28, %v15711_v43  ;;  %v14847_v28 = vld [vmem:[%s15673_s30 + $0x9c0] sm:$0xff]  }
  0xf5   : > { %13351 = vmatpush3.bf16.msra.mxu1 %v14774_v34  ;;  %13330 = vmatprep.subr.bf16.mxu0 %v14775_v36  ;;  %v1008_v34 = vpack.c.bf16 %v441_v31, %v441_v31 }
  0xf6   : > { %13352 = vmatprep.subr.bf16.mxu1 %v14776_v39  ;;  %v442_v36 = vcombine.high %v440_v33, %v440_v33  ;;  %v1009_v41 = vpack.c.bf16 %v440_v33, %v440_v33  ;;  %v14849_v33 = vld [vmem:[%s15673_s30 + $0x980] sm:$0xff]  }
  0xf8   : > { %13331 = vmatpush3.bf16.msra.mxu0 %v14777_v40  ;;  %v1010_v39 = vpack.c.bf16 %v442_v36, %v442_v36  ;;  %v1007_v40 = vpack.c.bf16 %v433_v25, %v433_v25  ;;  %v14846_v25 = vld [vmem:[%s15673_s30 + $0x940] sm:$0xff]   ;;  %v14852_v36 = vld [vmem:[%s15673_s30 + $0x908] sm:$0xff]  }
  0xf9   : > { %13353 = vmatpush3.bf16.msra.mxu1 %v14778_v44  ;;  %13360 = vmatprep.subr.bf16.mxu0 %v14780_v47  ;;  %v14817_v44 = vld [vmem:[%s15673_s30 + $0x848] sm:$0xff]  }
  0xfa   : > { %13382 = vmatprep.subr.bf16.mxu1 %v14781_v48  ;;  %v14820_v47 = vld [vmem:[%s15673_s30 + $0x888] sm:$0xff]   ;;  %v14821_v48 = vld [vmem:[%s15673_s30 + $0x850] sm:$0xff]  }
  0xfb   : > { %9812 = vmatmul.mubr.bf16.vlgmr.msra.gmra.mrb[24].mxu0 %v1003_v51  ;;  %v14824_v51 = vld [vmem:[%s15673_s30 + $0x890] sm:$0xff]  }
  0xfc   : > { %9852 = vmatmul.mubr.bf16.vlgmr.msra.gmra.mrb[24].mxu1 %v1005_v52  ;;  %13361 = vmatpush3.bf16.msra.mxu0 %v14782_v50  ;;  %v14823_v50 = vld [vmem:[%s15673_s30 + $0x810] sm:$0xff]   ;;  %v14825_v52 = vld [vmem:[%s15673_s30 + $0x858] sm:$0xff]  }
  0xfd   : > { %13383 = vmatpush3.bf16.msra.mxu1 %v14783_v53  ;;  %13362 = vmatprep.subr.bf16.mxu0 %v14784_v54  ;;  %v14826_v53 = vld [vmem:[%s15673_s30 + $0x8d8] sm:$0xff]  }
  0xfe   : > { %13384 = vmatprep.subr.bf16.mxu1 %v14785_v55  ;;  %9891 = vmatprep.mubr.bf16.mxu0 %v1008_v34  ;;  %v14827_v54 = vld [vmem:[%s15673_s30 + $0x818] sm:$0xff]   ;;  %v14850_v34 = vld [vmem:[%s15673_s30 + $0x948] sm:$0xff]  }
  0xff   : > { %9931 = vmatprep.mubr.bf16.mxu1 %v1010_v39  ;;  %v14828_v55 = vld [vmem:[%s15673_s30 + $0x898] sm:$0xff]   ;;  %v14855_v39 = vld [vmem:[%s15673_s30 + $0x9d0] sm:$0xff]  }
 0x100   : > { %13363 = vmatpush3.bf16.msra.mxu0 %v14786_v56  ;;  %v14829_v56 = vld [vmem:[%s15673_s30 + $0x860] sm:$0xff]  }
 0x101   : > { %13385 = vmatpush3.bf16.msra.mxu1 %v14787_v57  ;;  %13364 = vmatprep.subr.bf16.mxu0 %v14788_v58  ;;  %v14830_v57 = vld [vmem:[%s15673_s30 + $0x8e0] sm:$0xff]  }
 0x102   : > { %13386 = vmatprep.subr.bf16.mxu1 %v14789_v59  ;;  %v14831_v58 = vld [vmem:[%s15673_s30 + $0x820] sm:$0xff]  }
 0x103   : > { %v14832_v59 = vld [vmem:[%s15673_s30 + $0x8a0] sm:$0xff]  }
 0x104   : > { %13365 = vmatpush3.bf16.msra.mxu0 %v14790_v60  ;;  %v14833_v60 = vld [vmem:[%s15673_s30 + $0x868] sm:$0xff]  }
 0x105   : > { %13387 = vmatpush3.bf16.msra.mxu1 %v14791_v61  ;;  %13366 = vmatprep.subr.bf16.mxu0 %v14792_v62  ;;  %v14834_v61 = vld [vmem:[%s15673_s30 + $0x8e8] sm:$0xff]  }
 0x106   : > { %13388 = vmatprep.subr.bf16.mxu1 %v14793_v63  ;;  %v14835_v62 = vld [vmem:[%s15673_s30 + $0x828] sm:$0xff]  }
 0x107   : > { %v14836_v63 = vld [vmem:[%s15673_s30 + $0x8a8] sm:$0xff]  }
 0x108   : > { %13367 = vmatpush3.bf16.msra.mxu0 %v14794_v0  ;;  %v14837_v0 = vld [vmem:[%s15673_s30 + $0x870] sm:$0xff]  }
 0x109   : > { %13389 = vmatpush3.bf16.msra.mxu1 %v14795_v1  ;;  %13368 = vmatprep.subr.bf16.mxu0 %v14796_v2  ;;  %v14838_v1 = vld [vmem:[%s15673_s30 + $0x8f0] sm:$0xff]  }
 0x10a   : > { %13390 = vmatprep.subr.bf16.mxu1 %v14797_v3 }
 0x10c   : > { %13369 = vmatpush3.bf16.msra.mxu0 %v14798_v4  ;;  %v14839_v4 = vld [vmem:[%s15673_s30 + $0x830] sm:$0xff]  }
 0x10d   : > { %13391 = vmatpush3.bf16.msra.mxu1 %v14799_v5  ;;  %13370 = vmatprep.subr.bf16.mxu0 %v14800_v6  ;;  %v14840_v5 = vld [vmem:[%s15673_s30 + $0x8b0] sm:$0xff]  }
 0x10e   : > { %13392 = vmatprep.subr.bf16.mxu1 %v14801_v7  ;;  %v13068_v12 = vpop.f32.mrb[0].mxu0 }
 0x10f   : > { %v13090_v13 = vpop.f32.mrb[0].mxu1  ;;  %v13069_v16 = vpop.f32.mrb[1].mxu0 }
 0x110   : > { %v13091_v17 = vpop.f32.mrb[1].mxu1  ;;  %v13070_v21 = vadd.f32 %v13069_v16, %v13068_v12  ;;  %v13071_v23 = vpop.f32.mrb[2].mxu0  ;;  %13371 = vmatpush3.bf16.msra.mxu0 %v14802_v8  ;;  %v14841_v8 = vld [vmem:[%s15673_s30 + $0x878] sm:$0xff]  }
 0x111   : > { %v13092_v22 = vadd.f32 %v13091_v17, %v13090_v13  ;;  %v13093_v24 = vpop.f32.mrb[2].mxu1  ;;  %13393 = vmatpush3.bf16.msra.mxu1 %v14803_v9  ;;  %v13072_v26 = vpop.f32.mrb[3].mxu0  ;;  %13372 = vmatprep.subr.bf16.mxu0 %v14804_v10  ;;  %v14842_v13 = vld [vmem:[%s15673_s30 + $0x8f8] sm:$0xff]  }
 0x112   : > { %v13094_v27 = vpop.f32.mrb[3].mxu1  ;;  %13394 = vmatprep.subr.bf16.mxu1 %v14805_v11 }
 0x113   : > { %v15955_v29 = vadd.f32 %v13092_v22, %v13070_v21  ;;  %v14844_v21 = vld [vmem:[%s15673_s30 + $0x8b8] sm:$0xff]  }
 0x114   : > { %13373 = vmatpush3.bf16.msra.mxu0 %v14806_v14  ;;  %v251_v14 = vld [vmem:[%s15668_s26 + $0x40] sm:$0xff] }
 0x115   : > { %13395 = vmatpush3.bf16.msra.mxu1 %v14807_v15  ;;  %13374 = vmatprep.subr.bf16.mxu0 %v14808_v18  ;;  %v450_v17 = vrot.slane %v251_v14, %v15711_v43  ;;  %v443_v18 = vcombine.high %v251_v14, %v251_v14 }
 0x116   : > { %13396 = vmatprep.subr.bf16.mxu1 %v14809_v19 }
 0x117   : > { %v458_v22 = vcombine.high %v450_v17, %v450_v17  ;;  %v457_v23 = vrot.slane %v443_v18, %v15711_v43  ;;  %v1011_v31 = vpack.c.bf16 %v450_v17, %v450_v17  ;;  %v14880_v17 = vld [vmem:[%s15673_s30 + $0xac0] sm:$0xff]  }
 0x118   : > { %13375 = vmatpush3.bf16.msra.mxu0 %v14810_v30 }
 0x119   : > { %13397 = vmatpush3.bf16.msra.mxu1 %v14811_v32  ;;  %13404 = vmatprep.subr.bf16.mxu0 %v14813_v35  ;;  %v1012_v26 = vpack.c.bf16 %v458_v22, %v458_v22  ;;  %v459_v27 = vcombine.high %v457_v23, %v457_v23  ;;  %v1013_v32 = vpack.c.bf16 %v457_v23, %v457_v23  ;;  %v14851_v35 = vld [vmem:[%s15673_s30 + $0x9c8] sm:$0xff]   ;;  %v14882_v23 = vld [vmem:[%s15673_s30 + $0xa80] sm:$0xff]  }
 0x11a   : > { %13426 = vmatprep.subr.bf16.mxu1 %v14814_v37  ;;  %v14853_v37 = vld [vmem:[%s15673_s30 + $0x988] sm:$0xff]  }
 0x11b   : > { %9892 = vmatmul.mubr.bf16.vlgmr.msra.gmra.mrb[28].mxu0 %v1007_v40  ;;  %v1014_v30 = vpack.c.bf16 %v459_v27, %v459_v27  ;;  %v14856_v40 = vld [vmem:[%s15673_s30 + $0x910] sm:$0xff]   ;;  %v14885_v27 = vld [vmem:[%s15673_s30 + $0xa08] sm:$0xff]  }
 0x11c   : > { %9932 = vmatmul.mubr.bf16.vlgmr.msra.gmra.mrb[28].mxu1 %v1009_v41  ;;  %13405 = vmatpush3.bf16.msra.mxu0 %v14815_v38  ;;  %v14854_v38 = vld [vmem:[%s15673_s30 + $0x950] sm:$0xff]  }
 0x11d   : > { %13427 = vmatpush3.bf16.msra.mxu1 %v14816_v42  ;;  %13406 = vmatprep.subr.bf16.mxu0 %v14817_v44  ;;  %v14857_v41 = vld [vmem:[%s15673_s30 + $0x990] sm:$0xff]   ;;  %v14858_v42 = vld [vmem:[%s15673_s30 + $0x958] sm:$0xff]  }
 0x11e   : > { %13428 = vmatprep.subr.bf16.mxu1 %v14818_v45  ;;  %9971 = vmatprep.mubr.bf16.mxu0 %v1012_v26  ;;  %v14859_v44 = vld [vmem:[%s15673_s30 + $0x9d8] sm:$0xff]   ;;  %v14884_v26 = vld [vmem:[%s15673_s30 + $0xac8] sm:$0xff]  }
 0x11f   : > { %10011 = vmatprep.mubr.bf16.mxu1 %v1014_v30  ;;  %v14860_v45 = vld [vmem:[%s15673_s30 + $0x918] sm:$0xff]   ;;  %v14888_v30 = vld [vmem:[%s15673_s30 + $0xad0] sm:$0xff]  }
 0x120   : > { %13407 = vmatpush3.bf16.msra.mxu0 %v14819_v46  ;;  %v14861_v46 = vld [vmem:[%s15673_s30 + $0x998] sm:$0xff]  }
 0x121   : > { %13429 = vmatpush3.bf16.msra.mxu1 %v14820_v47  ;;  %13408 = vmatprep.subr.bf16.mxu0 %v14821_v48  ;;  %v14862_v47 = vld [vmem:[%s15673_s30 + $0x960] sm:$0xff]  }
 0x122   : > { %13430 = vmatprep.subr.bf16.mxu1 %v14822_v49  ;;  %v14863_v48 = vld [vmem:[%s15673_s30 + $0x9e0] sm:$0xff]  }
 0x123   : > { %v14864_v49 = vld [vmem:[%s15673_s30 + $0x920] sm:$0xff]  }
 0x124   : > { %13409 = vmatpush3.bf16.msra.mxu0 %v14823_v50  ;;  %v14865_v50 = vld [vmem:[%s15673_s30 + $0x9a0] sm:$0xff]  }
 0x125   : > { %13431 = vmatpush3.bf16.msra.mxu1 %v14824_v51  ;;  %13410 = vmatprep.subr.bf16.mxu0 %v14825_v52  ;;  %v14866_v51 = vld [vmem:[%s15673_s30 + $0x968] sm:$0xff]  }
 0x126   : > { %13432 = vmatprep.subr.bf16.mxu1 %v14826_v53  ;;  %v14867_v52 = vld [vmem:[%s15673_s30 + $0x9e8] sm:$0xff]  }
 0x127   : > { %v14868_v53 = vld [vmem:[%s15673_s30 + $0x928] sm:$0xff]  }
 0x128   : > { %13411 = vmatpush3.bf16.msra.mxu0 %v14827_v54  ;;  %v14869_v54 = vld [vmem:[%s15673_s30 + $0x9a8] sm:$0xff]  }
 0x129   : > { %13433 = vmatpush3.bf16.msra.mxu1 %v14828_v55  ;;  %13412 = vmatprep.subr.bf16.mxu0 %v14829_v56  ;;  %v14870_v55 = vld [vmem:[%s15673_s30 + $0x970] sm:$0xff]  }
 0x12a   : > { %13434 = vmatprep.subr.bf16.mxu1 %v14830_v57  ;;  %v14871_v56 = vld [vmem:[%s15673_s30 + $0x9f0] sm:$0xff]  }
 0x12c   : > { %13413 = vmatpush3.bf16.msra.mxu0 %v14831_v58 }
 0x12d   : > { %13435 = vmatpush3.bf16.msra.mxu1 %v14832_v59  ;;  %13414 = vmatprep.subr.bf16.mxu0 %v14833_v60  ;;  %v14872_v59 = vld [vmem:[%s15673_s30 + $0x930] sm:$0xff]  }
 0x12e   : > { %13436 = vmatprep.subr.bf16.mxu1 %v14834_v61  ;;  %v13112_v2 = vpop.f32.mrb[4].mxu0  ;;  %v14873_v60 = vld [vmem:[%s15673_s30 + $0x9b0] sm:$0xff]  }
 0x12f   : > { %v13134_v3 = vpop.f32.mrb[4].mxu1  ;;  %v13113_v6 = vpop.f32.mrb[5].mxu0 }
 0x130   : > { %v13135_v7 = vpop.f32.mrb[5].mxu1  ;;  %v13114_v9 = vadd.f32 %v13113_v6, %v13112_v2  ;;  %v13115_v11 = vpop.f32.mrb[6].mxu0  ;;  %13415 = vmatpush3.bf16.msra.mxu0 %v14835_v62 }
 0x131   : > { %v13136_v10 = vadd.f32 %v13135_v7, %v13134_v3  ;;  %v13137_v12 = vpop.f32.mrb[6].mxu1  ;;  %13437 = vmatpush3.bf16.msra.mxu1 %v14836_v63  ;;  %v13116_v15 = vpop.f32.mrb[7].mxu0  ;;  %13416 = vmatprep.subr.bf16.mxu0 %v14837_v0  ;;  %v14874_v3 = vld [vmem:[%s15673_s30 + $0x978] sm:$0xff]  }
 0x132   : > { %v13138_v16 = vpop.f32.mrb[7].mxu1  ;;  %13438 = vmatprep.subr.bf16.mxu1 %v14838_v1  ;;  %v9414_v19 = vadd.f32 %v13114_v9, %v15955_v29  ;;  %v14848_v29 = vld [vmem:[%s15673_s30 + $0x900] sm:$0xff]   ;;  %v14876_v9 = vld [vmem:[%s15673_s30 + $0x938] sm:$0xff]  }
 0x133   : > { %v14879_v16 = vld [vmem:[%s15673_s30 + $0xa40] sm:$0xff]  }
 0x134   : > { %v15996_v24 = vadd.f32 %v13136_v10, %v9414_v19  ;;  %13417 = vmatpush3.bf16.msra.mxu0 %v14839_v4  ;;  %v14875_v4 = vld [vmem:[%s15673_s30 + $0x9f8] sm:$0xff]  }
 0x135   : > { %13439 = vmatpush3.bf16.msra.mxu1 %v14840_v5  ;;  %13418 = vmatprep.subr.bf16.mxu0 %v14841_v8  ;;  %v252_v8 = vld [vmem:[%s15668_s26 + $0x48] sm:$0xff] }
 0x136   : > { %13440 = vmatprep.subr.bf16.mxu1 %v14842_v13  ;;  %v467_v10 = vrot.slane %v252_v8, %v15711_v43  ;;  %v460_v11 = vcombine.high %v252_v8, %v252_v8  ;;  %v14877_v13 = vld [vmem:[%s15673_s30 + $0x9b8] sm:$0xff]   ;;  %v14913_v8 = vld [vmem:[%s15673_s30 + $0xbc0] sm:$0xff]  }
 0x138   : > { %13419 = vmatpush3.bf16.msra.mxu0 %v14843_v20  ;;  %v475_v14 = vcombine.high %v467_v10, %v467_v10  ;;  %v474_v15 = vrot.slane %v460_v11, %v15711_v43  ;;  %v1015_v20 = vpack.c.bf16 %v467_v10, %v467_v10  ;;  %v14914_v10 = vld [vmem:[%s15673_s30 + $0xb00] sm:$0xff]  }
 0x139   : > { %13441 = vmatpush3.bf16.msra.mxu1 %v14844_v21  ;;  %13448 = vmatprep.subr.bf16.mxu0 %v14846_v25  ;;  %v14881_v21 = vld [vmem:[%s15673_s30 + $0xa00] sm:$0xff]   ;;  %v14883_v25 = vld [vmem:[%s15673_s30 + $0xa48] sm:$0xff]  }
 0x13a   : > { %13470 = vmatprep.subr.bf16.mxu1 %v14847_v28  ;;  %v1016_v18 = vpack.c.bf16 %v475_v14, %v475_v14  ;;  %v476_v19 = vcombine.high %v474_v15, %v474_v15  ;;  %v1017_v22 = vpack.c.bf16 %v474_v15, %v474_v15  ;;  %v14886_v28 = vld [vmem:[%s15673_s30 + $0xa88] sm:$0xff]  }
 0x13b   : > { %9972 = vmatmul.mubr.bf16.vlgmr.msra.gmra.mrb[32].mxu0 %v1011_v31  ;;  %v14889_v31 = vld [vmem:[%s15673_s30 + $0xa10] sm:$0xff]   ;;  %v14916_v15 = vld [vmem:[%s15673_s30 + $0xb48] sm:$0xff]  }
 0x13c   : > { %10012 = vmatmul.mubr.bf16.vlgmr.msra.gmra.mrb[32].mxu1 %v1013_v32  ;;  %13449 = vmatpush3.bf16.msra.mxu0 %v14848_v29  ;;  %v14887_v29 = vld [vmem:[%s15673_s30 + $0xa50] sm:$0xff]  }
 0x13d   : > { %13471 = vmatpush3.bf16.msra.mxu1 %v14849_v33  ;;  %13450 = vmatprep.subr.bf16.mxu0 %v14850_v34  ;;  %v14890_v32 = vld [vmem:[%s15673_s30 + $0xa90] sm:$0xff]   ;;  %v14891_v33 = vld [vmem:[%s15673_s30 + $0xa58] sm:$0xff]  }
 0x13e   : > { %13472 = vmatprep.subr.bf16.mxu1 %v14851_v35  ;;  %10051 = vmatprep.mubr.bf16.mxu0 %v1016_v18  ;;  %v14892_v34 = vld [vmem:[%s15673_s30 + $0xad8] sm:$0xff]   ;;  %v14918_v18 = vld [vmem:[%s15673_s30 + $0xb08] sm:$0xff]  }
 0x13f   : > { %v14893_v35 = vld [vmem:[%s15673_s30 + $0xa18] sm:$0xff]  }
 0x140   : > { %13451 = vmatpush3.bf16.msra.mxu0 %v14852_v36  ;;  %v14894_v36 = vld [vmem:[%s15673_s30 + $0xa98] sm:$0xff]  }
 0x141   : > { %13473 = vmatpush3.bf16.msra.mxu1 %v14853_v37  ;;  %13452 = vmatprep.subr.bf16.mxu0 %v14854_v38  ;;  %v14895_v37 = vld [vmem:[%s15673_s30 + $0xa60] sm:$0xff]  }
 0x142   : > { %13474 = vmatprep.subr.bf16.mxu1 %v14855_v39  ;;  %v14896_v38 = vld [vmem:[%s15673_s30 + $0xae0] sm:$0xff]  }
 0x143   : > { %v14897_v39 = vld [vmem:[%s15673_s30 + $0xa20] sm:$0xff]  }
 0x144   : > { %13453 = vmatpush3.bf16.msra.mxu0 %v14856_v40  ;;  %v14898_v40 = vld [vmem:[%s15673_s30 + $0xaa0] sm:$0xff]  }
 0x145   : > { %13475 = vmatpush3.bf16.msra.mxu1 %v14857_v41  ;;  %13454 = vmatprep.subr.bf16.mxu0 %v14858_v42  ;;  %v14899_v41 = vld [vmem:[%s15673_s30 + $0xa68] sm:$0xff]  }
 0x146   : > { %13476 = vmatprep.subr.bf16.mxu1 %v14859_v44  ;;  %v14900_v42 = vld [vmem:[%s15673_s30 + $0xae8] sm:$0xff]  }
 0x147   : > { %v14901_v44 = vld [vmem:[%s15673_s30 + $0xa28] sm:$0xff]  }
 0x148   : > { %13455 = vmatpush3.bf16.msra.mxu0 %v14860_v45  ;;  %v14902_v45 = vld [vmem:[%s15673_s30 + $0xaa8] sm:$0xff]  }
 0x149   : > { %13477 = vmatpush3.bf16.msra.mxu1 %v14861_v46  ;;  %13456 = vmatprep.subr.bf16.mxu0 %v14862_v47  ;;  %v14903_v46 = vld [vmem:[%s15673_s30 + $0xa70] sm:$0xff]  }
 0x14a   : > { %13478 = vmatprep.subr.bf16.mxu1 %v14863_v48 }
 0x14c   : > { %13457 = vmatpush3.bf16.msra.mxu0 %v14864_v49  ;;  %v14904_v49 = vld [vmem:[%s15673_s30 + $0xaf0] sm:$0xff]  }
 0x14d   : > { %13479 = vmatpush3.bf16.msra.mxu1 %v14865_v50  ;;  %13458 = vmatprep.subr.bf16.mxu0 %v14866_v51  ;;  %v14905_v50 = vld [vmem:[%s15673_s30 + $0xa30] sm:$0xff]  }
 0x14e   : > { %13480 = vmatprep.subr.bf16.mxu1 %v14867_v52  ;;  %v13156_v57 = vpop.f32.mrb[8].mxu0 }
 0x14f   : > { %v13178_v58 = vpop.f32.mrb[8].mxu1  ;;  %v13157_v61 = vpop.f32.mrb[9].mxu0 }
 0x150   : > { %v13179_v62 = vpop.f32.mrb[9].mxu1  ;;  %v13158_v63 = vadd.f32 %v13157_v61, %v13156_v57  ;;  %v13159_v1 = vpop.f32.mrb[10].mxu0  ;;  %13459 = vmatpush3.bf16.msra.mxu0 %v14868_v53  ;;  %v14906_v53 = vld [vmem:[%s15673_s30 + $0xab0] sm:$0xff]  }
 0x151   : > { %v13180_v0 = vadd.f32 %v13179_v62, %v13178_v58  ;;  %v13181_v2 = vpop.f32.mrb[10].mxu1  ;;  %13481 = vmatpush3.bf16.msra.mxu1 %v14869_v54  ;;  %v13160_v5 = vpop.f32.mrb[11].mxu0  ;;  %13460 = vmatprep.subr.bf16.mxu0 %v14870_v55  ;;  %v14907_v58 = vld [vmem:[%s15673_s30 + $0xa78] sm:$0xff]  }
 0x152   : > { %v13182_v6 = vpop.f32.mrb[11].mxu1  ;;  %13482 = vmatprep.subr.bf16.mxu1 %v14871_v56  ;;  %v9494_v7 = vadd.f32 %v13158_v63, %v15996_v24  ;;  %v1018_v24 = vpack.c.bf16 %v476_v19, %v476_v19  ;;  %v14909_v63 = vld [vmem:[%s15673_s30 + $0xa38] sm:$0xff]   ;;  %v14912_v5 = vld [vmem:[%s15673_s30 + $0xb40] sm:$0xff]   ;;  %v14919_v19 = vld [vmem:[%s15673_s30 + $0xb88] sm:$0xff]  }
 0x153   : > { %v14910_v2 = vld [vmem:[%s15673_s30 + $0xab8] sm:$0xff]  }
 0x154   : > { %v16032_v12 = vadd.f32 %v13180_v0, %v9494_v7  ;;  %13461 = vmatpush3.bf16.msra.mxu0 %v14872_v59  ;;  %10091 = vmatprep.mubr.bf16.mxu1 %v1018_v24  ;;  %v14908_v59 = vld [vmem:[%s15673_s30 + $0xaf8] sm:$0xff]   ;;  %v253_v0 = vld [vmem:[%s15668_s26 + $0x50] sm:$0xff] }
 0x155   : > { %13483 = vmatpush3.bf16.msra.mxu1 %v14873_v60  ;;  %13462 = vmatprep.subr.bf16.mxu0 %v14874_v3  ;;  %v484_v3 = vrot.slane %v253_v0, %v15711_v43  ;;  %v14924_v24 = vld [vmem:[%s15673_s30 + $0xb58] sm:$0xff]  }
 0x156   : > { %13484 = vmatprep.subr.bf16.mxu1 %v14875_v4  ;;  %v477_v4 = vcombine.high %v253_v0, %v253_v0 }
 0x157   : > { %v492_v6 = vcombine.high %v484_v3, %v484_v3 }
 0x158   : > { %13463 = vmatpush3.bf16.msra.mxu0 %v14876_v9  ;;  %v491_v7 = vrot.slane %v477_v4, %v15711_v43  ;;  %v1019_v9 = vpack.c.bf16 %v484_v3, %v484_v3  ;;  %v14947_v3 = vld [vmem:[%s15673_s30 + $0xc00] sm:$0xff]  }
 0x159   : > { %13485 = vmatpush3.bf16.msra.mxu1 %v14877_v13  ;;  %13492 = vmatprep.subr.bf16.mxu0 %v14879_v16  ;;  %v1020_v11 = vpack.c.bf16 %v492_v6, %v492_v6  ;;  %v14915_v13 = vld [vmem:[%s15673_s30 + $0xb80] sm:$0xff]  }
 0x15a   : > { %13514 = vmatprep.subr.bf16.mxu1 %v14880_v17  ;;  %v1021_v14 = vpack.c.bf16 %v491_v7, %v491_v7  ;;  %v14917_v17 = vld [vmem:[%s15673_s30 + $0xbc8] sm:$0xff]  }
 0x15b   : > { %10052 = vmatmul.mubr.bf16.vlgmr.msra.gmra.mrb[36].mxu0 %v1015_v20  ;;  %v14920_v20 = vld [vmem:[%s15673_s30 + $0xb50] sm:$0xff]  }
 0x15c   : > { %10092 = vmatmul.mubr.bf16.vlgmr.msra.gmra.mrb[36].mxu1 %v1017_v22  ;;  %13493 = vmatpush3.bf16.msra.mxu0 %v14881_v21  ;;  %v14921_v21 = vld [vmem:[%s15673_s30 + $0xbd0] sm:$0xff]  }
 0x15d   : > { %13515 = vmatpush3.bf16.msra.mxu1 %v14882_v23  ;;  %13494 = vmatprep.subr.bf16.mxu0 %v14883_v25  ;;  %v14922_v22 = vld [vmem:[%s15673_s30 + $0xb10] sm:$0xff]   ;;  %v14925_v25 = vld [vmem:[%s15673_s30 + $0xbd8] sm:$0xff]  }
 0x15e   : > { %13516 = vmatprep.subr.bf16.mxu1 %v14884_v26  ;;  %10131 = vmatprep.mubr.bf16.mxu0 %v1020_v11  ;;  %v14923_v23 = vld [vmem:[%s15673_s30 + $0xb90] sm:$0xff]   ;;  %v14926_v26 = vld [vmem:[%s15673_s30 + $0xb18] sm:$0xff]   ;;  %v14952_v11 = vld [vmem:[%s15673_s30 + $0xc88] sm:$0xff]  }
 0x160   : > { %13495 = vmatpush3.bf16.msra.mxu0 %v14885_v27  ;;  %v14927_v27 = vld [vmem:[%s15673_s30 + $0xb98] sm:$0xff]  }
 0x161   : > { %13517 = vmatpush3.bf16.msra.mxu1 %v14886_v28  ;;  %13496 = vmatprep.subr.bf16.mxu0 %v14887_v29  ;;  %v14928_v28 = vld [vmem:[%s15673_s30 + $0xb60] sm:$0xff]  }
 0x162   : > { %13518 = vmatprep.subr.bf16.mxu1 %v14888_v30  ;;  %v14929_v29 = vld [vmem:[%s15673_s30 + $0xbe0] sm:$0xff]  }
 0x163   : > { %v14930_v30 = vld [vmem:[%s15673_s30 + $0xb20] sm:$0xff]  }
 0x164   : > { %13497 = vmatpush3.bf16.msra.mxu0 %v14889_v31  ;;  %v14931_v31 = vld [vmem:[%s15673_s30 + $0xba0] sm:$0xff]  }
 0x165   : > { %13519 = vmatpush3.bf16.msra.mxu1 %v14890_v32  ;;  %13498 = vmatprep.subr.bf16.mxu0 %v14891_v33  ;;  %v14932_v32 = vld [vmem:[%s15673_s30 + $0xb68] sm:$0xff]  }
 0x166   : > { %13520 = vmatprep.subr.bf16.mxu1 %v14892_v34  ;;  %v14933_v33 = vld [vmem:[%s15673_s30 + $0xbe8] sm:$0xff]  }
 0x167   : > { %v14934_v34 = vld [vmem:[%s15673_s30 + $0xb28] sm:$0xff]  }
 0x168   : > { %13499 = vmatpush3.bf16.msra.mxu0 %v14893_v35  ;;  %v14935_v35 = vld [vmem:[%s15673_s30 + $0xba8] sm:$0xff]  }
 0x169   : > { %13521 = vmatpush3.bf16.msra.mxu1 %v14894_v36  ;;  %13500 = vmatprep.subr.bf16.mxu0 %v14895_v37  ;;  %v14936_v36 = vld [vmem:[%s15673_s30 + $0xb70] sm:$0xff]  }
 0x16a   : > { %13522 = vmatprep.subr.bf16.mxu1 %v14896_v38 }
 0x16c   : > { %13501 = vmatpush3.bf16.msra.mxu0 %v14897_v39  ;;  %v14937_v39 = vld [vmem:[%s15673_s30 + $0xbf0] sm:$0xff]  }
 0x16d   : > { %13523 = vmatpush3.bf16.msra.mxu1 %v14898_v40  ;;  %13502 = vmatprep.subr.bf16.mxu0 %v14899_v41  ;;  %v14938_v40 = vld [vmem:[%s15673_s30 + $0xb30] sm:$0xff]  }
 0x16e   : > { %v13200_v47 = vpop.f32.mrb[12].mxu0  ;;  %13524 = vmatprep.subr.bf16.mxu1 %v14900_v42 }
 0x16f   : > { %v13222_v48 = vpop.f32.mrb[12].mxu1  ;;  %v13201_v51 = vpop.f32.mrb[13].mxu0 }
 0x170   : > { %v13223_v52 = vpop.f32.mrb[13].mxu1  ;;  %v13202_v54 = vadd.f32 %v13201_v51, %v13200_v47  ;;  %v13203_v56 = vpop.f32.mrb[14].mxu0  ;;  %13503 = vmatpush3.bf16.msra.mxu0 %v14901_v44 }
 0x171   : > { %v13224_v55 = vadd.f32 %v13223_v52, %v13222_v48  ;;  %v13225_v57 = vpop.f32.mrb[14].mxu1  ;;  %13525 = vmatpush3.bf16.msra.mxu1 %v14902_v45  ;;  %v13204_v60 = vpop.f32.mrb[15].mxu0  ;;  %13504 = vmatprep.subr.bf16.mxu0 %v14903_v46  ;;  %v14939_v48 = vld [vmem:[%s15673_s30 + $0xbb0] sm:$0xff]   ;;  %v254_v56 = vld [vmem:[%s15668_s26 + $0x58] sm:$0xff] }
 0x172   : > { %v13226_v61 = vpop.f32.mrb[15].mxu1  ;;  %v9574_v62 = vadd.f32 %v13202_v54, %v16032_v12  ;;  %13526 = vmatprep.subr.bf16.mxu1 %v14904_v49  ;;  %v493_v12 = vcombine.high %v491_v7, %v491_v7  ;;  %v14940_v49 = vld [vmem:[%s15673_s30 + $0xb78] sm:$0xff]   ;;  %v501_v57 = vrot.slane %v254_v56, %v15711_v43  ;;  %v14948_v7 = vld [vmem:[%s15673_s30 + $0xc80] sm:$0xff]  }
 0x173   : > { %v14942_v54 = vld [vmem:[%s15673_s30 + $0xb38] sm:$0xff]  }
 0x174   : > { %v16069_v1 = vadd.f32 %v13224_v55, %v9574_v62  ;;  %13505 = vmatpush3.bf16.msra.mxu0 %v14905_v50  ;;  %v1022_v16 = vpack.c.bf16 %v493_v12, %v493_v12  ;;  %v14943_v60 = vld [vmem:[%s15673_s30 + $0xbb8] sm:$0xff]   ;;  %v509_v61 = vcombine.high %v501_v57, %v501_v57  ;;  %v1023_v0 = vpack.c.bf16 %v501_v57, %v501_v57  ;;  %v14954_v12 = vld [vmem:[%s15673_s30 + $0xcd0] sm:$0xff]  }
 0x175   : > { %13527 = vmatpush3.bf16.msra.mxu1 %v14906_v53  ;;  %13506 = vmatprep.subr.bf16.mxu0 %v14907_v58  ;;  %v14941_v53 = vld [vmem:[%s15673_s30 + $0xbf8] sm:$0xff]   ;;  %v494_v58 = vcombine.high %v254_v56, %v254_v56  ;;  %v14980_v56 = vld [vmem:[%s15673_s30 + $0xd00] sm:$0xff]  }
 0x176   : > { %13528 = vmatprep.subr.bf16.mxu1 %v14908_v59  ;;  %10171 = vmatprep.mubr.bf16.mxu1 %v1022_v16  ;;  %v14945_v59 = vld [vmem:[%s15673_s30 + $0xc40] sm:$0xff]   ;;  %v14958_v16 = vld [vmem:[%s15673_s30 + $0xcd8] sm:$0xff]  }
 0x177   : > { %v508_v62 = vrot.slane %v494_v58, %v15711_v43 }
 0x178   : > { %13507 = vmatpush3.bf16.msra.mxu0 %v14909_v63  ;;  %v14946_v63 = vld [vmem:[%s15673_s30 + $0xcc0] sm:$0xff]  }
 0x179   : > { %13529 = vmatpush3.bf16.msra.mxu1 %v14910_v2  ;;  %13536 = vmatprep.subr.bf16.mxu0 %v14912_v5  ;;  %v510_v2 = vcombine.high %v508_v62, %v508_v62  ;;  %v1025_v4 = vpack.c.bf16 %v508_v62, %v508_v62  ;;  %v14949_v5 = vld [vmem:[%s15673_s30 + $0xc48] sm:$0xff]  }
 0x17a   : > { %13558 = vmatprep.subr.bf16.mxu1 %v14913_v8  ;;  %v14950_v8 = vld [vmem:[%s15673_s30 + $0xcc8] sm:$0xff]  }
 0x17b   : > { %10132 = vmatmul.mubr.bf16.vlgmr.msra.gmra.mrb[40].mxu0 %v1019_v9  ;;  %v1026_v6 = vpack.c.bf16 %v510_v2, %v510_v2  ;;  %v14951_v9 = vld [vmem:[%s15673_s30 + $0xc08] sm:$0xff]   ;;  %v14986_v2 = vld [vmem:[%s15673_s30 + $0xd50] sm:$0xff]  }
 0x17c   : > { %13537 = vmatpush3.bf16.msra.mxu0 %v14914_v10  ;;  %10172 = vmatmul.mubr.bf16.vlgmr.msra.gmra.mrb[40].mxu1 %v1021_v14  ;;  %v14953_v10 = vld [vmem:[%s15673_s30 + $0xc50] sm:$0xff]   ;;  %v14957_v14 = vld [vmem:[%s15673_s30 + $0xc58] sm:$0xff]  }
 0x17d   : > { %13538 = vmatprep.subr.bf16.mxu0 %v14916_v15  ;;  %13559 = vmatpush3.bf16.msra.mxu1 %v14915_v13  ;;  %v14955_v13 = vld [vmem:[%s15673_s30 + $0xc10] sm:$0xff]  }
 0x17e   : > { %13560 = vmatprep.subr.bf16.mxu1 %v14917_v17  ;;  %10251 = vmatprep.mubr.bf16.mxu1 %v1026_v6  ;;  %v14956_v15 = vld [vmem:[%s15673_s30 + $0xc90] sm:$0xff]   ;;  %v14959_v17 = vld [vmem:[%s15673_s30 + $0xc18] sm:$0xff]  }
 0x17f   : > { %v14990_v6 = vld [vmem:[%s15673_s30 + $0xd58] sm:$0xff]  }
 0x180   : > { %13539 = vmatpush3.bf16.msra.mxu0 %v14918_v18  ;;  %v14961_v18 = vld [vmem:[%s15673_s30 + $0xc60] sm:$0xff]  }
 0x181   : > { %13540 = vmatprep.subr.bf16.mxu0 %v14920_v20  ;;  %13561 = vmatpush3.bf16.msra.mxu1 %v14919_v19  ;;  %v14960_v19 = vld [vmem:[%s15673_s30 + $0xc98] sm:$0xff]   ;;  %v14962_v20 = vld [vmem:[%s15673_s30 + $0xce0] sm:$0xff]  }
 0x182   : > { %13562 = vmatprep.subr.bf16.mxu1 %v14921_v21  ;;  %v14963_v21 = vld [vmem:[%s15673_s30 + $0xc20] sm:$0xff]  }
 0x184   : > { %13541 = vmatpush3.bf16.msra.mxu0 %v14922_v22  ;;  %v14965_v22 = vld [vmem:[%s15673_s30 + $0xc68] sm:$0xff]  }
 0x185   : > { %13542 = vmatprep.subr.bf16.mxu0 %v14924_v24  ;;  %13563 = vmatpush3.bf16.msra.mxu1 %v14923_v23  ;;  %v14964_v23 = vld [vmem:[%s15673_s30 + $0xca0] sm:$0xff]   ;;  %v14966_v24 = vld [vmem:[%s15673_s30 + $0xce8] sm:$0xff]  }
 0x186   : > { %13564 = vmatprep.subr.bf16.mxu1 %v14925_v25  ;;  %v14967_v25 = vld [vmem:[%s15673_s30 + $0xc28] sm:$0xff]  }
 0x188   : > { %13543 = vmatpush3.bf16.msra.mxu0 %v14926_v26 }
 0x189   : > { %13544 = vmatprep.subr.bf16.mxu0 %v14928_v28  ;;  %13565 = vmatpush3.bf16.msra.mxu1 %v14927_v27  ;;  %v14968_v28 = vld [vmem:[%s15673_s30 + $0xca8] sm:$0xff]  }
 0x18a   : > { %13566 = vmatprep.subr.bf16.mxu1 %v14929_v29  ;;  %v14969_v29 = vld [vmem:[%s15673_s30 + $0xc70] sm:$0xff]  }
 0x18c   : > { %13545 = vmatpush3.bf16.msra.mxu0 %v14930_v30 }
 0x18d   : > { %13546 = vmatprep.subr.bf16.mxu0 %v14932_v32  ;;  %13567 = vmatpush3.bf16.msra.mxu1 %v14931_v31 }
 0x18e   : > { %v13244_v37 = vpop.f32.mrb[16].mxu0  ;;  %13568 = vmatprep.subr.bf16.mxu1 %v14933_v33 }
 0x18f   : > { %v13266_v38 = vpop.f32.mrb[16].mxu1  ;;  %v13245_v41 = vpop.f32.mrb[17].mxu0 }
 0x190   : > { %v13267_v42 = vpop.f32.mrb[17].mxu1  ;;  %v13246_v44 = vadd.f32 %v13245_v41, %v13244_v37  ;;  %v13247_v46 = vpop.f32.mrb[18].mxu0  ;;  %13547 = vmatpush3.bf16.msra.mxu0 %v14934_v34  ;;  %v14971_v37 = vld [vmem:[%s15673_s30 + $0xc30] sm:$0xff]  }
 0x191   : > { %v13268_v45 = vadd.f32 %v13267_v42, %v13266_v38  ;;  %v13269_v47 = vpop.f32.mrb[18].mxu1  ;;  %v13248_v50 = vpop.f32.mrb[19].mxu0  ;;  %13548 = vmatprep.subr.bf16.mxu0 %v14936_v36  ;;  %13569 = vmatpush3.bf16.msra.mxu1 %v14935_v35  ;;  %v14970_v36 = vld [vmem:[%s15673_s30 + $0xcf0] sm:$0xff]   ;;  %v14973_v42 = vld [vmem:[%s15673_s30 + $0xc78] sm:$0xff]  }
 0x192   : > { %v13270_v51 = vpop.f32.mrb[19].mxu1  ;;  %v9654_v52 = vadd.f32 %v13246_v44, %v16069_v1  ;;  %13570 = vmatprep.subr.bf16.mxu1 %v14937_v39  ;;  %v1024_v1 = vpack.c.bf16 %v509_v61, %v509_v61  ;;  %v14974_v44 = vld [vmem:[%s15673_s30 + $0xcf8] sm:$0xff]   ;;  %v255_v47 = vld [vmem:[%s15668_s26 + $0x60] sm:$0xff]  ;;  %v14982_v61 = vld [vmem:[%s15673_s30 + $0xd48] sm:$0xff]  }
 0x193   : > { %v14975_v46 = vld [vmem:[%s15673_s30 + $0xc38] sm:$0xff]   ;;  %v14978_v50 = vld [vmem:[%s15673_s30 + $0xd40] sm:$0xff]  }
 0x194   : > { %v16106_v55 = vadd.f32 %v13268_v45, %v9654_v52  ;;  %13549 = vmatpush3.bf16.msra.mxu0 %v14938_v40  ;;  %10211 = vmatprep.mubr.bf16.mxu0 %v1024_v1  ;;  %v14972_v40 = vld [vmem:[%s15673_s30 + $0xcb0] sm:$0xff]   ;;  %v14976_v51 = vld [vmem:[%s15673_s30 + $0xcb8] sm:$0xff]   ;;  %v14985_v1 = vld [vmem:[%s15673_s30 + $0xd88] sm:$0xff]  }
 0x195   : > { %13550 = vmatprep.subr.bf16.mxu0 %v14940_v49  ;;  %13571 = vmatpush3.bf16.msra.mxu1 %v14939_v48  ;;  %v518_v48 = vrot.slane %v255_v47, %v15711_v43  ;;  %v511_v49 = vcombine.high %v255_v47, %v255_v47 }
 0x196   : > { %13572 = vmatprep.subr.bf16.mxu1 %v14941_v53 }
 0x197   : > { %v526_v52 = vcombine.high %v518_v48, %v518_v48  ;;  %v525_v53 = vrot.slane %v511_v49, %v15711_v43  ;;  %v15013_v49 = vld [vmem:[%s15673_s30 + $0xe00] sm:$0xff]  }
 0x198   : > { %13551 = vmatpush3.bf16.msra.mxu0 %v14942_v54  ;;  %v14979_v54 = vld [vmem:[%s15673_s30 + $0xdc0] sm:$0xff]  }
 0x199   : > { %13580 = vmatprep.subr.bf16.mxu0 %v14945_v59  ;;  %13573 = vmatpush3.bf16.msra.mxu1 %v14943_v60  ;;  %v1028_v57 = vpack.c.bf16 %v526_v52, %v526_v52  ;;  %v527_v58 = vcombine.high %v525_v53, %v525_v53  ;;  %v14981_v59 = vld [vmem:[%s15673_s30 + $0xd80] sm:$0xff]   ;;  %v1029_v60 = vpack.c.bf16 %v525_v53, %v525_v53 }
 0x19a   : > { %13602 = vmatprep.subr.bf16.mxu1 %v14946_v63  ;;  %v14983_v63 = vld [vmem:[%s15673_s30 + $0xdc8] sm:$0xff]   ;;  %v15014_v53 = vld [vmem:[%s15673_s30 + $0xe80] sm:$0xff]  }
 0x19b   : > { %10212 = vmatmul.mubr.bf16.vlgmr.msra.gmra.mrb[44].mxu0 %v1023_v0  ;;  %v1030_v62 = vpack.c.bf16 %v527_v58, %v527_v58  ;;  %v14984_v0 = vld [vmem:[%s15673_s30 + $0xd08] sm:$0xff]   ;;  %v15020_v58 = vld [vmem:[%s15673_s30 + $0xed0] sm:$0xff]  }
 0x19c   : > { %13581 = vmatpush3.bf16.msra.mxu0 %v14947_v3  ;;  %10252 = vmatmul.mubr.bf16.vlgmr.msra.gmra.mrb[44].mxu1 %v1025_v4  ;;  %v14987_v3 = vld [vmem:[%s15673_s30 + $0xdd0] sm:$0xff]  }
 0x19d   : > { %13582 = vmatprep.subr.bf16.mxu0 %v14949_v5  ;;  %13603 = vmatpush3.bf16.msra.mxu1 %v14948_v7  ;;  %v14988_v4 = vld [vmem:[%s15673_s30 + $0xd10] sm:$0xff]   ;;  %v14991_v7 = vld [vmem:[%s15673_s30 + $0xdd8] sm:$0xff]  }
 0x19e   : > { %13604 = vmatprep.subr.bf16.mxu1 %v14950_v8  ;;  %10291 = vmatprep.mubr.bf16.mxu0 %v1028_v57  ;;  %v14989_v5 = vld [vmem:[%s15673_s30 + $0xd90] sm:$0xff]   ;;  %v14992_v8 = vld [vmem:[%s15673_s30 + $0xd18] sm:$0xff]   ;;  %v15018_v57 = vld [vmem:[%s15673_s30 + $0xe88] sm:$0xff]  }
 0x19f   : > { %10331 = vmatprep.mubr.bf16.mxu1 %v1030_v62  ;;  %v15024_v62 = vld [vmem:[%s15673_s30 + $0xed8] sm:$0xff]  }
 0x1a0   : > { %13583 = vmatpush3.bf16.msra.mxu0 %v14951_v9  ;;  %v14993_v9 = vld [vmem:[%s15673_s30 + $0xd98] sm:$0xff]  }
 0x1a1   : > { %13584 = vmatprep.subr.bf16.mxu0 %v14953_v10  ;;  %13605 = vmatpush3.bf16.msra.mxu1 %v14952_v11  ;;  %v14994_v10 = vld [vmem:[%s15673_s30 + $0xd60] sm:$0xff]  }
 0x1a2   : > { %13606 = vmatprep.subr.bf16.mxu1 %v14954_v12  ;;  %v14995_v11 = vld [vmem:[%s15673_s30 + $0xde0] sm:$0xff]  }
 0x1a3   : > { %v14996_v12 = vld [vmem:[%s15673_s30 + $0xd20] sm:$0xff]  }
 0x1a4   : > { %13585 = vmatpush3.bf16.msra.mxu0 %v14955_v13  ;;  %v14997_v13 = vld [vmem:[%s15673_s30 + $0xda0] sm:$0xff]  }
 0x1a5   : > { %13586 = vmatprep.subr.bf16.mxu0 %v14957_v14  ;;  %13607 = vmatpush3.bf16.msra.mxu1 %v14956_v15  ;;  %v14998_v14 = vld [vmem:[%s15673_s30 + $0xd68] sm:$0xff]  }
 0x1a6   : > { %13608 = vmatprep.subr.bf16.mxu1 %v14958_v16  ;;  %v14999_v15 = vld [vmem:[%s15673_s30 + $0xde8] sm:$0xff]  }
 0x1a7   : > { %v15000_v16 = vld [vmem:[%s15673_s30 + $0xd28] sm:$0xff]  }
 0x1a8   : > { %13587 = vmatpush3.bf16.msra.mxu0 %v14959_v17 }
 0x1a9   : > { %13588 = vmatprep.subr.bf16.mxu0 %v14961_v18  ;;  %13609 = vmatpush3.bf16.msra.mxu1 %v14960_v19  ;;  %v15001_v19 = vld [vmem:[%s15673_s30 + $0xda8] sm:$0xff]  }
 0x1aa   : > { %13610 = vmatprep.subr.bf16.mxu1 %v14962_v20  ;;  %v15002_v20 = vld [vmem:[%s15673_s30 + $0xd70] sm:$0xff]  }
 0x1ac   : > { %13589 = vmatpush3.bf16.msra.mxu0 %v14963_v21 }
 0x1ad   : > { %13590 = vmatprep.subr.bf16.mxu0 %v14965_v22  ;;  %13611 = vmatpush3.bf16.msra.mxu1 %v14964_v23 }
 0x1ae   : > { %v13288_v26 = vpop.f32.mrb[20].mxu0  ;;  %13612 = vmatprep.subr.bf16.mxu1 %v14966_v24 }
 0x1af   : > { %v13310_v27 = vpop.f32.mrb[20].mxu1  ;;  %v13289_v30 = vpop.f32.mrb[21].mxu0 }
 0x1b0   : > { %v13311_v31 = vpop.f32.mrb[21].mxu1  ;;  %v13290_v32 = vadd.f32 %v13289_v30, %v13288_v26  ;;  %v13291_v34 = vpop.f32.mrb[22].mxu0  ;;  %13591 = vmatpush3.bf16.msra.mxu0 %v14967_v25 }
 0x1b1   : > { %v13312_v33 = vadd.f32 %v13311_v31, %v13310_v27  ;;  %v13313_v35 = vpop.f32.mrb[22].mxu1  ;;  %v13292_v38 = vpop.f32.mrb[23].mxu0  ;;  %13592 = vmatprep.subr.bf16.mxu0 %v14969_v29  ;;  %13613 = vmatpush3.bf16.msra.mxu1 %v14968_v28  ;;  %v15003_v27 = vld [vmem:[%s15673_s30 + $0xdf0] sm:$0xff]  }
 0x1b2   : > { %v13314_v39 = vpop.f32.mrb[23].mxu1  ;;  %v9734_v41 = vadd.f32 %v13290_v32, %v16106_v55  ;;  %13614 = vmatprep.subr.bf16.mxu1 %v14970_v36  ;;  %v1027_v55 = vpack.c.bf16 %v518_v48, %v518_v48  ;;  %v15004_v28 = vld [vmem:[%s15673_s30 + $0xd30] sm:$0xff]   ;;  %v15007_v35 = vld [vmem:[%s15673_s30 + $0xdf8] sm:$0xff]  }
 0x1b3   : > { %v15005_v32 = vld [vmem:[%s15673_s30 + $0xdb0] sm:$0xff]   ;;  %v15008_v36 = vld [vmem:[%s15673_s30 + $0xd38] sm:$0xff]  }
 0x1b4   : > { %v16143_v45 = vadd.f32 %v13312_v33, %v9734_v41  ;;  %13593 = vmatpush3.bf16.msra.mxu0 %v14971_v37  ;;  %v15006_v33 = vld [vmem:[%s15673_s30 + $0xd78] sm:$0xff]   ;;  %v256_v37 = vld [vmem:[%s15668_s26 + $0x68] sm:$0xff] }
 0x1b5   : > { %13594 = vmatprep.subr.bf16.mxu0 %v14973_v42  ;;  %13615 = vmatpush3.bf16.msra.mxu1 %v14972_v40  ;;  %v535_v38 = vrot.slane %v256_v37, %v15711_v43  ;;  %v528_v39 = vcombine.high %v256_v37, %v256_v37  ;;  %v15011_v40 = vld [vmem:[%s15673_s30 + $0xe40] sm:$0xff]   ;;  %v15009_v41 = vld [vmem:[%s15673_s30 + $0xdb8] sm:$0xff]  }
 0x1b6   : > { %13616 = vmatprep.subr.bf16.mxu1 %v14974_v44  ;;  %v15046_v37 = vld [vmem:[%s15673_s30 + $0xf00] sm:$0xff]  }
 0x1b7   : > { %v543_v42 = vcombine.high %v535_v38, %v535_v38  ;;  %v542_v44 = vrot.slane %v528_v39, %v15711_v43 }
 0x1b8   : > { %13595 = vmatpush3.bf16.msra.mxu0 %v14975_v46  ;;  %v1031_v46 = vpack.c.bf16 %v535_v38, %v535_v38 }
 0x1b9   : > { %13624 = vmatprep.subr.bf16.mxu0 %v14978_v50  ;;  %13617 = vmatpush3.bf16.msra.mxu1 %v14976_v51  ;;  %v1032_v47 = vpack.c.bf16 %v543_v42, %v543_v42  ;;  %v544_v48 = vcombine.high %v542_v44, %v542_v44  ;;  %v1033_v50 = vpack.c.bf16 %v542_v44, %v542_v44  ;;  %v15015_v51 = vld [vmem:[%s15673_s30 + $0xe48] sm:$0xff]  }
 0x1ba   : > { %13646 = vmatprep.subr.bf16.mxu1 %v14979_v54  ;;  %v15016_v54 = vld [vmem:[%s15673_s30 + $0xec8] sm:$0xff]  }
 0x1bb   : > { %10292 = vmatmul.mubr.bf16.vlgmr.msra.gmra.mrb[48].mxu0 %v1027_v55  ;;  %v1034_v52 = vpack.c.bf16 %v544_v48, %v544_v48  ;;  %v15017_v55 = vld [vmem:[%s15673_s30 + $0xe08] sm:$0xff]   ;;  %v15052_v48 = vld [vmem:[%s15673_s30 + $0xf50] sm:$0xff]  }
 0x1bc   : > { %13625 = vmatpush3.bf16.msra.mxu0 %v14980_v56  ;;  %10332 = vmatmul.mubr.bf16.vlgmr.msra.gmra.mrb[48].mxu1 %v1029_v60  ;;  %v15019_v56 = vld [vmem:[%s15673_s30 + $0xe50] sm:$0xff]   ;;  %v15023_v60 = vld [vmem:[%s15673_s30 + $0xe58] sm:$0xff]   ;;  %v15048_v42 = vld [vmem:[%s15673_s30 + $0xf48] sm:$0xff]  }
 0x1bd   : > { %13626 = vmatprep.subr.bf16.mxu0 %v14982_v61  ;;  %13647 = vmatpush3.bf16.msra.mxu1 %v14981_v59  ;;  %v15021_v59 = vld [vmem:[%s15673_s30 + $0xe10] sm:$0xff]  }
 0x1be   : > { %13648 = vmatprep.subr.bf16.mxu1 %v14983_v63  ;;  %10371 = vmatprep.mubr.bf16.mxu0 %v1032_v47  ;;  %v15022_v61 = vld [vmem:[%s15673_s30 + $0xe90] sm:$0xff]   ;;  %v15025_v63 = vld [vmem:[%s15673_s30 + $0xe18] sm:$0xff]   ;;  %v15051_v47 = vld [vmem:[%s15673_s30 + $0xf88] sm:$0xff]  }
 0x1bf   : > { %10411 = vmatprep.mubr.bf16.mxu1 %v1034_v52  ;;  %v15056_v52 = vld [vmem:[%s15673_s30 + $0xf58] sm:$0xff]  }
 0x1c0   : > { %13627 = vmatpush3.bf16.msra.mxu0 %v14984_v0  ;;  %v15027_v0 = vld [vmem:[%s15673_s30 + $0xe60] sm:$0xff]  }
 0x1c1   : > { %13628 = vmatprep.subr.bf16.mxu0 %v14986_v2  ;;  %13649 = vmatpush3.bf16.msra.mxu1 %v14985_v1  ;;  %v15026_v1 = vld [vmem:[%s15673_s30 + $0xe98] sm:$0xff]   ;;  %v15028_v2 = vld [vmem:[%s15673_s30 + $0xee0] sm:$0xff]  }
 0x1c2   : > { %13650 = vmatprep.subr.bf16.mxu1 %v14987_v3  ;;  %v15029_v3 = vld [vmem:[%s15673_s30 + $0xe20] sm:$0xff]  }
 0x1c4   : > { %13629 = vmatpush3.bf16.msra.mxu0 %v14988_v4  ;;  %v15031_v4 = vld [vmem:[%s15673_s30 + $0xe68] sm:$0xff]  }
 0x1c5   : > { %13630 = vmatprep.subr.bf16.mxu0 %v14990_v6  ;;  %13651 = vmatpush3.bf16.msra.mxu1 %v14989_v5  ;;  %v15030_v5 = vld [vmem:[%s15673_s30 + $0xea0] sm:$0xff]  }
 0x1c6   : > { %13652 = vmatprep.subr.bf16.mxu1 %v14991_v7 }
 0x1c8   : > { %13631 = vmatpush3.bf16.msra.mxu0 %v14992_v8  ;;  %v15032_v8 = vld [vmem:[%s15673_s30 + $0xee8] sm:$0xff]  }
 0x1c9   : > { %13632 = vmatprep.subr.bf16.mxu0 %v14994_v10  ;;  %13653 = vmatpush3.bf16.msra.mxu1 %v14993_v9  ;;  %v15033_v9 = vld [vmem:[%s15673_s30 + $0xe28] sm:$0xff]  }
 0x1ca   : > { %13654 = vmatprep.subr.bf16.mxu1 %v14995_v11 }
 0x1cc   : > { %13633 = vmatpush3.bf16.msra.mxu0 %v14996_v12  ;;  %v15034_v12 = vld [vmem:[%s15673_s30 + $0xea8] sm:$0xff]  }
 0x1cd   : > { %13634 = vmatprep.subr.bf16.mxu0 %v14998_v14  ;;  %13655 = vmatpush3.bf16.msra.mxu1 %v14997_v13 }
 0x1ce   : > { %v13332_v17 = vpop.f32.mrb[24].mxu0  ;;  %13656 = vmatprep.subr.bf16.mxu1 %v14999_v15 }
 0x1cf   : > { %v13354_v18 = vpop.f32.mrb[24].mxu1  ;;  %v13333_v21 = vpop.f32.mrb[25].mxu0 }
 0x1d0   : > { %v13355_v22 = vpop.f32.mrb[25].mxu1  ;;  %v13334_v23 = vadd.f32 %v13333_v21, %v13332_v17  ;;  %v13335_v25 = vpop.f32.mrb[26].mxu0  ;;  %13635 = vmatpush3.bf16.msra.mxu0 %v15000_v16  ;;  %v15035_v17 = vld [vmem:[%s15673_s30 + $0xe70] sm:$0xff]  }
 0x1d1   : > { %v13356_v24 = vadd.f32 %v13355_v22, %v13354_v18  ;;  %v13357_v26 = vpop.f32.mrb[26].mxu1  ;;  %v13336_v29 = vpop.f32.mrb[27].mxu0  ;;  %13636 = vmatprep.subr.bf16.mxu0 %v15002_v20  ;;  %13657 = vmatpush3.bf16.msra.mxu1 %v15001_v19  ;;  %v15036_v18 = vld [vmem:[%s15673_s30 + $0xef0] sm:$0xff]   ;;  %v15039_v25 = vld [vmem:[%s15673_s30 + $0xe78] sm:$0xff]  }
 0x1d2   : > { %v13358_v30 = vpop.f32.mrb[27].mxu1  ;;  %v9814_v31 = vadd.f32 %v13334_v23, %v16143_v45  ;;  %13658 = vmatprep.subr.bf16.mxu1 %v15003_v27  ;;  %v15012_v45 = vld [vmem:[%s15673_s30 + $0xec0] sm:$0xff]   ;;  %v15037_v22 = vld [vmem:[%s15673_s30 + $0xe30] sm:$0xff]   ;;  %v15040_v26 = vld [vmem:[%s15673_s30 + $0xef8] sm:$0xff]  }
 0x1d3   : > { %v15038_v23 = vld [vmem:[%s15673_s30 + $0xeb0] sm:$0xff]   ;;  %v15041_v27 = vld [vmem:[%s15673_s30 + $0xe38] sm:$0xff]  }
 0x1d4   : > { %v16180_v34 = vadd.f32 %v13356_v24, %v9814_v31  ;;  %13637 = vmatpush3.bf16.msra.mxu0 %v15004_v28  ;;  %v257_v28 = vld [vmem:[%s15668_s26 + $0x70] sm:$0xff]  ;;  %v15044_v31 = vld [vmem:[%s15673_s30 + $0xf40] sm:$0xff]  }
 0x1d5   : > { %13638 = vmatprep.subr.bf16.mxu0 %v15006_v33  ;;  %13659 = vmatpush3.bf16.msra.mxu1 %v15005_v32  ;;  %v552_v29 = vrot.slane %v257_v28, %v15711_v43  ;;  %v545_v30 = vcombine.high %v257_v28, %v257_v28  ;;  %v15042_v32 = vld [vmem:[%s15673_s30 + $0xeb8] sm:$0xff]   ;;  %v15079_v28 = vld [vmem:[%s15673_s30 + $0x1000] sm:$0xff]  }
 0x1d6   : > { %13660 = vmatprep.subr.bf16.mxu1 %v15007_v35  ;;  %v15045_v35 = vld [vmem:[%s15673_s30 + $0xfc0] sm:$0xff]  }
 0x1d7   : > { %v560_v33 = vcombine.high %v552_v29, %v552_v29 }
 0x1d8   : > { %13639 = vmatpush3.bf16.msra.mxu0 %v15008_v36  ;;  %v1035_v36 = vpack.c.bf16 %v552_v29, %v552_v29 }
 0x1d9   : > { %13668 = vmatprep.subr.bf16.mxu0 %v15011_v40  ;;  %13661 = vmatpush3.bf16.msra.mxu1 %v15009_v41  ;;  %v1036_v38 = vpack.c.bf16 %v560_v33, %v560_v33  ;;  %v15047_v40 = vld [vmem:[%s15673_s30 + $0xf80] sm:$0xff]   ;;  %v15081_v33 = vld [vmem:[%s15673_s30 + $0x1048] sm:$0xff]  }
 0x1da   : > { %13690 = vmatprep.subr.bf16.mxu1 %v15012_v45  ;;  %v15049_v45 = vld [vmem:[%s15673_s30 + $0xfc8] sm:$0xff]  }
 0x1db   : > { %10372 = vmatmul.mubr.bf16.vlgmr.msra.gmra.mrb[52].mxu0 %v1031_v46  ;;  %v15050_v46 = vld [vmem:[%s15673_s30 + $0xf08] sm:$0xff]  }
 0x1dc   : > { %13669 = vmatpush3.bf16.msra.mxu0 %v15013_v49  ;;  %10412 = vmatmul.mubr.bf16.vlgmr.msra.gmra.mrb[52].mxu1 %v1033_v50  ;;  %v15053_v49 = vld [vmem:[%s15673_s30 + $0xfd0] sm:$0xff]  }
 0x1dd   : > { %13670 = vmatprep.subr.bf16.mxu0 %v15015_v51  ;;  %13691 = vmatpush3.bf16.msra.mxu1 %v15014_v53  ;;  %v15054_v50 = vld [vmem:[%s15673_s30 + $0xf10] sm:$0xff]   ;;  %v15057_v53 = vld [vmem:[%s15673_s30 + $0xfd8] sm:$0xff]  }
 0x1de   : > { %13692 = vmatprep.subr.bf16.mxu1 %v15016_v54  ;;  %10451 = vmatprep.mubr.bf16.mxu0 %v1036_v38  ;;  %v15055_v51 = vld [vmem:[%s15673_s30 + $0xf90] sm:$0xff]   ;;  %v15058_v54 = vld [vmem:[%s15673_s30 + $0xf18] sm:$0xff]  }
 0x1df   : > { %v15085_v38 = vld [vmem:[%s15673_s30 + $0x1050] sm:$0xff]  }
 0x1e0   : > { %13671 = vmatpush3.bf16.msra.mxu0 %v15017_v55  ;;  %v15059_v55 = vld [vmem:[%s15673_s30 + $0xf98] sm:$0xff]  }
 0x1e1   : > { %13672 = vmatprep.subr.bf16.mxu0 %v15019_v56  ;;  %13693 = vmatpush3.bf16.msra.mxu1 %v15018_v57  ;;  %v15060_v56 = vld [vmem:[%s15673_s30 + $0xf60] sm:$0xff]  }
 0x1e2   : > { %13694 = vmatprep.subr.bf16.mxu1 %v15020_v58  ;;  %v15061_v57 = vld [vmem:[%s15673_s30 + $0xfe0] sm:$0xff]  }
 0x1e3   : > { %v15062_v58 = vld [vmem:[%s15673_s30 + $0xf20] sm:$0xff]  }
 0x1e4   : > { %13673 = vmatpush3.bf16.msra.mxu0 %v15021_v59  ;;  %v15063_v59 = vld [vmem:[%s15673_s30 + $0xfa0] sm:$0xff]  }
 0x1e5   : > { %13674 = vmatprep.subr.bf16.mxu0 %v15023_v60  ;;  %13695 = vmatpush3.bf16.msra.mxu1 %v15022_v61  ;;  %v15064_v60 = vld [vmem:[%s15673_s30 + $0xf68] sm:$0xff]  }
 0x1e6   : > { %13696 = vmatprep.subr.bf16.mxu1 %v15024_v62 }
 0x1e8   : > { %13675 = vmatpush3.bf16.msra.mxu0 %v15025_v63  ;;  %v15065_v63 = vld [vmem:[%s15673_s30 + $0xfe8] sm:$0xff]  }
 0x1e9   : > { %13676 = vmatprep.subr.bf16.mxu0 %v15027_v0  ;;  %13697 = vmatpush3.bf16.msra.mxu1 %v15026_v1  ;;  %v15066_v0 = vld [vmem:[%s15673_s30 + $0xf28] sm:$0xff]  }
 0x1ea   : > { %13698 = vmatprep.subr.bf16.mxu1 %v15028_v2 }
 0x1ec   : > { %13677 = vmatpush3.bf16.msra.mxu0 %v15029_v3 }
 0x1ed   : > { %13678 = vmatprep.subr.bf16.mxu0 %v15031_v4  ;;  %13699 = vmatpush3.bf16.msra.mxu1 %v15030_v5 }
 0x1ee   : > { %v13376_v6 = vpop.f32.mrb[28].mxu0  ;;  %13700 = vmatprep.subr.bf16.mxu1 %v15032_v8  ;;  %v15068_v8 = vld [vmem:[%s15673_s30 + $0xf70] sm:$0xff]  }
 0x1ef   : > { %v13398_v7 = vpop.f32.mrb[28].mxu1  ;;  %v13377_v10 = vpop.f32.mrb[29].mxu0 }
 0x1f0   : > { %v13399_v11 = vpop.f32.mrb[29].mxu1  ;;  %v13378_v13 = vadd.f32 %v13377_v10, %v13376_v6  ;;  %v13379_v15 = vpop.f32.mrb[30].mxu0  ;;  %13679 = vmatpush3.bf16.msra.mxu0 %v15033_v9 }
 0x1f1   : > { %v13400_v14 = vadd.f32 %v13399_v11, %v13398_v7  ;;  %v13401_v16 = vpop.f32.mrb[30].mxu1  ;;  %v13380_v19 = vpop.f32.mrb[31].mxu0  ;;  %13680 = vmatprep.subr.bf16.mxu0 %v15035_v17  ;;  %13701 = vmatpush3.bf16.msra.mxu1 %v15034_v12  ;;  %v15067_v7 = vld [vmem:[%s15673_s30 + $0xfa8] sm:$0xff]   ;;  %v15069_v12 = vld [vmem:[%s15673_s30 + $0xff0] sm:$0xff]   ;;  %v15073_v17 = vld [vmem:[%s15673_s30 + $0xff8] sm:$0xff]  }
 0x1f2   : > { %v13402_v20 = vpop.f32.mrb[31].mxu1  ;;  %v9894_v21 = vadd.f32 %v13378_v13, %v16180_v34  ;;  %13702 = vmatprep.subr.bf16.mxu1 %v15036_v18  ;;  %v559_v34 = vrot.slane %v545_v30, %v15711_v43  ;;  %v15070_v13 = vld [vmem:[%s15673_s30 + $0xf30] sm:$0xff]   ;;  %v15072_v16 = vld [vmem:[%s15673_s30 + $0xf78] sm:$0xff]  }
 0x1f3   : > { %v15071_v15 = vld [vmem:[%s15673_s30 + $0xfb0] sm:$0xff]   ;;  %v15074_v18 = vld [vmem:[%s15673_s30 + $0xf38] sm:$0xff]  }
 0x1f4   : > { %v16217_v24 = vadd.f32 %v13400_v14, %v9894_v21  ;;  %13681 = vmatpush3.bf16.msra.mxu0 %v15037_v22  ;;  %v561_v39 = vcombine.high %v559_v34, %v559_v34  ;;  %v1037_v41 = vpack.c.bf16 %v559_v34, %v559_v34  ;;  %v258_v19 = vld [vmem:[%s15668_s26 + $0x78] sm:$0xff]  ;;  %v15077_v22 = vld [vmem:[%s15673_s30 + $0x1040] sm:$0xff]  }
 0x1f5   : > { %13682 = vmatprep.subr.bf16.mxu0 %v15039_v25  ;;  %13703 = vmatpush3.bf16.msra.mxu1 %v15038_v23  ;;  %v569_v20 = vrot.slane %v258_v19, %v15711_v43  ;;  %v562_v21 = vcombine.high %v258_v19, %v258_v19  ;;  %v15075_v23 = vld [vmem:[%s15673_s30 + $0xfb8] sm:$0xff]   ;;  %v15112_v19 = vld [vmem:[%s15673_s30 + $0x1100] sm:$0xff]  }
 0x1f6   : > { %13704 = vmatprep.subr.bf16.mxu1 %v15040_v26  ;;  %v1038_v44 = vpack.c.bf16 %v561_v39, %v561_v39  ;;  %v15078_v26 = vld [vmem:[%s15673_s30 + $0x10c0] sm:$0xff]   ;;  %v15086_v39 = vld [vmem:[%s15673_s30 + $0x10d0] sm:$0xff]  }
 0x1f7   : > { %v576_v25 = vrot.slane %v562_v21, %v15711_v43 }
 0x1f8   : > { %13683 = vmatpush3.bf16.msra.mxu0 %v15041_v27  ;;  %10491 = vmatprep.mubr.bf16.mxu1 %v1038_v44  ;;  %v1039_v27 = vpack.c.bf16 %v569_v20, %v569_v20  ;;  %v15090_v44 = vld [vmem:[%s15673_s30 + $0x10d8] sm:$0xff]  }
 0x1f9   : > { %13712 = vmatprep.subr.bf16.mxu0 %v15044_v31  ;;  %13705 = vmatpush3.bf16.msra.mxu1 %v15042_v32  ;;  %v578_v30 = vcombine.high %v576_v25, %v576_v25  ;;  %v15080_v31 = vld [vmem:[%s15673_s30 + $0x1080] sm:$0xff]   ;;  %v1041_v32 = vpack.c.bf16 %v576_v25, %v576_v25 }
 0x1fa   : > { %13734 = vmatprep.subr.bf16.mxu1 %v15045_v35  ;;  %v15082_v35 = vld [vmem:[%s15673_s30 + $0x10c8] sm:$0xff]  }
 0x1fb   : > { %10452 = vmatmul.mubr.bf16.vlgmr.msra.gmra.mrb[56].mxu0 %v1035_v36  ;;  %v1042_v34 = vpack.c.bf16 %v578_v30, %v578_v30  ;;  %v15083_v36 = vld [vmem:[%s15673_s30 + $0x1008] sm:$0xff]   ;;  %v15119_v30 = vld [vmem:[%s15673_s30 + $0x11d0] sm:$0xff]  }
 0x1fc   : > { %13713 = vmatpush3.bf16.msra.mxu0 %v15046_v37  ;;  %10492 = vmatmul.mubr.bf16.vlgmr.msra.gmra.mrb[56].mxu1 %v1037_v41  ;;  %v15084_v37 = vld [vmem:[%s15673_s30 + $0x1088] sm:$0xff]   ;;  %v15088_v41 = vld [vmem:[%s15673_s30 + $0x1090] sm:$0xff]  }
 0x1fd   : > { %13714 = vmatprep.subr.bf16.mxu0 %v15048_v42  ;;  %13735 = vmatpush3.bf16.msra.mxu1 %v15047_v40  ;;  %v15087_v40 = vld [vmem:[%s15673_s30 + $0x1010] sm:$0xff]   ;;  %v15089_v42 = vld [vmem:[%s15673_s30 + $0x1058] sm:$0xff]  }
 0x1fe   : > { %13736 = vmatprep.subr.bf16.mxu1 %v15049_v45  ;;  %10571 = vmatprep.mubr.bf16.mxu1 %v1042_v34  ;;  %v15091_v45 = vld [vmem:[%s15673_s30 + $0x1018] sm:$0xff]  }
 0x1ff   : > { %v15123_v34 = vld [vmem:[%s15673_s30 + $0x11d8] sm:$0xff]  }
 0x200   : > { %13715 = vmatpush3.bf16.msra.mxu0 %v15050_v46  ;;  %v15092_v46 = vld [vmem:[%s15673_s30 + $0x1098] sm:$0xff]  }
 0x201   : > { %13716 = vmatprep.subr.bf16.mxu0 %v15052_v48  ;;  %13737 = vmatpush3.bf16.msra.mxu1 %v15051_v47  ;;  %v15093_v47 = vld [vmem:[%s15673_s30 + $0x1060] sm:$0xff]  }
 0x202   : > { %13738 = vmatprep.subr.bf16.mxu1 %v15053_v49  ;;  %v15094_v48 = vld [vmem:[%s15673_s30 + $0x10e0] sm:$0xff]  }
 0x203   : > { %v15095_v49 = vld [vmem:[%s15673_s30 + $0x1020] sm:$0xff]  }
 0x204   : > { %13717 = vmatpush3.bf16.msra.mxu0 %v15054_v50  ;;  %v15096_v50 = vld [vmem:[%s15673_s30 + $0x10a0] sm:$0xff]  }
 0x205   : > { %13718 = vmatprep.subr.bf16.mxu0 %v15056_v52  ;;  %13739 = vmatpush3.bf16.msra.mxu1 %v15055_v51  ;;  %v15097_v52 = vld [vmem:[%s15673_s30 + $0x1068] sm:$0xff]  }
 0x206   : > { %13740 = vmatprep.subr.bf16.mxu1 %v15057_v53 }
 0x208   : > { %13719 = vmatpush3.bf16.msra.mxu0 %v15058_v54 }
 0x209   : > { %13720 = vmatprep.subr.bf16.mxu0 %v15060_v56  ;;  %13741 = vmatpush3.bf16.msra.mxu1 %v15059_v55  ;;  %v15098_v55 = vld [vmem:[%s15673_s30 + $0x10e8] sm:$0xff]  }
 0x20a   : > { %13742 = vmatprep.subr.bf16.mxu1 %v15061_v57  ;;  %v15099_v56 = vld [vmem:[%s15673_s30 + $0x1028] sm:$0xff]  }
 0x20c   : > { %13721 = vmatpush3.bf16.msra.mxu0 %v15062_v58 }
 0x20d   : > { %13722 = vmatprep.subr.bf16.mxu0 %v15064_v60  ;;  %13743 = vmatpush3.bf16.msra.mxu1 %v15063_v59 }
 0x20e   : > { %v13420_v61 = vpop.f32.mrb[32].mxu0  ;;  %13744 = vmatprep.subr.bf16.mxu1 %v15065_v63 }
 0x20f   : > { %v13442_v62 = vpop.f32.mrb[32].mxu1  ;;  %v13421_v1 = vpop.f32.mrb[33].mxu0 }
 0x210   : > { %v13443_v2 = vpop.f32.mrb[33].mxu1  ;;  %v13422_v3 = vadd.f32 %v13421_v1, %v13420_v61  ;;  %v13423_v5 = vpop.f32.mrb[34].mxu0  ;;  %13723 = vmatpush3.bf16.msra.mxu0 %v15066_v0  ;;  %v15101_v0 = vld [vmem:[%s15673_s30 + $0x1070] sm:$0xff]  }
 0x211   : > { %v13444_v4 = vadd.f32 %v13443_v2, %v13442_v62  ;;  %v13445_v6 = vpop.f32.mrb[34].mxu1  ;;  %v13424_v9 = vpop.f32.mrb[35].mxu0  ;;  %13724 = vmatprep.subr.bf16.mxu0 %v15068_v8  ;;  %13745 = vmatpush3.bf16.msra.mxu1 %v15067_v7  ;;  %v15100_v62 = vld [vmem:[%s15673_s30 + $0x10a8] sm:$0xff]   ;;  %v15103_v5 = vld [vmem:[%s15673_s30 + $0x1030] sm:$0xff]   ;;  %v15105_v7 = vld [vmem:[%s15673_s30 + $0x1078] sm:$0xff]  }
 0x212   : > { %v13446_v10 = vpop.f32.mrb[35].mxu1  ;;  %v9974_v11 = vadd.f32 %v13422_v3, %v16217_v24  ;;  %13746 = vmatprep.subr.bf16.mxu1 %v15069_v12  ;;  %v577_v24 = vcombine.high %v569_v20, %v569_v20  ;;  %v15102_v3 = vld [vmem:[%s15673_s30 + $0x10f0] sm:$0xff]   ;;  %v15106_v8 = vld [vmem:[%s15673_s30 + $0x10f8] sm:$0xff]  }
 0x213   : > { %v15104_v6 = vld [vmem:[%s15673_s30 + $0x10b0] sm:$0xff]   ;;  %v15107_v9 = vld [vmem:[%s15673_s30 + $0x1038] sm:$0xff]   ;;  %v259_v10 = vld [vmem:[%s15668_s26 + $0x80] sm:$0xff] }
 0x214   : > { %v16254_v14 = vadd.f32 %v13444_v4, %v9974_v11  ;;  %13725 = vmatpush3.bf16.msra.mxu0 %v15070_v13  ;;  %v1040_v29 = vpack.c.bf16 %v577_v24, %v577_v24  ;;  %v15108_v11 = vld [vmem:[%s15673_s30 + $0x10b8] sm:$0xff]   ;;  %v586_v12 = vrot.slane %v259_v10, %v15711_v43  ;;  %v579_v13 = vcombine.high %v259_v10, %v259_v10  ;;  %v15114_v24 = vld [vmem:[%s15673_s30 + $0x1148] sm:$0xff]  }
 0x215   : > { %13726 = vmatprep.subr.bf16.mxu0 %v15072_v16  ;;  %13747 = vmatpush3.bf16.msra.mxu1 %v15071_v15 }
 0x216   : > { %13748 = vmatprep.subr.bf16.mxu1 %v15073_v17  ;;  %10531 = vmatprep.mubr.bf16.mxu0 %v1040_v29  ;;  %v594_v15 = vcombine.high %v586_v12, %v586_v12  ;;  %v593_v16 = vrot.slane %v579_v13, %v15711_v43  ;;  %v15111_v17 = vld [vmem:[%s15673_s30 + $0x11c0] sm:$0xff]   ;;  %v15118_v29 = vld [vmem:[%s15673_s30 + $0x1150] sm:$0xff]  }
 0x218   : > { %13727 = vmatpush3.bf16.msra.mxu0 %v15074_v18  ;;  %v1043_v18 = vpack.c.bf16 %v586_v12, %v586_v12  ;;  %v1044_v20 = vpack.c.bf16 %v594_v15, %v594_v15  ;;  %v595_v21 = vcombine.high %v593_v16, %v593_v16  ;;  %v15145_v12 = vld [vmem:[%s15673_s30 + $0x1200] sm:$0xff]  }
 0x219   : > { %13756 = vmatprep.subr.bf16.mxu0 %v15077_v22  ;;  %13749 = vmatpush3.bf16.msra.mxu1 %v15075_v23  ;;  %v15113_v22 = vld [vmem:[%s15673_s30 + $0x1180] sm:$0xff]   ;;  %v1045_v23 = vpack.c.bf16 %v593_v16, %v593_v16 }
 0x21a   : > { %13778 = vmatprep.subr.bf16.mxu1 %v15078_v26  ;;  %v1046_v25 = vpack.c.bf16 %v595_v21, %v595_v21  ;;  %v15115_v26 = vld [vmem:[%s15673_s30 + $0x11c8] sm:$0xff]   ;;  %v15146_v16 = vld [vmem:[%s15673_s30 + $0x1280] sm:$0xff]   ;;  %v15152_v21 = vld [vmem:[%s15673_s30 + $0x12d0] sm:$0xff]  }
 0x21b   : > { %10532 = vmatmul.mubr.bf16.vlgmr.msra.gmra.mrb[60].mxu0 %v1039_v27  ;;  %v15116_v27 = vld [vmem:[%s15673_s30 + $0x1108] sm:$0xff]  }
 0x21c   : > { %13757 = vmatpush3.bf16.msra.mxu0 %v15079_v28  ;;  %10572 = vmatmul.mubr.bf16.vlgmr.msra.gmra.mrb[60].mxu1 %v1041_v32  ;;  %v15117_v28 = vld [vmem:[%s15673_s30 + $0x1188] sm:$0xff]   ;;  %v15121_v32 = vld [vmem:[%s15673_s30 + $0x1190] sm:$0xff]  }
 0x21d   : > { %13758 = vmatprep.subr.bf16.mxu0 %v15081_v33  ;;  %13779 = vmatpush3.bf16.msra.mxu1 %v15080_v31  ;;  %v15120_v31 = vld [vmem:[%s15673_s30 + $0x1110] sm:$0xff]   ;;  %v15122_v33 = vld [vmem:[%s15673_s30 + $0x1158] sm:$0xff]  }
 0x21e   : > { %13780 = vmatprep.subr.bf16.mxu1 %v15082_v35  ;;  %10611 = vmatprep.mubr.bf16.mxu0 %v1044_v20  ;;  %v15124_v35 = vld [vmem:[%s15673_s30 + $0x1118] sm:$0xff]   ;;  %v15150_v20 = vld [vmem:[%s15673_s30 + $0x1288] sm:$0xff]  }
 0x21f   : > { %10651 = vmatprep.mubr.bf16.mxu1 %v1046_v25  ;;  %v15156_v25 = vld [vmem:[%s15673_s30 + $0x12d8] sm:$0xff]  }
 0x220   : > { %13759 = vmatpush3.bf16.msra.mxu0 %v15083_v36  ;;  %v15125_v36 = vld [vmem:[%s15673_s30 + $0x1198] sm:$0xff]  }
 0x221   : > { %13760 = vmatprep.subr.bf16.mxu0 %v15085_v38  ;;  %13781 = vmatpush3.bf16.msra.mxu1 %v15084_v37  ;;  %v15126_v37 = vld [vmem:[%s15673_s30 + $0x1160] sm:$0xff]  }
 0x222   : > { %13782 = vmatprep.subr.bf16.mxu1 %v15086_v39  ;;  %v15127_v38 = vld [vmem:[%s15673_s30 + $0x11e0] sm:$0xff]  }
 0x223   : > { %v15128_v39 = vld [vmem:[%s15673_s30 + $0x1120] sm:$0xff]  }
 0x224   : > { %13761 = vmatpush3.bf16.msra.mxu0 %v15087_v40  ;;  %v15129_v40 = vld [vmem:[%s15673_s30 + $0x11a0] sm:$0xff]  }
 0x225   : > { %13762 = vmatprep.subr.bf16.mxu0 %v15089_v42  ;;  %13783 = vmatpush3.bf16.msra.mxu1 %v15088_v41  ;;  %v15130_v42 = vld [vmem:[%s15673_s30 + $0x1168] sm:$0xff]  }
 0x226   : > { %13784 = vmatprep.subr.bf16.mxu1 %v15090_v44 }
 0x228   : > { %13763 = vmatpush3.bf16.msra.mxu0 %v15091_v45  ;;  %v15131_v45 = vld [vmem:[%s15673_s30 + $0x11e8] sm:$0xff]  }
 0x229   : > { %13764 = vmatprep.subr.bf16.mxu0 %v15093_v47  ;;  %13785 = vmatpush3.bf16.msra.mxu1 %v15092_v46 }
 0x22a   : > { %13786 = vmatprep.subr.bf16.mxu1 %v15094_v48 }
 0x22c   : > { %13765 = vmatpush3.bf16.msra.mxu0 %v15095_v49 }
 0x22d   : > { %13766 = vmatprep.subr.bf16.mxu0 %v15097_v52  ;;  %13787 = vmatpush3.bf16.msra.mxu1 %v15096_v50  ;;  %v15132_v50 = vld [vmem:[%s15673_s30 + $0x1128] sm:$0xff]  }
 0x22e   : > { %v13464_v51 = vpop.f32.mrb[36].mxu0  ;;  %13788 = vmatprep.subr.bf16.mxu1 %v15098_v55 }
 0x22f   : > { %v13486_v53 = vpop.f32.mrb[36].mxu1  ;;  %v13465_v54 = vpop.f32.mrb[37].mxu0 }
 0x230   : > { %v13466_v57 = vadd.f32 %v13465_v54, %v13464_v51  ;;  %v13487_v58 = vpop.f32.mrb[37].mxu1  ;;  %v13467_v59 = vpop.f32.mrb[38].mxu0  ;;  %13767 = vmatpush3.bf16.msra.mxu0 %v15099_v56  ;;  %v15133_v51 = vld [vmem:[%s15673_s30 + $0x11a8] sm:$0xff]   ;;  %v15134_v56 = vld [vmem:[%s15673_s30 + $0x1170] sm:$0xff]  }
 0x231   : > { %v13488_v60 = vadd.f32 %v13487_v58, %v13486_v53  ;;  %v13489_v61 = vpop.f32.mrb[38].mxu1  ;;  %v13468_v63 = vpop.f32.mrb[39].mxu0  ;;  %13768 = vmatprep.subr.bf16.mxu0 %v15101_v0  ;;  %13789 = vmatpush3.bf16.msra.mxu1 %v15100_v62  ;;  %v15135_v58 = vld [vmem:[%s15673_s30 + $0x11f0] sm:$0xff]   ;;  %v15140_v0 = vld [vmem:[%s15673_s30 + $0x1138] sm:$0xff]  }
 0x232   : > { %v10054_v1 = vadd.f32 %v13466_v57, %v16254_v14  ;;  %v13490_v2 = vpop.f32.mrb[39].mxu1  ;;  %13790 = vmatprep.subr.bf16.mxu1 %v15102_v3  ;;  %v15110_v14 = vld [vmem:[%s15673_s30 + $0x1140] sm:$0xff]   ;;  %v15138_v61 = vld [vmem:[%s15673_s30 + $0x1178] sm:$0xff]   ;;  %v15137_v62 = vld [vmem:[%s15673_s30 + $0x11b0] sm:$0xff]  }
 0x233   : > { %v15139_v63 = vld [vmem:[%s15673_s30 + $0x11f8] sm:$0xff]  }
 0x234   : > { %v16291_v4 = vadd.f32 %v13488_v60, %v10054_v1  ;;  %13769 = vmatpush3.bf16.msra.mxu0 %v15103_v5  ;;  %v15136_v60 = vld [vmem:[%s15673_s30 + $0x1130] sm:$0xff]   ;;  %v260_v1 = vld [vmem:[%s15668_s26 + $0x88] sm:$0xff]  ;;  %v15141_v5 = vld [vmem:[%s15673_s30 + $0x11b8] sm:$0xff]  }
 0x235   : > { %13770 = vmatprep.subr.bf16.mxu0 %v15105_v7  ;;  %13791 = vmatpush3.bf16.msra.mxu1 %v15104_v6  ;;  %v603_v2 = vrot.slane %v260_v1, %v15711_v43  ;;  %v596_v3 = vcombine.high %v260_v1, %v260_v1 }
 0x236   : > { %13792 = vmatprep.subr.bf16.mxu1 %v15106_v8  ;;  %v15144_v8 = vld [vmem:[%s15673_s30 + $0x12c0] sm:$0xff]  }
 0x237   : > { %v611_v6 = vcombine.high %v603_v2, %v603_v2  ;;  %v610_v7 = vrot.slane %v596_v3, %v15711_v43  ;;  %v15178_v3 = vld [vmem:[%s15673_s30 + $0x1300] sm:$0xff]  }
 0x238   : > { %13771 = vmatpush3.bf16.msra.mxu0 %v15107_v9  ;;  %v1047_v9 = vpack.c.bf16 %v603_v2, %v603_v2 }
 0x239   : > { %13800 = vmatprep.subr.bf16.mxu0 %v15110_v14  ;;  %13793 = vmatpush3.bf16.msra.mxu1 %v15108_v11  ;;  %v1048_v10 = vpack.c.bf16 %v611_v6, %v611_v6  ;;  %v612_v11 = vcombine.high %v610_v7, %v610_v7  ;;  %v1049_v13 = vpack.c.bf16 %v610_v7, %v610_v7  ;;  %v15147_v14 = vld [vmem:[%s15673_s30 + $0x1248] sm:$0xff]   ;;  %v15179_v7 = vld [vmem:[%s15673_s30 + $0x1380] sm:$0xff]  }
 0x23a   : > { %13822 = vmatprep.subr.bf16.mxu1 %v15111_v17  ;;  %v15148_v17 = vld [vmem:[%s15673_s30 + $0x12c8] sm:$0xff]  }
 0x23b   : > { %10612 = vmatmul.mubr.bf16.vlgmr.msra.gmra.mrb[64].mxu0 %v1043_v18  ;;  %v1050_v15 = vpack.c.bf16 %v612_v11, %v612_v11  ;;  %v15149_v18 = vld [vmem:[%s15673_s30 + $0x1208] sm:$0xff]  }
 0x23c   : > { %13801 = vmatpush3.bf16.msra.mxu0 %v15112_v19  ;;  %10652 = vmatmul.mubr.bf16.vlgmr.msra.gmra.mrb[64].mxu1 %v1045_v23  ;;  %v15151_v19 = vld [vmem:[%s15673_s30 + $0x1250] sm:$0xff]   ;;  %v15155_v23 = vld [vmem:[%s15673_s30 + $0x1258] sm:$0xff]   ;;  %v15183_v11 = vld [vmem:[%s15673_s30 + $0x1388] sm:$0xff]  }
 0x23d   : > { %13802 = vmatprep.subr.bf16.mxu0 %v15114_v24  ;;  %13823 = vmatpush3.bf16.msra.mxu1 %v15113_v22  ;;  %v15153_v22 = vld [vmem:[%s15673_s30 + $0x1210] sm:$0xff]  }
 0x23e   : > { %13824 = vmatprep.subr.bf16.mxu1 %v15115_v26  ;;  %10691 = vmatprep.mubr.bf16.mxu0 %v1048_v10  ;;  %v15154_v24 = vld [vmem:[%s15673_s30 + $0x1290] sm:$0xff]   ;;  %v15157_v26 = vld [vmem:[%s15673_s30 + $0x1218] sm:$0xff]  }
 0x23f   : > { %10731 = vmatprep.mubr.bf16.mxu1 %v1050_v15  ;;  %v15184_v10 = vld [vmem:[%s15673_s30 + $0x1350] sm:$0xff]  }
 0x240   : > { %13803 = vmatpush3.bf16.msra.mxu0 %v15116_v27  ;;  %v15159_v27 = vld [vmem:[%s15673_s30 + $0x1260] sm:$0xff]   ;;  %v15187_v15 = vld [vmem:[%s15673_s30 + $0x1390] sm:$0xff]  }
 0x241   : > { %13804 = vmatprep.subr.bf16.mxu0 %v15118_v29  ;;  %13825 = vmatpush3.bf16.msra.mxu1 %v15117_v28  ;;  %v15158_v28 = vld [vmem:[%s15673_s30 + $0x1298] sm:$0xff]   ;;  %v15160_v29 = vld [vmem:[%s15673_s30 + $0x12e0] sm:$0xff]  }
 0x242   : > { %13826 = vmatprep.subr.bf16.mxu1 %v15119_v30  ;;  %v15161_v30 = vld [vmem:[%s15673_s30 + $0x1220] sm:$0xff]  }
 0x244   : > { %13805 = vmatpush3.bf16.msra.mxu0 %v15120_v31 }
 0x245   : > { %13806 = vmatprep.subr.bf16.mxu0 %v15122_v33  ;;  %13827 = vmatpush3.bf16.msra.mxu1 %v15121_v32  ;;  %v15163_v32 = vld [vmem:[%s15673_s30 + $0x1268] sm:$0xff]   ;;  %v15162_v33 = vld [vmem:[%s15673_s30 + $0x12a0] sm:$0xff]  }
 0x246   : > { %13828 = vmatprep.subr.bf16.mxu1 %v15123_v34 }
 0x248   : > { %13807 = vmatpush3.bf16.msra.mxu0 %v15124_v35 }
 0x249   : > { %13808 = vmatprep.subr.bf16.mxu0 %v15126_v37  ;;  %13829 = vmatpush3.bf16.msra.mxu1 %v15125_v36  ;;  %v15164_v37 = vld [vmem:[%s15673_s30 + $0x12e8] sm:$0xff]  }
 0x24a   : > { %13830 = vmatprep.subr.bf16.mxu1 %v15127_v38 }
 0x24c   : > { %13809 = vmatpush3.bf16.msra.mxu0 %v15128_v39  ;;  %v15165_v39 = vld [vmem:[%s15673_s30 + $0x1228] sm:$0xff]  }
 0x24d   : > { %13810 = vmatprep.subr.bf16.mxu0 %v15130_v42  ;;  %13831 = vmatpush3.bf16.msra.mxu1 %v15129_v40 }
 0x24e   : > { %v13508_v41 = vpop.f32.mrb[40].mxu0  ;;  %13832 = vmatprep.subr.bf16.mxu1 %v15131_v45 }
 0x24f   : > { %v13509_v44 = vpop.f32.mrb[41].mxu0  ;;  %v13530_v46 = vpop.f32.mrb[40].mxu1 }
 0x250   : > { %v13510_v47 = vadd.f32 %v13509_v44, %v13508_v41  ;;  %v13511_v48 = vpop.f32.mrb[42].mxu0  ;;  %v13531_v49 = vpop.f32.mrb[41].mxu1  ;;  %13811 = vmatpush3.bf16.msra.mxu0 %v15132_v50  ;;  %v15166_v41 = vld [vmem:[%s15673_s30 + $0x12a8] sm:$0xff]  }
 0x251   : > { %v13512_v52 = vpop.f32.mrb[43].mxu0  ;;  %v13532_v54 = vadd.f32 %v13531_v49, %v13530_v46  ;;  %v13533_v55 = vpop.f32.mrb[42].mxu1  ;;  %13812 = vmatprep.subr.bf16.mxu0 %v15134_v56  ;;  %13833 = vmatpush3.bf16.msra.mxu1 %v15133_v51  ;;  %v15168_v49 = vld [vmem:[%s15673_s30 + $0x12f0] sm:$0xff]  }
 0x252   : > { %v10134_v53 = vadd.f32 %v13510_v47, %v16291_v4  ;;  %v13534_v57 = vpop.f32.mrb[43].mxu1  ;;  %13834 = vmatprep.subr.bf16.mxu1 %v15135_v58  ;;  %v15143_v4 = vld [vmem:[%s15673_s30 + $0x1240] sm:$0xff]   ;;  %v15167_v47 = vld [vmem:[%s15673_s30 + $0x1270] sm:$0xff]   ;;  %v15173_v55 = vld [vmem:[%s15673_s30 + $0x1238] sm:$0xff]  }
 0x253   : > { %v15169_v51 = vld [vmem:[%s15673_s30 + $0x1230] sm:$0xff]  }
 0x254   : > { %v16329_v59 = vadd.f32 %v13532_v54, %v10134_v53  ;;  %13813 = vmatpush3.bf16.msra.mxu0 %v15136_v60  ;;  %v15170_v52 = vld [vmem:[%s15673_s30 + $0x12b0] sm:$0xff]   ;;  %v15171_v53 = vld [vmem:[%s15673_s30 + $0x1278] sm:$0xff]  }
 0x255   : > { %13814 = vmatprep.subr.bf16.mxu0 %v15138_v61  ;;  %13835 = vmatpush3.bf16.msra.mxu1 %v15137_v62  ;;  %v15172_v54 = vld [vmem:[%s15673_s30 + $0x12f8] sm:$0xff]   ;;  %v261_v56 = vld [vmem:[%s15668_s26 + $0x90] sm:$0xff] }
 0x256   : > { %13836 = vmatprep.subr.bf16.mxu1 %v15139_v63  ;;  %v620_v57 = vrot.slane %v261_v56, %v15711_v43  ;;  %v613_v58 = vcombine.high %v261_v56, %v261_v56  ;;  %v15174_v60 = vld [vmem:[%s15673_s30 + $0x12b8] sm:$0xff]   ;;  %v15177_v63 = vld [vmem:[%s15673_s30 + $0x13c0] sm:$0xff]  }
 0x257   : > { %v15211_v56 = vld [vmem:[%s15673_s30 + $0x1400] sm:$0xff]  }
 0x258   : > { %13815 = vmatpush3.bf16.msra.mxu0 %v15140_v0  ;;  %v628_v61 = vcombine.high %v620_v57, %v620_v57  ;;  %v627_v62 = vrot.slane %v613_v58, %v15711_v43  ;;  %v1051_v0 = vpack.c.bf16 %v620_v57, %v620_v57 }
 0x259   : > { %13844 = vmatprep.subr.bf16.mxu0 %v15143_v4  ;;  %13837 = vmatpush3.bf16.msra.mxu1 %v15141_v5  ;;  %v15180_v5 = vld [vmem:[%s15673_s30 + $0x1348] sm:$0xff]  }
 0x25a   : > { %13866 = vmatprep.subr.bf16.mxu1 %v15144_v8  ;;  %v1052_v1 = vpack.c.bf16 %v628_v61, %v628_v61  ;;  %v629_v2 = vcombine.high %v627_v62, %v627_v62  ;;  %v1053_v4 = vpack.c.bf16 %v627_v62, %v627_v62  ;;  %v15181_v8 = vld [vmem:[%s15673_s30 + $0x13c8] sm:$0xff]  }
 0x25b   : > { %10692 = vmatmul.mubr.bf16.vlgmr.msra.gmra.mrb[68].mxu0 %v1047_v9  ;;  %v15182_v9 = vld [vmem:[%s15673_s30 + $0x1308] sm:$0xff]  }
 0x25c   : > { %13845 = vmatpush3.bf16.msra.mxu0 %v15145_v12  ;;  %10732 = vmatmul.mubr.bf16.vlgmr.msra.gmra.mrb[68].mxu1 %v1049_v13  ;;  %v1054_v6 = vpack.c.bf16 %v629_v2, %v629_v2  ;;  %v15185_v12 = vld [vmem:[%s15673_s30 + $0x13d0] sm:$0xff]   ;;  %v15213_v61 = vld [vmem:[%s15673_s30 + $0x1448] sm:$0xff]  }
 0x25d   : > { %13846 = vmatprep.subr.bf16.mxu0 %v15147_v14  ;;  %13867 = vmatpush3.bf16.msra.mxu1 %v15146_v16  ;;  %v15186_v13 = vld [vmem:[%s15673_s30 + $0x1310] sm:$0xff]   ;;  %v15188_v14 = vld [vmem:[%s15673_s30 + $0x1358] sm:$0xff]  }
 0x25e   : > { %13868 = vmatprep.subr.bf16.mxu1 %v15148_v17  ;;  %10771 = vmatprep.mubr.bf16.mxu0 %v1052_v1  ;;  %v15189_v16 = vld [vmem:[%s15673_s30 + $0x13d8] sm:$0xff]   ;;  %v15216_v1 = vld [vmem:[%s15673_s30 + $0x1488] sm:$0xff]   ;;  %v15217_v2 = vld [vmem:[%s15673_s30 + $0x1450] sm:$0xff]  }
 0x25f   : > { %10811 = vmatprep.mubr.bf16.mxu1 %v1054_v6  ;;  %v15190_v17 = vld [vmem:[%s15673_s30 + $0x1318] sm:$0xff]  }
 0x260   : > { %13847 = vmatpush3.bf16.msra.mxu0 %v15149_v18  ;;  %v15192_v18 = vld [vmem:[%s15673_s30 + $0x1360] sm:$0xff]   ;;  %v15221_v6 = vld [vmem:[%s15673_s30 + $0x1458] sm:$0xff]  }
 0x261   : > { %13848 = vmatprep.subr.bf16.mxu0 %v15151_v19  ;;  %13869 = vmatpush3.bf16.msra.mxu1 %v15150_v20  ;;  %v15191_v19 = vld [vmem:[%s15673_s30 + $0x1398] sm:$0xff]   ;;  %v15193_v20 = vld [vmem:[%s15673_s30 + $0x13e0] sm:$0xff]  }
 0x262   : > { %13870 = vmatprep.subr.bf16.mxu1 %v15152_v21  ;;  %v15194_v21 = vld [vmem:[%s15673_s30 + $0x1320] sm:$0xff]  }
 0x264   : > { %13849 = vmatpush3.bf16.msra.mxu0 %v15153_v22 }
 0x265   : > { %13850 = vmatprep.subr.bf16.mxu0 %v15155_v23  ;;  %13871 = vmatpush3.bf16.msra.mxu1 %v15154_v24  ;;  %v15196_v23 = vld [vmem:[%s15673_s30 + $0x1368] sm:$0xff]   ;;  %v15195_v24 = vld [vmem:[%s15673_s30 + $0x13a0] sm:$0xff]  }
 0x266   : > { %13872 = vmatprep.subr.bf16.mxu1 %v15156_v25 }
 0x268   : > { %13851 = vmatpush3.bf16.msra.mxu0 %v15157_v26 }
 0x269   : > { %13852 = vmatprep.subr.bf16.mxu0 %v15159_v27  ;;  %13873 = vmatpush3.bf16.msra.mxu1 %v15158_v28  ;;  %v15197_v28 = vld [vmem:[%s15673_s30 + $0x13e8] sm:$0xff]  }
 0x26a   : > { %13874 = vmatprep.subr.bf16.mxu1 %v15160_v29 }
 0x26c   : > { %13853 = vmatpush3.bf16.msra.mxu0 %v15161_v30  ;;  %v15198_v30 = vld [vmem:[%s15673_s30 + $0x1328] sm:$0xff]  }
 0x26d   : > { %13854 = vmatprep.subr.bf16.mxu0 %v15163_v32  ;;  %13875 = vmatpush3.bf16.msra.mxu1 %v15162_v33  ;;  %v15199_v32 = vld [vmem:[%s15673_s30 + $0x13a8] sm:$0xff]  }
 0x26e   : > { %v13552_v31 = vpop.f32.mrb[44].mxu0  ;;  %13876 = vmatprep.subr.bf16.mxu1 %v15164_v37  ;;  %v15200_v37 = vld [vmem:[%s15673_s30 + $0x1370] sm:$0xff]  }
 0x26f   : > { %v13553_v34 = vpop.f32.mrb[45].mxu0  ;;  %v13574_v35 = vpop.f32.mrb[44].mxu1 }
 0x270   : > { %v13554_v36 = vadd.f32 %v13553_v34, %v13552_v31  ;;  %v13555_v38 = vpop.f32.mrb[46].mxu0  ;;  %v13575_v40 = vpop.f32.mrb[45].mxu1  ;;  %13855 = vmatpush3.bf16.msra.mxu0 %v15165_v39  ;;  %v15201_v39 = vld [vmem:[%s15673_s30 + $0x13f0] sm:$0xff]  }
 0x271   : > { %v13556_v42 = vpop.f32.mrb[47].mxu0  ;;  %v13576_v45 = vadd.f32 %v13575_v40, %v13574_v35  ;;  %v13577_v46 = vpop.f32.mrb[46].mxu1  ;;  %13856 = vmatprep.subr.bf16.mxu0 %v15167_v47  ;;  %13877 = vmatpush3.bf16.msra.mxu1 %v15166_v41  ;;  %v15202_v41 = vld [vmem:[%s15673_s30 + $0x1330] sm:$0xff]   ;;  %v262_v47 = vld [vmem:[%s15668_s26 + $0x98] sm:$0xff] }
 0x272   : > { %v10214_v44 = vadd.f32 %v13554_v36, %v16329_v59  ;;  %v13578_v48 = vpop.f32.mrb[47].mxu1  ;;  %13878 = vmatprep.subr.bf16.mxu1 %v15168_v49  ;;  %v15176_v59 = vld [vmem:[%s15673_s30 + $0x1340] sm:$0xff]   ;;  %v15203_v42 = vld [vmem:[%s15673_s30 + $0x13b0] sm:$0xff]   ;;  %v15206_v46 = vld [vmem:[%s15673_s30 + $0x1338] sm:$0xff]   ;;  %v637_v49 = vrot.slane %v262_v47, %v15711_v43 }
 0x273   : > { %v15207_v48 = vld [vmem:[%s15673_s30 + $0x13b8] sm:$0xff]  }
 0x274   : > { %v16367_v50 = vadd.f32 %v13576_v45, %v10214_v44  ;;  %13857 = vmatpush3.bf16.msra.mxu0 %v15169_v51  ;;  %v15204_v44 = vld [vmem:[%s15673_s30 + $0x1378] sm:$0xff]   ;;  %v15209_v51 = vld [vmem:[%s15673_s30 + $0x1440] sm:$0xff]  }
 0x275   : > { %13858 = vmatprep.subr.bf16.mxu0 %v15171_v53  ;;  %13879 = vmatpush3.bf16.msra.mxu1 %v15170_v52  ;;  %v15205_v45 = vld [vmem:[%s15673_s30 + $0x13f8] sm:$0xff]   ;;  %v645_v52 = vcombine.high %v637_v49, %v637_v49 }
 0x276   : > { %13880 = vmatprep.subr.bf16.mxu1 %v15172_v54  ;;  %v15210_v54 = vld [vmem:[%s15673_s30 + $0x14c0] sm:$0xff]  }
 0x277   : > { %v1056_v57 = vpack.c.bf16 %v645_v52, %v645_v52  ;;  %v15246_v52 = vld [vmem:[%s15673_s30 + $0x1548] sm:$0xff]  }
 0x278   : > { %13859 = vmatpush3.bf16.msra.mxu0 %v15173_v55  ;;  %v1055_v55 = vpack.c.bf16 %v637_v49, %v637_v49 }
 0x279   : > { %13888 = vmatprep.subr.bf16.mxu0 %v15176_v59  ;;  %13881 = vmatpush3.bf16.msra.mxu1 %v15174_v60  ;;  %v15212_v59 = vld [vmem:[%s15673_s30 + $0x1480] sm:$0xff]  }
 0x27a   : > { %13910 = vmatprep.subr.bf16.mxu1 %v15177_v63  ;;  %v15214_v63 = vld [vmem:[%s15673_s30 + $0x14c8] sm:$0xff]  }
 0x27b   : > { %10772 = vmatmul.mubr.bf16.vlgmr.msra.gmra.mrb[72].mxu0 %v1051_v0  ;;  %v15215_v0 = vld [vmem:[%s15673_s30 + $0x1408] sm:$0xff]  }
 0x27c   : > { %13889 = vmatpush3.bf16.msra.mxu0 %v15178_v3  ;;  %10812 = vmatmul.mubr.bf16.vlgmr.msra.gmra.mrb[72].mxu1 %v1053_v4  ;;  %v15218_v3 = vld [vmem:[%s15673_s30 + $0x14d0] sm:$0xff]  }
 0x27d   : > { %13890 = vmatprep.subr.bf16.mxu0 %v15180_v5  ;;  %13911 = vmatpush3.bf16.msra.mxu1 %v15179_v7  ;;  %v15219_v4 = vld [vmem:[%s15673_s30 + $0x1410] sm:$0xff]   ;;  %v15222_v7 = vld [vmem:[%s15673_s30 + $0x14d8] sm:$0xff]  }
 0x27e   : > { %13912 = vmatprep.subr.bf16.mxu1 %v15181_v8  ;;  %10851 = vmatprep.mubr.bf16.mxu0 %v1056_v57  ;;  %v15220_v5 = vld [vmem:[%s15673_s30 + $0x1490] sm:$0xff]   ;;  %v15223_v8 = vld [vmem:[%s15673_s30 + $0x1418] sm:$0xff]  }
 0x27f   : > { %v15250_v57 = vld [vmem:[%s15673_s30 + $0x1550] sm:$0xff]  }
 0x280   : > { %13891 = vmatpush3.bf16.msra.mxu0 %v15182_v9  ;;  %v15224_v9 = vld [vmem:[%s15673_s30 + $0x1498] sm:$0xff]  }
 0x281   : > { %13892 = vmatprep.subr.bf16.mxu0 %v15184_v10  ;;  %13913 = vmatpush3.bf16.msra.mxu1 %v15183_v11  ;;  %v15225_v10 = vld [vmem:[%s15673_s30 + $0x1460] sm:$0xff]  }
 0x282   : > { %13914 = vmatprep.subr.bf16.mxu1 %v15185_v12  ;;  %v15226_v11 = vld [vmem:[%s15673_s30 + $0x14e0] sm:$0xff]  }
 0x283   : > { %v15227_v12 = vld [vmem:[%s15673_s30 + $0x1420] sm:$0xff]  }
 0x284   : > { %13893 = vmatpush3.bf16.msra.mxu0 %v15186_v13  ;;  %v15228_v13 = vld [vmem:[%s15673_s30 + $0x14a0] sm:$0xff]  }
 0x285   : > { %13894 = vmatprep.subr.bf16.mxu0 %v15188_v14  ;;  %13915 = vmatpush3.bf16.msra.mxu1 %v15187_v15  ;;  %v15229_v14 = vld [vmem:[%s15673_s30 + $0x1468] sm:$0xff]  }
 0x286   : > { %13916 = vmatprep.subr.bf16.mxu1 %v15189_v16  ;;  %v15230_v16 = vld [vmem:[%s15673_s30 + $0x14e8] sm:$0xff]  }
 0x288   : > { %13895 = vmatpush3.bf16.msra.mxu0 %v15190_v17 }
 0x289   : > { %13896 = vmatprep.subr.bf16.mxu0 %v15192_v18  ;;  %13917 = vmatpush3.bf16.msra.mxu1 %v15191_v19  ;;  %v15231_v18 = vld [vmem:[%s15673_s30 + $0x1428] sm:$0xff]  }
 0x28a   : > { %13918 = vmatprep.subr.bf16.mxu1 %v15193_v20 }
 0x28c   : > { %13897 = vmatpush3.bf16.msra.mxu0 %v15194_v21 }
 0x28d   : > { %13898 = vmatprep.subr.bf16.mxu0 %v15196_v23  ;;  %13919 = vmatpush3.bf16.msra.mxu1 %v15195_v24  ;;  %v15232_v23 = vld [vmem:[%s15673_s30 + $0x14a8] sm:$0xff]  }
 0x28e   : > { %v13596_v22 = vpop.f32.mrb[48].mxu0  ;;  %13920 = vmatprep.subr.bf16.mxu1 %v15197_v28 }
 0x28f   : > { %v13597_v25 = vpop.f32.mrb[49].mxu0  ;;  %v13618_v26 = vpop.f32.mrb[48].mxu1 }
 0x290   : > { %v13598_v27 = vadd.f32 %v13597_v25, %v13596_v22  ;;  %v13599_v29 = vpop.f32.mrb[50].mxu0  ;;  %v13619_v31 = vpop.f32.mrb[49].mxu1  ;;  %13899 = vmatpush3.bf16.msra.mxu0 %v15198_v30  ;;  %v15233_v25 = vld [vmem:[%s15673_s30 + $0x1470] sm:$0xff]  }
 0x291   : > { %v13600_v33 = vpop.f32.mrb[51].mxu0  ;;  %v13620_v35 = vadd.f32 %v13619_v31, %v13618_v26  ;;  %v13621_v36 = vpop.f32.mrb[50].mxu1  ;;  %13900 = vmatprep.subr.bf16.mxu0 %v15200_v37  ;;  %13921 = vmatpush3.bf16.msra.mxu1 %v15199_v32  ;;  %v15234_v29 = vld [vmem:[%s15673_s30 + $0x14f0] sm:$0xff]   ;;  %v263_v37 = vld [vmem:[%s15668_s26 + $0xa0] sm:$0xff] }
 0x292   : > { %v10294_v34 = vadd.f32 %v13598_v27, %v16367_v50  ;;  %v13622_v38 = vpop.f32.mrb[51].mxu1  ;;  %13922 = vmatprep.subr.bf16.mxu1 %v15201_v39  ;;  %v630_v50 = vcombine.high %v262_v47, %v262_v47  ;;  %v15235_v31 = vld [vmem:[%s15673_s30 + $0x1430] sm:$0xff]   ;;  %v15237_v33 = vld [vmem:[%s15673_s30 + $0x1478] sm:$0xff]   ;;  %v647_v39 = vcombine.high %v263_v37, %v263_v37  ;;  %v15244_v47 = vld [vmem:[%s15673_s30 + $0x1500] sm:$0xff]  }
 0x293   : > { %v15239_v36 = vld [vmem:[%s15673_s30 + $0x1438] sm:$0xff]   ;;  %v654_v38 = vrot.slane %v263_v37, %v15711_v43  ;;  %v15277_v37 = vld [vmem:[%s15673_s30 + $0x1600] sm:$0xff]  }
 0x294   : > { %v16405_v40 = vadd.f32 %v13620_v35, %v10294_v34  ;;  %13901 = vmatpush3.bf16.msra.mxu0 %v15202_v41  ;;  %v644_v53 = vrot.slane %v630_v50, %v15711_v43  ;;  %v15236_v34 = vld [vmem:[%s15673_s30 + $0x14b0] sm:$0xff]   ;;  %v15238_v35 = vld [vmem:[%s15673_s30 + $0x14f8] sm:$0xff]   ;;  %v15245_v50 = vld [vmem:[%s15673_s30 + $0x1580] sm:$0xff]  }
 0x295   : > { %13902 = vmatprep.subr.bf16.mxu0 %v15204_v44  ;;  %13923 = vmatpush3.bf16.msra.mxu1 %v15203_v42  ;;  %v15240_v41 = vld [vmem:[%s15673_s30 + $0x14b8] sm:$0xff]   ;;  %v662_v42 = vcombine.high %v654_v38, %v654_v38  ;;  %v661_v44 = vrot.slane %v647_v39, %v15711_v43 }
 0x296   : > { %13924 = vmatprep.subr.bf16.mxu1 %v15205_v45  ;;  %v646_v58 = vcombine.high %v644_v53, %v644_v53  ;;  %v1057_v60 = vpack.c.bf16 %v644_v53, %v644_v53  ;;  %v15243_v45 = vld [vmem:[%s15673_s30 + $0x15c0] sm:$0xff]  }
 0x297   : > { %v663_v49 = vcombine.high %v661_v44, %v661_v44 }
 0x298   : > { %13903 = vmatpush3.bf16.msra.mxu0 %v15206_v46  ;;  %v1058_v62 = vpack.c.bf16 %v646_v58, %v646_v58  ;;  %v1059_v46 = vpack.c.bf16 %v654_v38, %v654_v38  ;;  %v15251_v58 = vld [vmem:[%s15673_s30 + $0x15d0] sm:$0xff]  }
 0x299   : > { %13932 = vmatprep.subr.bf16.mxu0 %v15209_v51  ;;  %13925 = vmatpush3.bf16.msra.mxu1 %v15207_v48  ;;  %v1060_v48 = vpack.c.bf16 %v662_v42, %v662_v42  ;;  %v1061_v51 = vpack.c.bf16 %v661_v44, %v661_v44  ;;  %v1062_v53 = vpack.c.bf16 %v663_v49, %v663_v49  ;;  %v15279_v42 = vld [vmem:[%s15673_s30 + $0x1648] sm:$0xff]   ;;  %v15284_v49 = vld [vmem:[%s15673_s30 + $0x16d0] sm:$0xff]  }
 0x29a   : > { %13954 = vmatprep.subr.bf16.mxu1 %v15210_v54  ;;  %10891 = vmatprep.mubr.bf16.mxu1 %v1058_v62  ;;  %v15247_v54 = vld [vmem:[%s15673_s30 + $0x15c8] sm:$0xff]   ;;  %v15255_v62 = vld [vmem:[%s15673_s30 + $0x15d8] sm:$0xff]  }
 0x29b   : > { %10852 = vmatmul.mubr.bf16.vlgmr.msra.gmra.mrb[76].mxu0 %v1055_v55  ;;  %v15248_v55 = vld [vmem:[%s15673_s30 + $0x1508] sm:$0xff]  }
 0x29c   : > { %13933 = vmatpush3.bf16.msra.mxu0 %v15211_v56  ;;  %10892 = vmatmul.mubr.bf16.vlgmr.msra.gmra.mrb[76].mxu1 %v1057_v60  ;;  %v15249_v56 = vld [vmem:[%s15673_s30 + $0x1588] sm:$0xff]   ;;  %v15253_v60 = vld [vmem:[%s15673_s30 + $0x1590] sm:$0xff]  }
 0x29d   : > { %13934 = vmatprep.subr.bf16.mxu0 %v15213_v61  ;;  %13955 = vmatpush3.bf16.msra.mxu1 %v15212_v59  ;;  %v15252_v59 = vld [vmem:[%s15673_s30 + $0x1510] sm:$0xff]   ;;  %v15254_v61 = vld [vmem:[%s15673_s30 + $0x1558] sm:$0xff]  }
 0x29e   : > { %13956 = vmatprep.subr.bf16.mxu1 %v15214_v63  ;;  %10931 = vmatprep.mubr.bf16.mxu0 %v1060_v48  ;;  %v15256_v63 = vld [vmem:[%s15673_s30 + $0x1518] sm:$0xff]   ;;  %v15283_v48 = vld [vmem:[%s15673_s30 + $0x1650] sm:$0xff]  }
 0x29f   : > { %10971 = vmatprep.mubr.bf16.mxu1 %v1062_v53  ;;  %v15288_v53 = vld [vmem:[%s15673_s30 + $0x16d8] sm:$0xff]  }
 0x2a0   : > { %13935 = vmatpush3.bf16.msra.mxu0 %v15215_v0  ;;  %v15257_v0 = vld [vmem:[%s15673_s30 + $0x1598] sm:$0xff]  }
 0x2a1   : > { %13936 = vmatprep.subr.bf16.mxu0 %v15217_v2  ;;  %13957 = vmatpush3.bf16.msra.mxu1 %v15216_v1  ;;  %v15258_v1 = vld [vmem:[%s15673_s30 + $0x1560] sm:$0xff]  }
 0x2a2   : > { %13958 = vmatprep.subr.bf16.mxu1 %v15218_v3  ;;  %v15259_v2 = vld [vmem:[%s15673_s30 + $0x15e0] sm:$0xff]  }
 0x2a3   : > { %v15260_v3 = vld [vmem:[%s15673_s30 + $0x1520] sm:$0xff]  }
 0x2a4   : > { %13937 = vmatpush3.bf16.msra.mxu0 %v15219_v4  ;;  %v15261_v4 = vld [vmem:[%s15673_s30 + $0x15a0] sm:$0xff]  }
 0x2a5   : > { %13938 = vmatprep.subr.bf16.mxu0 %v15221_v6  ;;  %13959 = vmatpush3.bf16.msra.mxu1 %v15220_v5  ;;  %v15262_v5 = vld [vmem:[%s15673_s30 + $0x1568] sm:$0xff]  }
 0x2a6   : > { %13960 = vmatprep.subr.bf16.mxu1 %v15222_v7  ;;  %v15263_v7 = vld [vmem:[%s15673_s30 + $0x15e8] sm:$0xff]  }
 0x2a8   : > { %13939 = vmatpush3.bf16.msra.mxu0 %v15223_v8 }
 0x2a9   : > { %13940 = vmatprep.subr.bf16.mxu0 %v15225_v10  ;;  %13961 = vmatpush3.bf16.msra.mxu1 %v15224_v9  ;;  %v15264_v9 = vld [vmem:[%s15673_s30 + $0x1528] sm:$0xff]  }
 0x2aa   : > { %13962 = vmatprep.subr.bf16.mxu1 %v15226_v11 }
 0x2ac   : > { %13941 = vmatpush3.bf16.msra.mxu0 %v15227_v12 }
 0x2ad   : > { %13942 = vmatprep.subr.bf16.mxu0 %v15229_v14  ;;  %13963 = vmatpush3.bf16.msra.mxu1 %v15228_v13  ;;  %v15265_v13 = vld [vmem:[%s15673_s30 + $0x15a8] sm:$0xff]   ;;  %v15266_v14 = vld [vmem:[%s15673_s30 + $0x1570] sm:$0xff]  }
 0x2ae   : > { %v13640_v15 = vpop.f32.mrb[52].mxu0  ;;  %13964 = vmatprep.subr.bf16.mxu1 %v15230_v16 }
 0x2af   : > { %v13641_v17 = vpop.f32.mrb[53].mxu0  ;;  %v13662_v19 = vpop.f32.mrb[52].mxu1 }
 0x2b0   : > { %v13642_v20 = vadd.f32 %v13641_v17, %v13640_v15  ;;  %v13643_v21 = vpop.f32.mrb[54].mxu0  ;;  %v13663_v22 = vpop.f32.mrb[53].mxu1  ;;  %13943 = vmatpush3.bf16.msra.mxu0 %v15231_v18 }
 0x2b1   : > { %v13644_v24 = vpop.f32.mrb[55].mxu0  ;;  %v13664_v27 = vadd.f32 %v13663_v22, %v13662_v19  ;;  %v13665_v28 = vpop.f32.mrb[54].mxu1  ;;  %13944 = vmatprep.subr.bf16.mxu0 %v15233_v25  ;;  %13965 = vmatpush3.bf16.msra.mxu1 %v15232_v23  ;;  %v15268_v22 = vld [vmem:[%s15673_s30 + $0x1530] sm:$0xff]   ;;  %v15270_v25 = vld [vmem:[%s15673_s30 + $0x1578] sm:$0xff]  }
 0x2b2   : > { %v10374_v26 = vadd.f32 %v13642_v20, %v16405_v40  ;;  %v13666_v30 = vpop.f32.mrb[55].mxu1  ;;  %13966 = vmatprep.subr.bf16.mxu1 %v15234_v29  ;;  %v15242_v40 = vld [vmem:[%s15673_s30 + $0x1540] sm:$0xff]   ;;  %v15267_v20 = vld [vmem:[%s15673_s30 + $0x15f0] sm:$0xff]   ;;  %v264_v28 = vld [vmem:[%s15668_s26 + $0xa8] sm:$0xff] }
 0x2b3   : > { %v15269_v24 = vld [vmem:[%s15673_s30 + $0x15b0] sm:$0xff]   ;;  %v671_v29 = vrot.slane %v264_v28, %v15711_v43  ;;  %v664_v30 = vcombine.high %v264_v28, %v264_v28  ;;  %v15310_v28 = vld [vmem:[%s15673_s30 + $0x1700] sm:$0xff]  }
 0x2b4   : > { %v16444_v32 = vadd.f32 %v13664_v27, %v10374_v26  ;;  %13945 = vmatpush3.bf16.msra.mxu0 %v15235_v31  ;;  %v15271_v26 = vld [vmem:[%s15673_s30 + $0x15f8] sm:$0xff]   ;;  %v15275_v31 = vld [vmem:[%s15673_s30 + $0x1640] sm:$0xff]  }
 0x2b5   : > { %13946 = vmatprep.subr.bf16.mxu0 %v15237_v33  ;;  %13967 = vmatpush3.bf16.msra.mxu1 %v15236_v34  ;;  %v15272_v27 = vld [vmem:[%s15673_s30 + $0x1538] sm:$0xff]   ;;  %v679_v33 = vcombine.high %v671_v29, %v671_v29  ;;  %v678_v34 = vrot.slane %v664_v30, %v15711_v43 }
 0x2b6   : > { %13968 = vmatprep.subr.bf16.mxu1 %v15238_v35  ;;  %v15276_v35 = vld [vmem:[%s15673_s30 + $0x16c0] sm:$0xff]  }
 0x2b7   : > { %v1064_v38 = vpack.c.bf16 %v679_v33, %v679_v33  ;;  %v680_v39 = vcombine.high %v678_v34, %v678_v34  ;;  %v15312_v33 = vld [vmem:[%s15673_s30 + $0x1748] sm:$0xff]  }
 0x2b8   : > { %13947 = vmatpush3.bf16.msra.mxu0 %v15239_v36  ;;  %v1063_v36 = vpack.c.bf16 %v671_v29, %v671_v29 }
 0x2b9   : > { %13976 = vmatprep.subr.bf16.mxu0 %v15242_v40  ;;  %13969 = vmatpush3.bf16.msra.mxu1 %v15240_v41  ;;  %v15278_v40 = vld [vmem:[%s15673_s30 + $0x1680] sm:$0xff]   ;;  %v1065_v41 = vpack.c.bf16 %v678_v34, %v678_v34  ;;  %v1066_v44 = vpack.c.bf16 %v680_v39, %v680_v39  ;;  %v15317_v39 = vld [vmem:[%s15673_s30 + $0x17d0] sm:$0xff]  }
 0x2ba   : > { %13998 = vmatprep.subr.bf16.mxu1 %v15243_v45  ;;  %v15280_v45 = vld [vmem:[%s15673_s30 + $0x16c8] sm:$0xff]  }
 0x2bb   : > { %10932 = vmatmul.mubr.bf16.vlgmr.msra.gmra.mrb[80].mxu0 %v1059_v46  ;;  %v15281_v46 = vld [vmem:[%s15673_s30 + $0x1608] sm:$0xff]  }
 0x2bc   : > { %13977 = vmatpush3.bf16.msra.mxu0 %v15244_v47  ;;  %10972 = vmatmul.mubr.bf16.vlgmr.msra.gmra.mrb[80].mxu1 %v1061_v51  ;;  %v15282_v47 = vld [vmem:[%s15673_s30 + $0x1688] sm:$0xff]   ;;  %v15286_v51 = vld [vmem:[%s15673_s30 + $0x1690] sm:$0xff]  }
 0x2bd   : > { %13978 = vmatprep.subr.bf16.mxu0 %v15246_v52  ;;  %13999 = vmatpush3.bf16.msra.mxu1 %v15245_v50  ;;  %v15285_v50 = vld [vmem:[%s15673_s30 + $0x1610] sm:$0xff]   ;;  %v15287_v52 = vld [vmem:[%s15673_s30 + $0x1658] sm:$0xff]  }
 0x2be   : > { %14000 = vmatprep.subr.bf16.mxu1 %v15247_v54  ;;  %11011 = vmatprep.mubr.bf16.mxu0 %v1064_v38  ;;  %v15289_v54 = vld [vmem:[%s15673_s30 + $0x1618] sm:$0xff]   ;;  %v15316_v38 = vld [vmem:[%s15673_s30 + $0x1750] sm:$0xff]  }
 0x2bf   : > { %11051 = vmatprep.mubr.bf16.mxu1 %v1066_v44  ;;  %v15321_v44 = vld [vmem:[%s15673_s30 + $0x17d8] sm:$0xff]  }
 0x2c0   : > { %13979 = vmatpush3.bf16.msra.mxu0 %v15248_v55  ;;  %v15290_v55 = vld [vmem:[%s15673_s30 + $0x1698] sm:$0xff]  }
 0x2c1   : > { %13980 = vmatprep.subr.bf16.mxu0 %v15250_v57  ;;  %14001 = vmatpush3.bf16.msra.mxu1 %v15249_v56  ;;  %v15291_v56 = vld [vmem:[%s15673_s30 + $0x1660] sm:$0xff]  }
 0x2c2   : > { %14002 = vmatprep.subr.bf16.mxu1 %v15251_v58  ;;  %v15292_v57 = vld [vmem:[%s15673_s30 + $0x16e0] sm:$0xff]  }
 0x2c3   : > { %v15293_v58 = vld [vmem:[%s15673_s30 + $0x1620] sm:$0xff]  }
 0x2c4   : > { %13981 = vmatpush3.bf16.msra.mxu0 %v15252_v59  ;;  %v15294_v59 = vld [vmem:[%s15673_s30 + $0x16a0] sm:$0xff]  }
 0x2c5   : > { %13982 = vmatprep.subr.bf16.mxu0 %v15254_v61  ;;  %14003 = vmatpush3.bf16.msra.mxu1 %v15253_v60  ;;  %v15295_v60 = vld [vmem:[%s15673_s30 + $0x1668] sm:$0xff]  }
 0x2c6   : > { %14004 = vmatprep.subr.bf16.mxu1 %v15255_v62  ;;  %v15296_v62 = vld [vmem:[%s15673_s30 + $0x16e8] sm:$0xff]  }
 0x2c8   : > { %13983 = vmatpush3.bf16.msra.mxu0 %v15256_v63 }
 0x2c9   : > { %13984 = vmatprep.subr.bf16.mxu0 %v15258_v1  ;;  %14005 = vmatpush3.bf16.msra.mxu1 %v15257_v0  ;;  %v15297_v0 = vld [vmem:[%s15673_s30 + $0x1628] sm:$0xff]  }
 0x2ca   : > { %14006 = vmatprep.subr.bf16.mxu1 %v15259_v2 }
 0x2cc   : > { %13985 = vmatpush3.bf16.msra.mxu0 %v15260_v3 }
 0x2cd   : > { %13986 = vmatprep.subr.bf16.mxu0 %v15262_v5  ;;  %14007 = vmatpush3.bf16.msra.mxu1 %v15261_v4  ;;  %v15298_v4 = vld [vmem:[%s15673_s30 + $0x16a8] sm:$0xff]   ;;  %v15299_v5 = vld [vmem:[%s15673_s30 + $0x1670] sm:$0xff]  }
 0x2ce   : > { %v13684_v6 = vpop.f32.mrb[56].mxu0  ;;  %14008 = vmatprep.subr.bf16.mxu1 %v15263_v7 }
 0x2cf   : > { %v13685_v8 = vpop.f32.mrb[57].mxu0  ;;  %v13706_v10 = vpop.f32.mrb[56].mxu1 }
 0x2d0   : > { %v13686_v11 = vadd.f32 %v13685_v8, %v13684_v6  ;;  %v13687_v12 = vpop.f32.mrb[58].mxu0  ;;  %v13707_v15 = vpop.f32.mrb[57].mxu1  ;;  %13987 = vmatpush3.bf16.msra.mxu0 %v15264_v9 }
 0x2d1   : > { %v13688_v16 = vpop.f32.mrb[59].mxu0  ;;  %v13708_v18 = vadd.f32 %v13707_v15, %v13706_v10  ;;  %v13709_v19 = vpop.f32.mrb[58].mxu1  ;;  %13988 = vmatprep.subr.bf16.mxu0 %v15266_v14  ;;  %14009 = vmatpush3.bf16.msra.mxu1 %v15265_v13  ;;  %v15301_v13 = vld [vmem:[%s15673_s30 + $0x1630] sm:$0xff]  }
 0x2d2   : > { %v10454_v17 = vadd.f32 %v13686_v11, %v16444_v32  ;;  %v13710_v21 = vpop.f32.mrb[59].mxu1  ;;  %14010 = vmatprep.subr.bf16.mxu1 %v15267_v20  ;;  %v15273_v32 = vld [vmem:[%s15673_s30 + $0x15b8] sm:$0xff]   ;;  %v15300_v11 = vld [vmem:[%s15673_s30 + $0x16f0] sm:$0xff]  }
 0x2d3   : > { %v15302_v15 = vld [vmem:[%s15673_s30 + $0x16b0] sm:$0xff]   ;;  %v15303_v16 = vld [vmem:[%s15673_s30 + $0x1678] sm:$0xff]  }
 0x2d4   : > { %v16482_v23 = vadd.f32 %v13708_v18, %v10454_v17  ;;  %13989 = vmatpush3.bf16.msra.mxu0 %v15268_v22  ;;  %v15304_v17 = vld [vmem:[%s15673_s30 + $0x16f8] sm:$0xff]   ;;  %v265_v19 = vld [vmem:[%s15668_s26 + $0xb0] sm:$0xff] }
 0x2d5   : > { %13990 = vmatprep.subr.bf16.mxu0 %v15270_v25  ;;  %14011 = vmatpush3.bf16.msra.mxu1 %v15269_v24  ;;  %v15305_v18 = vld [vmem:[%s15673_s30 + $0x1638] sm:$0xff]   ;;  %v688_v21 = vrot.slane %v265_v19, %v15711_v43  ;;  %v681_v22 = vcombine.high %v265_v19, %v265_v19  ;;  %v15343_v19 = vld [vmem:[%s15673_s30 + $0x1800] sm:$0xff]  }
 0x2d6   : > { %14012 = vmatprep.subr.bf16.mxu1 %v15271_v26  ;;  %v15306_v20 = vld [vmem:[%s15673_s30 + $0x16b8] sm:$0xff]   ;;  %v15309_v26 = vld [vmem:[%s15673_s30 + $0x17c0] sm:$0xff]  }
 0x2d7   : > { %v696_v24 = vcombine.high %v688_v21, %v688_v21  ;;  %v695_v25 = vrot.slane %v681_v22, %v15711_v43  ;;  %v15344_v22 = vld [vmem:[%s15673_s30 + $0x1880] sm:$0xff]  }
 0x2d8   : > { %13991 = vmatpush3.bf16.msra.mxu0 %v15272_v27  ;;  %v1067_v27 = vpack.c.bf16 %v688_v21, %v688_v21 }
 0x2d9   : > { %14020 = vmatprep.subr.bf16.mxu0 %v15275_v31  ;;  %14013 = vmatpush3.bf16.msra.mxu1 %v15273_v32  ;;  %v1068_v29 = vpack.c.bf16 %v696_v24, %v696_v24  ;;  %v697_v30 = vcombine.high %v695_v25, %v695_v25  ;;  %v15311_v31 = vld [vmem:[%s15673_s30 + $0x1780] sm:$0xff]   ;;  %v1069_v32 = vpack.c.bf16 %v695_v25, %v695_v25  ;;  %v15345_v24 = vld [vmem:[%s15673_s30 + $0x1848] sm:$0xff]  }
 0x2da   : > { %14042 = vmatprep.subr.bf16.mxu1 %v15276_v35  ;;  %v15313_v35 = vld [vmem:[%s15673_s30 + $0x17c8] sm:$0xff]  }
 0x2db   : > { %11012 = vmatmul.mubr.bf16.vlgmr.msra.gmra.mrb[84].mxu0 %v1063_v36  ;;  %v1070_v34 = vpack.c.bf16 %v697_v30, %v697_v30  ;;  %v15314_v36 = vld [vmem:[%s15673_s30 + $0x1708] sm:$0xff]   ;;  %v15350_v30 = vld [vmem:[%s15673_s30 + $0x18d0] sm:$0xff]  }
 0x2dc   : > { %14021 = vmatpush3.bf16.msra.mxu0 %v15277_v37  ;;  %11052 = vmatmul.mubr.bf16.vlgmr.msra.gmra.mrb[84].mxu1 %v1065_v41  ;;  %v15315_v37 = vld [vmem:[%s15673_s30 + $0x1788] sm:$0xff]   ;;  %v15319_v41 = vld [vmem:[%s15673_s30 + $0x1790] sm:$0xff]  }
 0x2dd   : > { %14022 = vmatprep.subr.bf16.mxu0 %v15279_v42  ;;  %14043 = vmatpush3.bf16.msra.mxu1 %v15278_v40  ;;  %v15318_v40 = vld [vmem:[%s15673_s30 + $0x1710] sm:$0xff]   ;;  %v15320_v42 = vld [vmem:[%s15673_s30 + $0x1758] sm:$0xff]  }
 0x2de   : > { %14044 = vmatprep.subr.bf16.mxu1 %v15280_v45  ;;  %11091 = vmatprep.mubr.bf16.mxu0 %v1068_v29  ;;  %v15322_v45 = vld [vmem:[%s15673_s30 + $0x1718] sm:$0xff]   ;;  %v15349_v29 = vld [vmem:[%s15673_s30 + $0x1850] sm:$0xff]  }
 0x2df   : > { %11131 = vmatprep.mubr.bf16.mxu1 %v1070_v34  ;;  %v15354_v34 = vld [vmem:[%s15673_s30 + $0x18d8] sm:$0xff]  }
 0x2e0   : > { %14023 = vmatpush3.bf16.msra.mxu0 %v15281_v46  ;;  %v15323_v46 = vld [vmem:[%s15673_s30 + $0x1798] sm:$0xff]  }
 0x2e1   : > { %14024 = vmatprep.subr.bf16.mxu0 %v15283_v48  ;;  %14045 = vmatpush3.bf16.msra.mxu1 %v15282_v47  ;;  %v15324_v47 = vld [vmem:[%s15673_s30 + $0x1760] sm:$0xff]  }
 0x2e2   : > { %14046 = vmatprep.subr.bf16.mxu1 %v15284_v49  ;;  %v15325_v48 = vld [vmem:[%s15673_s30 + $0x17e0] sm:$0xff]  }
 0x2e3   : > { %v15326_v49 = vld [vmem:[%s15673_s30 + $0x1720] sm:$0xff]  }
 0x2e4   : > { %14025 = vmatpush3.bf16.msra.mxu0 %v15285_v50  ;;  %v15327_v50 = vld [vmem:[%s15673_s30 + $0x17a0] sm:$0xff]  }
 0x2e5   : > { %14026 = vmatprep.subr.bf16.mxu0 %v15287_v52  ;;  %14047 = vmatpush3.bf16.msra.mxu1 %v15286_v51  ;;  %v15328_v51 = vld [vmem:[%s15673_s30 + $0x1768] sm:$0xff]  }
 0x2e6   : > { %14048 = vmatprep.subr.bf16.mxu1 %v15288_v53  ;;  %v15329_v53 = vld [vmem:[%s15673_s30 + $0x17e8] sm:$0xff]  }
 0x2e8   : > { %14027 = vmatpush3.bf16.msra.mxu0 %v15289_v54 }
 0x2e9   : > { %14028 = vmatprep.subr.bf16.mxu0 %v15291_v56  ;;  %14049 = vmatpush3.bf16.msra.mxu1 %v15290_v55  ;;  %v15330_v55 = vld [vmem:[%s15673_s30 + $0x1728] sm:$0xff]  }
 0x2ea   : > { %14050 = vmatprep.subr.bf16.mxu1 %v15292_v57 }
 0x2ec   : > { %14029 = vmatpush3.bf16.msra.mxu0 %v15293_v58 }
 0x2ed   : > { %14030 = vmatprep.subr.bf16.mxu0 %v15295_v60  ;;  %14051 = vmatpush3.bf16.msra.mxu1 %v15294_v59  ;;  %v15331_v60 = vld [vmem:[%s15673_s30 + $0x17a8] sm:$0xff]  }
 0x2ee   : > { %v13728_v61 = vpop.f32.mrb[60].mxu0  ;;  %14052 = vmatprep.subr.bf16.mxu1 %v15296_v62  ;;  %v15332_v62 = vld [vmem:[%s15673_s30 + $0x1770] sm:$0xff]  }
 0x2ef   : > { %v13729_v63 = vpop.f32.mrb[61].mxu0  ;;  %v13750_v1 = vpop.f32.mrb[60].mxu1 }
 0x2f0   : > { %v13730_v2 = vadd.f32 %v13729_v63, %v13728_v61  ;;  %v13731_v3 = vpop.f32.mrb[62].mxu0  ;;  %v13751_v6 = vpop.f32.mrb[61].mxu1  ;;  %14031 = vmatpush3.bf16.msra.mxu0 %v15297_v0 }
 0x2f1   : > { %v13732_v7 = vpop.f32.mrb[63].mxu0  ;;  %v13752_v9 = vadd.f32 %v13751_v6, %v13750_v1  ;;  %v13753_v10 = vpop.f32.mrb[62].mxu1  ;;  %14032 = vmatprep.subr.bf16.mxu0 %v15299_v5  ;;  %14053 = vmatpush3.bf16.msra.mxu1 %v15298_v4  ;;  %v15334_v4 = vld [vmem:[%s15673_s30 + $0x1730] sm:$0xff]   ;;  %v15336_v6 = vld [vmem:[%s15673_s30 + $0x1778] sm:$0xff]  }
 0x2f2   : > { %v10534_v8 = vadd.f32 %v13730_v2, %v16482_v23  ;;  %v13754_v12 = vpop.f32.mrb[63].mxu1  ;;  %14054 = vmatprep.subr.bf16.mxu1 %v15300_v11  ;;  %v15308_v23 = vld [vmem:[%s15673_s30 + $0x1740] sm:$0xff]   ;;  %v15333_v2 = vld [vmem:[%s15673_s30 + $0x17f0] sm:$0xff]   ;;  %v266_v10 = vld [vmem:[%s15668_s26 + $0xb8] sm:$0xff] }
 0x2f3   : > { %v15335_v7 = vld [vmem:[%s15673_s30 + $0x17b0] sm:$0xff]   ;;  %v705_v11 = vrot.slane %v266_v10, %v15711_v43  ;;  %v698_v12 = vcombine.high %v266_v10, %v266_v10  ;;  %v15376_v10 = vld [vmem:[%s15673_s30 + $0x1900] sm:$0xff]  }
 0x2f4   : > { %v16520_v14 = vadd.f32 %v13752_v9, %v10534_v8  ;;  %14033 = vmatpush3.bf16.msra.mxu0 %v15301_v13  ;;  %v15337_v8 = vld [vmem:[%s15673_s30 + $0x17f8] sm:$0xff]   ;;  %v15341_v13 = vld [vmem:[%s15673_s30 + $0x1840] sm:$0xff]  }
 0x2f5   : > { %14034 = vmatprep.subr.bf16.mxu0 %v15303_v16  ;;  %14055 = vmatpush3.bf16.msra.mxu1 %v15302_v15  ;;  %v15338_v9 = vld [vmem:[%s15673_s30 + $0x1738] sm:$0xff]   ;;  %v713_v15 = vcombine.high %v705_v11, %v705_v11  ;;  %v712_v16 = vrot.slane %v698_v12, %v15711_v43 }
 0x2f6   : > { %14056 = vmatprep.subr.bf16.mxu1 %v15304_v17  ;;  %v15342_v17 = vld [vmem:[%s15673_s30 + $0x18c0] sm:$0xff]  }
 0x2f7   : > { %v714_v21 = vcombine.high %v712_v16, %v712_v16 }
 0x2f8   : > { %14035 = vmatpush3.bf16.msra.mxu0 %v15305_v18  ;;  %v1071_v18 = vpack.c.bf16 %v705_v11, %v705_v11 }
 0x2f9   : > { %14064 = vmatprep.subr.bf16.mxu0 %v15308_v23  ;;  %14057 = vmatpush3.bf16.msra.mxu1 %v15306_v20  ;;  %v1072_v20 = vpack.c.bf16 %v713_v15, %v713_v15  ;;  %v1073_v23 = vpack.c.bf16 %v712_v16, %v712_v16  ;;  %v1074_v25 = vpack.c.bf16 %v714_v21, %v714_v21  ;;  %v15378_v15 = vld [vmem:[%s15673_s30 + $0x1948] sm:$0xff]   ;;  %v15383_v21 = vld [vmem:[%s15673_s30 + $0x19d0] sm:$0xff]  }
 0x2fa   : > { %14086 = vmatprep.subr.bf16.mxu1 %v15309_v26  ;;  %v15346_v26 = vld [vmem:[%s15673_s30 + $0x18c8] sm:$0xff]  }
 0x2fb   : > { %11092 = vmatmul.mubr.bf16.vlgmr.msra.gmra.mrb[88].mxu0 %v1067_v27  ;;  %v15347_v27 = vld [vmem:[%s15673_s30 + $0x1808] sm:$0xff]  }
 0x2fc   : > { %14065 = vmatpush3.bf16.msra.mxu0 %v15310_v28  ;;  %11132 = vmatmul.mubr.bf16.vlgmr.msra.gmra.mrb[88].mxu1 %v1069_v32  ;;  %v15348_v28 = vld [vmem:[%s15673_s30 + $0x1888] sm:$0xff]   ;;  %v15352_v32 = vld [vmem:[%s15673_s30 + $0x1890] sm:$0xff]  }
 0x2fd   : > { %14066 = vmatprep.subr.bf16.mxu0 %v15312_v33  ;;  %14087 = vmatpush3.bf16.msra.mxu1 %v15311_v31  ;;  %v15351_v31 = vld [vmem:[%s15673_s30 + $0x1810] sm:$0xff]   ;;  %v15353_v33 = vld [vmem:[%s15673_s30 + $0x1858] sm:$0xff]  }
 0x2fe   : > { %14088 = vmatprep.subr.bf16.mxu1 %v15313_v35  ;;  %11171 = vmatprep.mubr.bf16.mxu0 %v1072_v20  ;;  %v15355_v35 = vld [vmem:[%s15673_s30 + $0x1818] sm:$0xff]   ;;  %v15382_v20 = vld [vmem:[%s15673_s30 + $0x1950] sm:$0xff]  }
 0x2ff   : > { %11211 = vmatprep.mubr.bf16.mxu1 %v1074_v25  ;;  %v15387_v25 = vld [vmem:[%s15673_s30 + $0x19d8] sm:$0xff]  }
 0x300   : > { %14067 = vmatpush3.bf16.msra.mxu0 %v15314_v36  ;;  %v15356_v36 = vld [vmem:[%s15673_s30 + $0x1898] sm:$0xff]  }
 0x301   : > { %14068 = vmatprep.subr.bf16.mxu0 %v15316_v38  ;;  %14089 = vmatpush3.bf16.msra.mxu1 %v15315_v37  ;;  %v15357_v37 = vld [vmem:[%s15673_s30 + $0x1860] sm:$0xff]  }
 0x302   : > { %14090 = vmatprep.subr.bf16.mxu1 %v15317_v39  ;;  %v15358_v38 = vld [vmem:[%s15673_s30 + $0x18e0] sm:$0xff]  }
 0x303   : > { %v15359_v39 = vld [vmem:[%s15673_s30 + $0x1820] sm:$0xff]  }
 0x304   : > { %14069 = vmatpush3.bf16.msra.mxu0 %v15318_v40  ;;  %v15360_v40 = vld [vmem:[%s15673_s30 + $0x18a0] sm:$0xff]  }
 0x305   : > { %14070 = vmatprep.subr.bf16.mxu0 %v15320_v42  ;;  %14091 = vmatpush3.bf16.msra.mxu1 %v15319_v41  ;;  %v15361_v41 = vld [vmem:[%s15673_s30 + $0x1868] sm:$0xff]  }
 0x306   : > { %14092 = vmatprep.subr.bf16.mxu1 %v15321_v44  ;;  %v15362_v44 = vld [vmem:[%s15673_s30 + $0x18e8] sm:$0xff]  }
 0x308   : > { %14071 = vmatpush3.bf16.msra.mxu0 %v15322_v45 }
 0x309   : > { %14072 = vmatprep.subr.bf16.mxu0 %v15324_v47  ;;  %14093 = vmatpush3.bf16.msra.mxu1 %v15323_v46  ;;  %v15363_v46 = vld [vmem:[%s15673_s30 + $0x1828] sm:$0xff]  }
 0x30a   : > { %14094 = vmatprep.subr.bf16.mxu1 %v15325_v48 }
 0x30c   : > { %14073 = vmatpush3.bf16.msra.mxu0 %v15326_v49 }
 0x30d   : > { %14074 = vmatprep.subr.bf16.mxu0 %v15328_v51  ;;  %14095 = vmatpush3.bf16.msra.mxu1 %v15327_v50  ;;  %v15364_v50 = vld [vmem:[%s15673_s30 + $0x18a8] sm:$0xff]   ;;  %v15365_v51 = vld [vmem:[%s15673_s30 + $0x1870] sm:$0xff]  }
 0x30e   : > { %v13772_v52 = vpop.f32.mrb[64].mxu0  ;;  %14096 = vmatprep.subr.bf16.mxu1 %v15329_v53 }
 0x30f   : > { %v13773_v54 = vpop.f32.mrb[65].mxu0  ;;  %v13794_v56 = vpop.f32.mrb[64].mxu1 }
 0x310   : > { %v13774_v57 = vadd.f32 %v13773_v54, %v13772_v52  ;;  %v13775_v58 = vpop.f32.mrb[66].mxu0  ;;  %v13795_v59 = vpop.f32.mrb[65].mxu1  ;;  %14075 = vmatpush3.bf16.msra.mxu0 %v15330_v55 }
 0x311   : > { %v13776_v61 = vpop.f32.mrb[67].mxu0  ;;  %v13796_v0 = vadd.f32 %v13795_v59, %v13794_v56  ;;  %v13797_v1 = vpop.f32.mrb[66].mxu1  ;;  %14076 = vmatprep.subr.bf16.mxu0 %v15332_v62  ;;  %14097 = vmatpush3.bf16.msra.mxu1 %v15331_v60  ;;  %v15367_v59 = vld [vmem:[%s15673_s30 + $0x1830] sm:$0xff]   ;;  %v15369_v62 = vld [vmem:[%s15673_s30 + $0x1878] sm:$0xff]  }
 0x312   : > { %v10614_v63 = vadd.f32 %v13774_v57, %v16520_v14  ;;  %v13798_v3 = vpop.f32.mrb[67].mxu1  ;;  %14098 = vmatprep.subr.bf16.mxu1 %v15333_v2  ;;  %v15339_v14 = vld [vmem:[%s15673_s30 + $0x17b8] sm:$0xff]   ;;  %v15366_v57 = vld [vmem:[%s15673_s30 + $0x18f0] sm:$0xff]   ;;  %v267_v1 = vld [vmem:[%s15668_s26 + $0xc0] sm:$0xff] }
 0x313   : > { %v15368_v61 = vld [vmem:[%s15673_s30 + $0x18b0] sm:$0xff]   ;;  %v722_v2 = vrot.slane %v267_v1, %v15711_v43  ;;  %v715_v3 = vcombine.high %v267_v1, %v267_v1  ;;  %v15409_v1 = vld [vmem:[%s15673_s30 + $0x1a00] sm:$0xff]  }
 0x314   : > { %v16558_v5 = vadd.f32 %v13796_v0, %v10614_v63  ;;  %14077 = vmatpush3.bf16.msra.mxu0 %v15334_v4  ;;  %v15370_v63 = vld [vmem:[%s15673_s30 + $0x18f8] sm:$0xff]   ;;  %v15374_v4 = vld [vmem:[%s15673_s30 + $0x1940] sm:$0xff]  }
 0x315   : > { %14078 = vmatprep.subr.bf16.mxu0 %v15336_v6  ;;  %14099 = vmatpush3.bf16.msra.mxu1 %v15335_v7  ;;  %v15371_v0 = vld [vmem:[%s15673_s30 + $0x1838] sm:$0xff]   ;;  %v730_v6 = vcombine.high %v722_v2, %v722_v2  ;;  %v729_v7 = vrot.slane %v715_v3, %v15711_v43 }
 0x316   : > { %14100 = vmatprep.subr.bf16.mxu1 %v15337_v8  ;;  %v15375_v8 = vld [vmem:[%s15673_s30 + $0x19c0] sm:$0xff]  }
 0x317   : > { %v1076_v11 = vpack.c.bf16 %v730_v6, %v730_v6  ;;  %v731_v12 = vcombine.high %v729_v7, %v729_v7  ;;  %v15411_v6 = vld [vmem:[%s15673_s30 + $0x1a48] sm:$0xff]  }
 0x318   : > { %14079 = vmatpush3.bf16.msra.mxu0 %v15338_v9  ;;  %v1075_v9 = vpack.c.bf16 %v722_v2, %v722_v2 }
 0x319   : > { %14108 = vmatprep.subr.bf16.mxu0 %v15341_v13  ;;  %14101 = vmatpush3.bf16.msra.mxu1 %v15339_v14  ;;  %v15377_v13 = vld [vmem:[%s15673_s30 + $0x1980] sm:$0xff]   ;;  %v1077_v14 = vpack.c.bf16 %v729_v7, %v729_v7  ;;  %v1078_v16 = vpack.c.bf16 %v731_v12, %v731_v12  ;;  %v15416_v12 = vld [vmem:[%s15673_s30 + $0x1ad0] sm:$0xff]  }
 0x31a   : > { %14130 = vmatprep.subr.bf16.mxu1 %v15342_v17  ;;  %v15379_v17 = vld [vmem:[%s15673_s30 + $0x19c8] sm:$0xff]  }
 0x31b   : > { %11172 = vmatmul.mubr.bf16.vlgmr.msra.gmra.mrb[92].mxu0 %v1071_v18  ;;  %v15380_v18 = vld [vmem:[%s15673_s30 + $0x1908] sm:$0xff]  }
 0x31c   : > { %14109 = vmatpush3.bf16.msra.mxu0 %v15343_v19  ;;  %11212 = vmatmul.mubr.bf16.vlgmr.msra.gmra.mrb[92].mxu1 %v1073_v23  ;;  %v15381_v19 = vld [vmem:[%s15673_s30 + $0x1988] sm:$0xff]   ;;  %v15385_v23 = vld [vmem:[%s15673_s30 + $0x1990] sm:$0xff]  }
 0x31d   : > { %14110 = vmatprep.subr.bf16.mxu0 %v15345_v24  ;;  %14131 = vmatpush3.bf16.msra.mxu1 %v15344_v22  ;;  %v15384_v22 = vld [vmem:[%s15673_s30 + $0x1910] sm:$0xff]   ;;  %v15386_v24 = vld [vmem:[%s15673_s30 + $0x1958] sm:$0xff]  }
 0x31e   : > { %14132 = vmatprep.subr.bf16.mxu1 %v15346_v26  ;;  %11251 = vmatprep.mubr.bf16.mxu0 %v1076_v11  ;;  %v15388_v26 = vld [vmem:[%s15673_s30 + $0x1918] sm:$0xff]   ;;  %v15415_v11 = vld [vmem:[%s15673_s30 + $0x1a50] sm:$0xff]  }
 0x31f   : > { %11291 = vmatprep.mubr.bf16.mxu1 %v1078_v16  ;;  %v15420_v16 = vld [vmem:[%s15673_s30 + $0x1ad8] sm:$0xff]  }
 0x320   : > { %14111 = vmatpush3.bf16.msra.mxu0 %v15347_v27  ;;  %v15389_v27 = vld [vmem:[%s15673_s30 + $0x1998] sm:$0xff]  }
 0x321   : > { %14112 = vmatprep.subr.bf16.mxu0 %v15349_v29  ;;  %14133 = vmatpush3.bf16.msra.mxu1 %v15348_v28  ;;  %v15390_v28 = vld [vmem:[%s15673_s30 + $0x1960] sm:$0xff]  }
 0x322   : > { %14134 = vmatprep.subr.bf16.mxu1 %v15350_v30  ;;  %v15391_v29 = vld [vmem:[%s15673_s30 + $0x19e0] sm:$0xff]  }
 0x323   : > { %v15392_v30 = vld [vmem:[%s15673_s30 + $0x1920] sm:$0xff]  }
 0x324   : > { %14113 = vmatpush3.bf16.msra.mxu0 %v15351_v31  ;;  %v15393_v31 = vld [vmem:[%s15673_s30 + $0x19a0] sm:$0xff]  }
 0x325   : > { %14114 = vmatprep.subr.bf16.mxu0 %v15353_v33  ;;  %14135 = vmatpush3.bf16.msra.mxu1 %v15352_v32  ;;  %v15394_v32 = vld [vmem:[%s15673_s30 + $0x1968] sm:$0xff]  }
 0x326   : > { %14136 = vmatprep.subr.bf16.mxu1 %v15354_v34  ;;  %v15395_v34 = vld [vmem:[%s15673_s30 + $0x19e8] sm:$0xff]  }
 0x328   : > { %14115 = vmatpush3.bf16.msra.mxu0 %v15355_v35 }
 0x329   : > { %14116 = vmatprep.subr.bf16.mxu0 %v15357_v37  ;;  %14137 = vmatpush3.bf16.msra.mxu1 %v15356_v36  ;;  %v15396_v36 = vld [vmem:[%s15673_s30 + $0x1928] sm:$0xff]  }
 0x32a   : > { %14138 = vmatprep.subr.bf16.mxu1 %v15358_v38 }
 0x32c   : > { %14117 = vmatpush3.bf16.msra.mxu0 %v15359_v39 }
 0x32d   : > { %14118 = vmatprep.subr.bf16.mxu0 %v15361_v41  ;;  %14139 = vmatpush3.bf16.msra.mxu1 %v15360_v40  ;;  %v15397_v40 = vld [vmem:[%s15673_s30 + $0x19a8] sm:$0xff]   ;;  %v15398_v41 = vld [vmem:[%s15673_s30 + $0x1970] sm:$0xff]  }
 0x32e   : > { %v13816_v42 = vpop.f32.mrb[68].mxu0  ;;  %14140 = vmatprep.subr.bf16.mxu1 %v15362_v44 }
 0x32f   : > { %v13817_v45 = vpop.f32.mrb[69].mxu0  ;;  %v13838_v47 = vpop.f32.mrb[68].mxu1 }
 0x330   : > { %v13818_v48 = vadd.f32 %v13817_v45, %v13816_v42  ;;  %v13819_v49 = vpop.f32.mrb[70].mxu0  ;;  %v13839_v52 = vpop.f32.mrb[69].mxu1  ;;  %14119 = vmatpush3.bf16.msra.mxu0 %v15363_v46 }
 0x331   : > { %v13820_v53 = vpop.f32.mrb[71].mxu0  ;;  %v13840_v55 = vadd.f32 %v13839_v52, %v13838_v47  ;;  %v13841_v56 = vpop.f32.mrb[70].mxu1  ;;  %14120 = vmatprep.subr.bf16.mxu0 %v15365_v51  ;;  %14141 = vmatpush3.bf16.msra.mxu1 %v15364_v50  ;;  %v15400_v50 = vld [vmem:[%s15673_s30 + $0x1930] sm:$0xff]  }
 0x332   : > { %v10694_v54 = vadd.f32 %v13818_v48, %v16558_v5  ;;  %v13842_v58 = vpop.f32.mrb[71].mxu1  ;;  %14142 = vmatprep.subr.bf16.mxu1 %v15366_v57  ;;  %v15372_v5 = vld [vmem:[%s15673_s30 + $0x18b8] sm:$0xff]   ;;  %v15399_v48 = vld [vmem:[%s15673_s30 + $0x19f0] sm:$0xff]   ;;  %v268_v56 = vld [vmem:[%s15668_s26 + $0xc8] sm:$0xff] }
 0x333   : > { %v15401_v52 = vld [vmem:[%s15673_s30 + $0x19b0] sm:$0xff]   ;;  %v15402_v53 = vld [vmem:[%s15673_s30 + $0x1978] sm:$0xff]   ;;  %v739_v58 = vrot.slane %v268_v56, %v15711_v43 }
 0x334   : > { %v16596_v60 = vadd.f32 %v13840_v55, %v10694_v54  ;;  %14121 = vmatpush3.bf16.msra.mxu0 %v15367_v59  ;;  %v15403_v54 = vld [vmem:[%s15673_s30 + $0x19f8] sm:$0xff]   ;;  %v732_v59 = vcombine.high %v268_v56, %v268_v56  ;;  %v15442_v56 = vld [vmem:[%s15673_s30 + $0x1b00] sm:$0xff]  }
 0x335   : > { %14122 = vmatprep.subr.bf16.mxu0 %v15369_v62  ;;  %14143 = vmatpush3.bf16.msra.mxu1 %v15368_v61  ;;  %v15404_v55 = vld [vmem:[%s15673_s30 + $0x1938] sm:$0xff]   ;;  %v747_v61 = vcombine.high %v739_v58, %v739_v58 }
 0x336   : > { %14144 = vmatprep.subr.bf16.mxu1 %v15370_v63  ;;  %v15405_v57 = vld [vmem:[%s15673_s30 + $0x19b8] sm:$0xff]   ;;  %v746_v62 = vrot.slane %v732_v59, %v15711_v43  ;;  %v15408_v63 = vld [vmem:[%s15673_s30 + $0x1ac0] sm:$0xff]  }
 0x337   : > { %v1080_v2 = vpack.c.bf16 %v747_v61, %v747_v61  ;;  %v15443_v59 = vld [vmem:[%s15673_s30 + $0x1b80] sm:$0xff]   ;;  %v15444_v61 = vld [vmem:[%s15673_s30 + $0x1b48] sm:$0xff]  }
 0x338   : > { %14123 = vmatpush3.bf16.msra.mxu0 %v15371_v0  ;;  %v1079_v0 = vpack.c.bf16 %v739_v58, %v739_v58  ;;  %v748_v3 = vcombine.high %v746_v62, %v746_v62 }
 0x339   : > { %14152 = vmatprep.subr.bf16.mxu0 %v15374_v4  ;;  %14145 = vmatpush3.bf16.msra.mxu1 %v15372_v5  ;;  %v15410_v4 = vld [vmem:[%s15673_s30 + $0x1a80] sm:$0xff]   ;;  %v1081_v5 = vpack.c.bf16 %v746_v62, %v746_v62 }
 0x33a   : > { %14174 = vmatprep.subr.bf16.mxu1 %v15375_v8  ;;  %v1082_v7 = vpack.c.bf16 %v748_v3, %v748_v3  ;;  %v15412_v8 = vld [vmem:[%s15673_s30 + $0x1ac8] sm:$0xff]   ;;  %v15449_v3 = vld [vmem:[%s15673_s30 + $0x1bd0] sm:$0xff]  }
 0x33b   : > { %11252 = vmatmul.mubr.bf16.vlgmr.msra.gmra.mrb[96].mxu0 %v1075_v9  ;;  %v15413_v9 = vld [vmem:[%s15673_s30 + $0x1a08] sm:$0xff]  }
 0x33c   : > { %14153 = vmatpush3.bf16.msra.mxu0 %v15376_v10  ;;  %11292 = vmatmul.mubr.bf16.vlgmr.msra.gmra.mrb[96].mxu1 %v1077_v14  ;;  %v15414_v10 = vld [vmem:[%s15673_s30 + $0x1a88] sm:$0xff]   ;;  %v15418_v14 = vld [vmem:[%s15673_s30 + $0x1a90] sm:$0xff]  }
 0x33d   : > { %14154 = vmatprep.subr.bf16.mxu0 %v15378_v15  ;;  %14175 = vmatpush3.bf16.msra.mxu1 %v15377_v13  ;;  %v15417_v13 = vld [vmem:[%s15673_s30 + $0x1a10] sm:$0xff]   ;;  %v15419_v15 = vld [vmem:[%s15673_s30 + $0x1a58] sm:$0xff]  }
 0x33e   : > { %14176 = vmatprep.subr.bf16.mxu1 %v15379_v17  ;;  %11331 = vmatprep.mubr.bf16.mxu0 %v1080_v2  ;;  %v15421_v17 = vld [vmem:[%s15673_s30 + $0x1a18] sm:$0xff]   ;;  %v15448_v2 = vld [vmem:[%s15673_s30 + $0x1b50] sm:$0xff]  }
 0x33f   : > { %11371 = vmatprep.mubr.bf16.mxu1 %v1082_v7  ;;  %v15453_v7 = vld [vmem:[%s15673_s30 + $0x1bd8] sm:$0xff]  }
 0x340   : > { %14155 = vmatpush3.bf16.msra.mxu0 %v15380_v18  ;;  %v15422_v18 = vld [vmem:[%s15673_s30 + $0x1a98] sm:$0xff]  }
 0x341   : > { %14156 = vmatprep.subr.bf16.mxu0 %v15382_v20  ;;  %14177 = vmatpush3.bf16.msra.mxu1 %v15381_v19  ;;  %v15423_v19 = vld [vmem:[%s15673_s30 + $0x1a60] sm:$0xff]  }
 0x342   : > { %14178 = vmatprep.subr.bf16.mxu1 %v15383_v21  ;;  %v15424_v20 = vld [vmem:[%s15673_s30 + $0x1ae0] sm:$0xff]  }
 0x343   : > { %v15425_v21 = vld [vmem:[%s15673_s30 + $0x1a20] sm:$0xff]  }
 0x344   : > { %14157 = vmatpush3.bf16.msra.mxu0 %v15384_v22  ;;  %v15426_v22 = vld [vmem:[%s15673_s30 + $0x1aa0] sm:$0xff]  }
 0x345   : > { %14158 = vmatprep.subr.bf16.mxu0 %v15386_v24  ;;  %14179 = vmatpush3.bf16.msra.mxu1 %v15385_v23  ;;  %v15427_v23 = vld [vmem:[%s15673_s30 + $0x1a68] sm:$0xff]  }
 0x346   : > { %14180 = vmatprep.subr.bf16.mxu1 %v15387_v25  ;;  %v15428_v25 = vld [vmem:[%s15673_s30 + $0x1ae8] sm:$0xff]  }
 0x348   : > { %14159 = vmatpush3.bf16.msra.mxu0 %v15388_v26 }
 0x349   : > { %14160 = vmatprep.subr.bf16.mxu0 %v15390_v28  ;;  %14181 = vmatpush3.bf16.msra.mxu1 %v15389_v27  ;;  %v15429_v27 = vld [vmem:[%s15673_s30 + $0x1a28] sm:$0xff]  }
 0x34a   : > { %14182 = vmatprep.subr.bf16.mxu1 %v15391_v29 }
 0x34c   : > { %14161 = vmatpush3.bf16.msra.mxu0 %v15392_v30 }
 0x34d   : > { %14162 = vmatprep.subr.bf16.mxu0 %v15394_v32  ;;  %14183 = vmatpush3.bf16.msra.mxu1 %v15393_v31  ;;  %v15430_v32 = vld [vmem:[%s15673_s30 + $0x1aa8] sm:$0xff]  }
 0x34e   : > { %v13860_v33 = vpop.f32.mrb[72].mxu0  ;;  %14184 = vmatprep.subr.bf16.mxu1 %v15395_v34  ;;  %v15431_v34 = vld [vmem:[%s15673_s30 + $0x1a70] sm:$0xff]  }
 0x34f   : > { %v13861_v35 = vpop.f32.mrb[73].mxu0  ;;  %v13882_v37 = vpop.f32.mrb[72].mxu1 }
 0x350   : > { %v13862_v38 = vadd.f32 %v13861_v35, %v13860_v33  ;;  %v13863_v39 = vpop.f32.mrb[74].mxu0  ;;  %v13883_v42 = vpop.f32.mrb[73].mxu1  ;;  %14163 = vmatpush3.bf16.msra.mxu0 %v15396_v36 }
 0x351   : > { %v13864_v44 = vpop.f32.mrb[75].mxu0  ;;  %v13884_v46 = vadd.f32 %v13883_v42, %v13882_v37  ;;  %v13885_v47 = vpop.f32.mrb[74].mxu1  ;;  %14164 = vmatprep.subr.bf16.mxu0 %v15398_v41  ;;  %14185 = vmatpush3.bf16.msra.mxu1 %v15397_v40  ;;  %v15433_v40 = vld [vmem:[%s15673_s30 + $0x1a30] sm:$0xff]   ;;  %v15435_v42 = vld [vmem:[%s15673_s30 + $0x1a78] sm:$0xff]  }
 0x352   : > { %v10774_v45 = vadd.f32 %v13862_v38, %v16596_v60  ;;  %v13886_v49 = vpop.f32.mrb[75].mxu1  ;;  %14186 = vmatprep.subr.bf16.mxu1 %v15399_v48  ;;  %v15407_v60 = vld [vmem:[%s15673_s30 + $0x1a40] sm:$0xff]   ;;  %v15432_v38 = vld [vmem:[%s15673_s30 + $0x1af0] sm:$0xff]  }
 0x353   : > { %v15434_v44 = vld [vmem:[%s15673_s30 + $0x1ab0] sm:$0xff]  }
 0x354   : > { %v16634_v51 = vadd.f32 %v13884_v46, %v10774_v45  ;;  %14165 = vmatpush3.bf16.msra.mxu0 %v15400_v50  ;;  %v15436_v45 = vld [vmem:[%s15673_s30 + $0x1af8] sm:$0xff]   ;;  %v269_v47 = vld [vmem:[%s15668_s26 + $0xd0] sm:$0xff]  ;;  %v15440_v50 = vld [vmem:[%s15673_s30 + $0x1b40] sm:$0xff]  }
 0x355   : > { %14166 = vmatprep.subr.bf16.mxu0 %v15402_v53  ;;  %14187 = vmatpush3.bf16.msra.mxu1 %v15401_v52  ;;  %v15437_v46 = vld [vmem:[%s15673_s30 + $0x1a38] sm:$0xff]   ;;  %v756_v48 = vrot.slane %v269_v47, %v15711_v43  ;;  %v749_v49 = vcombine.high %v269_v47, %v269_v47  ;;  %v15475_v47 = vld [vmem:[%s15673_s30 + $0x1c00] sm:$0xff]  }
 0x356   : > { %14188 = vmatprep.subr.bf16.mxu1 %v15403_v54  ;;  %v15441_v54 = vld [vmem:[%s15673_s30 + $0x1bc0] sm:$0xff]  }
 0x357   : > { %v764_v52 = vcombine.high %v756_v48, %v756_v48  ;;  %v763_v53 = vrot.slane %v749_v49, %v15711_v43 }
 0x358   : > { %14167 = vmatpush3.bf16.msra.mxu0 %v15404_v55  ;;  %v1083_v55 = vpack.c.bf16 %v756_v48, %v756_v48 }
 0x359   : > { %14196 = vmatprep.subr.bf16.mxu0 %v15407_v60  ;;  %14189 = vmatpush3.bf16.msra.mxu1 %v15405_v57  ;;  %v1084_v57 = vpack.c.bf16 %v764_v52, %v764_v52  ;;  %v765_v58 = vcombine.high %v763_v53, %v763_v53  ;;  %v1085_v60 = vpack.c.bf16 %v763_v53, %v763_v53  ;;  %v15477_v52 = vld [vmem:[%s15673_s30 + $0x1c48] sm:$0xff]  }
 0x35a   : > { %14218 = vmatprep.subr.bf16.mxu1 %v15408_v63  ;;  %v15445_v63 = vld [vmem:[%s15673_s30 + $0x1bc8] sm:$0xff]  }
 0x35b   : > { %11332 = vmatmul.mubr.bf16.vlgmr.msra.gmra.mrb[100].mxu0 %v1079_v0  ;;  %v1086_v62 = vpack.c.bf16 %v765_v58, %v765_v58  ;;  %v15446_v0 = vld [vmem:[%s15673_s30 + $0x1b08] sm:$0xff]   ;;  %v15482_v58 = vld [vmem:[%s15673_s30 + $0x1cd0] sm:$0xff]  }
 0x35c   : > { %14197 = vmatpush3.bf16.msra.mxu0 %v15409_v1  ;;  %11372 = vmatmul.mubr.bf16.vlgmr.msra.gmra.mrb[100].mxu1 %v1081_v5  ;;  %v15447_v1 = vld [vmem:[%s15673_s30 + $0x1b88] sm:$0xff]   ;;  %v15451_v5 = vld [vmem:[%s15673_s30 + $0x1b90] sm:$0xff]  }
 0x35d   : > { %14198 = vmatprep.subr.bf16.mxu0 %v15411_v6  ;;  %14219 = vmatpush3.bf16.msra.mxu1 %v15410_v4  ;;  %v15450_v4 = vld [vmem:[%s15673_s30 + $0x1b10] sm:$0xff]   ;;  %v15452_v6 = vld [vmem:[%s15673_s30 + $0x1b58] sm:$0xff]  }
 0x35e   : > { %14220 = vmatprep.subr.bf16.mxu1 %v15412_v8  ;;  %11411 = vmatprep.mubr.bf16.mxu0 %v1084_v57  ;;  %v15454_v8 = vld [vmem:[%s15673_s30 + $0x1b18] sm:$0xff]   ;;  %v15481_v57 = vld [vmem:[%s15673_s30 + $0x1c50] sm:$0xff]  }
 0x35f   : > { %11451 = vmatprep.mubr.bf16.mxu1 %v1086_v62  ;;  %v15486_v62 = vld [vmem:[%s15673_s30 + $0x1cd8] sm:$0xff]  }
 0x360   : > { %14199 = vmatpush3.bf16.msra.mxu0 %v15413_v9  ;;  %v15455_v9 = vld [vmem:[%s15673_s30 + $0x1b98] sm:$0xff]  }
 0x361   : > { %14200 = vmatprep.subr.bf16.mxu0 %v15415_v11  ;;  %14221 = vmatpush3.bf16.msra.mxu1 %v15414_v10  ;;  %v15456_v10 = vld [vmem:[%s15673_s30 + $0x1b60] sm:$0xff]  }
 0x362   : > { %14222 = vmatprep.subr.bf16.mxu1 %v15416_v12  ;;  %v15457_v11 = vld [vmem:[%s15673_s30 + $0x1be0] sm:$0xff]  }
 0x363   : > { %v15458_v12 = vld [vmem:[%s15673_s30 + $0x1b20] sm:$0xff]  }
 0x364   : > { %14201 = vmatpush3.bf16.msra.mxu0 %v15417_v13  ;;  %v15459_v13 = vld [vmem:[%s15673_s30 + $0x1ba0] sm:$0xff]  }
 0x365   : > { %14202 = vmatprep.subr.bf16.mxu0 %v15419_v15  ;;  %14223 = vmatpush3.bf16.msra.mxu1 %v15418_v14  ;;  %v15460_v14 = vld [vmem:[%s15673_s30 + $0x1b68] sm:$0xff]  }
 0x366   : > { %14224 = vmatprep.subr.bf16.mxu1 %v15420_v16  ;;  %v15461_v16 = vld [vmem:[%s15673_s30 + $0x1be8] sm:$0xff]  }
 0x368   : > { %14203 = vmatpush3.bf16.msra.mxu0 %v15421_v17 }
 0x369   : > { %14204 = vmatprep.subr.bf16.mxu0 %v15423_v19  ;;  %14225 = vmatpush3.bf16.msra.mxu1 %v15422_v18  ;;  %v15462_v18 = vld [vmem:[%s15673_s30 + $0x1b28] sm:$0xff]  }
 0x36a   : > { %14226 = vmatprep.subr.bf16.mxu1 %v15424_v20 }
 0x36c   : > { %14205 = vmatpush3.bf16.msra.mxu0 %v15425_v21 }
 0x36d   : > { %14206 = vmatprep.subr.bf16.mxu0 %v15427_v23  ;;  %14227 = vmatpush3.bf16.msra.mxu1 %v15426_v22  ;;  %v15463_v22 = vld [vmem:[%s15673_s30 + $0x1ba8] sm:$0xff]   ;;  %v15464_v23 = vld [vmem:[%s15673_s30 + $0x1b70] sm:$0xff]  }
 0x36e   : > { %v13904_v24 = vpop.f32.mrb[76].mxu0  ;;  %14228 = vmatprep.subr.bf16.mxu1 %v15428_v25 }
 0x36f   : > { %v13905_v26 = vpop.f32.mrb[77].mxu0  ;;  %v13926_v28 = vpop.f32.mrb[76].mxu1 }
 0x370   : > { %v13906_v29 = vadd.f32 %v13905_v26, %v13904_v24  ;;  %v13907_v30 = vpop.f32.mrb[78].mxu0  ;;  %v13927_v31 = vpop.f32.mrb[77].mxu1  ;;  %14207 = vmatpush3.bf16.msra.mxu0 %v15429_v27 }
 0x371   : > { %v13908_v33 = vpop.f32.mrb[79].mxu0  ;;  %v13928_v36 = vadd.f32 %v13927_v31, %v13926_v28  ;;  %v13929_v37 = vpop.f32.mrb[78].mxu1  ;;  %14208 = vmatprep.subr.bf16.mxu0 %v15431_v34  ;;  %14229 = vmatpush3.bf16.msra.mxu1 %v15430_v32  ;;  %v15466_v31 = vld [vmem:[%s15673_s30 + $0x1b30] sm:$0xff]   ;;  %v15468_v34 = vld [vmem:[%s15673_s30 + $0x1b78] sm:$0xff]  }
 0x372   : > { %v10854_v35 = vadd.f32 %v13906_v29, %v16634_v51  ;;  %v13930_v39 = vpop.f32.mrb[79].mxu1  ;;  %14230 = vmatprep.subr.bf16.mxu1 %v15432_v38  ;;  %v15438_v51 = vld [vmem:[%s15673_s30 + $0x1ab8] sm:$0xff]   ;;  %v15465_v29 = vld [vmem:[%s15673_s30 + $0x1bf0] sm:$0xff]  }
 0x373   : > { %v15467_v33 = vld [vmem:[%s15673_s30 + $0x1bb0] sm:$0xff]   ;;  %v270_v37 = vld [vmem:[%s15668_s26 + $0xd8] sm:$0xff] }
 0x374   : > { %v16672_v41 = vadd.f32 %v13928_v36, %v10854_v35  ;;  %14209 = vmatpush3.bf16.msra.mxu0 %v15433_v40  ;;  %v15469_v35 = vld [vmem:[%s15673_s30 + $0x1bf8] sm:$0xff]   ;;  %v773_v38 = vrot.slane %v270_v37, %v15711_v43  ;;  %v766_v39 = vcombine.high %v270_v37, %v270_v37  ;;  %v15473_v40 = vld [vmem:[%s15673_s30 + $0x1c40] sm:$0xff]  }
 0x375   : > { %14210 = vmatprep.subr.bf16.mxu0 %v15435_v42  ;;  %14231 = vmatpush3.bf16.msra.mxu1 %v15434_v44  ;;  %v15470_v36 = vld [vmem:[%s15673_s30 + $0x1b38] sm:$0xff]   ;;  %v15508_v37 = vld [vmem:[%s15673_s30 + $0x1d00] sm:$0xff]  }
 0x376   : > { %14232 = vmatprep.subr.bf16.mxu1 %v15436_v45  ;;  %v781_v42 = vcombine.high %v773_v38, %v773_v38  ;;  %v780_v44 = vrot.slane %v766_v39, %v15711_v43  ;;  %v15474_v45 = vld [vmem:[%s15673_s30 + $0x1cc0] sm:$0xff]  }
 0x378   : > { %14211 = vmatpush3.bf16.msra.mxu0 %v15437_v46  ;;  %v1087_v46 = vpack.c.bf16 %v773_v38, %v773_v38  ;;  %v1088_v48 = vpack.c.bf16 %v781_v42, %v781_v42  ;;  %v782_v49 = vcombine.high %v780_v44, %v780_v44  ;;  %v15510_v42 = vld [vmem:[%s15673_s30 + $0x1d48] sm:$0xff]  }
 0x379   : > { %14240 = vmatprep.subr.bf16.mxu0 %v15440_v50  ;;  %14233 = vmatpush3.bf16.msra.mxu1 %v15438_v51  ;;  %v15476_v50 = vld [vmem:[%s15673_s30 + $0x1c80] sm:$0xff]   ;;  %v1089_v51 = vpack.c.bf16 %v780_v44, %v780_v44 }
 0x37a   : > { %14262 = vmatprep.subr.bf16.mxu1 %v15441_v54  ;;  %v1090_v53 = vpack.c.bf16 %v782_v49, %v782_v49  ;;  %v15478_v54 = vld [vmem:[%s15673_s30 + $0x1cc8] sm:$0xff]   ;;  %v15515_v49 = vld [vmem:[%s15673_s30 + $0x1dd0] sm:$0xff]  }
 0x37b   : > { %11412 = vmatmul.mubr.bf16.vlgmr.msra.gmra.mrb[104].mxu0 %v1083_v55  ;;  %v15479_v55 = vld [vmem:[%s15673_s30 + $0x1c08] sm:$0xff]  }
 0x37c   : > { %14241 = vmatpush3.bf16.msra.mxu0 %v15442_v56  ;;  %11452 = vmatmul.mubr.bf16.vlgmr.msra.gmra.mrb[104].mxu1 %v1085_v60  ;;  %v15480_v56 = vld [vmem:[%s15673_s30 + $0x1c88] sm:$0xff]   ;;  %v15484_v60 = vld [vmem:[%s15673_s30 + $0x1c90] sm:$0xff]  }
 0x37d   : > { %14242 = vmatprep.subr.bf16.mxu0 %v15444_v61  ;;  %14263 = vmatpush3.bf16.msra.mxu1 %v15443_v59  ;;  %v15483_v59 = vld [vmem:[%s15673_s30 + $0x1c10] sm:$0xff]   ;;  %v15485_v61 = vld [vmem:[%s15673_s30 + $0x1c58] sm:$0xff]  }
 0x37e   : > { %14264 = vmatprep.subr.bf16.mxu1 %v15445_v63  ;;  %11491 = vmatprep.mubr.bf16.mxu0 %v1088_v48  ;;  %v15487_v63 = vld [vmem:[%s15673_s30 + $0x1c18] sm:$0xff]   ;;  %v15514_v48 = vld [vmem:[%s15673_s30 + $0x1d50] sm:$0xff]  }
 0x37f   : > { %11531 = vmatprep.mubr.bf16.mxu1 %v1090_v53  ;;  %v15519_v53 = vld [vmem:[%s15673_s30 + $0x1dd8] sm:$0xff]  }
 0x380   : > { %14243 = vmatpush3.bf16.msra.mxu0 %v15446_v0  ;;  %v15488_v0 = vld [vmem:[%s15673_s30 + $0x1c98] sm:$0xff]  }
 0x381   : > { %14244 = vmatprep.subr.bf16.mxu0 %v15448_v2  ;;  %14265 = vmatpush3.bf16.msra.mxu1 %v15447_v1  ;;  %v15489_v1 = vld [vmem:[%s15673_s30 + $0x1c60] sm:$0xff]  }
 0x382   : > { %14266 = vmatprep.subr.bf16.mxu1 %v15449_v3  ;;  %v15490_v2 = vld [vmem:[%s15673_s30 + $0x1ce0] sm:$0xff]  }
 0x383   : > { %v15491_v3 = vld [vmem:[%s15673_s30 + $0x1c20] sm:$0xff]  }
 0x384   : > { %14245 = vmatpush3.bf16.msra.mxu0 %v15450_v4  ;;  %v15492_v4 = vld [vmem:[%s15673_s30 + $0x1ca0] sm:$0xff]  }
 0x385   : > { %14246 = vmatprep.subr.bf16.mxu0 %v15452_v6  ;;  %14267 = vmatpush3.bf16.msra.mxu1 %v15451_v5  ;;  %v15493_v5 = vld [vmem:[%s15673_s30 + $0x1c68] sm:$0xff]  }
 0x386   : > { %14268 = vmatprep.subr.bf16.mxu1 %v15453_v7  ;;  %v15494_v7 = vld [vmem:[%s15673_s30 + $0x1ce8] sm:$0xff]  }
 0x388   : > { %14247 = vmatpush3.bf16.msra.mxu0 %v15454_v8 }
 0x389   : > { %14248 = vmatprep.subr.bf16.mxu0 %v15456_v10  ;;  %14269 = vmatpush3.bf16.msra.mxu1 %v15455_v9  ;;  %v15495_v9 = vld [vmem:[%s15673_s30 + $0x1c28] sm:$0xff]  }
 0x38a   : > { %14270 = vmatprep.subr.bf16.mxu1 %v15457_v11 }
 0x38c   : > { %14249 = vmatpush3.bf16.msra.mxu0 %v15458_v12 }
 0x38d   : > { %14250 = vmatprep.subr.bf16.mxu0 %v15460_v14  ;;  %14271 = vmatpush3.bf16.msra.mxu1 %v15459_v13  ;;  %v15496_v13 = vld [vmem:[%s15673_s30 + $0x1ca8] sm:$0xff]   ;;  %v15497_v14 = vld [vmem:[%s15673_s30 + $0x1c70] sm:$0xff]  }
 0x38e   : > { %v13948_v15 = vpop.f32.mrb[80].mxu0  ;;  %14272 = vmatprep.subr.bf16.mxu1 %v15461_v16 }
 0x38f   : > { %v13949_v17 = vpop.f32.mrb[81].mxu0  ;;  %v13970_v19 = vpop.f32.mrb[80].mxu1 }
 0x390   : > { %v13950_v20 = vadd.f32 %v13949_v17, %v13948_v15  ;;  %v13951_v21 = vpop.f32.mrb[82].mxu0  ;;  %v13971_v24 = vpop.f32.mrb[81].mxu1  ;;  %14251 = vmatpush3.bf16.msra.mxu0 %v15462_v18 }
 0x391   : > { %v13952_v25 = vpop.f32.mrb[83].mxu0  ;;  %v13972_v27 = vadd.f32 %v13971_v24, %v13970_v19  ;;  %v13973_v28 = vpop.f32.mrb[82].mxu1  ;;  %14252 = vmatprep.subr.bf16.mxu0 %v15464_v23  ;;  %14273 = vmatpush3.bf16.msra.mxu1 %v15463_v22  ;;  %v15499_v22 = vld [vmem:[%s15673_s30 + $0x1c30] sm:$0xff]  }
 0x392   : > { %v10934_v26 = vadd.f32 %v13950_v20, %v16672_v41  ;;  %v13974_v30 = vpop.f32.mrb[83].mxu1  ;;  %14274 = vmatprep.subr.bf16.mxu1 %v15465_v29  ;;  %v15471_v41 = vld [vmem:[%s15673_s30 + $0x1bb8] sm:$0xff]   ;;  %v15498_v20 = vld [vmem:[%s15673_s30 + $0x1cf0] sm:$0xff]   ;;  %v271_v28 = vld [vmem:[%s15668_s26 + $0xe0] sm:$0xff] }
 0x393   : > { %v15500_v24 = vld [vmem:[%s15673_s30 + $0x1cb0] sm:$0xff]   ;;  %v15501_v25 = vld [vmem:[%s15673_s30 + $0x1c78] sm:$0xff]   ;;  %v790_v30 = vrot.slane %v271_v28, %v15711_v43 }
 0x394   : > { %v16710_v32 = vadd.f32 %v13972_v27, %v10934_v26  ;;  %14253 = vmatpush3.bf16.msra.mxu0 %v15466_v31  ;;  %v15502_v26 = vld [vmem:[%s15673_s30 + $0x1cf8] sm:$0xff]   ;;  %v783_v31 = vcombine.high %v271_v28, %v271_v28  ;;  %v15541_v28 = vld [vmem:[%s15673_s30 + $0x1e00] sm:$0xff]  }
 0x395   : > { %14254 = vmatprep.subr.bf16.mxu0 %v15468_v34  ;;  %14275 = vmatpush3.bf16.msra.mxu1 %v15467_v33  ;;  %v15503_v27 = vld [vmem:[%s15673_s30 + $0x1c38] sm:$0xff]   ;;  %v798_v33 = vcombine.high %v790_v30, %v790_v30 }
 0x396   : > { %14276 = vmatprep.subr.bf16.mxu1 %v15469_v35  ;;  %v15504_v29 = vld [vmem:[%s15673_s30 + $0x1cb8] sm:$0xff]   ;;  %v797_v34 = vrot.slane %v783_v31, %v15711_v43  ;;  %v15507_v35 = vld [vmem:[%s15673_s30 + $0x1dc0] sm:$0xff]  }
 0x397   : > { %v1092_v38 = vpack.c.bf16 %v798_v33, %v798_v33  ;;  %v15542_v31 = vld [vmem:[%s15673_s30 + $0x1e80] sm:$0xff]   ;;  %v15543_v33 = vld [vmem:[%s15673_s30 + $0x1e48] sm:$0xff]  }
 0x398   : > { %14255 = vmatpush3.bf16.msra.mxu0 %v15470_v36  ;;  %v1091_v36 = vpack.c.bf16 %v790_v30, %v790_v30  ;;  %v799_v39 = vcombine.high %v797_v34, %v797_v34 }
 0x399   : > { %14284 = vmatprep.subr.bf16.mxu0 %v15473_v40  ;;  %14277 = vmatpush3.bf16.msra.mxu1 %v15471_v41  ;;  %v15509_v40 = vld [vmem:[%s15673_s30 + $0x1d80] sm:$0xff]   ;;  %v1093_v41 = vpack.c.bf16 %v797_v34, %v797_v34 }
 0x39a   : > { %14306 = vmatprep.subr.bf16.mxu1 %v15474_v45  ;;  %v1094_v44 = vpack.c.bf16 %v799_v39, %v799_v39  ;;  %v15511_v45 = vld [vmem:[%s15673_s30 + $0x1dc8] sm:$0xff]   ;;  %v15548_v39 = vld [vmem:[%s15673_s30 + $0x1ed0] sm:$0xff]  }
 0x39b   : > { %11492 = vmatmul.mubr.bf16.vlgmr.msra.gmra.mrb[108].mxu0 %v1087_v46  ;;  %v15512_v46 = vld [vmem:[%s15673_s30 + $0x1d08] sm:$0xff]  }
 0x39c   : > { %14285 = vmatpush3.bf16.msra.mxu0 %v15475_v47  ;;  %11532 = vmatmul.mubr.bf16.vlgmr.msra.gmra.mrb[108].mxu1 %v1089_v51  ;;  %v15513_v47 = vld [vmem:[%s15673_s30 + $0x1d88] sm:$0xff]   ;;  %v15517_v51 = vld [vmem:[%s15673_s30 + $0x1d90] sm:$0xff]  }
 0x39d   : > { %14286 = vmatprep.subr.bf16.mxu0 %v15477_v52  ;;  %14307 = vmatpush3.bf16.msra.mxu1 %v15476_v50  ;;  %v15516_v50 = vld [vmem:[%s15673_s30 + $0x1d10] sm:$0xff]   ;;  %v15518_v52 = vld [vmem:[%s15673_s30 + $0x1d58] sm:$0xff]  }
 0x39e   : > { %14308 = vmatprep.subr.bf16.mxu1 %v15478_v54  ;;  %11571 = vmatprep.mubr.bf16.mxu0 %v1092_v38  ;;  %v15520_v54 = vld [vmem:[%s15673_s30 + $0x1d18] sm:$0xff]   ;;  %v15547_v38 = vld [vmem:[%s15673_s30 + $0x1e50] sm:$0xff]  }
 0x39f   : > { %11611 = vmatprep.mubr.bf16.mxu1 %v1094_v44  ;;  %v15552_v44 = vld [vmem:[%s15673_s30 + $0x1ed8] sm:$0xff]  }
 0x3a0   : > { %14287 = vmatpush3.bf16.msra.mxu0 %v15479_v55  ;;  %v15521_v55 = vld [vmem:[%s15673_s30 + $0x1d98] sm:$0xff]  }
 0x3a1   : > { %14288 = vmatprep.subr.bf16.mxu0 %v15481_v57  ;;  %14309 = vmatpush3.bf16.msra.mxu1 %v15480_v56  ;;  %v15522_v56 = vld [vmem:[%s15673_s30 + $0x1d60] sm:$0xff]  }
 0x3a2   : > { %14310 = vmatprep.subr.bf16.mxu1 %v15482_v58  ;;  %v15523_v57 = vld [vmem:[%s15673_s30 + $0x1de0] sm:$0xff]  }
 0x3a3   : > { %v15524_v58 = vld [vmem:[%s15673_s30 + $0x1d20] sm:$0xff]  }
 0x3a4   : > { %14289 = vmatpush3.bf16.msra.mxu0 %v15483_v59  ;;  %v15525_v59 = vld [vmem:[%s15673_s30 + $0x1da0] sm:$0xff]  }
 0x3a5   : > { %14290 = vmatprep.subr.bf16.mxu0 %v15485_v61  ;;  %14311 = vmatpush3.bf16.msra.mxu1 %v15484_v60  ;;  %v15526_v60 = vld [vmem:[%s15673_s30 + $0x1d68] sm:$0xff]  }
 0x3a6   : > { %14312 = vmatprep.subr.bf16.mxu1 %v15486_v62  ;;  %v15527_v62 = vld [vmem:[%s15673_s30 + $0x1de8] sm:$0xff]  }
 0x3a8   : > { %14291 = vmatpush3.bf16.msra.mxu0 %v15487_v63 }
 0x3a9   : > { %14292 = vmatprep.subr.bf16.mxu0 %v15489_v1  ;;  %14313 = vmatpush3.bf16.msra.mxu1 %v15488_v0  ;;  %v15528_v0 = vld [vmem:[%s15673_s30 + $0x1d28] sm:$0xff]  }
 0x3aa   : > { %14314 = vmatprep.subr.bf16.mxu1 %v15490_v2 }
 0x3ac   : > { %14293 = vmatpush3.bf16.msra.mxu0 %v15491_v3 }
 0x3ad   : > { %14294 = vmatprep.subr.bf16.mxu0 %v15493_v5  ;;  %14315 = vmatpush3.bf16.msra.mxu1 %v15492_v4  ;;  %v15529_v5 = vld [vmem:[%s15673_s30 + $0x1da8] sm:$0xff]  }
 0x3ae   : > { %v13992_v6 = vpop.f32.mrb[84].mxu0  ;;  %14316 = vmatprep.subr.bf16.mxu1 %v15494_v7  ;;  %v15530_v7 = vld [vmem:[%s15673_s30 + $0x1d70] sm:$0xff]  }
 0x3af   : > { %v13993_v8 = vpop.f32.mrb[85].mxu0  ;;  %v14014_v10 = vpop.f32.mrb[84].mxu1 }
 0x3b0   : > { %v13994_v11 = vadd.f32 %v13993_v8, %v13992_v6  ;;  %v13995_v12 = vpop.f32.mrb[86].mxu0  ;;  %v14015_v15 = vpop.f32.mrb[85].mxu1  ;;  %14295 = vmatpush3.bf16.msra.mxu0 %v15495_v9 }
 0x3b1   : > { %v13996_v16 = vpop.f32.mrb[87].mxu0  ;;  %v14016_v18 = vadd.f32 %v14015_v15, %v14014_v10  ;;  %v14017_v19 = vpop.f32.mrb[86].mxu1  ;;  %14296 = vmatprep.subr.bf16.mxu0 %v15497_v14  ;;  %14317 = vmatpush3.bf16.msra.mxu1 %v15496_v13  ;;  %v15532_v13 = vld [vmem:[%s15673_s30 + $0x1d30] sm:$0xff]   ;;  %v15534_v15 = vld [vmem:[%s15673_s30 + $0x1d78] sm:$0xff]  }
 0x3b2   : > { %v11014_v17 = vadd.f32 %v13994_v11, %v16710_v32  ;;  %v14018_v21 = vpop.f32.mrb[87].mxu1  ;;  %14318 = vmatprep.subr.bf16.mxu1 %v15498_v20  ;;  %v15506_v32 = vld [vmem:[%s15673_s30 + $0x1d40] sm:$0xff]   ;;  %v15531_v11 = vld [vmem:[%s15673_s30 + $0x1df0] sm:$0xff]   ;;  %v272_v19 = vld [vmem:[%s15668_s26 + $0xe8] sm:$0xff] }
 0x3b3   : > { %v15533_v16 = vld [vmem:[%s15673_s30 + $0x1db0] sm:$0xff]   ;;  %v807_v20 = vrot.slane %v272_v19, %v15711_v43  ;;  %v800_v21 = vcombine.high %v272_v19, %v272_v19 }
 0x3b4   : > { %v16748_v23 = vadd.f32 %v14016_v18, %v11014_v17  ;;  %14297 = vmatpush3.bf16.msra.mxu0 %v15499_v22  ;;  %v15535_v17 = vld [vmem:[%s15673_s30 + $0x1df8] sm:$0xff]   ;;  %v15539_v22 = vld [vmem:[%s15673_s30 + $0x1e40] sm:$0xff]  }
 0x3b5   : > { %14298 = vmatprep.subr.bf16.mxu0 %v15501_v25  ;;  %14319 = vmatpush3.bf16.msra.mxu1 %v15500_v24  ;;  %v15536_v18 = vld [vmem:[%s15673_s30 + $0x1d38] sm:$0xff]   ;;  %v815_v24 = vcombine.high %v807_v20, %v807_v20  ;;  %v814_v25 = vrot.slane %v800_v21, %v15711_v43  ;;  %v15574_v21 = vld [vmem:[%s15673_s30 + $0x1f00] sm:$0xff]  }
 0x3b6   : > { %14320 = vmatprep.subr.bf16.mxu1 %v15502_v26  ;;  %v15540_v26 = vld [vmem:[%s15673_s30 + $0x1ec0] sm:$0xff]  }
 0x3b7   : > { %v816_v30 = vcombine.high %v814_v25, %v814_v25 }
 0x3b8   : > { %14299 = vmatpush3.bf16.msra.mxu0 %v15503_v27  ;;  %v1095_v27 = vpack.c.bf16 %v807_v20, %v807_v20 }
 0x3b9   : > { %14328 = vmatprep.subr.bf16.mxu0 %v15506_v32  ;;  %14321 = vmatpush3.bf16.msra.mxu1 %v15504_v29  ;;  %v1096_v29 = vpack.c.bf16 %v815_v24, %v815_v24  ;;  %v1097_v32 = vpack.c.bf16 %v814_v25, %v814_v25  ;;  %v1098_v34 = vpack.c.bf16 %v816_v30, %v816_v30  ;;  %v15575_v25 = vld [vmem:[%s15673_s30 + $0x1f80] sm:$0xff]   ;;  %v15581_v30 = vld [vmem:[%s15673_s30 + $0x1fd0] sm:$0xff]  }
 0x3ba   : > { %14350 = vmatprep.subr.bf16.mxu1 %v15507_v35  ;;  %v15544_v35 = vld [vmem:[%s15673_s30 + $0x1ec8] sm:$0xff]  }
 0x3bb   : > { %11572 = vmatmul.mubr.bf16.vlgmr.msra.gmra.mrb[112].mxu0 %v1091_v36  ;;  %v15545_v36 = vld [vmem:[%s15673_s30 + $0x1e08] sm:$0xff]  }
 0x3bc   : > { %14329 = vmatpush3.bf16.msra.mxu0 %v15508_v37  ;;  %11612 = vmatmul.mubr.bf16.vlgmr.msra.gmra.mrb[112].mxu1 %v1093_v41  ;;  %v15546_v37 = vld [vmem:[%s15673_s30 + $0x1e88] sm:$0xff]   ;;  %v15550_v41 = vld [vmem:[%s15673_s30 + $0x1e90] sm:$0xff]  }
 0x3bd   : > { %14330 = vmatprep.subr.bf16.mxu0 %v15510_v42  ;;  %14351 = vmatpush3.bf16.msra.mxu1 %v15509_v40  ;;  %v15549_v40 = vld [vmem:[%s15673_s30 + $0x1e10] sm:$0xff]   ;;  %v15551_v42 = vld [vmem:[%s15673_s30 + $0x1e58] sm:$0xff]  }
 0x3be   : > { %14352 = vmatprep.subr.bf16.mxu1 %v15511_v45  ;;  %11651 = vmatprep.mubr.bf16.mxu0 %v1096_v29  ;;  %v15553_v45 = vld [vmem:[%s15673_s30 + $0x1e18] sm:$0xff]   ;;  %v15579_v29 = vld [vmem:[%s15673_s30 + $0x1f88] sm:$0xff]  }
 0x3bf   : > { %11691 = vmatprep.mubr.bf16.mxu1 %v1098_v34  ;;  %v15585_v34 = vld [vmem:[%s15673_s30 + $0x1fd8] sm:$0xff]  }
 0x3c0   : > { %14331 = vmatpush3.bf16.msra.mxu0 %v15512_v46  ;;  %v15554_v46 = vld [vmem:[%s15673_s30 + $0x1e98] sm:$0xff]  }
 0x3c1   : > { %14332 = vmatprep.subr.bf16.mxu0 %v15514_v48  ;;  %14353 = vmatpush3.bf16.msra.mxu1 %v15513_v47  ;;  %v15555_v47 = vld [vmem:[%s15673_s30 + $0x1e60] sm:$0xff]  }
 0x3c2   : > { %14354 = vmatprep.subr.bf16.mxu1 %v15515_v49  ;;  %v15556_v48 = vld [vmem:[%s15673_s30 + $0x1ee0] sm:$0xff]  }
 0x3c3   : > { %v15557_v49 = vld [vmem:[%s15673_s30 + $0x1e20] sm:$0xff]  }
 0x3c4   : > { %14333 = vmatpush3.bf16.msra.mxu0 %v15516_v50  ;;  %v15558_v50 = vld [vmem:[%s15673_s30 + $0x1ea0] sm:$0xff]  }
 0x3c5   : > { %14334 = vmatprep.subr.bf16.mxu0 %v15518_v52  ;;  %14355 = vmatpush3.bf16.msra.mxu1 %v15517_v51  ;;  %v15559_v51 = vld [vmem:[%s15673_s30 + $0x1e68] sm:$0xff]  }
 0x3c6   : > { %14356 = vmatprep.subr.bf16.mxu1 %v15519_v53  ;;  %v15560_v53 = vld [vmem:[%s15673_s30 + $0x1ee8] sm:$0xff]  }
 0x3c8   : > { %14335 = vmatpush3.bf16.msra.mxu0 %v15520_v54 }
 0x3c9   : > { %14336 = vmatprep.subr.bf16.mxu0 %v15522_v56  ;;  %14357 = vmatpush3.bf16.msra.mxu1 %v15521_v55  ;;  %v15561_v55 = vld [vmem:[%s15673_s30 + $0x1e28] sm:$0xff]  }
 0x3ca   : > { %14358 = vmatprep.subr.bf16.mxu1 %v15523_v57 }
 0x3cc   : > { %14337 = vmatpush3.bf16.msra.mxu0 %v15524_v58 }
 0x3cd   : > { %14338 = vmatprep.subr.bf16.mxu0 %v15526_v60  ;;  %14359 = vmatpush3.bf16.msra.mxu1 %v15525_v59  ;;  %v15562_v59 = vld [vmem:[%s15673_s30 + $0x1ea8] sm:$0xff]   ;;  %v15563_v60 = vld [vmem:[%s15673_s30 + $0x1e70] sm:$0xff]  }
 0x3ce   : > { %v14036_v61 = vpop.f32.mrb[88].mxu0  ;;  %14360 = vmatprep.subr.bf16.mxu1 %v15527_v62 }
 0x3cf   : > { %v14037_v63 = vpop.f32.mrb[89].mxu0  ;;  %v14058_v1 = vpop.f32.mrb[88].mxu1 }
 0x3d0   : > { %v14038_v2 = vadd.f32 %v14037_v63, %v14036_v61  ;;  %v14039_v3 = vpop.f32.mrb[90].mxu0  ;;  %v14059_v4 = vpop.f32.mrb[89].mxu1  ;;  %14339 = vmatpush3.bf16.msra.mxu0 %v15528_v0 }
 0x3d1   : > { %v14040_v6 = vpop.f32.mrb[91].mxu0  ;;  %v14060_v9 = vadd.f32 %v14059_v4, %v14058_v1  ;;  %v14061_v10 = vpop.f32.mrb[90].mxu1  ;;  %14340 = vmatprep.subr.bf16.mxu0 %v15530_v7  ;;  %14361 = vmatpush3.bf16.msra.mxu1 %v15529_v5  ;;  %v15565_v4 = vld [vmem:[%s15673_s30 + $0x1e30] sm:$0xff]   ;;  %v15567_v7 = vld [vmem:[%s15673_s30 + $0x1e78] sm:$0xff]  }
 0x3d2   : > { %v11094_v8 = vadd.f32 %v14038_v2, %v16748_v23  ;;  %v14062_v12 = vpop.f32.mrb[91].mxu1  ;;  %14362 = vmatprep.subr.bf16.mxu1 %v15531_v11  ;;  %v15537_v23 = vld [vmem:[%s15673_s30 + $0x1db8] sm:$0xff]   ;;  %v15564_v2 = vld [vmem:[%s15673_s30 + $0x1ef0] sm:$0xff]  }
 0x3d3   : > { %v15566_v6 = vld [vmem:[%s15673_s30 + $0x1eb0] sm:$0xff]  }
 0x3d4   : > { %v16786_v14 = vadd.f32 %v14060_v9, %v11094_v8  ;;  %14341 = vmatpush3.bf16.msra.mxu0 %v15532_v13  ;;  %v15568_v8 = vld [vmem:[%s15673_s30 + $0x1ef8] sm:$0xff]   ;;  %v273_v10 = vld [vmem:[%s15668_s26 + $0xf0] sm:$0xff]  ;;  %v15572_v13 = vld [vmem:[%s15673_s30 + $0x1f40] sm:$0xff]  }
 0x3d5   : > { %14342 = vmatprep.subr.bf16.mxu0 %v15534_v15  ;;  %14363 = vmatpush3.bf16.msra.mxu1 %v15533_v16  ;;  %v15569_v9 = vld [vmem:[%s15673_s30 + $0x1e38] sm:$0xff]   ;;  %v824_v11 = vrot.slane %v273_v10, %v15711_v43  ;;  %v817_v12 = vcombine.high %v273_v10, %v273_v10 }
 0x3d6   : > { %14364 = vmatprep.subr.bf16.mxu1 %v15535_v17  ;;  %v15573_v17 = vld [vmem:[%s15673_s30 + $0x1fc0] sm:$0xff]  }
 0x3d7   : > { %v832_v15 = vcombine.high %v824_v11, %v824_v11  ;;  %v831_v16 = vrot.slane %v817_v12, %v15711_v43 }
 0x3d8   : > { %14343 = vmatpush3.bf16.msra.mxu0 %v15536_v18  ;;  %v1099_v18 = vpack.c.bf16 %v824_v11, %v824_v11 }
 0x3d9   : > { %14372 = vmatprep.subr.bf16.mxu0 %v15539_v22  ;;  %14365 = vmatpush3.bf16.msra.mxu1 %v15537_v23  ;;  %v1100_v19 = vpack.c.bf16 %v832_v15, %v832_v15  ;;  %v833_v20 = vcombine.high %v831_v16, %v831_v16  ;;  %v1101_v22 = vpack.c.bf16 %v831_v16, %v831_v16  ;;  %v15576_v23 = vld [vmem:[%s15673_s30 + $0x1f48] sm:$0xff]  }
 0x3da   : > { %14394 = vmatprep.subr.bf16.mxu1 %v15540_v26  ;;  %v15577_v26 = vld [vmem:[%s15673_s30 + $0x1fc8] sm:$0xff]  }
 0x3db   : > { %11652 = vmatmul.mubr.bf16.vlgmr.msra.gmra.mrb[116].mxu0 %v1095_v27  ;;  %v1102_v24 = vpack.c.bf16 %v833_v20, %v833_v20  ;;  %v15578_v27 = vld [vmem:[%s15673_s30 + $0x1f08] sm:$0xff]  }
 0x3dc   : > { %14373 = vmatpush3.bf16.msra.mxu0 %v15541_v28  ;;  %11692 = vmatmul.mubr.bf16.vlgmr.msra.gmra.mrb[116].mxu1 %v1097_v32  ;;  %v15580_v28 = vld [vmem:[%s15673_s30 + $0x1f50] sm:$0xff]   ;;  %v15584_v32 = vld [vmem:[%s15673_s30 + $0x1f58] sm:$0xff]  }
 0x3dd   : > { %14374 = vmatprep.subr.bf16.mxu0 %v15543_v33  ;;  %14395 = vmatpush3.bf16.msra.mxu1 %v15542_v31  ;;  %v15582_v31 = vld [vmem:[%s15673_s30 + $0x1f10] sm:$0xff]  }
 0x3de   : > { %14396 = vmatprep.subr.bf16.mxu1 %v15544_v35  ;;  %11731 = vmatprep.mubr.bf16.mxu0 %v1100_v19  ;;  %v15583_v33 = vld [vmem:[%s15673_s30 + $0x1f90] sm:$0xff]   ;;  %v15586_v35 = vld [vmem:[%s15673_s30 + $0x1f18] sm:$0xff]  }
 0x3df   : > { %11771 = vmatprep.mubr.bf16.mxu1 %v1102_v24 }
 0x3e0   : > { %14375 = vmatpush3.bf16.msra.mxu0 %v15545_v36  ;;  %v15588_v36 = vld [vmem:[%s15673_s30 + $0x1f60] sm:$0xff]  }
 0x3e1   : > { %14376 = vmatprep.subr.bf16.mxu0 %v15547_v38  ;;  %14397 = vmatpush3.bf16.msra.mxu1 %v15546_v37  ;;  %v15587_v37 = vld [vmem:[%s15673_s30 + $0x1f98] sm:$0xff]   ;;  %v15589_v38 = vld [vmem:[%s15673_s30 + $0x1fe0] sm:$0xff]  }
 0x3e2   : > { %14398 = vmatprep.subr.bf16.mxu1 %v15548_v39  ;;  %v15590_v39 = vld [vmem:[%s15673_s30 + $0x1f20] sm:$0xff]  }
 0x3e4   : > { %14377 = vmatpush3.bf16.msra.mxu0 %v15549_v40  ;;  %v15592_v40 = vld [vmem:[%s15673_s30 + $0x1f68] sm:$0xff]  }
 0x3e5   : > { %14378 = vmatprep.subr.bf16.mxu0 %v15551_v42  ;;  %14399 = vmatpush3.bf16.msra.mxu1 %v15550_v41  ;;  %v15591_v41 = vld [vmem:[%s15673_s30 + $0x1fa0] sm:$0xff]  }
 0x3e6   : > { %14400 = vmatprep.subr.bf16.mxu1 %v15552_v44 }
 0x3e8   : > { %14379 = vmatpush3.bf16.msra.mxu0 %v15553_v45  ;;  %v15593_v45 = vld [vmem:[%s15673_s30 + $0x1fe8] sm:$0xff]  }
 0x3e9   : > { %14380 = vmatprep.subr.bf16.mxu0 %v15555_v47  ;;  %14401 = vmatpush3.bf16.msra.mxu1 %v15554_v46 }
 0x3ea   : > { %14402 = vmatprep.subr.bf16.mxu1 %v15556_v48 }
 0x3ec   : > { %14381 = vmatpush3.bf16.msra.mxu0 %v15557_v49  ;;  %v15594_v49 = vld [vmem:[%s15673_s30 + $0x1f28] sm:$0xff]  }
 0x3ed   : > { %14382 = vmatprep.subr.bf16.mxu0 %v15559_v51  ;;  %14403 = vmatpush3.bf16.msra.mxu1 %v15558_v50  ;;  %v15596_v50 = vld [vmem:[%s15673_s30 + $0x1f70] sm:$0xff]  }
 0x3ee   : > { %v14080_v52 = vpop.f32.mrb[92].mxu0  ;;  %14404 = vmatprep.subr.bf16.mxu1 %v15560_v53 }
 0x3ef   : > { %v14081_v54 = vpop.f32.mrb[93].mxu0  ;;  %v14102_v56 = vpop.f32.mrb[92].mxu1 }
 0x3f0   : > { %v14082_v57 = vadd.f32 %v14081_v54, %v14080_v52  ;;  %v14083_v58 = vpop.f32.mrb[94].mxu0  ;;  %v14103_v61 = vpop.f32.mrb[93].mxu1  ;;  %14383 = vmatpush3.bf16.msra.mxu0 %v15561_v55 }
 0x3f1   : > { %v14084_v62 = vpop.f32.mrb[95].mxu0  ;;  %v14104_v0 = vadd.f32 %v14103_v61, %v14102_v56  ;;  %v14105_v1 = vpop.f32.mrb[94].mxu1  ;;  %14384 = vmatprep.subr.bf16.mxu0 %v15563_v60  ;;  %14405 = vmatpush3.bf16.msra.mxu1 %v15562_v59  ;;  %v15595_v56 = vld [vmem:[%s15673_s30 + $0x1fa8] sm:$0xff]   ;;  %v15597_v58 = vld [vmem:[%s15673_s30 + $0x1ff0] sm:$0xff]   ;;  %v15600_v61 = vld [vmem:[%s15673_s30 + $0x1f78] sm:$0xff]  }
 0x3f2   : > { %v11174_v63 = vadd.f32 %v14082_v57, %v16786_v14  ;;  %v14106_v3 = vpop.f32.mrb[95].mxu1  ;;  %14406 = vmatprep.subr.bf16.mxu1 %v15564_v2  ;;  %v15570_v14 = vld [vmem:[%s15673_s30 + $0x1eb8] sm:$0xff]   ;;  %v15598_v60 = vld [vmem:[%s15673_s30 + $0x1f30] sm:$0xff]  }
 0x3f3   : > { %v15599_v62 = vld [vmem:[%s15673_s30 + $0x1fb0] sm:$0xff]   ;;  %v15602_v1 = vld [vmem:[%s15673_s30 + $0x1f38] sm:$0xff]  }
 0x3f4   : > { %v16824_v5 = vadd.f32 %v14104_v0, %v11174_v63  ;;  %14385 = vmatpush3.bf16.msra.mxu0 %v15565_v4  ;;  %v15601_v63 = vld [vmem:[%s15673_s30 + $0x1ff8] sm:$0xff]  }
 0x3f5   : > { %14386 = vmatprep.subr.bf16.mxu0 %v15567_v7  ;;  %14407 = vmatpush3.bf16.msra.mxu1 %v15566_v6  ;;  %v274_v0 = vld [vmem:[%s15668_s26 + $0xf8] sm:$0xff] }
 0x3f6   : > { %14408 = vmatprep.subr.bf16.mxu1 %v15568_v8  ;;  %v841_v2 = vrot.slane %v274_v0, %v15711_v43  ;;  %v834_v3 = vcombine.high %v274_v0, %v274_v0  ;;  %v15603_v4 = vld [vmem:[%s15673_s30 + $0x1fb8] sm:$0xff]  }
 0x3f8   : > { %14387 = vmatpush3.bf16.msra.mxu0 %v15569_v9  ;;  %v848_v6 = vrot.slane %v834_v3, %v15711_v43  ;;  %v1103_v7 = vpack.c.bf16 %v841_v2, %v841_v2 }
 0x3f9   : > { %14416 = vmatprep.subr.bf16.mxu0 %v15572_v13  ;;  %14409 = vmatpush3.bf16.msra.mxu1 %v15570_v14 }
 0x3fa   : > { %14438 = vmatprep.subr.bf16.mxu1 %v15573_v17  ;;  %v850_v9 = vcombine.high %v848_v6, %v848_v6  ;;  %v1105_v10 = vpack.c.bf16 %v848_v6, %v848_v6 }
 0x3fb   : > { %11732 = vmatmul.mubr.bf16.vlgmr.msra.gmra.mrb[120].mxu0 %v1099_v18 }
 0x3fc   : > { %14417 = vmatpush3.bf16.msra.mxu0 %v15574_v21  ;;  %11772 = vmatmul.mubr.bf16.vlgmr.msra.gmra.mrb[120].mxu1 %v1101_v22  ;;  %v1106_v11 = vpack.c.bf16 %v850_v9, %v850_v9 }
 0x3fd   : > { %14418 = vmatprep.subr.bf16.mxu0 %v15576_v23  ;;  %14439 = vmatpush3.bf16.msra.mxu1 %v15575_v25 }
 0x3fe   : > { %14440 = vmatprep.subr.bf16.mxu1 %v15577_v26  ;;  %11851 = vmatprep.mubr.bf16.mxu1 %v1106_v11 }
 0x400   : > { %14419 = vmatpush3.bf16.msra.mxu0 %v15578_v27 }
 0x401   : > { %14420 = vmatprep.subr.bf16.mxu0 %v15580_v28  ;;  %14441 = vmatpush3.bf16.msra.mxu1 %v15579_v29 }
 0x402   : > { %14442 = vmatprep.subr.bf16.mxu1 %v15581_v30 }
 0x404   : > { %14421 = vmatpush3.bf16.msra.mxu0 %v15582_v31 }
 0x405   : > { %14422 = vmatprep.subr.bf16.mxu0 %v15584_v32  ;;  %14443 = vmatpush3.bf16.msra.mxu1 %v15583_v33 }
 0x406   : > { %14444 = vmatprep.subr.bf16.mxu1 %v15585_v34 }
 0x408   : > { %14423 = vmatpush3.bf16.msra.mxu0 %v15586_v35 }
 0x409   : > { %14424 = vmatprep.subr.bf16.mxu0 %v15588_v36  ;;  %14445 = vmatpush3.bf16.msra.mxu1 %v15587_v37 }
 0x40a   : > { %14446 = vmatprep.subr.bf16.mxu1 %v15589_v38 }
 0x40c   : > { %14425 = vmatpush3.bf16.msra.mxu0 %v15590_v39 }
 0x40d   : > { %14426 = vmatprep.subr.bf16.mxu0 %v15592_v40  ;;  %14447 = vmatpush3.bf16.msra.mxu1 %v15591_v41 }
 0x40e   : > { %v14124_v42 = vpop.f32.mrb[96].mxu0  ;;  %14448 = vmatprep.subr.bf16.mxu1 %v15593_v45 }
 0x40f   : > { %v14125_v44 = vpop.f32.mrb[97].mxu0  ;;  %v14146_v46 = vpop.f32.mrb[96].mxu1 }
 0x410   : > { %v14126_v47 = vadd.f32 %v14125_v44, %v14124_v42  ;;  %v14127_v48 = vpop.f32.mrb[98].mxu0  ;;  %v14147_v51 = vpop.f32.mrb[97].mxu1  ;;  %14427 = vmatpush3.bf16.msra.mxu0 %v15594_v49 }
 0x411   : > { %v14128_v52 = vpop.f32.mrb[99].mxu0  ;;  %v14148_v54 = vadd.f32 %v14147_v51, %v14146_v46  ;;  %v14149_v55 = vpop.f32.mrb[98].mxu1  ;;  %14428 = vmatprep.subr.bf16.mxu0 %v15596_v50  ;;  %14449 = vmatpush3.bf16.msra.mxu1 %v15595_v56 }
 0x412   : > { %v11254_v53 = vadd.f32 %v14126_v47, %v16824_v5  ;;  %v14150_v57 = vpop.f32.mrb[99].mxu1  ;;  %14450 = vmatprep.subr.bf16.mxu1 %v15597_v58  ;;  %v849_v5 = vcombine.high %v841_v2, %v841_v2 }
 0x414   : > { %v11294_v59 = vadd.f32 %v14148_v54, %v11254_v53  ;;  %14429 = vmatpush3.bf16.msra.mxu0 %v15598_v60  ;;  %v1104_v8 = vpack.c.bf16 %v849_v5, %v849_v5 }
 0x415   : > { %14430 = vmatprep.subr.bf16.mxu0 %v15600_v61  ;;  %14451 = vmatpush3.bf16.msra.mxu1 %v15599_v62 }
 0x416   : > { %14452 = vmatprep.subr.bf16.mxu1 %v15601_v63  ;;  %11811 = vmatprep.mubr.bf16.mxu0 %v1104_v8 }
 0x418   : > { %14431 = vmatpush3.bf16.msra.mxu0 %v15602_v1 }
 0x419   : > { %14453 = vmatpush3.bf16.msra.mxu1 %v15603_v4 }
 0x41b   : > { %11812 = vmatmul.mubr.bf16.vlgmr.msra.gmra.mrb[124].mxu0 %v1103_v7 }
 0x41c   : > { %11852 = vmatmul.mubr.bf16.vlgmr.msra.gmra.mrb[124].mxu1 %v1105_v10 }
 0x42e   : > { %v14168_v12 = vpop.f32.mrb[100].mxu0 }
 0x42f   : > { %v14169_v13 = vpop.f32.mrb[101].mxu0  ;;  %v14190_v14 = vpop.f32.mrb[100].mxu1 }
 0x430   : > { %v14170_v15 = vadd.f32 %v14169_v13, %v14168_v12  ;;  %v14171_v16 = vpop.f32.mrb[102].mxu0  ;;  %v14191_v17 = vpop.f32.mrb[101].mxu1 }
 0x431   : > { %v14172_v18 = vpop.f32.mrb[103].mxu0  ;;  %v14192_v19 = vadd.f32 %v14191_v17, %v14190_v14  ;;  %v14193_v20 = vpop.f32.mrb[102].mxu1 }
 0x432   : > { %v11334_v43 = vadd.f32 %v14170_v15, %v11294_v59  ;;  %v14194_v21 = vpop.f32.mrb[103].mxu1 }
 0x434   : > { %v11374_v22 = vadd.f32 %v14192_v19, %v11334_v43 }
 0x44e   : > { %v14212_v23 = vpop.f32.mrb[104].mxu0 }
 0x44f   : > { %v14213_v24 = vpop.f32.mrb[105].mxu0  ;;  %v14234_v25 = vpop.f32.mrb[104].mxu1 }
 0x450   : > { %v14214_v26 = vadd.f32 %v14213_v24, %v14212_v23  ;;  %v14215_v27 = vpop.f32.mrb[106].mxu0  ;;  %v14235_v28 = vpop.f32.mrb[105].mxu1 }
 0x451   : > { %v14216_v29 = vpop.f32.mrb[107].mxu0  ;;  %v14236_v31 = vadd.f32 %v14235_v28, %v14234_v25  ;;  %v14237_v32 = vpop.f32.mrb[106].mxu1 }
 0x452   : > { %v11414_v30 = vadd.f32 %v14214_v26, %v11374_v22  ;;  %v14238_v33 = vpop.f32.mrb[107].mxu1  ;;  %v242_v29 = vld [vmem:[#allocation2] sm:$0x3] }
 0x453   : > { %v11875_v33 = vld [vmem:[%s16931_s3] sm:$0xff] (!%p13047_p6) }
 0x454   : > { %v11454_v34 = vadd.f32 %v14236_v31, %v11414_v30 }
 0x46e   : > { %v14256_v35 = vpop.f32.mrb[108].mxu0 }
 0x46f   : > { %v14257_v36 = vpop.f32.mrb[109].mxu0  ;;  %v14278_v37 = vpop.f32.mrb[108].mxu1 }
 0x470   : > { %v14258_v38 = vadd.f32 %v14257_v36, %v14256_v35  ;;  %v14259_v39 = vpop.f32.mrb[110].mxu0  ;;  %v14279_v40 = vpop.f32.mrb[109].mxu1  ;;  %v11877_v35 = vld [vmem:[%s16931_s3 + $0x10] sm:$0xff] (!%p13047_p6)  ;;  %v15617_v36 = vmov (!%p13047_p6), 0.0|0.0  }
 0x471   : > { %v14260_v41 = vpop.f32.mrb[111].mxu0  ;;  %v14280_v44 = vadd.f32 %v14279_v40, %v14278_v37  ;;  %v14281_v45 = vpop.f32.mrb[110].mxu1  ;;  %14512 = vmatprep.subr.bf16.mxu0 (!%p13047_p6), %v15617_v36  ;;  %v15619_v39 = vmov (!%p13047_p6), 0.0  }
 0x472   : > { %v11494_v42 = vadd.f32 %v14258_v38, %v11454_v34  ;;  %v14282_v46 = vpop.f32.mrb[111].mxu1  ;;  %v11876_v34 = vld [vmem:[%s16931_s3 + $0x8] sm:$0xff] (!%p13047_p6)  ;;  %v11878_v38 = vld [vmem:[%s16931_s3 + $0x18] sm:$0xff] (!%p13047_p6)  ;;  %14509 = vmatprep.mubr.msk.f32.mxu0 (!%p13047_p6), %vm15618_vm0, %v15619_v39  ;;  %v11879_v41 = vld [vmem:[%s16931_s3 + $0x20] sm:$0xff] (!%p13047_p6) }
 0x473   : > { %v14513_v37 = vpack.c.bf16 (!%p13047_p6), %v11876_v34, %v11875_v33  ;;  %v14516_v40 = vpack.c.bf16 (!%p13047_p6), %v11878_v38, %v11877_v35  ;;  %v11881_v45 = vld [vmem:[%s16931_s3 + $0x30] sm:$0xff] (!%p13047_p6)  ;;  %v11882_v46 = vld [vmem:[%s16931_s3 + $0x38] sm:$0xff] (!%p13047_p6) }
 0x474   : > { %v11534_v47 = vadd.f32 %v14280_v44, %v11494_v42  ;;  %v11880_v42 = vld [vmem:[%s16931_s3 + $0x28] sm:$0xff] (!%p13047_p6) }
 0x475   : > { %14514 = vmatpush3.bf16.msra.mxu0 (!%p13047_p6), %v14513_v37  ;;  %v14519_v44 = vpack.c.bf16 (!%p13047_p6), %v11880_v42, %v11879_v41 }
 0x476   : > { %14515 = vmatprep.subr.bf16.mxu0 (!%p13047_p6), %v15617_v36 }
 0x479   : > { %14517 = vmatpush3.bf16.msra.mxu0 (!%p13047_p6), %v14516_v40 }
 0x47a   : > { %14518 = vmatprep.subr.bf16.mxu0 (!%p13047_p6), %v15617_v36 }
 0x47d   : > { %14520 = vmatpush3.bf16.msra.mxu0 (!%p13047_p6), %v14519_v44 }
 0x47e   : > { %14521 = vmatprep.subr.bf16.mxu0 (!%p13047_p6), %v15617_v36 }
 0x48e   : > { %v14300_v48 = vpop.f32.mrb[112].mxu0 }
 0x48f   : > { %v14301_v49 = vpop.f32.mrb[113].mxu0  ;;  %v14322_v50 = vpop.f32.mrb[112].mxu1 }
 0x490   : > { %v14302_v51 = vadd.f32 %v14301_v49, %v14300_v48  ;;  %v14303_v52 = vpop.f32.mrb[114].mxu0  ;;  %v14323_v53 = vpop.f32.mrb[113].mxu1  ;;  %v11883_v48 = vld [vmem:[%s16931_s3 + $0x40] sm:$0xff] (!%p13047_p6)  ;;  %v11884_v49 = vld [vmem:[%s16931_s3 + $0x48] sm:$0xff] (!%p13047_p6) }
 0x491   : > { %v14304_v54 = vpop.f32.mrb[115].mxu0  ;;  %v14324_v56 = vadd.f32 %v14323_v53, %v14322_v50  ;;  %v14325_v57 = vpop.f32.mrb[114].mxu1  ;;  %v14525_v50 = vpack.c.bf16 (!%p13047_p6), %v11884_v49, %v11883_v48  ;;  %v11886_v52 = vld [vmem:[%s16931_s3 + $0x58] sm:$0xff] (!%p13047_p6) }
 0x492   : > { %v11574_v55 = vadd.f32 %v14302_v51, %v11534_v47  ;;  %v14326_v58 = vpop.f32.mrb[115].mxu1  ;;  %v14522_v47 = vpack.c.bf16 (!%p13047_p6), %v11882_v46, %v11881_v45  ;;  %v11885_v51 = vld [vmem:[%s16931_s3 + $0x50] sm:$0xff] (!%p13047_p6)  ;;  %v11887_v54 = vld [vmem:[%s16931_s3 + $0x60] sm:$0xff] (!%p13047_p6) }
 0x493   : > { %v14528_v53 = vpack.c.bf16 (!%p13047_p6), %v11886_v52, %v11885_v51  ;;  %v13048_v58 = vld [vmem:[%s16930_s2] ss:$0 sm:$0xff] (!%p13047_p6) }
 0x494   : > { %v11614_v59 = vadd.f32 %v14324_v56, %v11574_v55  ;;  %14523 = vmatpush3.bf16.msra.mxu0 (!%p13047_p6), %v14522_v47  ;;  %v11888_v55 = vld [vmem:[%s16931_s3 + $0x68] sm:$0xff] (!%p13047_p6) }
 0x495   : > { %14524 = vmatprep.subr.bf16.mxu0 (!%p13047_p6), %v15617_v36  ;;  %v14531_v56 = vpack.c.bf16 (!%p13047_p6), %v11888_v55, %v11887_v54 }
 0x498   : > { %14526 = vmatpush3.bf16.msra.mxu0 (!%p13047_p6), %v14525_v50 }
 0x499   : > { %14527 = vmatprep.subr.bf16.mxu0 (!%p13047_p6), %v15617_v36 }
 0x49c   : > { %14529 = vmatpush3.bf16.msra.mxu0 (!%p13047_p6), %v14528_v53 }
 0x49d   : > { %14530 = vmatprep.subr.bf16.mxu0 (!%p13047_p6), %v15617_v36 }
 0x4a0   : > { %14532 = vmatpush3.bf16.msra.mxu0 (!%p13047_p6), %v14531_v56 }
 0x4a1   : > { %14533 = vmatprep.subr.bf16.mxu0 (!%p13047_p6), %v15617_v36 }
 0x4ae   : > { %v14344_v60 = vpop.f32.mrb[116].mxu0 }
 0x4af   : > { %v14345_v61 = vpop.f32.mrb[117].mxu0  ;;  %v14366_v62 = vpop.f32.mrb[116].mxu1 }
 0x4b0   : > { %v14346_v63 = vadd.f32 %v14345_v61, %v14344_v60  ;;  %v14347_v0 = vpop.f32.mrb[118].mxu0  ;;  %v14367_v1 = vpop.f32.mrb[117].mxu1  ;;  %v11890_v60 = vld [vmem:[%s16931_s3 + $0x78] sm:$0xff] (!%p13047_p6) }
 0x4b1   : > { %v14348_v2 = vpop.f32.mrb[119].mxu0  ;;  %v14368_v4 = vadd.f32 %v14367_v1, %v14366_v62  ;;  %v14369_v5 = vpop.f32.mrb[118].mxu1  ;;  %v13049_v0 = vld [vmem:[#allocation3] ss:$0 sm:$0xff] (!%p13047_p6) }
 0x4b2   : > { %v11654_v3 = vadd.f32 %v14346_v63, %v11614_v59  ;;  %v14370_v6 = vpop.f32.mrb[119].mxu1  ;;  %v11889_v59 = vld [vmem:[%s16931_s3 + $0x70] sm:$0xff] (!%p13047_p6) }
 0x4b3   : > { %v14534_v62 = vpack.c.bf16 (!%p13047_p6), %v11890_v60, %v11889_v59 }
 0x4b4   : > { %v11694_v7 = vadd.f32 %v14368_v4, %v11654_v3 }
 0x4b5   : > { %14535 = vmatpush3.bf16.msra.mxu0 (!%p13047_p6), %v14534_v62 }
 0x4ce   : > { %v14388_v8 = vpop.f32.mrb[120].mxu0 }
 0x4cf   : > { %v14389_v9 = vpop.f32.mrb[121].mxu0  ;;  %v14410_v10 = vpop.f32.mrb[120].mxu1 }
 0x4d0   : > { %v14390_v11 = vadd.f32 %v14389_v9, %v14388_v8  ;;  %v14391_v12 = vpop.f32.mrb[122].mxu0  ;;  %v14411_v13 = vpop.f32.mrb[121].mxu1 }
 0x4d1   : > { %v14392_v14 = vpop.f32.mrb[123].mxu0  ;;  %v14412_v16 = vadd.f32 %v14411_v13, %v14410_v10  ;;  %v14413_v17 = vpop.f32.mrb[122].mxu1 }
 0x4d2   : > { %v11734_v15 = vadd.f32 %v14390_v11, %v11694_v7  ;;  %v14414_v18 = vpop.f32.mrb[123].mxu1 }
 0x4d4   : > { %v11774_v43 = vadd.f32 %v14412_v16, %v11734_v15 }
 0x4ee   : > { %v14432_v19 = vpop.f32.mrb[124].mxu0 }
 0x4ef   : > { %v14433_v20 = vpop.f32.mrb[125].mxu0  ;;  %v14454_v21 = vpop.f32.mrb[124].mxu1 }
 0x4f0   : > { %v14434_v22 = vadd.f32 %v14433_v20, %v14432_v19  ;;  %v14435_v23 = vpop.f32.mrb[126].mxu0  ;;  %v14455_v24 = vpop.f32.mrb[125].mxu1 }
 0x4f1   : > { %v14436_v25 = vpop.f32.mrb[127].mxu0  ;;  %v14456_v27 = vadd.f32 %v14455_v24, %v14454_v21  ;;  %v14457_v28 = vpop.f32.mrb[126].mxu1 }
 0x4f2   : > { %v11814_v26 = vadd.f32 %v14434_v22, %v11774_v43  ;;  %v14458_v30 = vpop.f32.mrb[127].mxu1  ;;  %11864 = sbr.rel (%p13047_p6) target bundleno = 1516 (0x5ec), region = 48 }
 0x4f4   : > { %v11854_v31 = vadd.f32 %v14456_v27, %v11814_v26 }
 0x4f6   : > { %v11859_v32 = vadd.f32 %v11854_v31, %v242_v29 }
 0x4f8   : > { %11860 = vst [vmem:[#allocation2] sm:$0x3] %v11859_v32 }
 0x4ff   : > { %v11865_v57 = vld [vmem:[#allocation2] sm:$0x3] }
 0x500   : > { %v11873_v61 = vadd.f32 %v13048_v58, %v11865_v57 }
 0x502   : > { %v11874_v63 = vmax.f32 %v11873_v61, 0.0 }
 0x504   : > { %14510 = vmatmul.mubr.f32.vlgmr.msra.gmra.mrb[0].mxu0 %v11874_v63 }
 0x5d7   : > { %v11964_v1 = vpop.f32.mrb[0].mxu0 }
 0x5d8   : > { %v11965_v2 = vadd.f32 %v13049_v0, %v11964_v1  ;;  %v14511_v3 = vpop.f32.mrb[1].mxu0 }
 0x5da   : > { %v11968_v4 = vmul.f32 0.5, %v11965_v2 }
 0x5dc   : > { %15605 = vtanh.f32 %v11968_v4 }
 0x5e6   : > { %v15606_v5 = vpop.eup %15605 }
 0x5e7   : > { %v11970_v6 = vadd.f32 1.0, %v15606_v5 }
 0x5e9   : > { %v11971_v7 = vmul.f32 0.5, %v11970_v6 }
 0x5eb   : > { %11973 = vst.msk [vmem:[%s16933_s5] sm:$0x3] %vm11972_vm1, %v11971_v7 }
 0x5ec PF: > { %s17_s20 = sadd.s32 1, %s15613_s20  }
 0x5ed   : > { %p14_p7 = scmp.ge.s32.totalorder %s17_s20, 4  }
 0x5ef   :  { %16 = sbr.rel (!%p14_p7) target bundleno = 3 (0x3), region = 77 }

</bundles_post_ra>
